<compile_context>
chip_gen: v6e
topology: v6e:2x2x1
jax: 0.10.0
libtpu: 0.0.40
codegen_flags: <defaults>
</compile_context>

<pallas_src>
import functools

import jax
import jax.numpy as jnp
from jax.experimental import pallas as pl
from jax.experimental.pallas import tpu as pltpu


# ----------------------------------------------------------------------------- helpers
def _hardswish(x):
    return x * jnp.clip(x + 3.0, 0.0, 6.0) * (1.0 / 6.0)


def _round_up(v, m):
    return (v + m - 1) // m * m


# ----------------------------------------------------------------------------- in-kernel building blocks
def _dw_conv(x_flat, pad_ref, w_ref, H, W, K):
    """Depthwise KxK conv (stride 1, 'same') on a VMEM-resident (H*W, C) value.

    pad_ref: VMEM scratch (H+K-1, Wpad, C); the image is written at rows [K//2, K//2+H)
    and columns [8, 8+W) so the interior store is sublane-tile aligned; the border stays 0.
    w_ref: (K*K, 1, C).
    """
    C = x_flat.shape[-1]
    p = K // 2
    pad_ref[...] = jnp.zeros(pad_ref.shape, jnp.float32)
    pad_ref[pl.ds(p, H), pl.ds(8, W), :] = x_flat.reshape(H, W, C)
    acc = jnp.zeros((H, W, C), jnp.float32)
    for dy in range(K):
        for dx in range(K):
            tap = pad_ref[pl.ds(dy, H), pl.ds(8 + dx - p, W), :]
            acc = acc + tap * w_ref[dy * K + dx]
    return acc.reshape(H * W, C)


def _linear_attn(q, k, v, bmask, eps):
    """ReLU linear attention for a group of heads packed along lanes.

    q, k, v: (L, nh*dim) f32 (ReLU already applied to q, k).
    bmask:   (nh*dim, nh*dim) block-diagonal 0/1 mask (head_dim-sized blocks) keeping
             the per-head structure while everything stays one lane-dense matmul.
    """
    kv = jnp.einsum("lc,le->ce", k, v, preferred_element_type=jnp.float32) * bmask
    num = jnp.dot(q, kv, preferred_element_type=jnp.float32)
    ksum = jnp.sum(k, axis=0, keepdims=True)                       # analytic ones-column
    den = jnp.dot(q * ksum, bmask, preferred_element_type=jnp.float32)
    return num * pl.reciprocal(den + eps, approx=True)


# ----------------------------------------------------------------------------- fused kernel
def _evit_kernel(x_ref, wqkv_ref, wq_ref, wk_ref, wv_ref, w5_ref,
                 wqa_ref, wka_ref, wva_ref, bmask_ref,
                 wpa_ref, wpb_ref, ps_ref, pb_ref,
                 winv_ref, binv_ref, w3_ref, b3_ref,
                 wpt_ref, ts_ref, tb_ref,
                 o_ref, pad5_ref, pad3_ref,
                 *, H, W, k_agg, k_dw, eps):
    xf = x_ref[0]                                                   # (L, C) f32
    xb = xf.astype(jnp.bfloat16)
    bmask = bmask_ref[...]

    # ---- LiteMLA context module -------------------------------------------------
    # qkv 1x1 conv (bf16 on MXU, f32 accumulate); full 3*total_dim needed for the DW branch.
    qkv = jnp.dot(xb, wqkv_ref[...], preferred_element_type=jnp.float32)      # (L, 3*td)

    # heads 0..heads-1: q/k/v column subsets of the qkv conv, computed lane-dense from x.
    q0 = jnp.maximum(jnp.dot(xb, wq_ref[...], preferred_element_type=jnp.float32), 0.0)
    k0 = jnp.maximum(jnp.dot(xb, wk_ref[...], preferred_element_type=jnp.float32), 0.0)
    v0 = jnp.dot(xb, wv_ref[...], preferred_element_type=jnp.float32)
    attn0 = _linear_attn(q0, k0, v0, bmask, eps)                              # (L, td)

    # multi-scale branch: 5x5 depthwise conv, then grouped 1x1 folded into q/k/v column
    # selections of the (block-diagonal) pointwise weight.
    aggdw = _dw_conv(qkv, pad5_ref, w5_ref, H, W, k_agg).astype(jnp.bfloat16)  # (L, 3*td)
    q1 = jnp.maximum(jnp.dot(aggdw, wqa_ref[...], preferred_element_type=jnp.float32), 0.0)
    k1 = jnp.maximum(jnp.dot(aggdw, wka_ref[...], preferred_element_type=jnp.float32), 0.0)
    v1 = jnp.dot(aggdw, wva_ref[...], preferred_element_type=jnp.float32)
    attn1 = _linear_attn(q1, k1, v1, bmask, eps)                              # (L, td)

    # proj 1x1 conv (+ folded BatchNorm) + residual; proj weight split by head group.
    proj = (jnp.dot(attn0.astype(jnp.bfloat16), wpa_ref[...],
                    preferred_element_type=jnp.float32)
            + jnp.dot(attn1.astype(jnp.bfloat16), wpb_ref[...],
                      preferred_element_type=jnp.float32))
    xctx = proj * ps_ref[...] + pb_ref[...] + xf                              # (L, C)

    # ---- MBConv local module ------------------------------------------------------
    inv = _hardswish(jnp.dot(xctx.astype(jnp.bfloat16), winv_ref[...],
                             preferred_element_type=jnp.float32) + binv_ref[...])   # (L, mid)
    dwv = _hardswish(_dw_conv(inv, pad3_ref, w3_ref, H, W, k_dw) + b3_ref[...])
    out = (jnp.dot(dwv.astype(jnp.bfloat16), wpt_ref[...],
                   preferred_element_type=jnp.float32) * ts_ref[...] + tb_ref[...] + xctx)

    o_ref[0] = out.astype(o_ref.dtype)


# ----------------------------------------------------------------------------- wrapper
def _qkv_cols(heads, head_dim):
    qc, kc, vc = [], [], []
    for h in range(heads):
        base = 3 * head_dim * h
        qc += list(range(base, base + head_dim))
        kc += list(range(base + head_dim, base + 2 * head_dim))
        vc += list(range(base + 2 * head_dim, base + 3 * head_dim))
    return qc, kc, vc


def efficientvit_block(x_nhwc, p, *, head_dim, heads, scales=(5,), eps=1e-5):
    assert len(scales) == 1, "kernel specialised for one aggregation scale"
    B, H, W, C = x_nhwc.shape
    L = H * W
    td = heads * head_dim
    mid = p["w_inv"].shape[1]
    k_agg, k_dw = scales[0], 3

    qc, kc, vc = _qkv_cols(heads, head_dim)
    bf16 = jnp.bfloat16
    hid = jnp.arange(td) // head_dim
    bmask = (hid[:, None] == hid[None, :]).astype(jnp.float32)      # (td, td) block-diag

    operands = [
        p["w_qkv"].astype(bf16),                              # (C, 3*td)
        p["w_qkv"][:, qc].astype(bf16),                       # (C, td)
        p["w_qkv"][:, kc].astype(bf16),
        p["w_qkv"][:, vc].astype(bf16),
        p["w_agg_dw"].reshape(k_agg * k_agg, 1, 3 * td),      # f32 (VPU taps)
        p["w_agg_pw"][:, qc].astype(bf16),                    # (3*td, td)
        p["w_agg_pw"][:, kc].astype(bf16),
        p["w_agg_pw"][:, vc].astype(bf16),
        bmask,
        p["w_proj"][:td].astype(bf16),                        # rows for heads 0..heads-1
        p["w_proj"][td:].astype(bf16),                        # rows for aggregated heads
        p["proj_bn_scale"].reshape(1, C),
        p["proj_bn_bias"].reshape(1, C),
        p["w_inv"].astype(bf16),                              # (C, mid)
        p["b_inv"].reshape(1, mid),
        p["w_dw3"].reshape(k_dw * k_dw, 1, mid),              # f32
        p["b_dw3"].reshape(1, mid),
        p["w_pt"].astype(bf16),                               # (mid, C)
        p["pt_bn_scale"].reshape(1, C),
        p["pt_bn_bias"].reshape(1, C),
    ]

    def _const_spec(arr):
        nd = arr.ndim
        return pl.BlockSpec(arr.shape, lambda b, _nd=nd: (0,) * _nd)

    wpad5 = _round_up(8 + W + k_agg // 2, 8)
    wpad3 = _round_up(8 + W + k_dw // 2, 8)

    kernel = functools.partial(_evit_kernel, H=H, W=W, k_agg=k_agg, k_dw=k_dw, eps=eps)
    out = pl.pallas_call(
        kernel,
        out_shape=jax.ShapeDtypeStruct((B, L, C), x_nhwc.dtype),
        grid=(B,),
        in_specs=[pl.BlockSpec((1, L, C), lambda b: (b, 0, 0))]
                 + [_const_spec(op) for op in operands],
        out_specs=pl.BlockSpec((1, L, C), lambda b: (b, 0, 0)),
        scratch_shapes=[
            pltpu.VMEM((H + k_agg - 1, wpad5, 3 * td), jnp.float32),
            pltpu.VMEM((H + k_dw - 1, wpad3, mid), jnp.float32),
        ],
        compiler_params=pltpu.CompilerParams(dimension_semantics=("parallel",)),
    )(x_nhwc.reshape(B, L, C), *operands)
    return out.reshape(B, H, W, C)


# ----------------------------------------------------------------------------- pure-JAX reference (f32)
def _ref_dw(img, w):
    K = w.shape[0]
    pd = K // 2
    Hh, Ww = img.shape[1], img.shape[2]
    xp = jnp.pad(img, ((0, 0), (pd, pd), (pd, pd), (0, 0)))
    acc = jnp.zeros_like(img)
    for dy in range(K):
        for dx in range(K):
            acc = acc + xp[:, dy:dy + Hh, dx:dx + Ww, :] * w[dy, dx, :]
    return acc


def reference_forward(x, p, *, head_dim, heads, scales=(5,), eps=1e-5):
    B, H, W, C = x.shape
    L = H * W
    td = heads * head_dim
    xf = x.reshape(B, L, C).astype(jnp.float32)
    qkv = xf @ p["w_qkv"]
    agg_dw = _ref_dw(qkv.reshape(B, H, W, 3 * td), p["w_agg_dw"])
    agg = agg_dw.reshape(B, L, 3 * td) @ p["w_agg_pw"]
    ms = jnp.concatenate([qkv, agg], axis=-1)
    nh = ms.shape[-1] // (3 * head_dim)
    ms = ms.reshape(B, L, nh, 3 * head_dim)
    q = jax.nn.relu(ms[..., :head_dim])
    k = jax.nn.relu(ms[..., head_dim:2 * head_dim])
    v = ms[..., 2 * head_dim:]
    kv = jnp.einsum("blhc,blhe->bhce", k, v)
    num = jnp.einsum("blhc,bhce->blhe", q, kv)
    den = jnp.einsum("blhc,bhc->blh", q, jnp.sum(k, axis=1))[..., None]
    attn = (num / (den + eps)).reshape(B, L, nh * head_dim)
    x_ctx = attn @ p["w_proj"] * p["proj_bn_scale"] + p["proj_bn_bias"] + xf
    inv = _hardswish(x_ctx @ p["w_inv"] + p["b_inv"])
    mid = inv.shape[-1]
    dwv = _hardswish(_ref_dw(inv.reshape(B, H, W, mid), p["w_dw3"]).reshape(B, L, mid)
                     + p["b_dw3"])
    out = dwv @ p["w_pt"] * p["pt_bn_scale"] + p["pt_bn_bias"] + x_ctx
    return out.reshape(B, H, W, C)


# ----------------------------------------------------------------------------- deterministic parameter init
def make_params(key, *, C, head_dim, heads, expand_ratio, scales=(5,)):
    total_dim = heads * head_dim
    three_td = 3 * total_dim
    mid = round(C * expand_ratio)
    proj_in = total_dim * (1 + len(scales))
    ks = list(jax.random.split(key, 20))

    def nrm(k, shape, std=0.1):
        return std * jax.random.normal(k, shape, jnp.float32)

    def bn_fold(kg, kb, km, kv, n, bn_eps=1e-5):
        gamma = 1.0 + 0.1 * jax.random.normal(kg, (n,), jnp.float32)
        beta = 0.1 * jax.random.normal(kb, (n,), jnp.float32)
        mean = 0.05 * jax.random.normal(km, (n,), jnp.float32)
        var = 1.0 + 0.1 * jnp.abs(jax.random.normal(kv, (n,), jnp.float32))
        scale = gamma / jnp.sqrt(var + bn_eps)
        return scale, beta - mean * scale

    # grouped 1x1 conv (groups = 3*heads, head_dim->head_dim per group) as block-diagonal
    g = 3 * heads
    blocks = nrm(ks[2], (g, head_dim, head_dim))
    w_agg_pw = jax.scipy.linalg.block_diag(*[blocks[i] for i in range(g)])

    proj_scale, proj_bias = bn_fold(ks[4], ks[5], ks[6], ks[7], C)
    pt_scale, pt_bias = bn_fold(ks[12], ks[13], ks[14], ks[15], C)

    return {
        # LiteMLA
        "w_qkv": nrm(ks[0], (C, three_td)),
        "w_agg_dw": nrm(ks[1], (scales[0], scales[0], three_td)),
        "w_agg_pw": w_agg_pw,
        "w_proj": nrm(ks[3], (proj_in, C)),
        "proj_bn_scale": proj_scale,
        "proj_bn_bias": proj_bias,
        # MBConv
        "w_inv": nrm(ks[8], (C, mid)),
        "b_inv": nrm(ks[9], (mid,)),
        "w_dw3": nrm(ks[10], (3, 3, mid)),
        "b_dw3": nrm(ks[11], (mid,)),
        "w_pt": nrm(ks[16], (mid, C)),
        "pt_bn_scale": pt_scale,
        "pt_bn_bias": pt_bias,
    }


# ----------------------------------------------------------------------------- main
if __name__ == "__main__":
    B, H, W, C = 2, 16, 16, 32          # NHWC  (== torch NCHW [2, 32, 16, 16])
    head_dim = 8
    heads_ratio = 1.0
    heads = int(C // head_dim * heads_ratio)       # 4
    expand_ratio = 4.0

    key = jax.random.PRNGKey(0)
    k_x, k_p = jax.random.split(key)
    x = jax.random.normal(k_x, (B, H, W, C), jnp.float32)
    params = make_params(k_p, C=C, head_dim=head_dim, heads=heads, expand_ratio=expand_ratio)

    fwd = jax.jit(functools.partial(efficientvit_block, head_dim=head_dim, heads=heads))
    y = fwd(x, params)
    jax.block_until_ready(y)

    y_ref = reference_forward(x, params, head_dim=head_dim, heads=heads)
    max_err = float(jnp.max(jnp.abs(y - y_ref)))

    assert y.shape == (B, H, W, C)
    assert bool(jnp.isfinite(y).all())
    # bf16 MXU operands / EUP approx-reciprocal -> small deviation vs the f32 reference
    assert max_err < 0.15, f"kernel/reference mismatch: max abs err {max_err}"
    print("KERNEL_OK")
</pallas_src>

<mosaic_0001>
module attributes {stable_mosaic.version = 11 : i64} {
  func.func @_evit_kernel(%arg0: i32, %arg1: memref<1x256x32xf32, #tpu.memory_space<vmem>>, %arg2: memref<32x96xbf16, #tpu.memory_space<vmem>>, %arg3: memref<32x32xbf16, #tpu.memory_space<vmem>>, %arg4: memref<32x32xbf16, #tpu.memory_space<vmem>>, %arg5: memref<32x32xbf16, #tpu.memory_space<vmem>>, %arg6: memref<25x1x96xf32, #tpu.memory_space<vmem>>, %arg7: memref<96x32xbf16, #tpu.memory_space<vmem>>, %arg8: memref<96x32xbf16, #tpu.memory_space<vmem>>, %arg9: memref<96x32xbf16, #tpu.memory_space<vmem>>, %arg10: memref<32x32xf32, #tpu.memory_space<vmem>>, %arg11: memref<32x32xbf16, #tpu.memory_space<vmem>>, %arg12: memref<32x32xbf16, #tpu.memory_space<vmem>>, %arg13: memref<1x32xf32, #tpu.memory_space<vmem>>, %arg14: memref<1x32xf32, #tpu.memory_space<vmem>>, %arg15: memref<32x128xbf16, #tpu.memory_space<vmem>>, %arg16: memref<1x128xf32, #tpu.memory_space<vmem>>, %arg17: memref<9x1x128xf32, #tpu.memory_space<vmem>>, %arg18: memref<1x128xf32, #tpu.memory_space<vmem>>, %arg19: memref<128x32xbf16, #tpu.memory_space<vmem>>, %arg20: memref<1x32xf32, #tpu.memory_space<vmem>>, %arg21: memref<1x32xf32, #tpu.memory_space<vmem>>, %arg22: memref<1x256x32xf32, #tpu.memory_space<vmem>>, %arg23: memref<20x32x96xf32, #tpu.memory_space<vmem>>, %arg24: memref<18x32x128xf32, #tpu.memory_space<vmem>>) attributes {dimension_semantics = [#tpu.dimension_semantics<parallel>], iteration_bounds = array<i64: 2>, scalar_prefetch = 0 : i64, scratch_operands = 2 : i64, tpu.core_type = #tpu.core_type<tc>, window_params = [{transform_indices = @transform_0, window_bounds = array<i64: 1, 256, 32>}, {pipeline_mode = #tpu.pipeline_mode<synchronous>, transform_indices = @transform_1, window_bounds = array<i64: 32, 96>}, {pipeline_mode = #tpu.pipeline_mode<synchronous>, transform_indices = @transform_2, window_bounds = array<i64: 32, 32>}, {pipeline_mode = #tpu.pipeline_mode<synchronous>, transform_indices = @transform_3, window_bounds = array<i64: 32, 32>}, {pipeline_mode = #tpu.pipeline_mode<synchronous>, transform_indices = @transform_4, window_bounds = array<i64: 32, 32>}, {pipeline_mode = #tpu.pipeline_mode<synchronous>, transform_indices = @transform_5, window_bounds = array<i64: 25, 1, 96>}, {pipeline_mode = #tpu.pipeline_mode<synchronous>, transform_indices = @transform_6, window_bounds = array<i64: 96, 32>}, {pipeline_mode = #tpu.pipeline_mode<synchronous>, transform_indices = @transform_7, window_bounds = array<i64: 96, 32>}, {pipeline_mode = #tpu.pipeline_mode<synchronous>, transform_indices = @transform_8, window_bounds = array<i64: 96, 32>}, {pipeline_mode = #tpu.pipeline_mode<synchronous>, transform_indices = @transform_9, window_bounds = array<i64: 32, 32>}, {pipeline_mode = #tpu.pipeline_mode<synchronous>, transform_indices = @transform_10, window_bounds = array<i64: 32, 32>}, {pipeline_mode = #tpu.pipeline_mode<synchronous>, transform_indices = @transform_11, window_bounds = array<i64: 32, 32>}, {pipeline_mode = #tpu.pipeline_mode<synchronous>, transform_indices = @transform_12, window_bounds = array<i64: 1, 32>}, {pipeline_mode = #tpu.pipeline_mode<synchronous>, transform_indices = @transform_13, window_bounds = array<i64: 1, 32>}, {pipeline_mode = #tpu.pipeline_mode<synchronous>, transform_indices = @transform_14, window_bounds = array<i64: 32, 128>}, {pipeline_mode = #tpu.pipeline_mode<synchronous>, transform_indices = @transform_15, window_bounds = array<i64: 1, 128>}, {pipeline_mode = #tpu.pipeline_mode<synchronous>, transform_indices = @transform_16, window_bounds = array<i64: 9, 1, 128>}, {pipeline_mode = #tpu.pipeline_mode<synchronous>, transform_indices = @transform_17, window_bounds = array<i64: 1, 128>}, {pipeline_mode = #tpu.pipeline_mode<synchronous>, transform_indices = @transform_18, window_bounds = array<i64: 128, 32>}, {pipeline_mode = #tpu.pipeline_mode<synchronous>, transform_indices = @transform_19, window_bounds = array<i64: 1, 32>}, {pipeline_mode = #tpu.pipeline_mode<synchronous>, transform_indices = @transform_20, window_bounds = array<i64: 1, 32>}, {transform_indices = @transform_21, window_bounds = array<i64: 1, 256, 32>}]} {
    %c0 = arith.constant 0 : index
    %c0_0 = arith.constant 0 : index
    %c0_1 = arith.constant 0 : index
    %0 = vector.load %arg1[%c0, %c0_0, %c0_1] : memref<1x256x32xf32, #tpu.memory_space<vmem>>, vector<1x256x32xf32>
    %1 = vector.shape_cast %0 : vector<1x256x32xf32> to vector<256x32xf32>
    %2 = arith.truncf %1 : vector<256x32xf32> to vector<256x32xbf16>
    %c0_2 = arith.constant 0 : index
    %c0_3 = arith.constant 0 : index
    %3 = vector.load %arg10[%c0_2, %c0_3] : memref<32x32xf32, #tpu.memory_space<vmem>>, vector<32x32xf32>
    %c0_4 = arith.constant 0 : index
    %c0_5 = arith.constant 0 : index
    %4 = vector.load %arg2[%c0_4, %c0_5] : memref<32x96xbf16, #tpu.memory_space<vmem>>, vector<32x96xbf16>
    %cst = arith.constant dense<0.000000e+00> : vector<256x96xf32>
    %5 = tpu.matmul %2, %4, %cst {dimension_numbers = #tpu.dot_dimension_numbers<[1], [0], [0], [1], [0, 0, 1, 1], [], []>} : vector<256x32xbf16>, vector<32x96xbf16>, vector<256x96xf32> -> vector<256x96xf32>
    %c0_6 = arith.constant 0 : index
    %c0_7 = arith.constant 0 : index
    %6 = vector.load %arg3[%c0_6, %c0_7] : memref<32x32xbf16, #tpu.memory_space<vmem>>, vector<32x32xbf16>
    %cst_8 = arith.constant dense<0.000000e+00> : vector<256x32xf32>
    %7 = tpu.matmul %2, %6, %cst_8 {dimension_numbers = #tpu.dot_dimension_numbers<[1], [0], [0], [1], [0, 0, 1, 1], [], []>} : vector<256x32xbf16>, vector<32x32xbf16>, vector<256x32xf32> -> vector<256x32xf32>
    %cst_9 = arith.constant 0.000000e+00 : f32
    %8 = vector.broadcast %cst_9 : f32 to vector<256x32xf32>
    %9 = arith.maximumf %7, %8 : vector<256x32xf32>
    %c0_10 = arith.constant 0 : index
    %c0_11 = arith.constant 0 : index
    %10 = vector.load %arg4[%c0_10, %c0_11] : memref<32x32xbf16, #tpu.memory_space<vmem>>, vector<32x32xbf16>
    %cst_12 = arith.constant dense<0.000000e+00> : vector<256x32xf32>
    %11 = tpu.matmul %2, %10, %cst_12 {dimension_numbers = #tpu.dot_dimension_numbers<[1], [0], [0], [1], [0, 0, 1, 1], [], []>} : vector<256x32xbf16>, vector<32x32xbf16>, vector<256x32xf32> -> vector<256x32xf32>
    %cst_13 = arith.constant 0.000000e+00 : f32
    %12 = vector.broadcast %cst_13 : f32 to vector<256x32xf32>
    %13 = arith.maximumf %11, %12 : vector<256x32xf32>
    %c0_14 = arith.constant 0 : index
    %c0_15 = arith.constant 0 : index
    %14 = vector.load %arg5[%c0_14, %c0_15] : memref<32x32xbf16, #tpu.memory_space<vmem>>, vector<32x32xbf16>
    %cst_16 = arith.constant dense<0.000000e+00> : vector<256x32xf32>
    %15 = tpu.matmul %2, %14, %cst_16 {dimension_numbers = #tpu.dot_dimension_numbers<[1], [0], [0], [1], [0, 0, 1, 1], [], []>} : vector<256x32xbf16>, vector<32x32xbf16>, vector<256x32xf32> -> vector<256x32xf32>
    "tpu.trace_start"() <{level = 10 : i32, message = "lc,le->ce"}> : () -> ()
    %cst_17 = arith.constant dense<0.000000e+00> : vector<32x32xf32>
    %16 = tpu.matmul %13, %15, %cst_17 {dimension_numbers = #tpu.dot_dimension_numbers<[0], [0], [1], [1], [0, 1, 1, 1], [], []>} : vector<256x32xf32>, vector<256x32xf32>, vector<32x32xf32> -> vector<32x32xf32>
    "tpu.trace_stop"() : () -> ()
    %17 = arith.mulf %16, %3 : vector<32x32xf32>
    %cst_18 = arith.constant dense<0.000000e+00> : vector<256x32xf32>
    %18 = tpu.matmul %9, %17, %cst_18 {dimension_numbers = #tpu.dot_dimension_numbers<[1], [0], [0], [1], [0, 0, 1, 1], [], []>} : vector<256x32xf32>, vector<32x32xf32>, vector<256x32xf32> -> vector<256x32xf32>
    %cst_19 = arith.constant dense<0.000000e+00> : vector<32xf32>
    %19 = vector.multi_reduction <add>, %13, %cst_19 [0] : vector<256x32xf32> to vector<32xf32>
    %20 = vector.shape_cast %19 : vector<32xf32> to vector<1x32xf32>
    %21 = vector.broadcast %20 : vector<1x32xf32> to vector<256x32xf32>
    %22 = arith.mulf %9, %21 : vector<256x32xf32>
    %cst_20 = arith.constant dense<0.000000e+00> : vector<256x32xf32>
    %23 = tpu.matmul %22, %3, %cst_20 {dimension_numbers = #tpu.dot_dimension_numbers<[1], [0], [0], [1], [0, 0, 1, 1], [], []>} : vector<256x32xf32>, vector<32x32xf32>, vector<256x32xf32> -> vector<256x32xf32>
    %cst_21 = arith.constant 9.99999974E-6 : f32
    %24 = vector.broadcast %cst_21 : f32 to vector<256x32xf32>
    %25 = arith.addf %23, %24 : vector<256x32xf32>
    %26 = tpu.reciprocal %25 {approx = true} : vector<256x32xf32> -> vector<256x32xf32>
    %27 = arith.mulf %18, %26 : vector<256x32xf32>
    %cst_22 = arith.constant 0.000000e+00 : f32
    %28 = vector.broadcast %cst_22 : f32 to vector<20x32x96xf32>
    %c0_23 = arith.constant 0 : index
    %c0_24 = arith.constant 0 : index
    %c0_25 = arith.constant 0 : index
    %29 = vector.load %arg23[%c0_23, %c0_24, %c0_25] : memref<20x32x96xf32, #tpu.memory_space<vmem>>, vector<20x32x96xf32>
    tpu.vector_store %arg23[%c0_23, %c0_24, %c0_25], %28 {strides = array<i32>} : memref<20x32x96xf32, #tpu.memory_space<vmem>>, vector<20x32x96xf32>,
    %30 = vector.shape_cast %5 : vector<256x96xf32> to vector<16x16x96xf32>
    %c2 = arith.constant 2 : index
    %c8 = arith.constant 8 : index
    %c0_26 = arith.constant 0 : index
    %31 = vector.load %arg23[%c2, %c8, %c0_26] : memref<20x32x96xf32, #tpu.memory_space<vmem>>, vector<16x16x96xf32>
    tpu.vector_store %arg23[%c2, %c8, %c0_26], %30 {strides = array<i32>} : memref<20x32x96xf32, #tpu.memory_space<vmem>>, vector<16x16x96xf32>,
    %cst_27 = arith.constant 0.000000e+00 : f32
    %32 = vector.broadcast %cst_27 : f32 to vector<16x16x96xf32>
    %c0_28 = arith.constant 0 : index
    %c6 = arith.constant 6 : index
    %c0_29 = arith.constant 0 : index
    %33 = vector.load %arg23[%c0_28, %c6, %c0_29] : memref<20x32x96xf32, #tpu.memory_space<vmem>>, vector<16x16x96xf32>
    %c0_30 = arith.constant 0 : index
    %c0_31 = arith.constant 0 : index
    %c0_32 = arith.constant 0 : index
    %34 = vector.load %arg6[%c0_30, %c0_31, %c0_32] : memref<25x1x96xf32, #tpu.memory_space<vmem>>, vector<1x1x96xf32>
    %35 = vector.shape_cast %34 : vector<1x1x96xf32> to vector<1x96xf32>
    %36 = vector.shape_cast %35 : vector<1x96xf32> to vector<1x1x96xf32>
    %37 = vector.broadcast %36 : vector<1x1x96xf32> to vector<16x16x96xf32>
    %38 = arith.mulf %33, %37 : vector<16x16x96xf32>
    %39 = arith.addf %32, %38 : vector<16x16x96xf32>
    %c0_33 = arith.constant 0 : index
    %c7 = arith.constant 7 : index
    %c0_34 = arith.constant 0 : index
    %40 = vector.load %arg23[%c0_33, %c7, %c0_34] : memref<20x32x96xf32, #tpu.memory_space<vmem>>, vector<16x16x96xf32>
    %c1 = arith.constant 1 : index
    %c0_35 = arith.constant 0 : index
    %c0_36 = arith.constant 0 : index
    %41 = vector.load %arg6[%c1, %c0_35, %c0_36] : memref<25x1x96xf32, #tpu.memory_space<vmem>>, vector<1x1x96xf32>
    %42 = vector.shape_cast %41 : vector<1x1x96xf32> to vector<1x96xf32>
    %43 = vector.shape_cast %42 : vector<1x96xf32> to vector<1x1x96xf32>
    %44 = vector.broadcast %43 : vector<1x1x96xf32> to vector<16x16x96xf32>
    %45 = arith.mulf %40, %44 : vector<16x16x96xf32>
    %46 = arith.addf %39, %45 : vector<16x16x96xf32>
    %c0_37 = arith.constant 0 : index
    %c8_38 = arith.constant 8 : index
    %c0_39 = arith.constant 0 : index
    %47 = vector.load %arg23[%c0_37, %c8_38, %c0_39] : memref<20x32x96xf32, #tpu.memory_space<vmem>>, vector<16x16x96xf32>
    %c2_40 = arith.constant 2 : index
    %c0_41 = arith.constant 0 : index
    %c0_42 = arith.constant 0 : index
    %48 = vector.load %arg6[%c2_40, %c0_41, %c0_42] : memref<25x1x96xf32, #tpu.memory_space<vmem>>, vector<1x1x96xf32>
    %49 = vector.shape_cast %48 : vector<1x1x96xf32> to vector<1x96xf32>
    %50 = vector.shape_cast %49 : vector<1x96xf32> to vector<1x1x96xf32>
    %51 = vector.broadcast %50 : vector<1x1x96xf32> to vector<16x16x96xf32>
    %52 = arith.mulf %47, %51 : vector<16x16x96xf32>
    %53 = arith.addf %46, %52 : vector<16x16x96xf32>
    %c0_43 = arith.constant 0 : index
    %c9 = arith.constant 9 : index
    %c0_44 = arith.constant 0 : index
    %54 = vector.load %arg23[%c0_43, %c9, %c0_44] : memref<20x32x96xf32, #tpu.memory_space<vmem>>, vector<16x16x96xf32>
    %c3 = arith.constant 3 : index
    %c0_45 = arith.constant 0 : index
    %c0_46 = arith.constant 0 : index
    %55 = vector.load %arg6[%c3, %c0_45, %c0_46] : memref<25x1x96xf32, #tpu.memory_space<vmem>>, vector<1x1x96xf32>
    %56 = vector.shape_cast %55 : vector<1x1x96xf32> to vector<1x96xf32>
    %57 = vector.shape_cast %56 : vector<1x96xf32> to vector<1x1x96xf32>
    %58 = vector.broadcast %57 : vector<1x1x96xf32> to vector<16x16x96xf32>
    %59 = arith.mulf %54, %58 : vector<16x16x96xf32>
    %60 = arith.addf %53, %59 : vector<16x16x96xf32>
    %c0_47 = arith.constant 0 : index
    %c10 = arith.constant 10 : index
    %c0_48 = arith.constant 0 : index
    %61 = vector.load %arg23[%c0_47, %c10, %c0_48] : memref<20x32x96xf32, #tpu.memory_space<vmem>>, vector<16x16x96xf32>
    %c4 = arith.constant 4 : index
    %c0_49 = arith.constant 0 : index
    %c0_50 = arith.constant 0 : index
    %62 = vector.load %arg6[%c4, %c0_49, %c0_50] : memref<25x1x96xf32, #tpu.memory_space<vmem>>, vector<1x1x96xf32>
    %63 = vector.shape_cast %62 : vector<1x1x96xf32> to vector<1x96xf32>
    %64 = vector.shape_cast %63 : vector<1x96xf32> to vector<1x1x96xf32>
    %65 = vector.broadcast %64 : vector<1x1x96xf32> to vector<16x16x96xf32>
    %66 = arith.mulf %61, %65 : vector<16x16x96xf32>
    %67 = arith.addf %60, %66 : vector<16x16x96xf32>
    %c1_51 = arith.constant 1 : index
    %c6_52 = arith.constant 6 : index
    %c0_53 = arith.constant 0 : index
    %68 = vector.load %arg23[%c1_51, %c6_52, %c0_53] : memref<20x32x96xf32, #tpu.memory_space<vmem>>, vector<16x16x96xf32>
    %c5 = arith.constant 5 : index
    %c0_54 = arith.constant 0 : index
    %c0_55 = arith.constant 0 : index
    %69 = vector.load %arg6[%c5, %c0_54, %c0_55] : memref<25x1x96xf32, #tpu.memory_space<vmem>>, vector<1x1x96xf32>
    %70 = vector.shape_cast %69 : vector<1x1x96xf32> to vector<1x96xf32>
    %71 = vector.shape_cast %70 : vector<1x96xf32> to vector<1x1x96xf32>
    %72 = vector.broadcast %71 : vector<1x1x96xf32> to vector<16x16x96xf32>
    %73 = arith.mulf %68, %72 : vector<16x16x96xf32>
    %74 = arith.addf %67, %73 : vector<16x16x96xf32>
    %c1_56 = arith.constant 1 : index
    %c7_57 = arith.constant 7 : index
    %c0_58 = arith.constant 0 : index
    %75 = vector.load %arg23[%c1_56, %c7_57, %c0_58] : memref<20x32x96xf32, #tpu.memory_space<vmem>>, vector<16x16x96xf32>
    %c6_59 = arith.constant 6 : index
    %c0_60 = arith.constant 0 : index
    %c0_61 = arith.constant 0 : index
    %76 = vector.load %arg6[%c6_59, %c0_60, %c0_61] : memref<25x1x96xf32, #tpu.memory_space<vmem>>, vector<1x1x96xf32>
    %77 = vector.shape_cast %76 : vector<1x1x96xf32> to vector<1x96xf32>
    %78 = vector.shape_cast %77 : vector<1x96xf32> to vector<1x1x96xf32>
    %79 = vector.broadcast %78 : vector<1x1x96xf32> to vector<16x16x96xf32>
    %80 = arith.mulf %75, %79 : vector<16x16x96xf32>
    %81 = arith.addf %74, %80 : vector<16x16x96xf32>
    %c1_62 = arith.constant 1 : index
    %c8_63 = arith.constant 8 : index
    %c0_64 = arith.constant 0 : index
    %82 = vector.load %arg23[%c1_62, %c8_63, %c0_64] : memref<20x32x96xf32, #tpu.memory_space<vmem>>, vector<16x16x96xf32>
    %c7_65 = arith.constant 7 : index
    %c0_66 = arith.constant 0 : index
    %c0_67 = arith.constant 0 : index
    %83 = vector.load %arg6[%c7_65, %c0_66, %c0_67] : memref<25x1x96xf32, #tpu.memory_space<vmem>>, vector<1x1x96xf32>
    %84 = vector.shape_cast %83 : vector<1x1x96xf32> to vector<1x96xf32>
    %85 = vector.shape_cast %84 : vector<1x96xf32> to vector<1x1x96xf32>
    %86 = vector.broadcast %85 : vector<1x1x96xf32> to vector<16x16x96xf32>
    %87 = arith.mulf %82, %86 : vector<16x16x96xf32>
    %88 = arith.addf %81, %87 : vector<16x16x96xf32>
    %c1_68 = arith.constant 1 : index
    %c9_69 = arith.constant 9 : index
    %c0_70 = arith.constant 0 : index
    %89 = vector.load %arg23[%c1_68, %c9_69, %c0_70] : memref<20x32x96xf32, #tpu.memory_space<vmem>>, vector<16x16x96xf32>
    %c8_71 = arith.constant 8 : index
    %c0_72 = arith.constant 0 : index
    %c0_73 = arith.constant 0 : index
    %90 = vector.load %arg6[%c8_71, %c0_72, %c0_73] : memref<25x1x96xf32, #tpu.memory_space<vmem>>, vector<1x1x96xf32>
    %91 = vector.shape_cast %90 : vector<1x1x96xf32> to vector<1x96xf32>
    %92 = vector.shape_cast %91 : vector<1x96xf32> to vector<1x1x96xf32>
    %93 = vector.broadcast %92 : vector<1x1x96xf32> to vector<16x16x96xf32>
    %94 = arith.mulf %89, %93 : vector<16x16x96xf32>
    %95 = arith.addf %88, %94 : vector<16x16x96xf32>
    %c1_74 = arith.constant 1 : index
    %c10_75 = arith.constant 10 : index
    %c0_76 = arith.constant 0 : index
    %96 = vector.load %arg23[%c1_74, %c10_75, %c0_76] : memref<20x32x96xf32, #tpu.memory_space<vmem>>, vector<16x16x96xf32>
    %c9_77 = arith.constant 9 : index
    %c0_78 = arith.constant 0 : index
    %c0_79 = arith.constant 0 : index
    %97 = vector.load %arg6[%c9_77, %c0_78, %c0_79] : memref<25x1x96xf32, #tpu.memory_space<vmem>>, vector<1x1x96xf32>
    %98 = vector.shape_cast %97 : vector<1x1x96xf32> to vector<1x96xf32>
    %99 = vector.shape_cast %98 : vector<1x96xf32> to vector<1x1x96xf32>
    %100 = vector.broadcast %99 : vector<1x1x96xf32> to vector<16x16x96xf32>
    %101 = arith.mulf %96, %100 : vector<16x16x96xf32>
    %102 = arith.addf %95, %101 : vector<16x16x96xf32>
    %c2_80 = arith.constant 2 : index
    %c6_81 = arith.constant 6 : index
    %c0_82 = arith.constant 0 : index
    %103 = vector.load %arg23[%c2_80, %c6_81, %c0_82] : memref<20x32x96xf32, #tpu.memory_space<vmem>>, vector<16x16x96xf32>
    %c10_83 = arith.constant 10 : index
    %c0_84 = arith.constant 0 : index
    %c0_85 = arith.constant 0 : index
    %104 = vector.load %arg6[%c10_83, %c0_84, %c0_85] : memref<25x1x96xf32, #tpu.memory_space<vmem>>, vector<1x1x96xf32>
    %105 = vector.shape_cast %104 : vector<1x1x96xf32> to vector<1x96xf32>
    %106 = vector.shape_cast %105 : vector<1x96xf32> to vector<1x1x96xf32>
    %107 = vector.broadcast %106 : vector<1x1x96xf32> to vector<16x16x96xf32>
    %108 = arith.mulf %103, %107 : vector<16x16x96xf32>
    %109 = arith.addf %102, %108 : vector<16x16x96xf32>
    %c2_86 = arith.constant 2 : index
    %c7_87 = arith.constant 7 : index
    %c0_88 = arith.constant 0 : index
    %110 = vector.load %arg23[%c2_86, %c7_87, %c0_88] : memref<20x32x96xf32, #tpu.memory_space<vmem>>, vector<16x16x96xf32>
    %c11 = arith.constant 11 : index
    %c0_89 = arith.constant 0 : index
    %c0_90 = arith.constant 0 : index
    %111 = vector.load %arg6[%c11, %c0_89, %c0_90] : memref<25x1x96xf32, #tpu.memory_space<vmem>>, vector<1x1x96xf32>
    %112 = vector.shape_cast %111 : vector<1x1x96xf32> to vector<1x96xf32>
    %113 = vector.shape_cast %112 : vector<1x96xf32> to vector<1x1x96xf32>
    %114 = vector.broadcast %113 : vector<1x1x96xf32> to vector<16x16x96xf32>
    %115 = arith.mulf %110, %114 : vector<16x16x96xf32>
    %116 = arith.addf %109, %115 : vector<16x16x96xf32>
    %c2_91 = arith.constant 2 : index
    %c8_92 = arith.constant 8 : index
    %c0_93 = arith.constant 0 : index
    %117 = vector.load %arg23[%c2_91, %c8_92, %c0_93] : memref<20x32x96xf32, #tpu.memory_space<vmem>>, vector<16x16x96xf32>
    %c12 = arith.constant 12 : index
    %c0_94 = arith.constant 0 : index
    %c0_95 = arith.constant 0 : index
    %118 = vector.load %arg6[%c12, %c0_94, %c0_95] : memref<25x1x96xf32, #tpu.memory_space<vmem>>, vector<1x1x96xf32>
    %119 = vector.shape_cast %118 : vector<1x1x96xf32> to vector<1x96xf32>
    %120 = vector.shape_cast %119 : vector<1x96xf32> to vector<1x1x96xf32>
    %121 = vector.broadcast %120 : vector<1x1x96xf32> to vector<16x16x96xf32>
    %122 = arith.mulf %117, %121 : vector<16x16x96xf32>
    %123 = arith.addf %116, %122 : vector<16x16x96xf32>
    %c2_96 = arith.constant 2 : index
    %c9_97 = arith.constant 9 : index
    %c0_98 = arith.constant 0 : index
    %124 = vector.load %arg23[%c2_96, %c9_97, %c0_98] : memref<20x32x96xf32, #tpu.memory_space<vmem>>, vector<16x16x96xf32>
    %c13 = arith.constant 13 : index
    %c0_99 = arith.constant 0 : index
    %c0_100 = arith.constant 0 : index
    %125 = vector.load %arg6[%c13, %c0_99, %c0_100] : memref<25x1x96xf32, #tpu.memory_space<vmem>>, vector<1x1x96xf32>
    %126 = vector.shape_cast %125 : vector<1x1x96xf32> to vector<1x96xf32>
    %127 = vector.shape_cast %126 : vector<1x96xf32> to vector<1x1x96xf32>
    %128 = vector.broadcast %127 : vector<1x1x96xf32> to vector<16x16x96xf32>
    %129 = arith.mulf %124, %128 : vector<16x16x96xf32>
    %130 = arith.addf %123, %129 : vector<16x16x96xf32>
    %c2_101 = arith.constant 2 : index
    %c10_102 = arith.constant 10 : index
    %c0_103 = arith.constant 0 : index
    %131 = vector.load %arg23[%c2_101, %c10_102, %c0_103] : memref<20x32x96xf32, #tpu.memory_space<vmem>>, vector<16x16x96xf32>
    %c14 = arith.constant 14 : index
    %c0_104 = arith.constant 0 : index
    %c0_105 = arith.constant 0 : index
    %132 = vector.load %arg6[%c14, %c0_104, %c0_105] : memref<25x1x96xf32, #tpu.memory_space<vmem>>, vector<1x1x96xf32>
    %133 = vector.shape_cast %132 : vector<1x1x96xf32> to vector<1x96xf32>
    %134 = vector.shape_cast %133 : vector<1x96xf32> to vector<1x1x96xf32>
    %135 = vector.broadcast %134 : vector<1x1x96xf32> to vector<16x16x96xf32>
    %136 = arith.mulf %131, %135 : vector<16x16x96xf32>
    %137 = arith.addf %130, %136 : vector<16x16x96xf32>
    %c3_106 = arith.constant 3 : index
    %c6_107 = arith.constant 6 : index
    %c0_108 = arith.constant 0 : index
    %138 = vector.load %arg23[%c3_106, %c6_107, %c0_108] : memref<20x32x96xf32, #tpu.memory_space<vmem>>, vector<16x16x96xf32>
    %c15 = arith.constant 15 : index
    %c0_109 = arith.constant 0 : index
    %c0_110 = arith.constant 0 : index
    %139 = vector.load %arg6[%c15, %c0_109, %c0_110] : memref<25x1x96xf32, #tpu.memory_space<vmem>>, vector<1x1x96xf32>
    %140 = vector.shape_cast %139 : vector<1x1x96xf32> to vector<1x96xf32>
    %141 = vector.shape_cast %140 : vector<1x96xf32> to vector<1x1x96xf32>
    %142 = vector.broadcast %141 : vector<1x1x96xf32> to vector<16x16x96xf32>
    %143 = arith.mulf %138, %142 : vector<16x16x96xf32>
    %144 = arith.addf %137, %143 : vector<16x16x96xf32>
    %c3_111 = arith.constant 3 : index
    %c7_112 = arith.constant 7 : index
    %c0_113 = arith.constant 0 : index
    %145 = vector.load %arg23[%c3_111, %c7_112, %c0_113] : memref<20x32x96xf32, #tpu.memory_space<vmem>>, vector<16x16x96xf32>
    %c16 = arith.constant 16 : index
    %c0_114 = arith.constant 0 : index
    %c0_115 = arith.constant 0 : index
    %146 = vector.load %arg6[%c16, %c0_114, %c0_115] : memref<25x1x96xf32, #tpu.memory_space<vmem>>, vector<1x1x96xf32>
    %147 = vector.shape_cast %146 : vector<1x1x96xf32> to vector<1x96xf32>
    %148 = vector.shape_cast %147 : vector<1x96xf32> to vector<1x1x96xf32>
    %149 = vector.broadcast %148 : vector<1x1x96xf32> to vector<16x16x96xf32>
    %150 = arith.mulf %145, %149 : vector<16x16x96xf32>
    %151 = arith.addf %144, %150 : vector<16x16x96xf32>
    %c3_116 = arith.constant 3 : index
    %c8_117 = arith.constant 8 : index
    %c0_118 = arith.constant 0 : index
    %152 = vector.load %arg23[%c3_116, %c8_117, %c0_118] : memref<20x32x96xf32, #tpu.memory_space<vmem>>, vector<16x16x96xf32>
    %c17 = arith.constant 17 : index
    %c0_119 = arith.constant 0 : index
    %c0_120 = arith.constant 0 : index
    %153 = vector.load %arg6[%c17, %c0_119, %c0_120] : memref<25x1x96xf32, #tpu.memory_space<vmem>>, vector<1x1x96xf32>
    %154 = vector.shape_cast %153 : vector<1x1x96xf32> to vector<1x96xf32>
    %155 = vector.shape_cast %154 : vector<1x96xf32> to vector<1x1x96xf32>
    %156 = vector.broadcast %155 : vector<1x1x96xf32> to vector<16x16x96xf32>
    %157 = arith.mulf %152, %156 : vector<16x16x96xf32>
    %158 = arith.addf %151, %157 : vector<16x16x96xf32>
    %c3_121 = arith.constant 3 : index
    %c9_122 = arith.constant 9 : index
    %c0_123 = arith.constant 0 : index
    %159 = vector.load %arg23[%c3_121, %c9_122, %c0_123] : memref<20x32x96xf32, #tpu.memory_space<vmem>>, vector<16x16x96xf32>
    %c18 = arith.constant 18 : index
    %c0_124 = arith.constant 0 : index
    %c0_125 = arith.constant 0 : index
    %160 = vector.load %arg6[%c18, %c0_124, %c0_125] : memref<25x1x96xf32, #tpu.memory_space<vmem>>, vector<1x1x96xf32>
    %161 = vector.shape_cast %160 : vector<1x1x96xf32> to vector<1x96xf32>
    %162 = vector.shape_cast %161 : vector<1x96xf32> to vector<1x1x96xf32>
    %163 = vector.broadcast %162 : vector<1x1x96xf32> to vector<16x16x96xf32>
    %164 = arith.mulf %159, %163 : vector<16x16x96xf32>
    %165 = arith.addf %158, %164 : vector<16x16x96xf32>
    %c3_126 = arith.constant 3 : index
    %c10_127 = arith.constant 10 : index
    %c0_128 = arith.constant 0 : index
    %166 = vector.load %arg23[%c3_126, %c10_127, %c0_128] : memref<20x32x96xf32, #tpu.memory_space<vmem>>, vector<16x16x96xf32>
    %c19 = arith.constant 19 : index
    %c0_129 = arith.constant 0 : index
    %c0_130 = arith.constant 0 : index
    %167 = vector.load %arg6[%c19, %c0_129, %c0_130] : memref<25x1x96xf32, #tpu.memory_space<vmem>>, vector<1x1x96xf32>
    %168 = vector.shape_cast %167 : vector<1x1x96xf32> to vector<1x96xf32>
    %169 = vector.shape_cast %168 : vector<1x96xf32> to vector<1x1x96xf32>
    %170 = vector.broadcast %169 : vector<1x1x96xf32> to vector<16x16x96xf32>
    %171 = arith.mulf %166, %170 : vector<16x16x96xf32>
    %172 = arith.addf %165, %171 : vector<16x16x96xf32>
    %c4_131 = arith.constant 4 : index
    %c6_132 = arith.constant 6 : index
    %c0_133 = arith.constant 0 : index
    %173 = vector.load %arg23[%c4_131, %c6_132, %c0_133] : memref<20x32x96xf32, #tpu.memory_space<vmem>>, vector<16x16x96xf32>
    %c20 = arith.constant 20 : index
    %c0_134 = arith.constant 0 : index
    %c0_135 = arith.constant 0 : index
    %174 = vector.load %arg6[%c20, %c0_134, %c0_135] : memref<25x1x96xf32, #tpu.memory_space<vmem>>, vector<1x1x96xf32>
    %175 = vector.shape_cast %174 : vector<1x1x96xf32> to vector<1x96xf32>
    %176 = vector.shape_cast %175 : vector<1x96xf32> to vector<1x1x96xf32>
    %177 = vector.broadcast %176 : vector<1x1x96xf32> to vector<16x16x96xf32>
    %178 = arith.mulf %173, %177 : vector<16x16x96xf32>
    %179 = arith.addf %172, %178 : vector<16x16x96xf32>
    %c4_136 = arith.constant 4 : index
    %c7_137 = arith.constant 7 : index
    %c0_138 = arith.constant 0 : index
    %180 = vector.load %arg23[%c4_136, %c7_137, %c0_138] : memref<20x32x96xf32, #tpu.memory_space<vmem>>, vector<16x16x96xf32>
    %c21 = arith.constant 21 : index
    %c0_139 = arith.constant 0 : index
    %c0_140 = arith.constant 0 : index
    %181 = vector.load %arg6[%c21, %c0_139, %c0_140] : memref<25x1x96xf32, #tpu.memory_space<vmem>>, vector<1x1x96xf32>
    %182 = vector.shape_cast %181 : vector<1x1x96xf32> to vector<1x96xf32>
    %183 = vector.shape_cast %182 : vector<1x96xf32> to vector<1x1x96xf32>
    %184 = vector.broadcast %183 : vector<1x1x96xf32> to vector<16x16x96xf32>
    %185 = arith.mulf %180, %184 : vector<16x16x96xf32>
    %186 = arith.addf %179, %185 : vector<16x16x96xf32>
    %c4_141 = arith.constant 4 : index
    %c8_142 = arith.constant 8 : index
    %c0_143 = arith.constant 0 : index
    %187 = vector.load %arg23[%c4_141, %c8_142, %c0_143] : memref<20x32x96xf32, #tpu.memory_space<vmem>>, vector<16x16x96xf32>
    %c22 = arith.constant 22 : index
    %c0_144 = arith.constant 0 : index
    %c0_145 = arith.constant 0 : index
    %188 = vector.load %arg6[%c22, %c0_144, %c0_145] : memref<25x1x96xf32, #tpu.memory_space<vmem>>, vector<1x1x96xf32>
    %189 = vector.shape_cast %188 : vector<1x1x96xf32> to vector<1x96xf32>
    %190 = vector.shape_cast %189 : vector<1x96xf32> to vector<1x1x96xf32>
    %191 = vector.broadcast %190 : vector<1x1x96xf32> to vector<16x16x96xf32>
    %192 = arith.mulf %187, %191 : vector<16x16x96xf32>
    %193 = arith.addf %186, %192 : vector<16x16x96xf32>
    %c4_146 = arith.constant 4 : index
    %c9_147 = arith.constant 9 : index
    %c0_148 = arith.constant 0 : index
    %194 = vector.load %arg23[%c4_146, %c9_147, %c0_148] : memref<20x32x96xf32, #tpu.memory_space<vmem>>, vector<16x16x96xf32>
    %c23 = arith.constant 23 : index
    %c0_149 = arith.constant 0 : index
    %c0_150 = arith.constant 0 : index
    %195 = vector.load %arg6[%c23, %c0_149, %c0_150] : memref<25x1x96xf32, #tpu.memory_space<vmem>>, vector<1x1x96xf32>
    %196 = vector.shape_cast %195 : vector<1x1x96xf32> to vector<1x96xf32>
    %197 = vector.shape_cast %196 : vector<1x96xf32> to vector<1x1x96xf32>
    %198 = vector.broadcast %197 : vector<1x1x96xf32> to vector<16x16x96xf32>
    %199 = arith.mulf %194, %198 : vector<16x16x96xf32>
    %200 = arith.addf %193, %199 : vector<16x16x96xf32>
    %c4_151 = arith.constant 4 : index
    %c10_152 = arith.constant 10 : index
    %c0_153 = arith.constant 0 : index
    %201 = vector.load %arg23[%c4_151, %c10_152, %c0_153] : memref<20x32x96xf32, #tpu.memory_space<vmem>>, vector<16x16x96xf32>
    %c24 = arith.constant 24 : index
    %c0_154 = arith.constant 0 : index
    %c0_155 = arith.constant 0 : index
    %202 = vector.load %arg6[%c24, %c0_154, %c0_155] : memref<25x1x96xf32, #tpu.memory_space<vmem>>, vector<1x1x96xf32>
    %203 = vector.shape_cast %202 : vector<1x1x96xf32> to vector<1x96xf32>
    %204 = vector.shape_cast %203 : vector<1x96xf32> to vector<1x1x96xf32>
    %205 = vector.broadcast %204 : vector<1x1x96xf32> to vector<16x16x96xf32>
    %206 = arith.mulf %201, %205 : vector<16x16x96xf32>
    %207 = arith.addf %200, %206 : vector<16x16x96xf32>
    %208 = vector.shape_cast %207 : vector<16x16x96xf32> to vector<256x96xf32>
    %209 = arith.truncf %208 : vector<256x96xf32> to vector<256x96xbf16>
    %c0_156 = arith.constant 0 : index
    %c0_157 = arith.constant 0 : index
    %210 = vector.load %arg7[%c0_156, %c0_157] : memref<96x32xbf16, #tpu.memory_space<vmem>>, vector<96x32xbf16>
    %cst_158 = arith.constant dense<0.000000e+00> : vector<256x32xf32>
    %211 = tpu.matmul %209, %210, %cst_158 {dimension_numbers = #tpu.dot_dimension_numbers<[1], [0], [0], [1], [0, 0, 1, 1], [], []>} : vector<256x96xbf16>, vector<96x32xbf16>, vector<256x32xf32> -> vector<256x32xf32>
    %cst_159 = arith.constant 0.000000e+00 : f32
    %212 = vector.broadcast %cst_159 : f32 to vector<256x32xf32>
    %213 = arith.maximumf %211, %212 : vector<256x32xf32>
    %c0_160 = arith.constant 0 : index
    %c0_161 = arith.constant 0 : index
    %214 = vector.load %arg8[%c0_160, %c0_161] : memref<96x32xbf16, #tpu.memory_space<vmem>>, vector<96x32xbf16>
    %cst_162 = arith.constant dense<0.000000e+00> : vector<256x32xf32>
    %215 = tpu.matmul %209, %214, %cst_162 {dimension_numbers = #tpu.dot_dimension_numbers<[1], [0], [0], [1], [0, 0, 1, 1], [], []>} : vector<256x96xbf16>, vector<96x32xbf16>, vector<256x32xf32> -> vector<256x32xf32>
    %cst_163 = arith.constant 0.000000e+00 : f32
    %216 = vector.broadcast %cst_163 : f32 to vector<256x32xf32>
    %217 = arith.maximumf %215, %216 : vector<256x32xf32>
    %c0_164 = arith.constant 0 : index
    %c0_165 = arith.constant 0 : index
    %218 = vector.load %arg9[%c0_164, %c0_165] : memref<96x32xbf16, #tpu.memory_space<vmem>>, vector<96x32xbf16>
    %cst_166 = arith.constant dense<0.000000e+00> : vector<256x32xf32>
    %219 = tpu.matmul %209, %218, %cst_166 {dimension_numbers = #tpu.dot_dimension_numbers<[1], [0], [0], [1], [0, 0, 1, 1], [], []>} : vector<256x96xbf16>, vector<96x32xbf16>, vector<256x32xf32> -> vector<256x32xf32>
    "tpu.trace_start"() <{level = 10 : i32, message = "lc,le->ce"}> : () -> ()
    %cst_167 = arith.constant dense<0.000000e+00> : vector<32x32xf32>
    %220 = tpu.matmul %217, %219, %cst_167 {dimension_numbers = #tpu.dot_dimension_numbers<[0], [0], [1], [1], [0, 1, 1, 1], [], []>} : vector<256x32xf32>, vector<256x32xf32>, vector<32x32xf32> -> vector<32x32xf32>
    "tpu.trace_stop"() : () -> ()
    %221 = arith.mulf %220, %3 : vector<32x32xf32>
    %cst_168 = arith.constant dense<0.000000e+00> : vector<256x32xf32>
    %222 = tpu.matmul %213, %221, %cst_168 {dimension_numbers = #tpu.dot_dimension_numbers<[1], [0], [0], [1], [0, 0, 1, 1], [], []>} : vector<256x32xf32>, vector<32x32xf32>, vector<256x32xf32> -> vector<256x32xf32>
    %cst_169 = arith.constant dense<0.000000e+00> : vector<32xf32>
    %223 = vector.multi_reduction <add>, %217, %cst_169 [0] : vector<256x32xf32> to vector<32xf32>
    %224 = vector.shape_cast %223 : vector<32xf32> to vector<1x32xf32>
    %225 = vector.broadcast %224 : vector<1x32xf32> to vector<256x32xf32>
    %226 = arith.mulf %213, %225 : vector<256x32xf32>
    %cst_170 = arith.constant dense<0.000000e+00> : vector<256x32xf32>
    %227 = tpu.matmul %226, %3, %cst_170 {dimension_numbers = #tpu.dot_dimension_numbers<[1], [0], [0], [1], [0, 0, 1, 1], [], []>} : vector<256x32xf32>, vector<32x32xf32>, vector<256x32xf32> -> vector<256x32xf32>
    %cst_171 = arith.constant 9.99999974E-6 : f32
    %228 = vector.broadcast %cst_171 : f32 to vector<256x32xf32>
    %229 = arith.addf %227, %228 : vector<256x32xf32>
    %230 = tpu.reciprocal %229 {approx = true} : vector<256x32xf32> -> vector<256x32xf32>
    %231 = arith.mulf %222, %230 : vector<256x32xf32>
    %232 = arith.truncf %27 : vector<256x32xf32> to vector<256x32xbf16>
    %c0_172 = arith.constant 0 : index
    %c0_173 = arith.constant 0 : index
    %233 = vector.load %arg11[%c0_172, %c0_173] : memref<32x32xbf16, #tpu.memory_space<vmem>>, vector<32x32xbf16>
    %cst_174 = arith.constant dense<0.000000e+00> : vector<256x32xf32>
    %234 = tpu.matmul %232, %233, %cst_174 {dimension_numbers = #tpu.dot_dimension_numbers<[1], [0], [0], [1], [0, 0, 1, 1], [], []>} : vector<256x32xbf16>, vector<32x32xbf16>, vector<256x32xf32> -> vector<256x32xf32>
    %235 = arith.truncf %231 : vector<256x32xf32> to vector<256x32xbf16>
    %c0_175 = arith.constant 0 : index
    %c0_176 = arith.constant 0 : index
    %236 = vector.load %arg12[%c0_175, %c0_176] : memref<32x32xbf16, #tpu.memory_space<vmem>>, vector<32x32xbf16>
    %cst_177 = arith.constant dense<0.000000e+00> : vector<256x32xf32>
    %237 = tpu.matmul %235, %236, %cst_177 {dimension_numbers = #tpu.dot_dimension_numbers<[1], [0], [0], [1], [0, 0, 1, 1], [], []>} : vector<256x32xbf16>, vector<32x32xbf16>, vector<256x32xf32> -> vector<256x32xf32>
    %238 = arith.addf %234, %237 : vector<256x32xf32>
    %c0_178 = arith.constant 0 : index
    %c0_179 = arith.constant 0 : index
    %239 = vector.load %arg13[%c0_178, %c0_179] : memref<1x32xf32, #tpu.memory_space<vmem>>, vector<1x32xf32>
    %240 = vector.broadcast %239 : vector<1x32xf32> to vector<256x32xf32>
    %241 = arith.mulf %238, %240 : vector<256x32xf32>
    %c0_180 = arith.constant 0 : index
    %c0_181 = arith.constant 0 : index
    %242 = vector.load %arg14[%c0_180, %c0_181] : memref<1x32xf32, #tpu.memory_space<vmem>>, vector<1x32xf32>
    %243 = vector.broadcast %242 : vector<1x32xf32> to vector<256x32xf32>
    %244 = arith.addf %241, %243 : vector<256x32xf32>
    %245 = arith.addf %244, %1 : vector<256x32xf32>
    %246 = arith.truncf %245 : vector<256x32xf32> to vector<256x32xbf16>
    %c0_182 = arith.constant 0 : index
    %c0_183 = arith.constant 0 : index
    %247 = vector.load %arg15[%c0_182, %c0_183] : memref<32x128xbf16, #tpu.memory_space<vmem>>, vector<32x128xbf16>
    %cst_184 = arith.constant dense<0.000000e+00> : vector<256x128xf32>
    %248 = tpu.matmul %246, %247, %cst_184 {dimension_numbers = #tpu.dot_dimension_numbers<[1], [0], [0], [1], [0, 0, 1, 1], [], []>} : vector<256x32xbf16>, vector<32x128xbf16>, vector<256x128xf32> -> vector<256x128xf32>
    %c0_185 = arith.constant 0 : index
    %c0_186 = arith.constant 0 : index
    %249 = vector.load %arg16[%c0_185, %c0_186] : memref<1x128xf32, #tpu.memory_space<vmem>>, vector<1x128xf32>
    %250 = vector.broadcast %249 : vector<1x128xf32> to vector<256x128xf32>
    %251 = arith.addf %248, %250 : vector<256x128xf32>
    %cst_187 = arith.constant 3.000000e+00 : f32
    %252 = vector.broadcast %cst_187 : f32 to vector<256x128xf32>
    %253 = arith.addf %251, %252 : vector<256x128xf32>
    %cst_188 = arith.constant 0.000000e+00 : f32
    %cst_189 = arith.constant 6.000000e+00 : f32
    %254 = vector.broadcast %cst_188 : f32 to vector<256x128xf32>
    %255 = arith.maximumf %254, %253 : vector<256x128xf32>
    %256 = vector.broadcast %cst_189 : f32 to vector<256x128xf32>
    %257 = arith.minimumf %256, %255 : vector<256x128xf32>
    %258 = arith.mulf %251, %257 : vector<256x128xf32>
    %cst_190 = arith.constant 0.166666672 : f32
    %259 = vector.broadcast %cst_190 : f32 to vector<256x128xf32>
    %260 = arith.mulf %258, %259 : vector<256x128xf32>
    %cst_191 = arith.constant 0.000000e+00 : f32
    %261 = vector.broadcast %cst_191 : f32 to vector<18x32x128xf32>
    %c0_192 = arith.constant 0 : index
    %c0_193 = arith.constant 0 : index
    %c0_194 = arith.constant 0 : index
    %262 = vector.load %arg24[%c0_192, %c0_193, %c0_194] : memref<18x32x128xf32, #tpu.memory_space<vmem>>, vector<18x32x128xf32>
    tpu.vector_store %arg24[%c0_192, %c0_193, %c0_194], %261 {strides = array<i32>} : memref<18x32x128xf32, #tpu.memory_space<vmem>>, vector<18x32x128xf32>,
    %263 = vector.shape_cast %260 : vector<256x128xf32> to vector<16x16x128xf32>
    %c1_195 = arith.constant 1 : index
    %c8_196 = arith.constant 8 : index
    %c0_197 = arith.constant 0 : index
    %264 = vector.load %arg24[%c1_195, %c8_196, %c0_197] : memref<18x32x128xf32, #tpu.memory_space<vmem>>, vector<16x16x128xf32>
    tpu.vector_store %arg24[%c1_195, %c8_196, %c0_197], %263 {strides = array<i32>} : memref<18x32x128xf32, #tpu.memory_space<vmem>>, vector<16x16x128xf32>,
    %cst_198 = arith.constant 0.000000e+00 : f32
    %265 = vector.broadcast %cst_198 : f32 to vector<16x16x128xf32>
    %c0_199 = arith.constant 0 : index
    %c7_200 = arith.constant 7 : index
    %c0_201 = arith.constant 0 : index
    %266 = vector.load %arg24[%c0_199, %c7_200, %c0_201] : memref<18x32x128xf32, #tpu.memory_space<vmem>>, vector<16x16x128xf32>
    %c0_202 = arith.constant 0 : index
    %c0_203 = arith.constant 0 : index
    %c0_204 = arith.constant 0 : index
    %267 = vector.load %arg17[%c0_202, %c0_203, %c0_204] : memref<9x1x128xf32, #tpu.memory_space<vmem>>, vector<1x1x128xf32>
    %268 = vector.shape_cast %267 : vector<1x1x128xf32> to vector<1x128xf32>
    %269 = vector.shape_cast %268 : vector<1x128xf32> to vector<1x1x128xf32>
    %270 = vector.broadcast %269 : vector<1x1x128xf32> to vector<16x16x128xf32>
    %271 = arith.mulf %266, %270 : vector<16x16x128xf32>
    %272 = arith.addf %265, %271 : vector<16x16x128xf32>
    %c0_205 = arith.constant 0 : index
    %c8_206 = arith.constant 8 : index
    %c0_207 = arith.constant 0 : index
    %273 = vector.load %arg24[%c0_205, %c8_206, %c0_207] : memref<18x32x128xf32, #tpu.memory_space<vmem>>, vector<16x16x128xf32>
    %c1_208 = arith.constant 1 : index
    %c0_209 = arith.constant 0 : index
    %c0_210 = arith.constant 0 : index
    %274 = vector.load %arg17[%c1_208, %c0_209, %c0_210] : memref<9x1x128xf32, #tpu.memory_space<vmem>>, vector<1x1x128xf32>
    %275 = vector.shape_cast %274 : vector<1x1x128xf32> to vector<1x128xf32>
    %276 = vector.shape_cast %275 : vector<1x128xf32> to vector<1x1x128xf32>
    %277 = vector.broadcast %276 : vector<1x1x128xf32> to vector<16x16x128xf32>
    %278 = arith.mulf %273, %277 : vector<16x16x128xf32>
    %279 = arith.addf %272, %278 : vector<16x16x128xf32>
    %c0_211 = arith.constant 0 : index
    %c9_212 = arith.constant 9 : index
    %c0_213 = arith.constant 0 : index
    %280 = vector.load %arg24[%c0_211, %c9_212, %c0_213] : memref<18x32x128xf32, #tpu.memory_space<vmem>>, vector<16x16x128xf32>
    %c2_214 = arith.constant 2 : index
    %c0_215 = arith.constant 0 : index
    %c0_216 = arith.constant 0 : index
    %281 = vector.load %arg17[%c2_214, %c0_215, %c0_216] : memref<9x1x128xf32, #tpu.memory_space<vmem>>, vector<1x1x128xf32>
    %282 = vector.shape_cast %281 : vector<1x1x128xf32> to vector<1x128xf32>
    %283 = vector.shape_cast %282 : vector<1x128xf32> to vector<1x1x128xf32>
    %284 = vector.broadcast %283 : vector<1x1x128xf32> to vector<16x16x128xf32>
    %285 = arith.mulf %280, %284 : vector<16x16x128xf32>
    %286 = arith.addf %279, %285 : vector<16x16x128xf32>
    %c1_217 = arith.constant 1 : index
    %c7_218 = arith.constant 7 : index
    %c0_219 = arith.constant 0 : index
    %287 = vector.load %arg24[%c1_217, %c7_218, %c0_219] : memref<18x32x128xf32, #tpu.memory_space<vmem>>, vector<16x16x128xf32>
    %c3_220 = arith.constant 3 : index
    %c0_221 = arith.constant 0 : index
    %c0_222 = arith.constant 0 : index
    %288 = vector.load %arg17[%c3_220, %c0_221, %c0_222] : memref<9x1x128xf32, #tpu.memory_space<vmem>>, vector<1x1x128xf32>
    %289 = vector.shape_cast %288 : vector<1x1x128xf32> to vector<1x128xf32>
    %290 = vector.shape_cast %289 : vector<1x128xf32> to vector<1x1x128xf32>
    %291 = vector.broadcast %290 : vector<1x1x128xf32> to vector<16x16x128xf32>
    %292 = arith.mulf %287, %291 : vector<16x16x128xf32>
    %293 = arith.addf %286, %292 : vector<16x16x128xf32>
    %c1_223 = arith.constant 1 : index
    %c8_224 = arith.constant 8 : index
    %c0_225 = arith.constant 0 : index
    %294 = vector.load %arg24[%c1_223, %c8_224, %c0_225] : memref<18x32x128xf32, #tpu.memory_space<vmem>>, vector<16x16x128xf32>
    %c4_226 = arith.constant 4 : index
    %c0_227 = arith.constant 0 : index
    %c0_228 = arith.constant 0 : index
    %295 = vector.load %arg17[%c4_226, %c0_227, %c0_228] : memref<9x1x128xf32, #tpu.memory_space<vmem>>, vector<1x1x128xf32>
    %296 = vector.shape_cast %295 : vector<1x1x128xf32> to vector<1x128xf32>
    %297 = vector.shape_cast %296 : vector<1x128xf32> to vector<1x1x128xf32>
    %298 = vector.broadcast %297 : vector<1x1x128xf32> to vector<16x16x128xf32>
    %299 = arith.mulf %294, %298 : vector<16x16x128xf32>
    %300 = arith.addf %293, %299 : vector<16x16x128xf32>
    %c1_229 = arith.constant 1 : index
    %c9_230 = arith.constant 9 : index
    %c0_231 = arith.constant 0 : index
    %301 = vector.load %arg24[%c1_229, %c9_230, %c0_231] : memref<18x32x128xf32, #tpu.memory_space<vmem>>, vector<16x16x128xf32>
    %c5_232 = arith.constant 5 : index
    %c0_233 = arith.constant 0 : index
    %c0_234 = arith.constant 0 : index
    %302 = vector.load %arg17[%c5_232, %c0_233, %c0_234] : memref<9x1x128xf32, #tpu.memory_space<vmem>>, vector<1x1x128xf32>
    %303 = vector.shape_cast %302 : vector<1x1x128xf32> to vector<1x128xf32>
    %304 = vector.shape_cast %303 : vector<1x128xf32> to vector<1x1x128xf32>
    %305 = vector.broadcast %304 : vector<1x1x128xf32> to vector<16x16x128xf32>
    %306 = arith.mulf %301, %305 : vector<16x16x128xf32>
    %307 = arith.addf %300, %306 : vector<16x16x128xf32>
    %c2_235 = arith.constant 2 : index
    %c7_236 = arith.constant 7 : index
    %c0_237 = arith.constant 0 : index
    %308 = vector.load %arg24[%c2_235, %c7_236, %c0_237] : memref<18x32x128xf32, #tpu.memory_space<vmem>>, vector<16x16x128xf32>
    %c6_238 = arith.constant 6 : index
    %c0_239 = arith.constant 0 : index
    %c0_240 = arith.constant 0 : index
    %309 = vector.load %arg17[%c6_238, %c0_239, %c0_240] : memref<9x1x128xf32, #tpu.memory_space<vmem>>, vector<1x1x128xf32>
    %310 = vector.shape_cast %309 : vector<1x1x128xf32> to vector<1x128xf32>
    %311 = vector.shape_cast %310 : vector<1x128xf32> to vector<1x1x128xf32>
    %312 = vector.broadcast %311 : vector<1x1x128xf32> to vector<16x16x128xf32>
    %313 = arith.mulf %308, %312 : vector<16x16x128xf32>
    %314 = arith.addf %307, %313 : vector<16x16x128xf32>
    %c2_241 = arith.constant 2 : index
    %c8_242 = arith.constant 8 : index
    %c0_243 = arith.constant 0 : index
    %315 = vector.load %arg24[%c2_241, %c8_242, %c0_243] : memref<18x32x128xf32, #tpu.memory_space<vmem>>, vector<16x16x128xf32>
    %c7_244 = arith.constant 7 : index
    %c0_245 = arith.constant 0 : index
    %c0_246 = arith.constant 0 : index
    %316 = vector.load %arg17[%c7_244, %c0_245, %c0_246] : memref<9x1x128xf32, #tpu.memory_space<vmem>>, vector<1x1x128xf32>
    %317 = vector.shape_cast %316 : vector<1x1x128xf32> to vector<1x128xf32>
    %318 = vector.shape_cast %317 : vector<1x128xf32> to vector<1x1x128xf32>
    %319 = vector.broadcast %318 : vector<1x1x128xf32> to vector<16x16x128xf32>
    %320 = arith.mulf %315, %319 : vector<16x16x128xf32>
    %321 = arith.addf %314, %320 : vector<16x16x128xf32>
    %c2_247 = arith.constant 2 : index
    %c9_248 = arith.constant 9 : index
    %c0_249 = arith.constant 0 : index
    %322 = vector.load %arg24[%c2_247, %c9_248, %c0_249] : memref<18x32x128xf32, #tpu.memory_space<vmem>>, vector<16x16x128xf32>
    %c8_250 = arith.constant 8 : index
    %c0_251 = arith.constant 0 : index
    %c0_252 = arith.constant 0 : index
    %323 = vector.load %arg17[%c8_250, %c0_251, %c0_252] : memref<9x1x128xf32, #tpu.memory_space<vmem>>, vector<1x1x128xf32>
    %324 = vector.shape_cast %323 : vector<1x1x128xf32> to vector<1x128xf32>
    %325 = vector.shape_cast %324 : vector<1x128xf32> to vector<1x1x128xf32>
    %326 = vector.broadcast %325 : vector<1x1x128xf32> to vector<16x16x128xf32>
    %327 = arith.mulf %322, %326 : vector<16x16x128xf32>
    %328 = arith.addf %321, %327 : vector<16x16x128xf32>
    %329 = vector.shape_cast %328 : vector<16x16x128xf32> to vector<256x128xf32>
    %c0_253 = arith.constant 0 : index
    %c0_254 = arith.constant 0 : index
    %330 = vector.load %arg18[%c0_253, %c0_254] : memref<1x128xf32, #tpu.memory_space<vmem>>, vector<1x128xf32>
    %331 = vector.broadcast %330 : vector<1x128xf32> to vector<256x128xf32>
    %332 = arith.addf %329, %331 : vector<256x128xf32>
    %cst_255 = arith.constant 3.000000e+00 : f32
    %333 = vector.broadcast %cst_255 : f32 to vector<256x128xf32>
    %334 = arith.addf %332, %333 : vector<256x128xf32>
    %cst_256 = arith.constant 0.000000e+00 : f32
    %cst_257 = arith.constant 6.000000e+00 : f32
    %335 = vector.broadcast %cst_256 : f32 to vector<256x128xf32>
    %336 = arith.maximumf %335, %334 : vector<256x128xf32>
    %337 = vector.broadcast %cst_257 : f32 to vector<256x128xf32>
    %338 = arith.minimumf %337, %336 : vector<256x128xf32>
    %339 = arith.mulf %332, %338 : vector<256x128xf32>
    %cst_258 = arith.constant 0.166666672 : f32
    %340 = vector.broadcast %cst_258 : f32 to vector<256x128xf32>
    %341 = arith.mulf %339, %340 : vector<256x128xf32>
    %342 = arith.truncf %341 : vector<256x128xf32> to vector<256x128xbf16>
    %c0_259 = arith.constant 0 : index
    %c0_260 = arith.constant 0 : index
    %343 = vector.load %arg19[%c0_259, %c0_260] : memref<128x32xbf16, #tpu.memory_space<vmem>>, vector<128x32xbf16>
    %cst_261 = arith.constant dense<0.000000e+00> : vector<256x32xf32>
    %344 = tpu.matmul %342, %343, %cst_261 {dimension_numbers = #tpu.dot_dimension_numbers<[1], [0], [0], [1], [0, 0, 1, 1], [], []>} : vector<256x128xbf16>, vector<128x32xbf16>, vector<256x32xf32> -> vector<256x32xf32>
    %c0_262 = arith.constant 0 : index
    %c0_263 = arith.constant 0 : index
    %345 = vector.load %arg20[%c0_262, %c0_263] : memref<1x32xf32, #tpu.memory_space<vmem>>, vector<1x32xf32>
    %346 = vector.broadcast %345 : vector<1x32xf32> to vector<256x32xf32>
    %347 = arith.mulf %344, %346 : vector<256x32xf32>
    %c0_264 = arith.constant 0 : index
    %c0_265 = arith.constant 0 : index
    %348 = vector.load %arg21[%c0_264, %c0_265] : memref<1x32xf32, #tpu.memory_space<vmem>>, vector<1x32xf32>
    %349 = vector.broadcast %348 : vector<1x32xf32> to vector<256x32xf32>
    %350 = arith.addf %347, %349 : vector<256x32xf32>
    %351 = arith.addf %350, %245 : vector<256x32xf32>
    %c0_266 = arith.constant 0 : index
    %c0_267 = arith.constant 0 : index
    %c0_268 = arith.constant 0 : index
    %352 = vector.load %arg22[%c0_266, %c0_267, %c0_268] : memref<1x256x32xf32, #tpu.memory_space<vmem>>, vector<1x256x32xf32>
    %353 = vector.shape_cast %352 : vector<1x256x32xf32> to vector<256x32xf32>
    %354 = vector.shape_cast %351 : vector<256x32xf32> to vector<1x256x32xf32>
    tpu.vector_store %arg22[%c0_266, %c0_267, %c0_268], %354 {strides = array<i32>} : memref<1x256x32xf32, #tpu.memory_space<vmem>>, vector<1x256x32xf32>,
    return
  }
  func.func @transform_0(%arg0: i32) -> (i32, i32, i32) {
    %c0_i32 = arith.constant 0 : i32
    %c0_i32_0 = arith.constant 0 : i32
    %c0_i32_1 = arith.constant 0 : i32
    return %arg0, %c0_i32, %c0_i32_0 : i32, i32, i32
  }
  func.func @transform_1(%arg0: i32) -> (i32, i32) {
    %c0_i32 = arith.constant 0 : i32
    %c0_i32_0 = arith.constant 0 : i32
    %c0_i32_1 = arith.constant 0 : i32
    return %c0_i32, %c0_i32_0 : i32, i32
  }
  func.func @transform_2(%arg0: i32) -> (i32, i32) {
    %c0_i32 = arith.constant 0 : i32
    %c0_i32_0 = arith.constant 0 : i32
    %c0_i32_1 = arith.constant 0 : i32
    return %c0_i32, %c0_i32_0 : i32, i32
  }
  func.func @transform_3(%arg0: i32) -> (i32, i32) {
    %c0_i32 = arith.constant 0 : i32
    %c0_i32_0 = arith.constant 0 : i32
    %c0_i32_1 = arith.constant 0 : i32
    return %c0_i32, %c0_i32_0 : i32, i32
  }
  func.func @transform_4(%arg0: i32) -> (i32, i32) {
    %c0_i32 = arith.constant 0 : i32
    %c0_i32_0 = arith.constant 0 : i32
    %c0_i32_1 = arith.constant 0 : i32
    return %c0_i32, %c0_i32_0 : i32, i32
  }
  func.func @transform_5(%arg0: i32) -> (i32, i32, i32) {
    %c0_i32 = arith.constant 0 : i32
    %c0_i32_0 = arith.constant 0 : i32
    %c0_i32_1 = arith.constant 0 : i32
    %c0_i32_2 = arith.constant 0 : i32
    return %c0_i32, %c0_i32_0, %c0_i32_1 : i32, i32, i32
  }
  func.func @transform_6(%arg0: i32) -> (i32, i32) {
    %c0_i32 = arith.constant 0 : i32
    %c0_i32_0 = arith.constant 0 : i32
    %c0_i32_1 = arith.constant 0 : i32
    return %c0_i32, %c0_i32_0 : i32, i32
  }
  func.func @transform_7(%arg0: i32) -> (i32, i32) {
    %c0_i32 = arith.constant 0 : i32
    %c0_i32_0 = arith.constant 0 : i32
    %c0_i32_1 = arith.constant 0 : i32
    return %c0_i32, %c0_i32_0 : i32, i32
  }
  func.func @transform_8(%arg0: i32) -> (i32, i32) {
    %c0_i32 = arith.constant 0 : i32
    %c0_i32_0 = arith.constant 0 : i32
    %c0_i32_1 = arith.constant 0 : i32
    return %c0_i32, %c0_i32_0 : i32, i32
  }
  func.func @transform_9(%arg0: i32) -> (i32, i32) {
    %c0_i32 = arith.constant 0 : i32
    %c0_i32_0 = arith.constant 0 : i32
    %c0_i32_1 = arith.constant 0 : i32
    return %c0_i32, %c0_i32_0 : i32, i32
  }
  func.func @transform_10(%arg0: i32) -> (i32, i32) {
    %c0_i32 = arith.constant 0 : i32
    %c0_i32_0 = arith.constant 0 : i32
    %c0_i32_1 = arith.constant 0 : i32
    return %c0_i32, %c0_i32_0 : i32, i32
  }
  func.func @transform_11(%arg0: i32) -> (i32, i32) {
    %c0_i32 = arith.constant 0 : i32
    %c0_i32_0 = arith.constant 0 : i32
    %c0_i32_1 = arith.constant 0 : i32
    return %c0_i32, %c0_i32_0 : i32, i32
  }
  func.func @transform_12(%arg0: i32) -> (i32, i32) {
    %c0_i32 = arith.constant 0 : i32
    %c0_i32_0 = arith.constant 0 : i32
    %c0_i32_1 = arith.constant 0 : i32
    return %c0_i32, %c0_i32_0 : i32, i32
  }
  func.func @transform_13(%arg0: i32) -> (i32, i32) {
    %c0_i32 = arith.constant 0 : i32
    %c0_i32_0 = arith.constant 0 : i32
    %c0_i32_1 = arith.constant 0 : i32
    return %c0_i32, %c0_i32_0 : i32, i32
  }
  func.func @transform_14(%arg0: i32) -> (i32, i32) {
    %c0_i32 = arith.constant 0 : i32
    %c0_i32_0 = arith.constant 0 : i32
    %c0_i32_1 = arith.constant 0 : i32
    return %c0_i32, %c0_i32_0 : i32, i32
  }
  func.func @transform_15(%arg0: i32) -> (i32, i32) {
    %c0_i32 = arith.constant 0 : i32
    %c0_i32_0 = arith.constant 0 : i32
    %c0_i32_1 = arith.constant 0 : i32
    return %c0_i32, %c0_i32_0 : i32, i32
  }
  func.func @transform_16(%arg0: i32) -> (i32, i32, i32) {
    %c0_i32 = arith.constant 0 : i32
    %c0_i32_0 = arith.constant 0 : i32
    %c0_i32_1 = arith.constant 0 : i32
    %c0_i32_2 = arith.constant 0 : i32
    return %c0_i32, %c0_i32_0, %c0_i32_1 : i32, i32, i32
  }
  func.func @transform_17(%arg0: i32) -> (i32, i32) {
    %c0_i32 = arith.constant 0 : i32
    %c0_i32_0 = arith.constant 0 : i32
    %c0_i32_1 = arith.constant 0 : i32
    return %c0_i32, %c0_i32_0 : i32, i32
  }
  func.func @transform_18(%arg0: i32) -> (i32, i32) {
    %c0_i32 = arith.constant 0 : i32
    %c0_i32_0 = arith.constant 0 : i32
    %c0_i32_1 = arith.constant 0 : i32
    return %c0_i32, %c0_i32_0 : i32, i32
  }
  func.func @transform_19(%arg0: i32) -> (i32, i32) {
    %c0_i32 = arith.constant 0 : i32
    %c0_i32_0 = arith.constant 0 : i32
    %c0_i32_1 = arith.constant 0 : i32
    return %c0_i32, %c0_i32_0 : i32, i32
  }
  func.func @transform_20(%arg0: i32) -> (i32, i32) {
    %c0_i32 = arith.constant 0 : i32
    %c0_i32_0 = arith.constant 0 : i32
    %c0_i32_1 = arith.constant 0 : i32
    return %c0_i32, %c0_i32_0 : i32, i32
  }
  func.func @transform_21(%arg0: i32) -> (i32, i32, i32) {
    %c0_i32 = arith.constant 0 : i32
    %c0_i32_0 = arith.constant 0 : i32
    %c0_i32_1 = arith.constant 0 : i32
    return %arg0, %c0_i32, %c0_i32_0 : i32, i32, i32
  }
}

</mosaic_0001>

<bundles_post_ra>
// kernel: efficientvit_block.1
= control target key start
LH: loop header
LB: loop body
LE: loop exit
PB: predicated region body
PF: predicated region fallthrough
CT: control target
= control target key end

     0   :  { %s18582_s0 = inlined_call_operand.vmem [shape: f32[2,256,32], index: 0, kind: input, shape index: {}]   ;;  %s18583_s1 = inlined_call_operand.vmem [shape: bf16[32,96], index: 1, kind: input, shape index: {}]   ;;  %s18584_s2 = inlined_call_operand.vmem [shape: bf16[32,32], index: 2, kind: input, shape index: {}]   ;;  %s18585_s3 = inlined_call_operand.vmem [shape: bf16[32,32], index: 3, kind: input, shape index: {}]   ;;  %s18586_s4 = inlined_call_operand.vmem [shape: bf16[32,32], index: 4, kind: input, shape index: {}]   ;;  %s18587_s5 = inlined_call_operand.vmem [shape: f32[25,1,96], index: 5, kind: input, shape index: {}]   ;;  %s18588_s6 = inlined_call_operand.vmem [shape: bf16[96,32], index: 6, kind: input, shape index: {}]   ;;  %s18589_s7 = inlined_call_operand.vmem [shape: bf16[96,32], index: 7, kind: input, shape index: {}]   ;;  %s18590_s8 = inlined_call_operand.vmem [shape: bf16[96,32], index: 8, kind: input, shape index: {}]   ;;  %s18591_s9 = inlined_call_operand.vmem [shape: f32[32,32], index: 9, kind: input, shape index: {}]   ;;  %s18592_s10 = inlined_call_operand.vmem [shape: bf16[32,32], index: 10, kind: input, shape index: {}]   ;;  %s18593_s11 = inlined_call_operand.vmem [shape: bf16[32,32], index: 11, kind: input, shape index: {}]   ;;  %s18594_s12 = inlined_call_operand.vmem [shape: f32[1,32], index: 12, kind: input, shape index: {}]   ;;  %s18595_s13 = inlined_call_operand.vmem [shape: f32[1,32], index: 13, kind: input, shape index: {}]   ;;  %s18596_s14 = inlined_call_operand.vmem [shape: bf16[32,128], index: 14, kind: input, shape index: {}]   ;;  %s18597_s15 = inlined_call_operand.vmem [shape: f32[1,128], index: 15, kind: input, shape index: {}]   ;;  %s18598_s16 = inlined_call_operand.vmem [shape: f32[9,1,128], index: 16, kind: input, shape index: {}]   ;;  %s18599_s17 = inlined_call_operand.vmem [shape: f32[1,128], index: 17, kind: input, shape index: {}]   ;;  %s18600_s18 = inlined_call_operand.vmem [shape: bf16[128,32], index: 18, kind: input, shape index: {}]   ;;  %s18601_s19 = inlined_call_operand.vmem [shape: f32[1,32], index: 19, kind: input, shape index: {}]   ;;  %s18602_s20 = inlined_call_operand.vmem [shape: f32[1,32], index: 20, kind: input, shape index: {}]   ;;  %s18603_s21 = inlined_call_operand.hbm [shape: f32[2,256,32], index: 21, kind: output, shape index: {}]  }
   0x1   :  { %19238 = sst [smem:[#allocation147_spill]] %s18582_s0 }
   0x2   :  { %19239 = sst [smem:[#allocation148_spill]] %s18583_s1 }
   0x3   :  { %19240 = sst [smem:[#allocation149_spill]] %s18584_s2 }
   0x4   :  { %19241 = sst [smem:[#allocation150_spill]] %s18585_s3 }
   0x5   :  { %19242 = sst [smem:[#allocation151_spill]] %s18586_s4 }
   0x6   :  { %19243 = sst [smem:[#allocation152_spill]] %s18587_s5 }
   0x7   :  { %19244 = sst [smem:[#allocation153_spill]] %s18588_s6 }
   0x8   :  { %19245 = sst [smem:[#allocation154_spill]] %s18589_s7 }
   0x9   :  { %19246 = sst [smem:[#allocation155_spill]] %s18590_s8 }
   0xa   :  { %19247 = sst [smem:[#allocation156_spill]] %s18591_s9 }
   0xb   :  { %19248 = sst [smem:[#allocation157_spill]] %s18603_s21 }
   0xc   :  { %26 = vsyncpa [#allocation5], 0 }
   0xd   :  { %28 = vsyncpa [#allocation5 + $0x1], 0  ;;  %s11776_s2 = smov 0   ;;  %s11778_s25 = smov 0  }
   0xe   :  { %s11780_s26 = smov 0   ;;  %s11782_s27 = smov 0  }
   0xf LB: > { %19249 = sst [smem:[#allocation7_spill]] %s11648_s2  ;;  %s11797_s3 = sadd.s32 4294967295, %s11660_s27   ;;  %s11660_s27 = sphi %s11782_s27, %s20438_s27   ;;  %s11656_s26 = sphi %s11780_s26, %s20440_s26   ;;  %s11652_s25 = sphi %s11778_s25, %s20442_s25   ;;  %s11648_s2 = sphi %s11776_s2, %s20441_s2  }
  0x10   : > { %19250 = sst [smem:[#allocation8_spill]] %s11656_s26  ;;  %s9619_s28 = sadd.s32 4294967294, %s11660_s27  }
  0x11   : > { %19251 = sst [smem:[#allocation9_spill]] %s11660_s27  ;;  %s11801_s29 = sadd.s32 1, %s11660_s27  }
  0x12   : > { %19252 = sst [smem:[#allocation10_spill]] %s11801_s29  ;;  %s487_s0 = sadd.s32 1, %s11656_s26 }
  0x13   : > { %s484_s4 = ssub.s32 %s11660_s27, %s11801_s29  ;;  %p497_p0 = scmp.ne.s32.totalorder %s11656_s26, %s11652_s25 }
  0x14   : > { %p485_p1 = scmp.eq.s32.totalorder %s484_s4, 0  ;;  %p498_p2 = scmp.eq.s32.totalorder %s11797_s3, 1 }
  0x15   : > { %p503_p3 = scmp.ne.s32.totalorder %s11652_s25, %s11648_s2  ;;  %p504_p4 = scmp.eq.s32.totalorder %s9619_s28, 1 }
  0x16   : > { %s11812_s30 = scalar_select %p485_p1, %s11656_s26, %s487_s0  }
  0x17   : > { %p11814_p5 = por %p498_p2, %p497_p0  ;;  %p11818_p6 = por %p504_p4, %p503_p3 }
  0x18   : > { %19253 = sst [smem:[#allocation11_spill]] %s11812_s30  ;;  %p9622_p7 = scmp.ge.s32.totalorder %s11660_s27, 1 }
  0x19   : > { %s19254_s5 = scalar_select %p11814_p5, 1, 0 }
  0x1a   : > { %s19256_s22 = scalar_select %p11818_p6, 1, 0 }
  0x1b   : > { %19255 = sst [smem:[#allocation12_spill]] %s19254_s5  ;;  %p590_p8 = scmp.lt.s32.totalorder %s11660_s27, 3 }
  0x1c   : > { %19257 = sst [smem:[#allocation13_spill]] %s19256_s22 }
  0x1d   : > { %p591_p9 = pnand %p9622_p7, %p590_p8 }
  0x1f   : > { %594 = sbr.rel (%p591_p9) target bundleno = 2472 (0x9a8), region = 104 }
  0x24   : > { %s19258_s24 = sld [smem:[#allocation148_spill]]  ;;  %p650_p10 = scmp.lt.s32.totalorder %s11797_s3, 1  ;;  %vm724_vm0 = vcmask 261120   ;;  %vm2489_vm1 = vcmask 785408   ;;  %v11662_v55 = vmov 0.0  }
  0x25   : > { %s19259_s29 = sld [smem:[#allocation149_spill]]  ;;  %2502 = vst.msk [vmem:[#allocation2 + $0x60] sm:$0xff] %vm2489_vm1, %v11662_v55  ;;  %2503 = vst.msk [vmem:[#allocation2 + $0x68] sm:$0xff] %vm2489_vm1, %v11662_v55  ;;  %s10032_s30 = sshll.u32 %s11797_s3, 12 }
  0x26   : > { %s651_s4 = scalar_select %p650_p10, %s11797_s3, 1  ;;  %2490 = vst.msk [vmem:[#allocation2] sm:$0xff] %vm2489_vm1, %v11662_v55  ;;  %2491 = vst.msk [vmem:[#allocation2 + $0x8] sm:$0xff] %vm2489_vm1, %v11662_v55 }
  0x27   : > { %s19260_s21 = sld [smem:[#allocation147_spill]]  ;;  %2492 = vst.msk [vmem:[#allocation2 + $0x10] sm:$0xff] %vm2489_vm1, %v11662_v55  ;;  %2493 = vst.msk [vmem:[#allocation2 + $0x18] sm:$0xff] %vm2489_vm1, %v11662_v55 }
  0x28   : > { %s10031_s23 = sshll.u32 %s651_s4, 8  ;;  %s19261_s2 = sld [smem:[#allocation151_spill]]  ;;  %2494 = vst.msk [vmem:[#allocation2 + $0x20] sm:$0xff] %vm2489_vm1, %v11662_v55  ;;  %2495 = vst.msk [vmem:[#allocation2 + $0x28] sm:$0xff] %vm2489_vm1, %v11662_v55 }
  0x29   : > { %s19263_s4 = sld [smem:[#allocation150_spill]]  ;;  %2496 = vst.msk [vmem:[#allocation2 + $0x30] sm:$0xff] %vm2489_vm1, %v11662_v55  ;;  %2497 = vst.msk [vmem:[#allocation2 + $0x38] sm:$0xff] %vm2489_vm1, %v11662_v55 }
  0x2a   : > { %v11287_v0 = vld [vmem:[%s19258_s24 + $0x8] sm:$0xff]   ;;  %v11288_v1 = vld [vmem:[%s19258_s24] sm:$0xff]   ;;  %2498 = vst.msk [vmem:[#allocation2 + $0x40] sm:$0xff] %vm2489_vm1, %v11662_v55  ;;  %2499 = vst.msk [vmem:[#allocation2 + $0x48] sm:$0xff] %vm2489_vm1, %v11662_v55  ;;  %s19501_s9 = sld [smem:[#allocation156_spill]] }
  0x2b   : > { %10481 = vmatprep.subr.bf16.mxu0 %v11287_v0  ;;  %v11289_v2 = vld [vmem:[%s19259_s29 + $0x8] sm:$0xff]   ;;  %v11290_v3 = vld [vmem:[%s19259_s29] sm:$0xff]   ;;  %2500 = vst.msk [vmem:[#allocation2 + $0x50] sm:$0xff] %vm2489_vm1, %v11662_v55  ;;  %2501 = vst.msk [vmem:[#allocation2 + $0x58] sm:$0xff] %vm2489_vm1, %v11662_v55  ;;  %s19801_s7 = sld [smem:[#allocation154_spill]] }
  0x2c   : > { %10482 = vmatpush3.bf16.msra.mxu0 %v11287_v0  ;;  %11137 = vmatprep.subr.bf16.mxu1 %v11289_v2  ;;  %2504 = vst.msk [vmem:[#allocation2 + $0x70] sm:$0xff] %vm2489_vm1, %v11662_v55  ;;  %2505 = vst.msk [vmem:[#allocation2 + $0x78] sm:$0xff] %vm2489_vm1, %v11662_v55  ;;  %s20158_s6 = sld [smem:[#allocation153_spill]] }
  0x2d   : > { %10483 = vmatprep.subr.bf16.mxu0 %v11288_v1  ;;  %s11841_s5 = scalar_lea.vmem %s19260_s21, %s10031_s23  ;;  %11139 = vmatpush3.bf16.msra.mxu1 %v11289_v2  ;;  %2506 = vst.msk [vmem:[#allocation2 + $0x80] sm:$0xff] %vm2489_vm1, %v11662_v55  ;;  %2507 = vst.msk [vmem:[#allocation2 + $0x88] sm:$0xff] %vm2489_vm1, %v11662_v55  ;;  %v2603_v59 = vld [vmem:[#allocation2 + $0x6] sm:$0xff]  ;;  %s20216_s8 = sld [smem:[#allocation155_spill]] }
  0x2e   : > { %s19262_s22 = smov %s19261_s2  ;;  %v11291_v4 = vld [vmem:[%s19261_s2 + $0x8] sm:$0xff]   ;;  %v656_v5 = vld [vmem:[%s11841_s5] sm:$0xff]  ;;  %v658_v7 = vld [vmem:[%s11841_s5 + $0x10] sm:$0xff]  ;;  %11138 = vmatprep.subr.bf16.mxu1 %v11290_v3  ;;  %2508 = vst.msk [vmem:[#allocation2 + $0x90] sm:$0xff] %vm2489_vm1, %v11662_v55  ;;  %s19264_s2 = sld [smem:[#allocation152_spill]] }
  0x2f   : > { %v657_v6 = vld [vmem:[%s11841_s5 + $0x8] sm:$0xff]  ;;  %v659_v9 = vld [vmem:[%s11841_s5 + $0x18] sm:$0xff]  ;;  %v660_v10 = vld [vmem:[%s11841_s5 + $0x20] sm:$0xff]  ;;  %2509 = vst.msk [vmem:[#allocation2 + $0x98] sm:$0xff] %vm2489_vm1, %v11662_v55  ;;  %s20433_s23 = sld [smem:[#allocation157_spill]] }
  0x30   : > { %10484 = vmatpush3.bf16.msra.mxu0 %v11288_v1  ;;  %v11849_v8 = vpack.c.bf16 %v657_v6, %v656_v5  ;;  %v661_v11 = vld [vmem:[%s11841_s5 + $0x28] sm:$0xff]  ;;  %v11854_v12 = vpack.c.bf16 %v659_v9, %v658_v7  ;;  %v664_v14 = vld [vmem:[%s11841_s5 + $0x40] sm:$0xff]  ;;  %v666_v16 = vld [vmem:[%s11841_s5 + $0x50] sm:$0xff]  ;;  %2510 = vst.msk [vmem:[#allocation2 + $0xa0] sm:$0xff] %vm2489_vm1, %v11662_v55 }
  0x31   : > { %v11856_v13 = vpack.c.bf16 %v661_v11, %v660_v10  ;;  %10517 = vmatprep.subr.bf16.mxu0 %v11289_v2  ;;  %11140 = vmatpush3.bf16.msra.mxu1 %v11290_v3  ;;  %v665_v15 = vld [vmem:[%s11841_s5 + $0x48] sm:$0xff]  ;;  %v667_v17 = vld [vmem:[%s11841_s5 + $0x58] sm:$0xff]  ;;  %v668_v20 = vld [vmem:[%s11841_s5 + $0x60] sm:$0xff]  ;;  %2511 = vst.msk [vmem:[#allocation2 + $0xa8] sm:$0xff] %vm2489_vm1, %v11662_v55 }
  0x32   : > { %10485 = vmatprep.mubr.msk.bf16.mxu0 %vm724_vm0, %v11849_v8  ;;  %v11866_v18 = vpack.c.bf16 %v665_v15, %v664_v14  ;;  %v11868_v19 = vpack.c.bf16 %v667_v17, %v666_v16  ;;  %v669_v21 = vld [vmem:[%s11841_s5 + $0x68] sm:$0xff]  ;;  %10589 = vmatprep.subr.bf16.mxu1 %v11291_v4  ;;  %v662_v22 = vld [vmem:[%s11841_s5 + $0x30] sm:$0xff]  ;;  %v663_v23 = vld [vmem:[%s11841_s5 + $0x38] sm:$0xff]  ;;  %2512 = vst.msk [vmem:[#allocation2 + $0xb0] sm:$0xff] %vm2489_vm1, %v11662_v55 }
  0x33   : > { %10486 = vmatmul.mubr.msk.bf16.vlgmr.msra.gmra.mxu0 %vm724_vm0, %v11854_v12  ;;  %v11876_v24 = vpack.c.bf16 %v669_v21, %v668_v20  ;;  %v11292_v25 = vld [vmem:[%s19262_s22] sm:$0xff]   ;;  %v11885_v26 = vpack.c.bf16 %v663_v23, %v662_v22  ;;  %v670_v27 = vld [vmem:[%s11841_s5 + $0x70] sm:$0xff]  ;;  %v671_v28 = vld [vmem:[%s11841_s5 + $0x78] sm:$0xff]  ;;  %2513 = vst.msk [vmem:[#allocation2 + $0xb8] sm:$0xff] %vm2489_vm1, %v11662_v55 }
  0x34   : > { %10489 = vmatprep.mubr.msk.bf16.mxu0 %vm724_vm0, %v11856_v13  ;;  %10518 = vmatpush3.bf16.msra.mxu0 %v11289_v2  ;;  %v672_v29 = vld [vmem:[%s11841_s5 + $0x80] sm:$0xff]  ;;  %v673_v30 = vld [vmem:[%s11841_s5 + $0x88] sm:$0xff]  ;;  %v11893_v31 = vpack.c.bf16 %v671_v28, %v670_v27  ;;  %v674_v34 = vld [vmem:[%s11841_s5 + $0x90] sm:$0xff]  ;;  %2514 = vst.msk [vmem:[#allocation2 + $0xc0] sm:$0xff] %vm2489_vm1, %v11662_v55  ;;  %s19265_s21 = smov %s19264_s2 }
  0x35   : > { %10529 = vmatprep.mubr.msk.bf16.mxu1 %vm724_vm0, %v11866_v18  ;;  %10519 = vmatprep.subr.bf16.mxu0 %v11290_v3  ;;  %v11898_v32 = vld [vmem:[%s19263_s4 + $0x8] sm:$0xff]   ;;  %v11902_v33 = vpack.c.bf16 %v673_v30, %v672_v29  ;;  %v675_v35 = vld [vmem:[%s11841_s5 + $0x98] sm:$0xff]  ;;  %v676_v36 = vld [vmem:[%s11841_s5 + $0xa0] sm:$0xff]  ;;  %2515 = vst.msk [vmem:[#allocation2 + $0xc8] sm:$0xff] %vm2489_vm1, %v11662_v55 }
  0x36   : > { %10530 = vmatmul.mubr.msk.bf16.vlgmr.msra.gmra.mxu1 %vm724_vm0, %v11868_v19  ;;  %v677_v37 = vld [vmem:[%s11841_s5 + $0xa8] sm:$0xff]  ;;  %v11915_v38 = vpack.c.bf16 %v675_v35, %v674_v34  ;;  %v678_v40 = vld [vmem:[%s11841_s5 + $0xb0] sm:$0xff]  ;;  %v679_v41 = vld [vmem:[%s11841_s5 + $0xb8] sm:$0xff]  ;;  %2516 = vst.msk [vmem:[#allocation2 + $0xd0] sm:$0xff] %vm2489_vm1, %v11662_v55 }
  0x37   : > { %10533 = vmatprep.mubr.msk.bf16.mxu1 %vm724_vm0, %v11876_v24  ;;  %10590 = vmatpush3.bf16.msra.mxu1 %v11291_v4  ;;  %v11919_v39 = vpack.c.bf16 %v677_v37, %v676_v36  ;;  %v680_v42 = vld [vmem:[%s11841_s5 + $0xc0] sm:$0xff]  ;;  %v681_v43 = vld [vmem:[%s11841_s5 + $0xc8] sm:$0xff]  ;;  %v11931_v44 = vpack.c.bf16 %v679_v41, %v678_v40  ;;  %v682_v46 = vld [vmem:[%s11841_s5 + $0xd0] sm:$0xff]  ;;  %2517 = vst.msk [vmem:[#allocation2 + $0xd8] sm:$0xff] %vm2489_vm1, %v11662_v55 }
  0x38   : > { %10591 = vmatprep.subr.bf16.mxu1 %v11292_v25  ;;  %10520 = vmatpush3.bf16.msra.mxu0 %v11290_v3  ;;  %v11935_v45 = vpack.c.bf16 %v681_v43, %v680_v42  ;;  %v683_v47 = vld [vmem:[%s11841_s5 + $0xd8] sm:$0xff]  ;;  %v684_v48 = vld [vmem:[%s11841_s5 + $0xe0] sm:$0xff]  ;;  %v685_v49 = vld [vmem:[%s11841_s5 + $0xe8] sm:$0xff]  ;;  %2518 = vst.msk [vmem:[#allocation2 + $0xe0] sm:$0xff] %vm2489_vm1, %v11662_v55 }
  0x39   : > { %10553 = vmatprep.subr.bf16.mxu0 %v11898_v32  ;;  %v11947_v50 = vpack.c.bf16 %v683_v47, %v682_v46  ;;  %v11951_v51 = vpack.c.bf16 %v685_v49, %v684_v48  ;;  %v686_v52 = vld [vmem:[%s11841_s5 + $0xf0] sm:$0xff]  ;;  %v687_v53 = vld [vmem:[%s11841_s5 + $0xf8] sm:$0xff]  ;;  %2519 = vst.msk [vmem:[#allocation2 + $0xe8] sm:$0xff] %vm2489_vm1, %v11662_v55  ;;  %2520 = vst.msk [vmem:[#allocation2 + $0xf0] sm:$0xff] %vm2489_vm1, %v11662_v55 }
  0x3a   : > { %v11961_v54 = vpack.c.bf16 %v687_v53, %v686_v52  ;;  %2521 = vst.msk [vmem:[#allocation2 + $0xf8] sm:$0xff] %vm2489_vm1, %v11662_v55  ;;  %2522 = vst.msk [vmem:[#allocation2 + $0x100] sm:$0xff] %vm2489_vm1, %v11662_v55  ;;  %v11294_v56 = vld [vmem:[%s19263_s4] sm:$0xff]   ;;  %v2604_v61 = vld [vmem:[#allocation2 + $0xe] sm:$0xff] }
  0x3b   : > { %10490 = vmatmul.mubr.msk.bf16.gmra.mxu0 %vm724_vm0, %v11885_v26  ;;  %10592 = vmatpush3.bf16.msra.mxu1 %v11292_v25  ;;  %2523 = vst.msk [vmem:[#allocation2 + $0x108] sm:$0xff] %vm2489_vm1, %v11662_v55  ;;  %2524 = vst.msk [vmem:[#allocation2 + $0x110] sm:$0xff] %vm2489_vm1, %v11662_v55  ;;  %v12254_v57 = vld [vmem:[%s19264_s2] ss:$0 sm:$0xff]  ;;  %v12259_v58 = vld [vmem:[%s19265_s21 + $0x1] ss:$0 sm:$0xff] }
  0x3c   : > { %10493 = vmatprep.mubr.msk.bf16.mxu0 %vm724_vm0, %v11866_v18  ;;  %2525 = vst.msk [vmem:[#allocation2 + $0x118] sm:$0xff] %vm2489_vm1, %v11662_v55  ;;  %2526 = vst.msk [vmem:[#allocation2 + $0x120] sm:$0xff] %vm2489_vm1, %v11662_v55  ;;  %v2706_v60 = vld [vmem:[#allocation2 + $0x7] sm:$0xff]  ;;  %v2707_v62 = vld [vmem:[#allocation2 + $0xf] sm:$0xff]  ;;  %v2642_v63 = vmul.f32 %v12254_v57, %v2603_v59  ;;  %v2643_v3 = vmul.f32 %v12254_v57, %v2604_v61  ;;  %s647_s2 = sand.u32 1, %s11652_s25  }
  0x3d   : > { %2527 = vst.msk [vmem:[#allocation2 + $0x128] sm:$0xff] %vm2489_vm1, %v11662_v55  ;;  %2528 = vst.msk [vmem:[#allocation2 + $0x130] sm:$0xff] %vm2489_vm1, %v11662_v55  ;;  %v2746_v0 = vmul.f32 %v12259_v58, %v2706_v60  ;;  %v12266_v1 = vld [vmem:[%s19265_s21 + $0x2] ss:$0 sm:$0xff]  ;;  %v2810_v2 = vld [vmem:[#allocation2 + $0x8] sm:$0xff]  ;;  %v2747_v4 = vmul.f32 %v12259_v58, %v2707_v62  ;;  %s9623_s1 = sshll.u32 %s647_s2, 8 }
  0x3e   : > { %10534 = vmatmul.mubr.msk.bf16.gmra.mxu1 %vm724_vm0, %v11893_v31  ;;  %2529 = vst.msk [vmem:[#allocation2 + $0x138] sm:$0xff] %vm2489_vm1, %v11662_v55  ;;  %2530 = vst.msk [vmem:[#allocation2 + $0x140] sm:$0xff] %vm2489_vm1, %v11662_v55  ;;  %v2811_v5 = vld [vmem:[#allocation2 + $0x10] sm:$0xff]  ;;  %v2850_v7 = vmul.f32 %v12266_v1, %v2810_v2  ;;  %v12274_v9 = vld [vmem:[%s19265_s21 + $0x3] ss:$0 sm:$0xff]  ;;  %s18542_s3 = scalar_lea.sflag [#allocation5], %s647_s2 }
  0x3f   : > { %10537 = vmatprep.mubr.msk.bf16.mxu1 %vm724_vm0, %v11902_v33  ;;  %2531 = vst.msk [vmem:[#allocation2 + $0x148] sm:$0xff] %vm2489_vm1, %v11662_v55  ;;  %2532 = vst.msk [vmem:[#allocation2 + $0x150] sm:$0xff] %vm2489_vm1, %v11662_v55  ;;  %v2778_v6 = vadd.f32 %v2746_v0, %v2642_v63  ;;  %v2779_v10 = vadd.f32 %v2747_v4, %v2643_v3  ;;  %v2851_v11 = vmul.f32 %v12266_v1, %v2811_v5  ;;  %v3018_v15 = vld [vmem:[#allocation2 + $0xa] sm:$0xff]  ;;  %v12281_v16 = vld [vmem:[%s19265_s21 + $0x4] ss:$0 sm:$0xff] }
  0x40   : > { %2533 = vst.msk [vmem:[#allocation2 + $0x158] sm:$0xff] %vm2489_vm1, %v11662_v55  ;;  %2534 = vst.msk [vmem:[#allocation2 + $0x160] sm:$0xff] %vm2489_vm1, %v11662_v55  ;;  %v3058_v21 = vmul.f32 %v12281_v16, %v3018_v15  ;;  %v12288_v22 = vld [vmem:[%s19265_s21 + $0x5] ss:$0 sm:$0xff]  ;;  %v2605_v23 = vld [vmem:[#allocation2 + $0x26] sm:$0xff] }
  0x41   : > { %2535 = vst.msk [vmem:[#allocation2 + $0x168] sm:$0xff] %vm2489_vm1, %v11662_v55  ;;  %2536 = vst.msk [vmem:[#allocation2 + $0x170] sm:$0xff] %vm2489_vm1, %v11662_v55  ;;  %v2883_v17 = vadd.f32 %v2851_v11, %v2779_v10  ;;  %v3163_v28 = vmul.f32 %v12288_v22, %v2605_v23  ;;  %v12295_v29 = vld [vmem:[%s19265_s21 + $0x6] ss:$0 sm:$0xff]  ;;  %v2708_v30 = vld [vmem:[#allocation2 + $0x27] sm:$0xff]  ;;  %v2644_v34 = vmul.f32 %v12254_v57, %v2605_v23 }
  0x42   : > { %2537 = vst.msk [vmem:[#allocation2 + $0x178] sm:$0xff] %vm2489_vm1, %v11662_v55  ;;  %2538 = vst.msk [vmem:[#allocation2 + $0x180] sm:$0xff] %vm2489_vm1, %v11662_v55  ;;  %v2748_v35 = vmul.f32 %v12259_v58, %v2708_v30  ;;  %v3267_v37 = vmul.f32 %v12295_v29, %v2708_v30  ;;  %v2916_v49 = vld [vmem:[#allocation2 + $0x29] sm:$0xff] }
  0x43   : > { %10494 = vmatmul.mubr.msk.bf16.gmra.mxu0 %vm724_vm0, %v11868_v19  ;;  %2539 = vst.msk [vmem:[#allocation2 + $0x188] sm:$0xff] %vm2489_vm1, %v11662_v55  ;;  %2540 = vst.msk [vmem:[#allocation2 + $0x190] sm:$0xff] %vm2489_vm1, %v11662_v55  ;;  %v2956_v59 = vmul.f32 %v12274_v9, %v2916_v49  ;;  %v3020_v63 = vld [vmem:[#allocation2 + $0x2a] sm:$0xff]  ;;  %v12323_v0 = vld [vmem:[%s19265_s21 + $0x9] ss:$0 sm:$0xff] }
  0x44   : > { %10497 = vmatprep.mubr.msk.bf16.mxu0 %vm724_vm0, %v11876_v24  ;;  %2541 = vst.msk [vmem:[#allocation2 + $0x198] sm:$0xff] %vm2489_vm1, %v11662_v55  ;;  %2542 = vst.msk [vmem:[#allocation2 + $0x1a0] sm:$0xff] %vm2489_vm1, %v11662_v55  ;;  %v3060_v10 = vmul.f32 %v12281_v16, %v3020_v63  ;;  %v12341_v23 = vld [vmem:[%s19265_s21 + $0xa] ss:$0 sm:$0xff] }
  0x45   : > { %2543 = vst.msk [vmem:[#allocation2 + $0x1a8] sm:$0xff] %vm2489_vm1, %v11662_v55  ;;  %2544 = vst.msk [vmem:[#allocation2 + $0x1b0] sm:$0xff] %vm2489_vm1, %v11662_v55 }
  0x46   : > { %10538 = vmatmul.mubr.msk.bf16.gmra.mxu1 %vm724_vm0, %v11915_v38  ;;  %2545 = vst.msk [vmem:[#allocation2 + $0x1b8] sm:$0xff] %vm2489_vm1, %v11662_v55  ;;  %2546 = vst.msk [vmem:[#allocation2 + $0x1c0] sm:$0xff] %vm2489_vm1, %v11662_v55 }
  0x47   : > { %10541 = vmatprep.mubr.msk.bf16.mxu1 %vm724_vm0, %v11919_v39  ;;  %2547 = vst.msk [vmem:[#allocation2 + $0x1c8] sm:$0xff] %vm2489_vm1, %v11662_v55  ;;  %2548 = vst.msk [vmem:[#allocation2 + $0x1d0] sm:$0xff] %vm2489_vm1, %v11662_v55 }
  0x48   : > { %2549 = vst.msk [vmem:[#allocation2 + $0x1d8] sm:$0xff] %vm2489_vm1, %v11662_v55  ;;  %2550 = vst.msk [vmem:[#allocation2 + $0x1e0] sm:$0xff] %vm2489_vm1, %v11662_v55 }
  0x49   : > { %2551 = vst.msk [vmem:[#allocation2 + $0x1e8] sm:$0xff] %vm2489_vm1, %v11662_v55  ;;  %2552 = vst.msk [vmem:[#allocation2 + $0x1f0] sm:$0xff] %vm2489_vm1, %v11662_v55 }
  0x4a   : > { %2553 = vst.msk [vmem:[#allocation2 + $0x1f8] sm:$0xff] %vm2489_vm1, %v11662_v55  ;;  %2554 = vst.msk [vmem:[#allocation2 + $0x200] sm:$0xff] %vm2489_vm1, %v11662_v55 }
  0x4b   : > { %10498 = vmatmul.mubr.msk.bf16.gmra.mxu0 %vm724_vm0, %v11893_v31  ;;  %2555 = vst.msk [vmem:[#allocation2 + $0x208] sm:$0xff] %vm2489_vm1, %v11662_v55  ;;  %2556 = vst.msk [vmem:[#allocation2 + $0x210] sm:$0xff] %vm2489_vm1, %v11662_v55 }
  0x4c   : > { %10501 = vmatprep.mubr.msk.bf16.mxu0 %vm724_vm0, %v11902_v33  ;;  %2557 = vst.msk [vmem:[#allocation2 + $0x218] sm:$0xff] %vm2489_vm1, %v11662_v55  ;;  %2558 = vst.msk [vmem:[#allocation2 + $0x220] sm:$0xff] %vm2489_vm1, %v11662_v55 }
  0x4d   : > { %2559 = vst.msk [vmem:[#allocation2 + $0x228] sm:$0xff] %vm2489_vm1, %v11662_v55  ;;  %2560 = vst.msk [vmem:[#allocation2 + $0x230] sm:$0xff] %vm2489_vm1, %v11662_v55 }
  0x4e   : > { %10542 = vmatmul.mubr.msk.bf16.gmra.mxu1 %vm724_vm0, %v11931_v44  ;;  %2561 = vst.msk [vmem:[#allocation2 + $0x238] sm:$0xff] %vm2489_vm1, %v11662_v55  ;;  %2562 = vst.msk [vmem:[#allocation2 + $0x240] sm:$0xff] %vm2489_vm1, %v11662_v55 }
  0x4f   : > { %10545 = vmatprep.mubr.msk.bf16.mxu1 %vm724_vm0, %v11935_v45  ;;  %2563 = vst.msk [vmem:[#allocation2 + $0x248] sm:$0xff] %vm2489_vm1, %v11662_v55  ;;  %2564 = vst.msk [vmem:[#allocation2 + $0x250] sm:$0xff] %vm2489_vm1, %v11662_v55 }
  0x50   : > { %2565 = vst.msk [vmem:[#allocation2 + $0x258] sm:$0xff] %vm2489_vm1, %v11662_v55  ;;  %2566 = vst.msk [vmem:[#allocation2 + $0x260] sm:$0xff] %vm2489_vm1, %v11662_v55 }
  0x51   : > { %2567 = vst.msk [vmem:[#allocation2 + $0x268] sm:$0xff] %vm2489_vm1, %v11662_v55  ;;  %2568 = vst.msk [vmem:[#allocation2 + $0x270] sm:$0xff] %vm2489_vm1, %v11662_v55 }
  0x52   : > { %2569 = vst.msk [vmem:[#allocation2 + $0x278] sm:$0xff] %vm2489_vm1, %v11662_v55  ;;  %7920 = vst [vmem:[#allocation3] sm:$0xff] %v11662_v55 }
  0x53   : > { %10502 = vmatmul.mubr.msk.bf16.gmra.mxu0 %vm724_vm0, %v11915_v38  ;;  %7921 = vst [vmem:[#allocation3 + $0x8] sm:$0xff] %v11662_v55  ;;  %7922 = vst [vmem:[#allocation3 + $0x10] sm:$0xff] %v11662_v55 }
  0x54   : > { %10505 = vmatprep.mubr.msk.bf16.mxu0 %vm724_vm0, %v11919_v39  ;;  %7923 = vst [vmem:[#allocation3 + $0x18] sm:$0xff] %v11662_v55  ;;  %7924 = vst [vmem:[#allocation3 + $0x20] sm:$0xff] %v11662_v55 }
  0x55   : > { %7927 = vst [vmem:[#allocation3 + $0x38] sm:$0xff] %v11662_v55  ;;  %7928 = vst [vmem:[#allocation3 + $0x40] sm:$0xff] %v11662_v55 }
  0x56   : > { %10546 = vmatmul.mubr.msk.bf16.gmra.mxu1 %vm724_vm0, %v11947_v50  ;;  %7931 = vst [vmem:[#allocation3 + $0x58] sm:$0xff] %v11662_v55  ;;  %7932 = vst [vmem:[#allocation3 + $0x60] sm:$0xff] %v11662_v55 }
  0x57   : > { %10549 = vmatprep.mubr.msk.bf16.mxu1 %vm724_vm0, %v11951_v51  ;;  %7935 = vst [vmem:[#allocation3 + $0x78] sm:$0xff] %v11662_v55  ;;  %7936 = vst [vmem:[#allocation3 + $0x80] sm:$0xff] %v11662_v55 }
  0x58   : > { %7939 = vst [vmem:[#allocation3 + $0x98] sm:$0xff] %v11662_v55  ;;  %7940 = vst [vmem:[#allocation3 + $0xa0] sm:$0xff] %v11662_v55 }
  0x59   : > { %7943 = vst [vmem:[#allocation3 + $0xb8] sm:$0xff] %v11662_v55  ;;  %7944 = vst [vmem:[#allocation3 + $0xc0] sm:$0xff] %v11662_v55 }
  0x5a   : > { %7947 = vst [vmem:[#allocation3 + $0xd8] sm:$0xff] %v11662_v55  ;;  %7948 = vst [vmem:[#allocation3 + $0xe0] sm:$0xff] %v11662_v55 }
  0x5b   : > { %10506 = vmatmul.mubr.msk.bf16.gmra.mxu0 %vm724_vm0, %v11931_v44  ;;  %7951 = vst [vmem:[#allocation3 + $0xf8] sm:$0xff] %v11662_v55  ;;  %7952 = vst [vmem:[#allocation3 + $0x100] sm:$0xff] %v11662_v55 }
  0x5c   : > { %10509 = vmatprep.mubr.msk.bf16.mxu0 %vm724_vm0, %v11935_v45  ;;  %7955 = vst [vmem:[#allocation3 + $0x118] sm:$0xff] %v11662_v55  ;;  %7956 = vst [vmem:[#allocation3 + $0x120] sm:$0xff] %v11662_v55 }
  0x5d   : > { %7959 = vst [vmem:[#allocation3 + $0x138] sm:$0xff] %v11662_v55  ;;  %7960 = vst [vmem:[#allocation3 + $0x140] sm:$0xff] %v11662_v55 }
  0x5e   : > { %10550 = vmatmul.mubr.msk.bf16.gmra.mxu1 %vm724_vm0, %v11961_v54  ;;  %7963 = vst [vmem:[#allocation3 + $0x158] sm:$0xff] %v11662_v55  ;;  %7964 = vst [vmem:[#allocation3 + $0x160] sm:$0xff] %v11662_v55 }
  0x5f   : > { %10593 = vmatprep.mubr.msk.bf16.mxu1 %vm724_vm0, %v11849_v8  ;;  %7967 = vst [vmem:[#allocation3 + $0x178] sm:$0xff] %v11662_v55  ;;  %7968 = vst [vmem:[#allocation3 + $0x180] sm:$0xff] %v11662_v55 }
  0x60   : > { %7971 = vst [vmem:[#allocation3 + $0x198] sm:$0xff] %v11662_v55  ;;  %7972 = vst [vmem:[#allocation3 + $0x1a0] sm:$0xff] %v11662_v55 }
  0x61   : > { %7975 = vst [vmem:[#allocation3 + $0x1b8] sm:$0xff] %v11662_v55  ;;  %7976 = vst [vmem:[#allocation3 + $0x1c0] sm:$0xff] %v11662_v55 }
  0x62   : > { %7979 = vst [vmem:[#allocation3 + $0x1d8] sm:$0xff] %v11662_v55  ;;  %7980 = vst [vmem:[#allocation3 + $0x1e0] sm:$0xff] %v11662_v55 }
  0x63   : > { %10510 = vmatmul.mubr.msk.bf16.gmra.mxu0 %vm724_vm0, %v11947_v50  ;;  %7983 = vst [vmem:[#allocation3 + $0x1f8] sm:$0xff] %v11662_v55  ;;  %7984 = vst [vmem:[#allocation3 + $0x200] sm:$0xff] %v11662_v55 }
  0x64   : > { %10513 = vmatprep.mubr.msk.bf16.mxu0 %vm724_vm0, %v11951_v51  ;;  %7987 = vst [vmem:[#allocation3 + $0x218] sm:$0xff] %v11662_v55  ;;  %7988 = vst [vmem:[#allocation3 + $0x220] sm:$0xff] %v11662_v55 }
  0x65   : > { %7989 = vst [vmem:[#allocation3 + $0x228] sm:$0xff] %v11662_v55  ;;  %7990 = vst [vmem:[#allocation3 + $0x230] sm:$0xff] %v11662_v55 }
  0x66   : > { %7991 = vst [vmem:[#allocation3 + $0x238] sm:$0xff] %v11662_v55  ;;  %10594 = vmatmul.mubr.msk.bf16.vlgmr.msra.gmra.mxu1 %vm724_vm0, %v11854_v12  ;;  %19266 = vst [vmem:[#allocation14_spill] sm:$0xff] %v12254_v57  ;;  %v2917_v55 = vld [vmem:[#allocation2 + $0x31] sm:$0xff] }
  0x67   : > { %10597 = vmatprep.mubr.msk.bf16.mxu1 %vm724_vm0, %v11856_v13  ;;  %19267 = vst [vmem:[#allocation15_spill] sm:$0xff] %v12259_v58  ;;  %19268 = vst [vmem:[#allocation16_spill] sm:$0xff] %v12266_v1  ;;  %v2957_v3 = vmul.f32 %v12274_v9, %v2917_v55 }
  0x68   : > { %19269 = vst [vmem:[#allocation17_spill] sm:$0xff] %v12274_v9  ;;  %19270 = vst [vmem:[#allocation18_spill] sm:$0xff] %v12281_v16 }
  0x6b   : > { %10514 = vmatmul.mubr.msk.bf16.gmra.mxu0 %vm724_vm0, %v11961_v54 }
  0x6c   : > { %10521 = vmatprep.mubr.msk.bf16.mxu0 %vm724_vm0, %v11849_v8 }
  0x6e   : > { %10598 = vmatmul.mubr.msk.bf16.gmra.mxu1 %vm724_vm0, %v11885_v26 }
  0x6f   : > { %10601 = vmatprep.mubr.msk.bf16.mxu1 %vm724_vm0, %v11866_v18 }
  0x73   : > { %10522 = vmatmul.mubr.msk.bf16.vlgmr.msra.gmra.mxu0 %vm724_vm0, %v11854_v12 }
  0x74   : > { %10525 = vmatprep.mubr.msk.bf16.mxu0 %vm724_vm0, %v11856_v13  ;;  %10554 = vmatpush3.bf16.msra.mxu0 %v11898_v32 }
  0x75   : > { %10555 = vmatprep.subr.bf16.mxu0 %v11294_v56 }
  0x76   : > { %10602 = vmatmul.mubr.msk.bf16.gmra.mxu1 %vm724_vm0, %v11868_v19 }
  0x77   : > { %10605 = vmatprep.mubr.msk.bf16.mxu1 %vm724_vm0, %v11876_v24 }
  0x78   : > { %10556 = vmatpush3.bf16.msra.mxu0 %v11294_v56 }
  0x7b   : > { %10526 = vmatmul.mubr.msk.bf16.gmra.mxu0 %vm724_vm0, %v11885_v26 }
  0x7c   : > { %10557 = vmatprep.mubr.msk.bf16.mxu0 %vm724_vm0, %v11849_v8  ;;  %v2914_v8 = vld [vmem:[#allocation2 + $0x9] sm:$0xff] }
  0x7d   : > { %v2954_v14 = vmul.f32 %v12274_v9, %v2914_v8 }
  0x7e   : > { %10606 = vmatmul.mubr.msk.bf16.gmra.mxu1 %vm724_vm0, %v11893_v31 }
  0x7f   : > { %10609 = vmatprep.mubr.msk.bf16.mxu1 %vm724_vm0, %v11902_v33 }
  0x83   : > { %10558 = vmatmul.mubr.msk.bf16.vlgmr.msra.gmra.mxu0 %vm724_vm0, %v11854_v12  ;;  %v2915_v12 = vld [vmem:[#allocation2 + $0x11] sm:$0xff] }
  0x84   : > { %10561 = vmatprep.mubr.msk.bf16.mxu0 %vm724_vm0, %v11856_v13  ;;  %v2882_v13 = vadd.f32 %v2850_v7, %v2778_v6  ;;  %v3021_v6 = vld [vmem:[#allocation2 + $0x32] sm:$0xff] }
  0x86   : > { %10610 = vmatmul.mubr.msk.bf16.gmra.mxu1 %vm724_vm0, %v11915_v38  ;;  %v2986_v20 = vadd.f32 %v2954_v14, %v2882_v13 }
  0x87   : > { %10613 = vmatprep.mubr.msk.bf16.mxu1 %vm724_vm0, %v11919_v39 }
  0x88   : > { %v3090_v27 = vadd.f32 %v3058_v21, %v2986_v20 }
  0x8a   : > { %v3195_v36 = vadd.f32 %v3163_v28, %v3090_v27 }
  0x8b   : > { %10562 = vmatmul.mubr.msk.bf16.gmra.mxu0 %vm724_vm0, %v11885_v26  ;;  %v2606_v26 = vld [vmem:[#allocation2 + $0x2e] sm:$0xff] }
  0x8c   : > { %10565 = vmatprep.mubr.msk.bf16.mxu0 %vm724_vm0, %v11866_v18  ;;  %v2955_v18 = vmul.f32 %v12274_v9, %v2915_v12  ;;  %v3164_v32 = vmul.f32 %v12288_v22, %v2606_v26  ;;  %v2645_v40 = vmul.f32 %v12254_v57, %v2606_v26  ;;  %v3299_v47 = vadd.f32 %v3267_v37, %v3195_v36  ;;  %v12355_v36 = vld [vmem:[%s19265_s21 + $0xb] ss:$0 sm:$0xff]  ;;  %v12360_v37 = vld [vmem:[%s19265_s21 + $0xc] ss:$0 sm:$0xff] }
  0x8d   : > { %v3579_v12 = vmul.f32 %v12323_v0, %v3020_v63 }
  0x8e   : > { %10614 = vmatmul.mubr.msk.bf16.gmra.mxu1 %vm724_vm0, %v11931_v44 }
  0x8f   : > { %10617 = vmatprep.mubr.msk.bf16.mxu1 %vm724_vm0, %v11935_v45 }
  0x93   : > { %10566 = vmatmul.mubr.msk.bf16.gmra.mxu0 %vm724_vm0, %v11868_v19  ;;  %v3019_v19 = vld [vmem:[#allocation2 + $0x12] sm:$0xff] }
  0x94   : > { %10569 = vmatprep.mubr.msk.bf16.mxu0 %vm724_vm0, %v11876_v24  ;;  %v2987_v24 = vadd.f32 %v2955_v18, %v2883_v17  ;;  %v3059_v25 = vmul.f32 %v12281_v16, %v3019_v19  ;;  %v3061_v17 = vmul.f32 %v12281_v16, %v3021_v6  ;;  %v3580_v19 = vmul.f32 %v12323_v0, %v3021_v6 }
  0x96   : > { %10618 = vmatmul.mubr.msk.bf16.gmra.mxu1 %vm724_vm0, %v11947_v50 }
  0x97   : > { %10621 = vmatprep.mubr.msk.bf16.mxu1 %vm724_vm0, %v11951_v51 }
  0x9b   : > { %10570 = vmatmul.mubr.msk.bf16.gmra.mxu0 %vm724_vm0, %v11893_v31  ;;  %v3091_v31 = vadd.f32 %v3059_v25, %v2987_v24 }
  0x9c   : > { %10573 = vmatprep.mubr.msk.bf16.mxu0 %vm724_vm0, %v11902_v33  ;;  %v2709_v33 = vld [vmem:[#allocation2 + $0x2f] sm:$0xff] }
  0x9d   : > { %v2749_v41 = vmul.f32 %v12259_v58, %v2709_v33  ;;  %v3196_v42 = vadd.f32 %v3164_v32, %v3091_v31  ;;  %v3268_v43 = vmul.f32 %v12295_v29, %v2709_v33 }
  0x9e   : > { %10622 = vmatmul.mubr.msk.bf16.gmra.mxu1 %vm724_vm0, %v11961_v54 }
  0x9f   : > { %v3300_v53 = vadd.f32 %v3268_v43, %v3196_v42 }
  0xa3   : > { %10574 = vmatmul.mubr.msk.bf16.gmra.mxu0 %vm724_vm0, %v11915_v38  ;;  %v12304_v38 = vld [vmem:[%s19265_s21 + $0x7] ss:$0 sm:$0xff] }
  0xa4   : > { %10577 = vmatprep.mubr.msk.bf16.mxu0 %vm724_vm0, %v11919_v39  ;;  %v2812_v39 = vld [vmem:[#allocation2 + $0x28] sm:$0xff] }
  0xa5   : > { %v2852_v46 = vmul.f32 %v12266_v1, %v2812_v39  ;;  %v3371_v48 = vmul.f32 %v12304_v38, %v2812_v39 }
  0xa7   : > { %v3403_v60 = vadd.f32 %v3371_v48, %v3299_v47 }
  0xab   : > { %10578 = vmatmul.mubr.msk.bf16.gmra.mxu0 %vm724_vm0, %v11931_v44  ;;  %v2813_v44 = vld [vmem:[#allocation2 + $0x30] sm:$0xff] }
  0xac   : > { %10581 = vmatprep.mubr.msk.bf16.mxu0 %vm724_vm0, %v11935_v45  ;;  %v2780_v45 = vadd.f32 %v2748_v35, %v2644_v34  ;;  %v2853_v52 = vmul.f32 %v12266_v1, %v2813_v44 }
  0xae   : > { %v2884_v56 = vadd.f32 %v2852_v46, %v2780_v45 }
  0xb0   : > { %v2988_v8 = vadd.f32 %v2956_v59, %v2884_v56 }
  0xb2   : > { %v3092_v28 = vadd.f32 %v3060_v10, %v2988_v8 }
  0xb3   : > { %10582 = vmatmul.mubr.msk.bf16.gmra.mxu0 %vm724_vm0, %v11947_v50  ;;  %v12314_v50 = vld [vmem:[%s19265_s21 + $0x8] ss:$0 sm:$0xff] }
  0xb4   : > { %10585 = vmatprep.mubr.msk.bf16.mxu0 %vm724_vm0, %v11951_v51  ;;  %v2781_v51 = vadd.f32 %v2749_v41, %v2645_v40  ;;  %v3475_v61 = vmul.f32 %v12314_v50, %v2916_v49  ;;  %v3476_v5 = vmul.f32 %v12314_v50, %v2917_v55 }
  0xb6   : > { %v2885_v2 = vadd.f32 %v2853_v52, %v2781_v51  ;;  %v3507_v11 = vadd.f32 %v3475_v61, %v3403_v60 }
  0xb8   : > { %v2989_v15 = vadd.f32 %v2957_v3, %v2885_v2  ;;  %v3611_v30 = vadd.f32 %v3579_v12, %v3507_v11 }
  0xba   : > { %v12346_v31 = vadd.f32 %v3061_v17, %v2989_v15 }
  0xbb   : > { %10586 = vmatmul.mubr.msk.bf16.gmra.mxu0 %vm724_vm0, %v11961_v54  ;;  %v3372_v54 = vmul.f32 %v12304_v38, %v2813_v44 }
  0xbd   : > { %v3404_v4 = vadd.f32 %v3372_v54, %v3300_v53 }
  0xbf   : > { %v3508_v18 = vadd.f32 %v3476_v5, %v3404_v4 }
  0xc1   : > { %v12348_v32 = vadd.f32 %v3580_v19, %v3508_v18 }
  0xf3   : > { %v10487_v62 = vpop.f32.mrf.mxu0 }
  0xf4   : > { %2573 = vst.msk [vmem:[#allocation2 + $0x68] sm:$0xff] %vm2489_vm1, %v10487_v62 }
  0xf5   : > { %v807_v7 = vpop.f32.mrf.mxu0 }
  0xf6   : > { %2571 = vst.msk [vmem:[#allocation2 + $0x48] sm:$0xff] %vm2489_vm1, %v807_v7  ;;  %v12331_v13 = vpop.f32.mrf.mxu1 }
  0xf7   : > { %19271 = vst [vmem:[#allocation19_spill] sm:$0xff] %v12331_v13  ;;  %v10488_v14 = vpop.f32.mrf.mxu0 }
  0xf8   : > { %2574 = vst.msk [vmem:[#allocation2 + $0x70] sm:$0xff] %vm2489_vm1, %v10488_v14  ;;  %v12336_v20 = vpop.f32.mrf.mxu1 }
  0xf9   : > { %19272 = vst [vmem:[#allocation20_spill] sm:$0xff] %v12336_v20  ;;  %v810_v21 = vpop.f32.mrf.mxu0 }
  0xfa   : > { %2572 = vst.msk [vmem:[#allocation2 + $0x50] sm:$0xff] %vm2489_vm1, %v810_v21  ;;  %v12344_v24 = vpop.f32.mrf.mxu1 }
  0xfb   : > { %19273 = vst [vmem:[#allocation21_spill] sm:$0xff] %v12344_v24  ;;  %v2609_v25 = vld [vmem:[#allocation2 + $0x66] sm:$0xff]  ;;  %v10491_v33 = vpop.f32.mrf.mxu0 }
  0xfc   : > { %v2712_v26 = vld [vmem:[#allocation2 + $0x67] sm:$0xff]  ;;  %v2648_v34 = vmul.f32 %v12254_v57, %v2609_v25  ;;  %2577 = vst.msk [vmem:[#allocation2 + $0xa8] sm:$0xff] %vm2489_vm1, %v10491_v33  ;;  %v12365_v41 = vpop.f32.mrf.mxu1  ;;  %v12369_v43 = vmul.f32 %v12288_v22, %v2609_v25  ;;  %v12384_v56 = vmul.f32 %v12341_v23, %v2609_v25 }
  0xfd   : > { %v2816_v27 = vld [vmem:[#allocation2 + $0x68] sm:$0xff]  ;;  %v2752_v35 = vmul.f32 %v12259_v58, %v2712_v26  ;;  %19274 = vst [vmem:[#allocation22_spill] sm:$0xff] %v12365_v41  ;;  %v12372_v44 = vmul.f32 %v12295_v29, %v2712_v26  ;;  %v823_v48 = vpop.f32.mrf.mxu0  ;;  %v12387_v59 = vmul.f32 %v12355_v36, %v2712_v26 }
  0xfe   : > { %v2856_v42 = vmul.f32 %v12266_v1, %v2816_v27  ;;  %v2607_v45 = vld [vmem:[#allocation2 + $0x46] sm:$0xff]  ;;  %v12376_v52 = vmul.f32 %v12304_v38, %v2816_v27  ;;  %2575 = vst.msk [vmem:[#allocation2 + $0x88] sm:$0xff] %vm2489_vm1, %v823_v48  ;;  %v12381_v55 = vpop.f32.mrf.mxu1  ;;  %v12390_v60 = vmul.f32 %v12360_v37, %v2816_v27 }
  0xff   : > { %v2710_v46 = vld [vmem:[#allocation2 + $0x47] sm:$0xff]  ;;  %v2784_v51 = vadd.f32 %v2752_v35, %v2648_v34  ;;  %v2646_v53 = vmul.f32 %v12254_v57, %v2607_v45  ;;  %19275 = vst [vmem:[#allocation23_spill] sm:$0xff] %v12381_v55  ;;  %v3165_v61 = vmul.f32 %v12288_v22, %v2607_v45  ;;  %v2713_v63 = vld [vmem:[#allocation2 + $0x6f] sm:$0xff]  ;;  %v10492_v2 = vpop.f32.mrf.mxu0  ;;  %v3683_v6 = vmul.f32 %v12341_v23, %v2607_v45 }
 0x100   : > { %v2814_v47 = vld [vmem:[#allocation2 + $0x48] sm:$0xff]  ;;  %v2750_v54 = vmul.f32 %v12259_v58, %v2710_v46  ;;  %v2817_v7 = vld [vmem:[#allocation2 + $0x70] sm:$0xff]  ;;  %2578 = vst.msk [vmem:[#allocation2 + $0xb0] sm:$0xff] %vm2489_vm1, %v10492_v2  ;;  %v12396_v10 = vpop.f32.mrf.mxu1  ;;  %v3269_v12 = vmul.f32 %v12295_v29, %v2710_v46  ;;  %v2753_v15 = vmul.f32 %v12259_v58, %v2713_v63  ;;  %v12403_v25 = vmul.f32 %v12355_v36, %v2710_v46 }
 0x101   : > { %v2610_v62 = vld [vmem:[#allocation2 + $0x6e] sm:$0xff]  ;;  %v2888_v3 = vadd.f32 %v2856_v42, %v2784_v51  ;;  %v2854_v5 = vmul.f32 %v12266_v1, %v2814_v47  ;;  %19276 = vst [vmem:[#allocation24_spill] sm:$0xff] %v12396_v10  ;;  %v3197_v11 = vadd.f32 %v3165_v61, %v3092_v28  ;;  %v826_v19 = vpop.f32.mrf.mxu0  ;;  %v3373_v21 = vmul.f32 %v12304_v38, %v2814_v47 }
 0x102   : > { %v2782_v4 = vadd.f32 %v2750_v54, %v2646_v53  ;;  %v2920_v8 = vld [vmem:[#allocation2 + $0x69] sm:$0xff]  ;;  %v2649_v14 = vmul.f32 %v12254_v57, %v2610_v62  ;;  %v2921_v17 = vld [vmem:[#allocation2 + $0x71] sm:$0xff]  ;;  %19277 = vst [vmem:[#allocation25_spill] sm:$0xff] %v12403_v25  ;;  %v12406_v26 = vmul.f32 %v12360_v37, %v2814_v47  ;;  %2576 = vst.msk [vmem:[#allocation2 + $0x90] sm:$0xff] %vm2489_vm1, %v826_v19  ;;  %v12410_v33 = vpop.f32.mrf.mxu1 }
 0x103   : > { %v3024_v18 = vld [vmem:[#allocation2 + $0x6a] sm:$0xff]  ;;  %v2960_v27 = vmul.f32 %v12274_v9, %v2920_v8  ;;  %v3025_v28 = vld [vmem:[#allocation2 + $0x72] sm:$0xff]  ;;  %19279 = vst [vmem:[#allocation27_spill] sm:$0xff] %v12410_v33  ;;  %v3301_v35 = vadd.f32 %v3269_v12, %v3197_v11  ;;  %v2857_v45 = vmul.f32 %v12266_v1, %v2817_v7  ;;  %v10495_v48 = vpop.f32.mrf.mxu0  ;;  %v12413_v51 = vadd.f32 %v3683_v6, %v3611_v30 }
 0x104   : > { %19278 = vst [vmem:[#allocation26_spill] sm:$0xff] %v12406_v26  ;;  %v2886_v34 = vadd.f32 %v2854_v5, %v2782_v4  ;;  %v2785_v42 = vadd.f32 %v2753_v15, %v2649_v14  ;;  %v2961_v46 = vmul.f32 %v12274_v9, %v2921_v17  ;;  %v3064_v47 = vmul.f32 %v12281_v16, %v3024_v18  ;;  %v12418_v54 = vpop.f32.mrf.mxu1  ;;  %v12430_v30 = vld [vmem:[%s19265_s21 + $0xd] ss:$0 sm:$0xff]  ;;  %v12443_v15 = vld [vmem:[%s19265_s21 + $0xe] ss:$0 sm:$0xff]  ;;  %v12473_v40 = vld [vmem:[#allocation2 + $0x51] sm:$0xff] }
 0x105   : > { %19280 = vst [vmem:[#allocation28_spill] sm:$0xff] %v12413_v51  ;;  %v2992_v53 = vadd.f32 %v2960_v27, %v2888_v3  ;;  %2581 = vst.msk [vmem:[#allocation2 + $0xe8] sm:$0xff] %vm2489_vm1, %v10495_v48  ;;  %v3065_v2 = vmul.f32 %v12281_v16, %v3025_v28  ;;  %v12422_v4 = vmul.f32 %v12288_v22, %v2610_v62  ;;  %v839_v3 = vpop.f32.mrf.mxu0  ;;  %v2608_v19 = vld [vmem:[#allocation2 + $0x4e] sm:$0xff] }
 0x106   : > { %19281 = vst [vmem:[#allocation29_spill] sm:$0xff] %v12418_v54  ;;  %v2889_v61 = vadd.f32 %v2857_v45, %v2785_v42  ;;  %v12425_v5 = vmul.f32 %v12295_v29, %v2713_v63  ;;  %19282 = vst [vmem:[#allocation30_spill] sm:$0xff] %v12430_v30  ;;  %v3405_v6 = vadd.f32 %v3373_v21, %v3301_v35  ;;  %v2711_v27 = vld [vmem:[#allocation2 + $0x4f] sm:$0xff]  ;;  %v12446_v42 = vpop.f32.mrf.mxu1 }
 0x107   : > { %v12432_v11 = vadd.f32 %v3064_v47, %v2992_v53  ;;  %v12435_v12 = vmul.f32 %v12304_v38, %v2817_v7  ;;  %v12438_v14 = vmul.f32 %v12314_v50, %v2920_v8  ;;  %19284 = vst [vmem:[#allocation32_spill] sm:$0xff] %v12443_v15  ;;  %2579 = vst.msk [vmem:[#allocation2 + $0xc8] sm:$0xff] %vm2489_vm1, %v839_v3  ;;  %v12457_v53 = vld [vmem:[#allocation2 + $0x50] sm:$0xff]  ;;  %v10496_v49 = vpop.f32.mrf.mxu0 }
 0x108   : > { %19285 = vst [vmem:[#allocation33_spill] sm:$0xff] %v12446_v42  ;;  %v2993_v21 = vadd.f32 %v2961_v46, %v2889_v61  ;;  %v12449_v35 = vmul.f32 %v12314_v50, %v2921_v17  ;;  %v12452_v45 = vmul.f32 %v12323_v0, %v3024_v18  ;;  %v12455_v48 = vmul.f32 %v12323_v0, %v3025_v28  ;;  %v12459_v47 = vld [vmem:[#allocation2 + $0x49] sm:$0xff]  ;;  %v12476_v13 = vpop.f32.mrf.mxu1 }
 0x109   : > { %19283 = vst [vmem:[#allocation31_spill] sm:$0xff] %v12438_v14  ;;  %19289 = vst [vmem:[#allocation37_spill] sm:$0xff] %v12459_v47  ;;  %v12462_v39 = vmul.f32 %v12341_v23, %v2610_v62  ;;  %v12465_v3 = vmul.f32 %v12355_v36, %v2713_v63  ;;  %v12468_v46 = vmul.f32 %v12360_v37, %v2817_v7  ;;  %v3022_v24 = vld [vmem:[#allocation2 + $0x4a] sm:$0xff] }
 0x10a   : > { %19286 = vst [vmem:[#allocation34_spill] sm:$0xff] %v12449_v35  ;;  %19287 = vst [vmem:[#allocation35_spill] sm:$0xff] %v12452_v45  ;;  %v12471_v61 = vmul.f32 %v12430_v30, %v2920_v8  ;;  %v12479_v20 = vmul.f32 %v12430_v30, %v2921_v17  ;;  %v12482_v62 = vmul.f32 %v12443_v15, %v3024_v18  ;;  %v842_v8 = vpop.f32.mrf.mxu0  ;;  %v12496_v18 = vpop.f32.mrf.mxu1 }
 0x10b   : > { %19288 = vst [vmem:[#allocation36_spill] sm:$0xff] %v12455_v48  ;;  %19290 = vst [vmem:[#allocation38_spill] sm:$0xff] %v12473_v40  ;;  %v2647_v63 = vmul.f32 %v12254_v57, %v2608_v19  ;;  %v2751_v7 = vmul.f32 %v12259_v58, %v2711_v27  ;;  %v3023_v48 = vld [vmem:[#allocation2 + $0x52] sm:$0xff]  ;;  %v12486_v45 = vadd.f32 %v3065_v2, %v2993_v21 }
 0x10c   : > { %2582 = vst.msk [vmem:[#allocation2 + $0xf0] sm:$0xff] %vm2489_vm1, %v10496_v49  ;;  %19291 = vst [vmem:[#allocation39_spill] sm:$0xff] %v12476_v13  ;;  %v12489_v35 = vmul.f32 %v12443_v15, %v3025_v28  ;;  %v2855_v49 = vmul.f32 %v12266_v1, %v12457_v53  ;;  %v2958_v17 = vmul.f32 %v12274_v9, %v12459_v47  ;;  %v10499_v28 = vpop.f32.mrf.mxu0 }
 0x10d   : > { %19292 = vst [vmem:[#allocation40_spill] sm:$0xff] %v12479_v20  ;;  %19293 = vst [vmem:[#allocation41_spill] sm:$0xff] %v12482_v62  ;;  %v2783_v14 = vadd.f32 %v2751_v7, %v2647_v63  ;;  %v2959_v58 = vmul.f32 %v12274_v9, %v12473_v40  ;;  %v3062_v2 = vmul.f32 %v12281_v16, %v3022_v24  ;;  %v12507_v63 = vpop.f32.mrf.mxu1 }
 0x10e   : > { %19294 = vst [vmem:[#allocation42_spill] sm:$0xff] %v12489_v35  ;;  %2580 = vst.msk [vmem:[#allocation2 + $0xd0] sm:$0xff] %vm2489_vm1, %v842_v8  ;;  %v3166_v21 = vmul.f32 %v12288_v22, %v2608_v19  ;;  %v2990_v57 = vadd.f32 %v2958_v17, %v2886_v34  ;;  %v3063_v35 = vmul.f32 %v12281_v16, %v3023_v48  ;;  %v3129_v8 = vld [vmem:[#allocation2 + $0x86] sm:$0xff]  ;;  %v855_v16 = vpop.f32.mrf.mxu0 }
 0x10f   : > { %19295 = vst [vmem:[#allocation43_spill] sm:$0xff] %v12496_v18  ;;  %v3270_v1 = vmul.f32 %v12295_v29, %v2711_v27  ;;  %v3477_v62 = vmul.f32 %v12314_v50, %v12459_v47  ;;  %2585 = vst.msk [vmem:[#allocation2 + $0x128] sm:$0xff] %vm2489_vm1, %v10499_v28  ;;  %v2887_v7 = vadd.f32 %v2855_v49, %v2783_v14  ;;  %v3233_v17 = vld [vmem:[#allocation2 + $0x87] sm:$0xff]  ;;  %v12517_v14 = vpop.f32.mrf.mxu1  ;;  %v12737_v18 = vld [vmem:[#allocation2 + $0x92] sm:$0xff] }
 0x110   : > { %19296 = vst [vmem:[#allocation44_spill] sm:$0xff] %v12507_v63  ;;  %v3198_v9 = vadd.f32 %v3166_v21, %v12346_v31  ;;  %v3374_v20 = vmul.f32 %v12304_v38, %v12457_v53  ;;  %v3478_v34 = vmul.f32 %v12314_v50, %v12473_v40  ;;  %v3094_v15 = vadd.f32 %v3062_v2, %v2990_v57  ;;  %v3130_v28 = vld [vmem:[#allocation2 + $0x8e] sm:$0xff]  ;;  %v10500_v40 = vpop.f32.mrf.mxu0 }
 0x111   : > { %v3509_v30 = vadd.f32 %v3477_v62, %v3405_v6  ;;  %v3581_v47 = vmul.f32 %v12323_v0, %v3022_v24  ;;  %v3684_v26 = vmul.f32 %v12341_v23, %v2608_v19  ;;  %2583 = vst.msk [vmem:[#allocation2 + $0x108] sm:$0xff] %vm2489_vm1, %v855_v16  ;;  %19297 = vst [vmem:[#allocation45_spill] sm:$0xff] %v12517_v14  ;;  %v3337_v24 = vld [vmem:[#allocation2 + $0x88] sm:$0xff]  ;;  %v12527_v16 = vpop.f32.mrf.mxu1  ;;  %v3338_v62 = vld [vmem:[#allocation2 + $0x90] sm:$0xff] }
 0x112   : > { %v2991_v31 = vadd.f32 %v2959_v58, %v2887_v7  ;;  %v3302_v49 = vadd.f32 %v3270_v1, %v3198_v9  ;;  %v3582_v21 = vmul.f32 %v12323_v0, %v3023_v48  ;;  %v3169_v25 = vmul.f32 %v12288_v22, %v3129_v8  ;;  %2586 = vst.msk [vmem:[#allocation2 + $0x130] sm:$0xff] %vm2489_vm1, %v10500_v40  ;;  %v3234_v48 = vld [vmem:[#allocation2 + $0x8f] sm:$0xff] }
 0x113   : > { %v3199_v51 = vadd.f32 %v12369_v43, %v3094_v15  ;;  %v3613_v57 = vadd.f32 %v3581_v47, %v3509_v30  ;;  %v12523_v6 = vmul.f32 %v12355_v36, %v2711_v27  ;;  %v3273_v19 = vmul.f32 %v12295_v29, %v3233_v17  ;;  %19298 = vst [vmem:[#allocation46_spill] sm:$0xff] %v12527_v16  ;;  %v858_v43 = vpop.f32.mrf.mxu0  ;;  %v12723_v16 = vld [vmem:[#allocation2 + $0x8a] sm:$0xff] }
 0x114   : > { %v3095_v58 = vadd.f32 %v3063_v35, %v2991_v31  ;;  %v3406_v1 = vadd.f32 %v3374_v20, %v3302_v49  ;;  %v3201_v9 = vadd.f32 %v3169_v25, %v12432_v11  ;;  %v3170_v2 = vmul.f32 %v12288_v22, %v3130_v28  ;;  %v3441_v35 = vld [vmem:[#allocation2 + $0x89] sm:$0xff]  ;;  %2584 = vst.msk [vmem:[#allocation2 + $0x110] sm:$0xff] %vm2489_vm1, %v858_v43  ;;  %v12541_v20 = vpop.f32.mrf.mxu1 }
 0x115   : > { %v3303_v30 = vadd.f32 %v12372_v44, %v3199_v51  ;;  %v12533_v15 = vadd.f32 %v3684_v26, %v12348_v32  ;;  %v3717_v27 = vadd.f32 %v12384_v56, %v3613_v57  ;;  %v12538_v40 = vmul.f32 %v12360_v37, %v12457_v53  ;;  %19299 = vst [vmem:[#allocation47_spill] sm:$0xff] %v12541_v20  ;;  %v10503_v51 = vpop.f32.mrf.mxu0  ;;  %v12661_v57 = vld [vmem:[#allocation2 + $0x87] sm:$0xff] }
 0x116   : > { %v3200_v25 = vadd.f32 %v12422_v4, %v3095_v58  ;;  %v3510_v11 = vadd.f32 %v3478_v34, %v3406_v1  ;;  %v3377_v47 = vmul.f32 %v12304_v38, %v3337_v24  ;;  %v3305_v44 = vadd.f32 %v3273_v19, %v3201_v9  ;;  %2589 = vst.msk [vmem:[#allocation2 + $0x168] sm:$0xff] %vm2489_vm1, %v10503_v51  ;;  %v12550_v8 = vpop.f32.mrf.mxu1  ;;  %v19342_v33 = vld [vmem:[#allocation42_spill] sm:$0xff] }
 0x117   : > { %v3821_v32 = vadd.f32 %v12387_v59, %v3717_v27  ;;  %v3274_v56 = vmul.f32 %v12295_v29, %v3234_v48  ;;  %v3378_v26 = vmul.f32 %v12304_v38, %v3338_v62  ;;  %v3202_v53 = vadd.f32 %v3170_v2, %v12486_v45  ;;  %19300 = vst [vmem:[#allocation48_spill] sm:$0xff] %v12550_v8  ;;  %v871_v28 = vpop.f32.mrf.mxu0  ;;  %v19316_v27 = vld [vmem:[#allocation30_spill] sm:$0xff]  ;;  %v12721_v8 = vld [vmem:[%s19265_s21 + $0x17] ss:$0 sm:$0xff] }
 0x118   : > { %v3304_v7 = vadd.f32 %v12425_v5, %v3200_v25  ;;  %v3614_v4 = vadd.f32 %v3582_v21, %v3510_v11  ;;  %v3481_v34 = vmul.f32 %v12314_v50, %v3441_v35  ;;  %v3409_v17 = vadd.f32 %v3377_v47, %v3305_v44  ;;  %2587 = vst.msk [vmem:[#allocation2 + $0x148] sm:$0xff] %vm2489_vm1, %v871_v28  ;;  %v12560_v45 = vpop.f32.mrf.mxu1  ;;  %v12593_v11 = vld [vmem:[%s19265_s21 + $0xf] ss:$0 sm:$0xff]  ;;  %v12598_v47 = vld [vmem:[%s19265_s21 + $0x10] ss:$0 sm:$0xff]  ;;  %v4581_v21 = vld [vmem:[#allocation2 + $0x72] sm:$0xff] }
 0x119   : > { %v12555_v31 = vadd.f32 %v12376_v52, %v3303_v30  ;;  %v3925_v59 = vadd.f32 %v12390_v60, %v3821_v32  ;;  %v3306_v49 = vadd.f32 %v3274_v56, %v3202_v53  ;;  %19302 = vst [vmem:[#allocation50_spill] sm:$0xff] %v12560_v45  ;;  %v10504_v58 = vpop.f32.mrf.mxu0  ;;  %19308 = vst [vmem:[#allocation56_spill] sm:$0xff] %v12593_v11  ;;  %v19311_v53 = vld [vmem:[#allocation25_spill] sm:$0xff]  ;;  %v19317_v56 = vld [vmem:[#allocation38_spill] sm:$0xff] }
 0x11a   : > { %v3718_v24 = vadd.f32 %v12462_v39, %v3614_v4  ;;  %v12567_v52 = vadd.f32 %v12435_v12, %v3304_v7  ;;  %v12572_v1 = vadd.f32 %v3481_v34, %v3409_v17  ;;  %2590 = vst.msk [vmem:[#allocation2 + $0x170] sm:$0xff] %vm2489_vm1, %v10504_v58  ;;  %v12576_v39 = vpop.f32.mrf.mxu1  ;;  %19309 = vst [vmem:[#allocation57_spill] sm:$0xff] %v12598_v47  ;;  %v4060_v4 = vld [vmem:[#allocation2 + $0x52] sm:$0xff]  ;;  %v12608_v34 = vld [vmem:[%s19265_s21 + $0x11] ss:$0 sm:$0xff] }
 0x11b   : > { %19301 = vst [vmem:[#allocation49_spill] sm:$0xff] %v12555_v31  ;;  %v12570_v60 = vadd.f32 %v12471_v61, %v3925_v59  ;;  %19305 = vst [vmem:[#allocation53_spill] sm:$0xff] %v12576_v39  ;;  %v12579_v62 = vadd.f32 %v3378_v26, %v3306_v49  ;;  %v874_v43 = vpop.f32.mrf.mxu0  ;;  %v19310_v26 = vld [vmem:[#allocation28_spill] sm:$0xff]  ;;  %v3820_v49 = vadd.f32 %v12523_v6, %v12533_v15  ;;  %v19315_v32 = vld [vmem:[#allocation37_spill] sm:$0xff] }
 0x11c   : > { %19303 = vst [vmem:[#allocation51_spill] sm:$0xff] %v12567_v52  ;;  %19304 = vst [vmem:[#allocation52_spill] sm:$0xff] %v12572_v1  ;;  %v3822_v48 = vadd.f32 %v12465_v3, %v3718_v24  ;;  %v12588_v25 = vpop.f32.mrf.mxu1  ;;  %v4059_v3 = vld [vmem:[#allocation2 + $0x4a] sm:$0xff]  ;;  %v3819_v7 = vadd.f32 %v19311_v53, %v19310_v26  ;;  %v19314_v26 = vld [vmem:[#allocation26_spill] sm:$0xff]  ;;  %v3996_v17 = vmul.f32 %v19316_v27, %v19317_v56 }
 0x11d   : > { %19306 = vst [vmem:[#allocation54_spill] sm:$0xff] %v12579_v62  ;;  %2588 = vst.msk [vmem:[#allocation2 + $0x150] sm:$0xff] %vm2489_vm1, %v874_v43  ;;  %v10507_v51 = vpop.f32.mrf.mxu0  ;;  %v4164_v24 = vld [vmem:[#allocation2 + $0x66] sm:$0xff]  ;;  %v4165_v58 = vld [vmem:[#allocation2 + $0x6e] sm:$0xff]  ;;  %v3924_v56 = vadd.f32 %v12538_v40, %v3820_v49 }
 0x11e   : > { %19307 = vst [vmem:[#allocation55_spill] sm:$0xff] %v12588_v25  ;;  %v3926_v44 = vadd.f32 %v12468_v46, %v3822_v48  ;;  %19312 = vst [vmem:[#allocation28_spill] sm:$0xff] %v12608_v34  ;;  %v12614_v59 = vpop.f32.mrf.mxu1  ;;  %v4268_v48 = vld [vmem:[#allocation2 + $0x67] sm:$0xff]  ;;  %v3923_v53 = vadd.f32 %v19314_v26, %v3819_v7  ;;  %v19318_v46 = vld [vmem:[#allocation32_spill] sm:$0xff]  ;;  %v4204_v9 = vmul.f32 %v12593_v11, %v4164_v24 }
 0x11f   : > { %2593 = vst.msk [vmem:[#allocation2 + $0x1a8] sm:$0xff] %vm2489_vm1, %v10507_v51  ;;  %19313 = vst [vmem:[#allocation25_spill] sm:$0xff] %v12614_v59  ;;  %v887_v43 = vpop.f32.mrf.mxu0  ;;  %v3995_v51 = vmul.f32 %v19316_v27, %v19315_v32  ;;  %v4099_v35 = vmul.f32 %v19318_v46, %v4059_v3  ;;  %v4269_v28 = vld [vmem:[#allocation2 + $0x6f] sm:$0xff]  ;;  %v4100_v3 = vmul.f32 %v19318_v46, %v4060_v4  ;;  %v12773_v1 = vld [vmem:[#allocation2 + $0xa6] sm:$0xff] }
 0x120   : > { %v4372_v61 = vld [vmem:[#allocation2 + $0x68] sm:$0xff]  ;;  %v12627_v6 = vld [vmem:[%s19265_s21 + $0x12] ss:$0 sm:$0xff]  ;;  %2591 = vst.msk [vmem:[#allocation2 + $0x188] sm:$0xff] %vm2489_vm1, %v887_v43  ;;  %v12634_v32 = vpop.f32.mrf.mxu1  ;;  %v12644_v7 = vld [vmem:[%s19265_s21 + $0x13] ss:$0 sm:$0xff]  ;;  %v4028_v49 = vadd.f32 %v3996_v17, %v3924_v56  ;;  %v4309_v24 = vmul.f32 %v12598_v47, %v4269_v28 }
 0x121   : > { %19319 = vst [vmem:[#allocation26_spill] sm:$0xff] %v12627_v6  ;;  %v19320_v15 = vld [vmem:[#allocation40_spill] sm:$0xff]  ;;  %19321 = vst [vmem:[#allocation37_spill] sm:$0xff] %v12634_v32  ;;  %v10508_v19 = vpop.f32.mrf.mxu0  ;;  %v4027_v5 = vadd.f32 %v3995_v51, %v3923_v53  ;;  %v12652_v53 = vld [vmem:[#allocation2 + $0x86] sm:$0xff] }
 0x122   : > { %v12630_v2 = vadd.f32 %v19320_v15, %v3926_v44  ;;  %v4373_v26 = vld [vmem:[#allocation2 + $0x70] sm:$0xff]  ;;  %v4205_v44 = vmul.f32 %v12593_v11, %v4165_v58  ;;  %v4308_v15 = vmul.f32 %v12598_v47, %v4268_v48  ;;  %19322 = vst [vmem:[#allocation30_spill] sm:$0xff] %v12644_v7  ;;  %2594 = vst.msk [vmem:[#allocation2 + $0x1b0] sm:$0xff] %vm2489_vm1, %v10508_v19  ;;  %v12648_v4 = vpop.f32.mrf.mxu1  ;;  %v12673_v25 = vld [vmem:[#allocation2 + $0x88] sm:$0xff] }
 0x123   : > { %v4476_v30 = vld [vmem:[#allocation2 + $0x69] sm:$0xff]  ;;  %v4477_v12 = vld [vmem:[#allocation2 + $0x71] sm:$0xff]  ;;  %19323 = vst [vmem:[#allocation38_spill] sm:$0xff] %v12648_v4  ;;  %v4412_v58 = vmul.f32 %v12608_v34, %v4372_v61  ;;  %19324 = vst [vmem:[#allocation32_spill] sm:$0xff] %v12652_v53  ;;  %v890_v19 = vpop.f32.mrf.mxu0  ;;  %v4131_v40 = vadd.f32 %v4099_v35, %v4027_v5  ;;  %v4413_v32 = vmul.f32 %v12608_v34, %v4373_v26 }
 0x124   : > { %v4580_v43 = vld [vmem:[#allocation2 + $0x6a] sm:$0xff]  ;;  %v12659_v51 = vld [vmem:[%s19265_s21 + $0x14] ss:$0 sm:$0xff]  ;;  %19327 = vst [vmem:[#allocation59_spill] sm:$0xff] %v12661_v57  ;;  %v4516_v17 = vmul.f32 %v12627_v6, %v4476_v30  ;;  %v4517_v28 = vmul.f32 %v12627_v6, %v4477_v12  ;;  %v12671_v56 = vld [vmem:[%s19265_s21 + $0x15] ss:$0 sm:$0xff]  ;;  %v12677_v5 = vpop.f32.mrf.mxu1  ;;  %v4132_v35 = vadd.f32 %v4100_v3, %v4028_v49  ;;  %v12681_v12 = vmul.f32 %v12644_v7, %v4581_v21 }
 0x125   : > { %v12654_v48 = vld [vmem:[#allocation2 + $0x8e] sm:$0xff]  ;;  %19326 = vst [vmem:[#allocation58_spill] sm:$0xff] %v12659_v51  ;;  %19329 = vst [vmem:[#allocation61_spill] sm:$0xff] %v12673_v25  ;;  %v4620_v30 = vmul.f32 %v12644_v7, %v4580_v43  ;;  %v10511_v20 = vpop.f32.mrf.mxu0  ;;  %v4236_v14 = vadd.f32 %v4204_v9, %v4131_v40  ;;  %v12699_v21 = vmul.f32 %v12671_v56, %v12661_v57  ;;  %v12704_v43 = vld [vmem:[%s19265_s21 + $0x16] ss:$0 sm:$0xff] }
 0x126   : > { %19325 = vst [vmem:[#allocation40_spill] sm:$0xff] %v12654_v48  ;;  %v12666_v61 = vld [vmem:[#allocation2 + $0x8f] sm:$0xff]  ;;  %2592 = vst.msk [vmem:[#allocation2 + $0x190] sm:$0xff] %vm2489_vm1, %v890_v19  ;;  %v12691_v19 = vmul.f32 %v12659_v51, %v12652_v53  ;;  %v12695_v3 = vmul.f32 %v12659_v51, %v12654_v48  ;;  %v12708_v40 = vpop.f32.mrf.mxu1  ;;  %v4237_v49 = vadd.f32 %v4205_v44, %v4132_v35 }
 0x127   : > { %19328 = vst [vmem:[#allocation60_spill] sm:$0xff] %v12666_v61  ;;  %19330 = vst [vmem:[#allocation62_spill] sm:$0xff] %v12677_v5  ;;  %v12683_v26 = vld [vmem:[#allocation2 + $0x90] sm:$0xff]  ;;  %v12712_v45 = vmul.f32 %v12671_v56, %v12666_v61  ;;  %v12716_v4 = vmul.f32 %v12704_v43, %v12673_v25  ;;  %v4340_v9 = vadd.f32 %v4308_v15, %v4236_v14  ;;  %v12745_v14 = vld [vmem:[%s19265_s21 + $0x18] ss:$0 sm:$0xff] }
 0x128   : > { %19331 = vst [vmem:[#allocation63_spill] sm:$0xff] %v12683_v26  ;;  %v12685_v59 = vld [vmem:[#allocation2 + $0x89] sm:$0xff]  ;;  %v12687_v39 = vld [vmem:[#allocation2 + $0x91] sm:$0xff]  ;;  %19334 = vst [vmem:[#allocation66_spill] sm:$0xff] %v12704_v43  ;;  %v12727_v44 = vmul.f32 %v12704_v43, %v12683_v26  ;;  %v12740_v42 = vpop.f32.mrf.mxu1  ;;  %v4341_v63 = vadd.f32 %v4309_v24, %v4237_v49  ;;  %v4134_v55 = vadd.f32 %v19342_v33, %v12630_v2 }
 0x129   : > { %19332 = vst [vmem:[#allocation64_spill] sm:$0xff] %v12685_v59  ;;  %19333 = vst [vmem:[#allocation65_spill] sm:$0xff] %v12687_v39  ;;  %v12731_v35 = vmul.f32 %v12721_v8, %v12685_v59  ;;  %v12735_v5 = vmul.f32 %v12721_v8, %v12687_v39  ;;  %v19341_v15 = vld [vmem:[#allocation41_spill] sm:$0xff]  ;;  %v4206_v54 = vmul.f32 %v12593_v11, %v12652_v53 }
 0x12a   : > { %2597 = vst.msk [vmem:[#allocation2 + $0x1e8] sm:$0xff] %vm2489_vm1, %v10511_v20  ;;  %19335 = vst [vmem:[#allocation67_spill] sm:$0xff] %v12708_v40  ;;  %v903_v20 = vpop.f32.mrf.mxu0  ;;  %v4133_v13 = vadd.f32 %v19341_v15, %v12570_v60  ;;  %v4444_v41 = vadd.f32 %v4412_v58, %v4340_v9  ;;  %v12756_v24 = vmul.f32 %v12745_v14, %v12723_v16  ;;  %v12761_v60 = vpop.f32.mrf.mxu1 }
 0x12b   : > { %19336 = vst [vmem:[#allocation68_spill] sm:$0xff] %v12721_v8  ;;  %19337 = vst [vmem:[#allocation69_spill] sm:$0xff] %v12723_v16  ;;  %v4207_v49 = vmul.f32 %v12593_v11, %v12654_v48  ;;  %v4445_v15 = vadd.f32 %v4413_v32, %v4341_v63  ;;  %v12765_v33 = vmul.f32 %v12745_v14, %v12737_v18 }
 0x12c   : > { %19338 = vst [vmem:[#allocation70_spill] sm:$0xff] %v12737_v18  ;;  %2595 = vst.msk [vmem:[#allocation2 + $0x1c8] sm:$0xff] %vm2489_vm1, %v903_v20  ;;  %v10512_v10 = vpop.f32.mrf.mxu0  ;;  %v4238_v2 = vadd.f32 %v4206_v54, %v4133_v13  ;;  %v4310_v58 = vmul.f32 %v12598_v47, %v12661_v57  ;;  %v4548_v20 = vadd.f32 %v4516_v17, %v4444_v41  ;;  %v12776_v63 = vpop.f32.mrf.mxu1  ;;  %v12788_v54 = vld [vmem:[#allocation2 + $0xae] sm:$0xff] }
 0x12d   : > { %19339 = vst [vmem:[#allocation71_spill] sm:$0xff] %v12740_v42  ;;  %19340 = vst [vmem:[#allocation72_spill] sm:$0xff] %v12745_v14  ;;  %v4239_v40 = vadd.f32 %v4207_v49, %v4134_v55  ;;  %v4311_v42 = vmul.f32 %v12598_v47, %v12666_v61  ;;  %v4549_v32 = vadd.f32 %v4517_v28, %v4445_v15  ;;  %v19349_v47 = vld [vmem:[#allocation15_spill] sm:$0xff] }
 0x12e   : > { %19343 = vst [vmem:[#allocation41_spill] sm:$0xff] %v12756_v24  ;;  %2598 = vst.msk [vmem:[#allocation2 + $0x1f0] sm:$0xff] %vm2489_vm1, %v10512_v10  ;;  %v906_v9 = vpop.f32.mrf.mxu0  ;;  %v4414_v10 = vmul.f32 %v12608_v34, %v12673_v25  ;;  %v4415_v13 = vmul.f32 %v12608_v34, %v12683_v26  ;;  %v12782_v41 = vmul.f32 %v12627_v6, %v12685_v59  ;;  %v19351_v26 = vld [vmem:[#allocation16_spill] sm:$0xff] }
 0x12f   : > { %19344 = vst [vmem:[#allocation42_spill] sm:$0xff] %v12761_v60  ;;  %19345 = vst [vmem:[#allocation73_spill] sm:$0xff] %v12773_v1  ;;  %v12786_v55 = vmul.f32 %v12627_v6, %v12687_v39  ;;  %v4652_v62 = vadd.f32 %v4620_v30, %v4548_v20  ;;  %v12792_v28 = vmul.f32 %v12644_v7, %v12723_v16  ;;  %v19348_v6 = vld [vmem:[#allocation14_spill] sm:$0xff]  ;;  %v12801_v39 = vpop.f32.mrf.mxu1 }
 0x130   : > { %2596 = vst.msk [vmem:[#allocation2 + $0x1d0] sm:$0xff] %vm2489_vm1, %v906_v9  ;;  %19346 = vst [vmem:[#allocation74_spill] sm:$0xff] %v12776_v63  ;;  %v10515_v17 = vpop.f32.mrf.mxu0  ;;  %v4342_v63 = vadd.f32 %v4310_v58, %v4238_v2  ;;  %v12796_v15 = vmul.f32 %v12644_v7, %v12737_v18  ;;  %v4343_v59 = vadd.f32 %v4311_v42, %v4239_v40 }
 0x131   : > { %19347 = vst [vmem:[#allocation75_spill] sm:$0xff] %v12788_v54  ;;  %v2633_v49 = vld [vmem:[#allocation2 + $0x1e6] sm:$0xff]  ;;  %2601 = vst.msk [vmem:[#allocation2 + $0x228] sm:$0xff] %vm2489_vm1, %v10515_v17  ;;  %v12805_v30 = vmul.f32 %v12659_v51, %v12773_v1  ;;  %v4653_v18 = vadd.f32 %v12681_v12, %v4549_v32  ;;  %v4757_v17 = vadd.f32 %v12691_v19, %v4652_v62  ;;  %v12820_v61 = vpop.f32.mrf.mxu1 }
 0x132   : > { %v2736_v60 = vld [vmem:[#allocation2 + $0x1e7] sm:$0xff]  ;;  %v2672_v34 = vmul.f32 %v19348_v6, %v2633_v49  ;;  %19350 = vst [vmem:[#allocation14_spill] sm:$0xff] %v12801_v39  ;;  %v919_v20 = vpop.f32.mrf.mxu0  ;;  %v12812_v25 = vmul.f32 %v12659_v51, %v12788_v54  ;;  %v12818_v1 = vmul.f32 %v12288_v22, %v2633_v49  ;;  %19352 = vst [vmem:[#allocation15_spill] sm:$0xff] %v12820_v61 }
 0x133   : > { %v2840_v9 = vld [vmem:[#allocation2 + $0x1e8] sm:$0xff]  ;;  %v2776_v11 = vmul.f32 %v19349_v47, %v2736_v60  ;;  %2599 = vst.msk [vmem:[#allocation2 + $0x208] sm:$0xff] %vm2489_vm1, %v919_v20  ;;  %v12824_v19 = vmul.f32 %v12295_v29, %v2736_v60  ;;  %v12838_v54 = vpop.f32.mrf.mxu1  ;;  %v12841_v60 = vadd.f32 %v12699_v21, %v4757_v17  ;;  %v19355_v21 = vld [vmem:[#allocation18_spill] sm:$0xff] }
 0x134   : > { %v2631_v2 = vld [vmem:[#allocation2 + $0x1c6] sm:$0xff]  ;;  %v2880_v7 = vmul.f32 %v19351_v26, %v2840_v9  ;;  %v12827_v51 = vmul.f32 %v12304_v38, %v2840_v9  ;;  %v10516_v20 = vpop.f32.mrf.mxu0  ;;  %19354 = vst [vmem:[#allocation16_spill] sm:$0xff] %v12838_v54 }
 0x135   : > { %v2734_v58 = vld [vmem:[#allocation2 + $0x1c7] sm:$0xff]  ;;  %v2670_v42 = vmul.f32 %v19348_v6, %v2631_v2  ;;  %v2808_v39 = vadd.f32 %v2776_v11, %v2672_v34  ;;  %v12832_v11 = vadd.f32 %v12695_v3, %v4653_v18  ;;  %2602 = vst.msk [vmem:[#allocation2 + $0x230] sm:$0xff] %vm2489_vm1, %v10516_v20  ;;  %v12849_v3 = vadd.f32 %v4415_v13, %v4343_v59  ;;  %v12854_v31 = vld [vmem:[#allocation2 + $0x1f0] sm:$0xff]  ;;  %v12856_v14 = vpop.f32.mrf.mxu1 }
 0x136   : > { %v2838_v16 = vld [vmem:[#allocation2 + $0x1c8] sm:$0xff]  ;;  %v2774_v40 = vmul.f32 %v19349_v47, %v2734_v58  ;;  %v19353_v58 = vld [vmem:[#allocation17_spill] sm:$0xff]  ;;  %v922_v48 = vpop.f32.mrf.mxu0 }
 0x137   : > { %v2878_v12 = vmul.f32 %v19351_v26, %v2838_v16  ;;  %v2944_v32 = vld [vmem:[#allocation2 + $0x1e9] sm:$0xff]  ;;  %v2912_v49 = vadd.f32 %v2880_v7, %v2808_v39  ;;  %v12847_v7 = vadd.f32 %v4414_v10, %v4342_v63  ;;  %2600 = vst.msk [vmem:[#allocation2 + $0x210] sm:$0xff] %vm2489_vm1, %v922_v48  ;;  %19356 = vst [vmem:[#allocation17_spill] sm:$0xff] %v12856_v14  ;;  %v2943_v14 = vld [vmem:[#allocation2 + $0x1d1] sm:$0xff]  ;;  %v12870_v24 = vpop.f32.mrf.mxu1 }
 0x138   : > { %v3048_v62 = vld [vmem:[#allocation2 + $0x1ea] sm:$0xff]  ;;  %v2806_v34 = vadd.f32 %v2774_v40, %v2670_v42  ;;  %v2984_v61 = vmul.f32 %v19353_v58, %v2944_v32  ;;  %v12859_v59 = vmul.f32 %v12314_v50, %v2944_v32  ;;  %v12866_v48 = vpop.f32.mrf.mxu0  ;;  %19358 = vst [vmem:[#allocation76_spill] sm:$0xff] %v12870_v24 }
 0x139   : > { %v12829_v2 = vld [vmem:[#allocation2 + $0x1ee] sm:$0xff]  ;;  %v3088_v17 = vmul.f32 %v19355_v21, %v3048_v62  ;;  %v3673_v8 = vld [vmem:[#allocation2 + $0x226] sm:$0xff]  ;;  %v12862_v63 = vmul.f32 %v12323_v0, %v3048_v62  ;;  %19357 = vst [vmem:[#allocation18_spill] sm:$0xff] %v12866_v48 }
 0x13a   : > { %v12836_v16 = vld [vmem:[#allocation2 + $0x1ef] sm:$0xff]  ;;  %v2673_v18 = vmul.f32 %v19348_v6, %v12829_v2  ;;  %v2910_v42 = vadd.f32 %v2878_v12, %v2806_v34  ;;  %v3016_v20 = vadd.f32 %v2984_v61, %v2912_v49  ;;  %v3777_v43 = vld [vmem:[#allocation2 + $0x227] sm:$0xff]  ;;  %v12873_v32 = vmul.f32 %v12341_v23, %v3673_v8 }
 0x13b   : > { %v2942_v9 = vld [vmem:[#allocation2 + $0x1c9] sm:$0xff]  ;;  %v2777_v39 = vmul.f32 %v19349_v47, %v12836_v16  ;;  %v12876_v62 = vmul.f32 %v12355_v36, %v3777_v43  ;;  %v2881_v8 = vmul.f32 %v19351_v26, %v12854_v31  ;;  %v12888_v43 = vpop.f32.mrf.mxu1 }
 0x13c   : > { %v3046_v57 = vld [vmem:[#allocation2 + $0x1ca] sm:$0xff]  ;;  %v2982_v40 = vmul.f32 %v19353_v58, %v2942_v9  ;;  %19362 = vst [vmem:[#allocation80_spill] sm:$0xff] %v12888_v43 }
 0x13d   : > { %v2632_v53 = vld [vmem:[#allocation2 + $0x1ce] sm:$0xff]  ;;  %v3086_v34 = vmul.f32 %v19355_v21, %v3046_v57  ;;  %v2809_v49 = vadd.f32 %v2777_v39, %v2673_v18  ;;  %19359 = vst [vmem:[#allocation77_spill] sm:$0xff] %v12876_v62  ;;  %v12881_v57 = vpop.f32.mrf.mxu0  ;;  %v12902_v43 = vpop.f32.mrf.mxu1 }
 0x13e   : > { %v2735_v54 = vld [vmem:[#allocation2 + $0x1cf] sm:$0xff]  ;;  %v2671_v61 = vmul.f32 %v19348_v6, %v2632_v53  ;;  %v3014_v12 = vadd.f32 %v2982_v40, %v2910_v42  ;;  %v3257_v53 = vld [vmem:[#allocation2 + $0x207] sm:$0xff]  ;;  %19361 = vst [vmem:[#allocation79_spill] sm:$0xff] %v12881_v57 }
 0x13f   : > { %v2839_v52 = vld [vmem:[#allocation2 + $0x1d0] sm:$0xff]  ;;  %v3881_v10 = vld [vmem:[#allocation2 + $0x228] sm:$0xff]  ;;  %v2775_v13 = vmul.f32 %v19349_v47, %v2735_v54  ;;  %v3297_v21 = vmul.f32 %v12295_v29, %v3257_v53 }
 0x140   : > { %v2879_v9 = vmul.f32 %v19351_v26, %v2839_v52  ;;  %v12879_v6 = vmul.f32 %v12360_v37, %v3881_v10  ;;  %v3153_v47 = vld [vmem:[#allocation2 + $0x206] sm:$0xff]  ;;  %v3118_v18 = vadd.f32 %v3086_v34, %v3014_v12  ;;  %v3120_v52 = vadd.f32 %v3088_v17, %v3016_v20  ;;  %v12886_v40 = vld [vmem:[#allocation2 + $0x1f1] sm:$0xff]  ;;  %v12893_v20 = vpop.f32.mrf.mxu0 }
 0x141   : > { %v3361_v54 = vld [vmem:[#allocation2 + $0x208] sm:$0xff]  ;;  %v2807_v42 = vadd.f32 %v2775_v13, %v2671_v61  ;;  %v3193_v39 = vmul.f32 %v12288_v22, %v3153_v47  ;;  %v3882_v61 = vld [vmem:[#allocation2 + $0x230] sm:$0xff]  ;;  %v2983_v12 = vmul.f32 %v19353_v58, %v2943_v14  ;;  %19363 = vst [vmem:[#allocation81_spill] sm:$0xff] %v12893_v20  ;;  %v12897_v26 = vmul.f32 %v12341_v23, %v3153_v47 }
 0x142   : > { %19360 = vst [vmem:[#allocation78_spill] sm:$0xff] %v12879_v6  ;;  %v3401_v10 = vmul.f32 %v12304_v38, %v3361_v54  ;;  %v3674_v6 = vld [vmem:[#allocation2 + $0x22e] sm:$0xff]  ;;  %v3223_v22 = vadd.f32 %v12818_v1, %v3118_v18  ;;  %v12900_v34 = vmul.f32 %v12355_v36, %v3257_v53  ;;  %v12914_v58 = vmul.f32 %v12360_v37, %v3882_v61  ;;  %v12930_v61 = vld [vmem:[%s19265_s21 + $0x3] ss:$0 sm:$0xff] }
 0x143   : > { %v3778_v62 = vld [vmem:[#allocation2 + $0x22f] sm:$0xff]  ;;  %v2911_v13 = vadd.f32 %v2879_v9, %v2807_v42  ;;  %v3225_v17 = vadd.f32 %v3193_v39, %v3120_v52  ;;  %v12905_v9 = vmul.f32 %v12360_v37, %v3361_v54  ;;  %v12908_v14 = vmul.f32 %v12341_v23, %v3674_v6  ;;  %v12916_v42 = vpop.f32.mrf.mxu0  ;;  %v12922_v6 = vpop.f32.mrf.mxu1  ;;  %19371 = vst [vmem:[#allocation89_spill] sm:$0xff] %v12930_v61 }
 0x144   : > { %19364 = vst [vmem:[#allocation82_spill] sm:$0xff] %v12900_v34  ;;  %v3985_v29 = vld [vmem:[#allocation2 + $0x229] sm:$0xff]  ;;  %v3986_v24 = vld [vmem:[#allocation2 + $0x231] sm:$0xff]  ;;  %v12911_v1 = vmul.f32 %v12355_v36, %v3778_v62  ;;  %19367 = vst [vmem:[#allocation85_spill] sm:$0xff] %v12914_v58  ;;  %v3327_v18 = vadd.f32 %v12824_v19, %v3223_v22  ;;  %v2913_v54 = vadd.f32 %v2881_v8, %v2809_v49 }
 0x145   : > { %v3047_v38 = vld [vmem:[#allocation2 + $0x1d2] sm:$0xff]  ;;  %19365 = vst [vmem:[#allocation83_spill] sm:$0xff] %v12905_v9  ;;  %v4089_v47 = vld [vmem:[#allocation2 + $0x22a] sm:$0xff]  ;;  %19368 = vst [vmem:[#allocation86_spill] sm:$0xff] %v12916_v42  ;;  %v3329_v52 = vadd.f32 %v3297_v21, %v3225_v17  ;;  %v12920_v39 = vmul.f32 %v19316_v27, %v3985_v29  ;;  %v12925_v62 = vmul.f32 %v19316_v27, %v3986_v24  ;;  %v12940_v27 = vpop.f32.mrf.mxu0 }
 0x146   : > { %19366 = vst [vmem:[#allocation84_spill] sm:$0xff] %v12911_v1  ;;  %v3049_v53 = vld [vmem:[#allocation2 + $0x1f2] sm:$0xff]  ;;  %v2985_v19 = vmul.f32 %v12930_v61, %v12886_v40  ;;  %v3015_v21 = vadd.f32 %v2983_v12, %v2911_v13  ;;  %v12937_v49 = vld [vmem:[%s19265_s21 + $0x4] ss:$0 sm:$0xff]  ;;  %19373 = vst [vmem:[#allocation91_spill] sm:$0xff] %v12940_v27  ;;  %v3431_v24 = vadd.f32 %v12827_v51, %v3327_v18  ;;  %v12947_v13 = vpop.f32.mrf.mxu1 }
 0x147   : > { %19369 = vst [vmem:[#allocation87_spill] sm:$0xff] %v12920_v39  ;;  %v3154_v9 = vld [vmem:[#allocation2 + $0x20e] sm:$0xff]  ;;  %19370 = vst [vmem:[#allocation88_spill] sm:$0xff] %v12925_v62  ;;  %v3087_v8 = vmul.f32 %v12937_v49, %v3047_v38  ;;  %v3433_v17 = vadd.f32 %v3401_v10, %v3329_v52  ;;  %v12944_v29 = vmul.f32 %v19318_v46, %v4089_v47  ;;  %v12952_v38 = vld [vmem:[%s19265_s21 + $0x5] ss:$0 sm:$0xff]  ;;  %v12957_v18 = vpop.f32.mrf.mxu0 }
 0x148   : > { %v4090_v1 = vld [vmem:[#allocation2 + $0x232] sm:$0xff]  ;;  %19372 = vst [vmem:[#allocation90_spill] sm:$0xff] %v12937_v49  ;;  %v3089_v62 = vmul.f32 %v12937_v49, %v3049_v53  ;;  %v3465_v39 = vld [vmem:[#allocation2 + $0x209] sm:$0xff]  ;;  %v3017_v12 = vadd.f32 %v2985_v19, %v2913_v54  ;;  %19375 = vst [vmem:[#allocation93_spill] sm:$0xff] %v12952_v38  ;;  %v3192_v34 = vmul.f32 %v12952_v38, %v12829_v2 }
 0x149   : > { %v3258_v22 = vld [vmem:[#allocation2 + $0x20f] sm:$0xff]  ;;  %19374 = vst [vmem:[#allocation92_spill] sm:$0xff] %v12944_v29  ;;  %v3119_v58 = vadd.f32 %v3087_v8, %v3015_v21  ;;  %v3194_v51 = vmul.f32 %v12952_v38, %v3154_v9  ;;  %19376 = vst [vmem:[#allocation94_spill] sm:$0xff] %v12957_v18  ;;  %v3535_v52 = vadd.f32 %v12859_v59, %v3431_v24  ;;  %v12966_v54 = vld [vmem:[%s19265_s21 + $0x6] ss:$0 sm:$0xff]  ;;  %v12971_v21 = vpop.f32.mrf.mxu1  ;;  %v12981_v49 = vpop.f32.mrf.mxu0 }
 0x14a   : > { %v3362_v10 = vld [vmem:[#allocation2 + $0x210] sm:$0xff]  ;;  %v12961_v29 = vmul.f32 %v19318_v46, %v4090_v1  ;;  %19378 = vst [vmem:[#allocation96_spill] sm:$0xff] %v12966_v54  ;;  %v3296_v19 = vmul.f32 %v12966_v54, %v12836_v16  ;;  %v3298_v2 = vmul.f32 %v12966_v54, %v3258_v22  ;;  %v3121_v8 = vadd.f32 %v3089_v62, %v3017_v12  ;;  %v12976_v59 = vld [vmem:[%s19265_s21 + $0x7] ss:$0 sm:$0xff] }
 0x14b   : > { %v3466_v47 = vld [vmem:[#allocation2 + $0x211] sm:$0xff]  ;;  %v3224_v38 = vadd.f32 %v3192_v34, %v3119_v58  ;;  %19379 = vst [vmem:[#allocation97_spill] sm:$0xff] %v12976_v59  ;;  %v3400_v46 = vmul.f32 %v12976_v59, %v12854_v31  ;;  %v3505_v1 = vmul.f32 %v12314_v50, %v3465_v39  ;;  %19380 = vst [vmem:[#allocation98_spill] sm:$0xff] %v12981_v49  ;;  %v12988_v34 = vld [vmem:[%s19265_s21 + $0x8] ss:$0 sm:$0xff]  ;;  %v12993_v62 = vpop.f32.mrf.mxu1 }
 0x14c   : > { %19377 = vst [vmem:[#allocation95_spill] sm:$0xff] %v12961_v29  ;;  %v3569_v24 = vld [vmem:[#allocation2 + $0x20a] sm:$0xff]  ;;  %v3570_v29 = vld [vmem:[#allocation2 + $0x212] sm:$0xff]  ;;  %v3639_v16 = vadd.f32 %v12862_v63, %v3535_v52  ;;  %v3402_v54 = vmul.f32 %v12976_v59, %v3362_v10  ;;  %v3504_v58 = vmul.f32 %v12988_v34, %v12886_v40  ;;  %v3506_v31 = vmul.f32 %v12988_v34, %v3466_v47  ;;  %v12996_v63 = vpop.f32.mrf.mxu0  ;;  %v13004_v59 = vld [vmem:[%s19265_s21 + $0x9] ss:$0 sm:$0xff] }
 0x14d   : > { %v3226_v50 = vadd.f32 %v3194_v51, %v3121_v8  ;;  %v3328_v39 = vadd.f32 %v3296_v19, %v3224_v38  ;;  %v3537_v12 = vadd.f32 %v3505_v1, %v3433_v17  ;;  %v3608_v61 = vmul.f32 %v12323_v0, %v3049_v53  ;;  %19381 = vst [vmem:[#allocation99_spill] sm:$0xff] %v12996_v63  ;;  %v13009_v38 = vpop.f32.mrf.mxu1  ;;  %v19412_v63 = vld [vmem:[#allocation35_spill] sm:$0xff]  ;;  %v19421_v42 = vld [vmem:[#allocation60_spill] sm:$0xff] }
 0x14e   : > { %v12999_v52 = vadd.f32 %v12897_v26, %v3639_v16  ;;  %v3609_v40 = vmul.f32 %v13004_v59, %v3569_v24  ;;  %v3610_v47 = vmul.f32 %v13004_v59, %v3570_v29  ;;  %v3712_v51 = vmul.f32 %v12341_v23, %v3154_v9  ;;  %v13015_v19 = vpop.f32.mrf.mxu0 }
 0x14f   : > { %v3330_v17 = vadd.f32 %v3298_v2, %v3226_v50  ;;  %v3432_v0 = vadd.f32 %v3400_v46, %v3328_v39  ;;  %v13012_v53 = vmul.f32 %v12355_v36, %v3258_v22  ;;  %v18727_v26 = vmax.f32 %v12881_v57, 0.0  ;;  %v13022_v23 = vpop.f32.mrf.mxu1 }
 0x150   : > { %19382 = vst [vmem:[#allocation100_spill] sm:$0xff] %v12999_v52  ;;  %v3641_v8 = vadd.f32 %v3609_v40, %v3537_v12  ;;  %v13018_v1 = vmul.f32 %v12360_v37, %v3362_v10  ;;  %v13029_v46 = vpop.f32.mrf.mxu0  ;;  %v18730_v10 = vmax.f32 %v13015_v19, 0.0  ;;  %v4965_v40 = vadd.f32 %v12716_v4, %v12841_v60  ;;  %v19410_v52 = vld [vmem:[#allocation34_spill] sm:$0xff] }
 0x151   : > { %19383 = vst [vmem:[#allocation101_spill] sm:$0xff] %v13012_v53  ;;  %v3434_v9 = vadd.f32 %v3402_v54, %v3330_v17  ;;  %v3536_v2 = vadd.f32 %v3504_v58, %v3432_v0  ;;  %10633 = vmatprep.mubr.msk.f32.mxu1 %vm724_vm0, %v18727_v26  ;;  %v18731_v16 = vmax.f32 %v13029_v46, 0.0  ;;  %v13034_v50 = vpop.f32.mrf.mxu1  ;;  %v4862_v54 = vadd.f32 %v12712_v45, %v12832_v11  ;;  %v13052_v11 = vld [vmem:[#allocation2 + $0xa7] sm:$0xff] }
 0x152   : > { %19384 = vst [vmem:[#allocation102_spill] sm:$0xff] %v13018_v1  ;;  %19385 = vst [vmem:[#allocation103_spill] sm:$0xff] %v13034_v50  ;;  %v13038_v12 = vpop.f32.mrf.mxu0  ;;  %v4550_v17 = vadd.f32 %v12782_v41, %v12847_v7  ;;  %v13045_v0 = vadd.f32 %v12873_v32, %v3641_v8  ;;  %v2006_v4 = vsel %vm724_vm0, %v18730_v10, 0.0  ;;  %v4551_v32 = vadd.f32 %v12786_v55, %v12849_v3  ;;  %v13080_v3 = vld [vmem:[#allocation2 + $0xa8] sm:$0xff]  ;;  %v19397_v26 = vld [vmem:[#allocation66_spill] sm:$0xff] }
 0x153   : > { %v3538_v58 = vadd.f32 %v3506_v31, %v3434_v9  ;;  %v3640_v39 = vadd.f32 %v3608_v61, %v3536_v2  ;;  %v13049_v29 = vpop.f32.mrf.mxu1  ;;  %v4966_v45 = vadd.f32 %v12727_v44, %v4862_v54  ;;  %v2003_v41 = vsel %vm724_vm0, %v18731_v16, 0.0  ;;  %v13071_v2 = vld [vmem:[#allocation2 + $0xaf] sm:$0xff]  ;;  %19391 = vst [vmem:[#allocation109_spill] sm:$0xff] %v13080_v3 }
 0x154   : > { %19386 = vst [vmem:[#allocation104_spill] sm:$0xff] %v13045_v0  ;;  %19387 = vst [vmem:[#allocation105_spill] sm:$0xff] %v13049_v29  ;;  %v18728_v60 = vmax.f32 %v13038_v12, 0.0  ;;  %v13061_v7 = vpop.f32.mrf.mxu0  ;;  %v5069_v31 = vadd.f32 %v12731_v35, %v4965_v40  ;;  %v4654_v9 = vadd.f32 %v12792_v28, %v4550_v17  ;;  %v4655_v24 = vadd.f32 %v12796_v15, %v4551_v32  ;;  %v13100_v32 = vld [vmem:[#allocation2 + $0xa9] sm:$0xff] }
 0x155   : > { %v18729_v61 = vmax.f32 %v13061_v7, 0.0  ;;  %v13066_v44 = vpop.f32.mrf.mxu1  ;;  %v5070_v8 = vadd.f32 %v12735_v5, %v4966_v45  ;;  %19389 = vst [vmem:[#allocation107_spill] sm:$0xff] %v13071_v2  ;;  %v3642_v54 = vadd.f32 %v3610_v47, %v3538_v58  ;;  %v13073_v22 = vadd.f32 %v3712_v51, %v3640_v39  ;;  %v13090_v58 = vld [vmem:[#allocation2 + $0xb0] sm:$0xff]  ;;  %19394 = vst [vmem:[#allocation112_spill] sm:$0xff] %v13100_v32  ;;  %v19407_v0 = vld [vmem:[#allocation31_spill] sm:$0xff] }
 0x156   : > { %19388 = vst [vmem:[#allocation106_spill] sm:$0xff] %v13066_v44  ;;  %v13075_v37 = vpop.f32.mrf.mxu0  ;;  %v4831_v55 = vmul.f32 %v12671_v56, %v13052_v11  ;;  %v4759_v51 = vadd.f32 %v12805_v30, %v4654_v9  ;;  %19393 = vst [vmem:[#allocation111_spill] sm:$0xff] %v13090_v58  ;;  %v2008_v15 = vsel %vm724_vm0, %v18728_v60, 0.0  ;;  %v4760_v17 = vadd.f32 %v12812_v25, %v4655_v24  ;;  %v19396_v30 = vld [vmem:[#allocation41_spill] sm:$0xff]  ;;  %v13117_v16 = vld [vmem:[#allocation2 + $0xaa] sm:$0xff] }
 0x157   : > { %19390 = vst [vmem:[#allocation108_spill] sm:$0xff] %v13073_v22  ;;  %v2004_v5 = vsel %vm724_vm0, %v18729_v61, 0.0  ;;  %v18732_v35 = vmax.f32 %v13075_v37, 0.0  ;;  %v13086_v28 = vpop.f32.mrf.mxu1  ;;  %v5174_v47 = vadd.f32 %v12765_v33, %v5070_v8  ;;  %v4832_v45 = vmul.f32 %v12671_v56, %v13071_v2  ;;  %19400 = vst [vmem:[#allocation114_spill] sm:$0xff] %v13117_v16  ;;  %v19409_v22 = vld [vmem:[#allocation51_spill] sm:$0xff] }
 0x158   : > { %19392 = vst [vmem:[#allocation110_spill] sm:$0xff] %v13086_v28  ;;  %v2005_v39 = vadd.f32 %v2004_v5, %v2003_v41  ;;  %v13095_v40 = vpop.f32.mrf.mxu0  ;;  %v5173_v9 = vadd.f32 %v19396_v30, %v5069_v31  ;;  %v4863_v36 = vadd.f32 %v4831_v55, %v4759_v51  ;;  %v4935_v60 = vmul.f32 %v19397_v26, %v13080_v3  ;;  %v13108_v41 = vld [vmem:[#allocation2 + $0xb1] sm:$0xff] }
 0x159   : > { %v18733_v33 = vmax.f32 %v13095_v40, 0.0  ;;  %v13103_v8 = vpop.f32.mrf.mxu1  ;;  %19398 = vst [vmem:[#allocation41_spill] sm:$0xff] %v13108_v41  ;;  %v13111_v5 = vadd.f32 %v12908_v14, %v3642_v54  ;;  %v4864_v61 = vadd.f32 %v4832_v45, %v4760_v17  ;;  %v4936_v10 = vmul.f32 %v19397_v26, %v13090_v58  ;;  %v19403_v14 = vld [vmem:[#allocation68_spill] sm:$0xff] }
 0x15a   : > { %19395 = vst [vmem:[#allocation113_spill] sm:$0xff] %v13103_v8  ;;  %v2007_v25 = vadd.f32 %v2006_v4, %v2005_v39  ;;  %v13113_v24 = vpop.f32.mrf.mxu0  ;;  %v2014_v31 = vsel %vm724_vm0, %v18732_v35, 0.0  ;;  %v13124_v51 = vpack.c.bf16 %v5174_v47, %v5173_v9  ;;  %v4967_v30 = vadd.f32 %v4935_v60, %v4863_v36  ;;  %v13139_v36 = vld [vmem:[#allocation2 + $0xb2] sm:$0xff] }
 0x15b   : > { %19399 = vst [vmem:[#allocation66_spill] sm:$0xff] %v13111_v5  ;;  %v13122_v55 = vpop.f32.mrf.mxu1  ;;  %v5039_v4 = vmul.f32 %v19403_v14, %v13100_v32  ;;  %v2010_v39 = vsel %vm724_vm0, %v18733_v33, 0.0  ;;  %v4968_v45 = vadd.f32 %v4936_v10, %v4864_v61  ;;  %v5040_v5 = vmul.f32 %v19403_v14, %v13108_v41  ;;  %v19405_v60 = vld [vmem:[#allocation72_spill] sm:$0xff] }
 0x15c   : > { %19401 = vst [vmem:[#allocation115_spill] sm:$0xff] %v13122_v55  ;;  %19402 = vst [vmem:[#allocation116_spill] sm:$0xff] %v13124_v51  ;;  %v2009_v54 = vadd.f32 %v2008_v15, %v2007_v25  ;;  %v13131_v17 = vpop.f32.mrf.mxu0  ;;  %v5143_v15 = vmul.f32 %v19405_v60, %v13117_v16  ;;  %v19406_v25 = vld [vmem:[#allocation49_spill] sm:$0xff]  ;;  %v3512_v35 = vadd.f32 %v19410_v52, %v19409_v22  ;;  %v19440_v55 = vld [vmem:[#allocation56_spill] sm:$0xff] }
 0x15d   : > { %19404 = vst [vmem:[#allocation68_spill] sm:$0xff] %v13131_v17  ;;  %v18743_v47 = vmax.f32 %v13131_v17, 0.0  ;;  %v13137_v9 = vpop.f32.mrf.mxu1  ;;  %v3511_v33 = vadd.f32 %v19407_v0, %v19406_v25  ;;  %v5071_v10 = vadd.f32 %v5039_v4, %v4967_v30  ;;  %v5072_v61 = vadd.f32 %v5040_v5, %v4968_v45  ;;  %v13159_v0 = vld [vmem:[%s19265_s21 + $0xa] ss:$0 sm:$0xff]  ;;  %v19413_v30 = vld [vmem:[#allocation32_spill] sm:$0xff] }
 0x15e   : > { %v2011_v1 = vadd.f32 %v2010_v39, %v2009_v54  ;;  %v13145_v53 = vpop.f32.mrf.mxu0  ;;  %v3687_v5 = vmul.f32 %v13159_v0, %v19413_v30  ;;  %v5144_v22 = vmul.f32 %v19405_v60, %v13139_v36  ;;  %v19415_v54 = vld [vmem:[#allocation36_spill] sm:$0xff] }
 0x15f   : > { %19408 = vst [vmem:[#allocation72_spill] sm:$0xff] %v13145_v53  ;;  %v2012_v51 = vsel %vm724_vm0, %v18743_v47, 0.0  ;;  %v13153_v27 = vpop.f32.mrf.mxu1  ;;  %v3615_v18 = vadd.f32 %v19412_v63, %v3511_v33  ;;  %v3616_v39 = vadd.f32 %v19415_v54, %v3512_v35  ;;  %v19416_v45 = vld [vmem:[#allocation40_spill] sm:$0xff]  ;;  %v19417_v63 = vmax.f32 %v13113_v24, 0.0 }
 0x160   : > { %19411 = vst [vmem:[#allocation49_spill] sm:$0xff] %v13153_v27  ;;  %v2013_v4 = vadd.f32 %v2012_v51, %v2011_v1  ;;  %v13163_v52 = vpop.f32.mrf.mxu0  ;;  %v3688_v25 = vmul.f32 %v13159_v0, %v19416_v45  ;;  %v13179_v1 = vld [vmem:[%s19265_s21 + $0xb] ss:$0 sm:$0xff]  ;;  %v5176_v45 = vadd.f32 %v5144_v22, %v5072_v61  ;;  %v19422_v47 = vmax.f32 %v13145_v53, 0.0  ;;  %v19439_v53 = vld [vmem:[#allocation73_spill] sm:$0xff] }
 0x161   : > { %19414 = vst [vmem:[#allocation31_spill] sm:$0xff] %v13163_v52  ;;  %v2016_v33 = vsel %vm724_vm0, %v19417_v63, 0.0  ;;  %v13174_v49 = vpop.f32.mrf.mxu1  ;;  %v3719_v30 = vadd.f32 %v3687_v5, %v3615_v18  ;;  %19418 = vst [vmem:[#allocation51_spill] sm:$0xff] %v13179_v1  ;;  %v19419_v51 = vld [vmem:[#allocation59_spill] sm:$0xff]  ;;  %v3792_v63 = vmul.f32 %v13179_v1, %v19421_v42  ;;  %v5175_v57 = vadd.f32 %v5143_v15, %v5071_v10 }
 0x162   : > { %v3791_v35 = vmul.f32 %v13179_v1, %v19419_v51  ;;  %v2015_v54 = vadd.f32 %v2014_v31, %v2013_v4  ;;  %v13183_v20 = vpop.f32.mrf.mxu0  ;;  %v3720_v48 = vadd.f32 %v3688_v25, %v3616_v39  ;;  %v2022_v18 = vsel %vm724_vm0, %v19422_v47, 0.0  ;;  %v13195_v51 = vld [vmem:[%s19265_s21 + $0xc] ss:$0 sm:$0xff]  ;;  %v19424_v31 = vld [vmem:[#allocation61_spill] sm:$0xff] }
 0x163   : > { %19420 = vst [vmem:[#allocation34_spill] sm:$0xff] %v13183_v20  ;;  %v13190_v5 = vpop.f32.mrf.mxu1  ;;  %19423 = vst [vmem:[#allocation35_spill] sm:$0xff] %v13195_v51  ;;  %v3895_v61 = vmul.f32 %v13195_v51, %v19424_v31  ;;  %v19426_v25 = vld [vmem:[#allocation63_spill] sm:$0xff]  ;;  %v19427_v15 = vmax.f32 %v13163_v52, 0.0 }
 0x164   : > { %v3823_v29 = vadd.f32 %v3791_v35, %v3719_v30  ;;  %v2017_v4 = vadd.f32 %v2016_v33, %v2015_v54  ;;  %v13200_v42 = vpop.f32.mrf.mxu0  ;;  %v3824_v39 = vadd.f32 %v3792_v63, %v3720_v48  ;;  %v3896_v47 = vmul.f32 %v13195_v51, %v19426_v25  ;;  %v13213_v33 = vld [vmem:[%s19265_s21 + $0xd] ss:$0 sm:$0xff]  ;;  %v19429_v54 = vld [vmem:[#allocation64_spill] sm:$0xff] }
 0x165   : > { %19425 = vst [vmem:[#allocation32_spill] sm:$0xff] %v13200_v42  ;;  %v2018_v10 = vsel %vm724_vm0, %v19427_v15, 0.0  ;;  %v13208_v35 = vpop.f32.mrf.mxu1  ;;  %19428 = vst [vmem:[#allocation36_spill] sm:$0xff] %v13213_v33  ;;  %v3999_v48 = vmul.f32 %v13213_v33, %v19429_v54  ;;  %v13219_v25 = vpack.c.bf16 %v5176_v45, %v5175_v57  ;;  %v19432_v15 = vld [vmem:[#allocation65_spill] sm:$0xff]  ;;  %v19433_v50 = vmax.f32 %v13200_v42, 0.0  ;;  %v19441_v51 = vld [vmem:[#allocation75_spill] sm:$0xff] }
 0x166   : > { %v3927_v28 = vadd.f32 %v3895_v61, %v3823_v29  ;;  %v2019_v63 = vadd.f32 %v2018_v10, %v2017_v4  ;;  %v13217_v31 = vpop.f32.mrf.mxu0  ;;  %v3928_v22 = vadd.f32 %v3896_v47, %v3824_v39  ;;  %v4000_v30 = vmul.f32 %v13213_v33, %v19432_v15  ;;  %v13232_v4 = vld [vmem:[%s19265_s21 + $0xe] ss:$0 sm:$0xff]  ;;  %v19435_v57 = vld [vmem:[#allocation69_spill] sm:$0xff]  ;;  %v19438_v61 = vld [vmem:[#allocation70_spill] sm:$0xff] }
 0x167   : > { %19430 = vst [vmem:[#allocation40_spill] sm:$0xff] %v13217_v31  ;;  %19431 = vst [vmem:[#allocation59_spill] sm:$0xff] %v13219_v25  ;;  %v2020_v29 = vsel %vm724_vm0, %v19433_v50, 0.0  ;;  %v13227_v52 = vpop.f32.mrf.mxu1  ;;  %v4103_v45 = vmul.f32 %v13232_v4, %v19435_v57  ;;  %v19436_v39 = vmax.f32 %v13183_v20, 0.0  ;;  %v4104_v25 = vmul.f32 %v13232_v4, %v19438_v61 }
 0x168   : > { %v4031_v44 = vadd.f32 %v3999_v48, %v3927_v28  ;;  %19434 = vst [vmem:[#allocation60_spill] sm:$0xff] %v13232_v4  ;;  %v2021_v10 = vadd.f32 %v2020_v29, %v2019_v63  ;;  %v13239_v54 = vpop.f32.mrf.mxu0  ;;  %v4032_v50 = vadd.f32 %v4000_v30, %v3928_v22  ;;  %v4208_v33 = vmul.f32 %v19440_v55, %v19439_v53  ;;  %v19444_v30 = vld [vmem:[#allocation57_spill] sm:$0xff] }
 0x169   : > { %v2024_v47 = vsel %vm724_vm0, %v19436_v39, 0.0  ;;  %19437 = vst [vmem:[#allocation61_spill] sm:$0xff] %v13239_v54  ;;  %v10623_v48 = vpop.f32.mrf.mxu1  ;;  %v4209_v27 = vmul.f32 %v19440_v55, %v19441_v51  ;;  %v19442_v39 = vmax.f32 %v13217_v31, 0.0  ;;  %v4312_v4 = vmul.f32 %v19444_v30, %v13052_v11  ;;  %v19445_v55 = vld [vmem:[#allocation28_spill] sm:$0xff] }
 0x16a   : > { %v4135_v42 = vadd.f32 %v4103_v45, %v4031_v44  ;;  %v2023_v20 = vadd.f32 %v2022_v18, %v2021_v10  ;;  %v13251_v29 = vpop.f32.mrf.mxu0  ;;  %v4136_v22 = vadd.f32 %v4104_v25, %v4032_v50  ;;  %v4313_v17 = vmul.f32 %v19444_v30, %v13071_v2  ;;  %v19448_v30 = vld [vmem:[#allocation26_spill] sm:$0xff] }
 0x16b   : > { %v2030_v63 = vsel %vm724_vm0, %v19442_v39, 0.0  ;;  %19443 = vst [vmem:[#allocation63_spill] sm:$0xff] %v13251_v29  ;;  %v1514_v44 = vpop.f32.mrf.mxu1  ;;  %v4416_v18 = vmul.f32 %v19445_v55, %v13080_v3  ;;  %v19446_v31 = vmax.f32 %v13239_v54, 0.0  ;;  %v4417_v50 = vmul.f32 %v19445_v55, %v13090_v58  ;;  %v13274_v54 = vld [vmem:[#allocation2 + $0xce] sm:$0xff] }
 0x16c   : > { %v4240_v45 = vadd.f32 %v4208_v33, %v4135_v42  ;;  %v2025_v10 = vadd.f32 %v2024_v47, %v2023_v20  ;;  %v13263_v8 = vpop.f32.mrf.mxu0  ;;  %v4241_v25 = vadd.f32 %v4209_v27, %v4136_v22  ;;  %v4520_v2 = vmul.f32 %v19448_v30, %v13100_v32  ;;  %v13272_v47 = vld [vmem:[#allocation2 + $0xc6] sm:$0xff]  ;;  %v13283_v32 = vld [vmem:[#allocation2 + $0xcf] sm:$0xff] }
 0x16d   : > { %v2026_v39 = vsel %vm724_vm0, %v19446_v31, 0.0  ;;  %19447 = vst [vmem:[#allocation64_spill] sm:$0xff] %v13263_v8  ;;  %v10624_v42 = vpop.f32.mrf.mxu1  ;;  %v4521_v20 = vmul.f32 %v19448_v30, %v13108_v41  ;;  %v19449_v27 = vmax.f32 %v13251_v29, 0.0  ;;  %v13281_v58 = vld [vmem:[#allocation2 + $0xc7] sm:$0xff]  ;;  %19451 = vst [vmem:[#allocation65_spill] sm:$0xff] %v13283_v32  ;;  %v19452_v30 = vmax.f32 %v13263_v8, 0.0 }
 0x16e   : > { %v4344_v33 = vadd.f32 %v4312_v4, %v4240_v45  ;;  %v2027_v31 = vadd.f32 %v2026_v39, %v2025_v10  ;;  %v10575_v55 = vpop.f32.mrf.mxu0  ;;  %10105 = vmatprep.subr.mxu0 %v10624_v42  ;;  %v4345_v28 = vadd.f32 %v4313_v17, %v4241_v25  ;;  %v19450_v4 = vld [vmem:[#allocation30_spill] sm:$0xff]  ;;  %v13291_v17 = vld [vmem:[#allocation2 + $0xc8] sm:$0xff] }
 0x16f   : > { %v2032_v22 = vsel %vm724_vm0, %v19449_v27, 0.0  ;;  %v4624_v45 = vmul.f32 %v19450_v4, %v13117_v16  ;;  %v2028_v41 = vsel %vm724_vm0, %v19452_v30, 0.0  ;;  %v1338_v3 = vmax.f32 %v10575_v55, 0.0  ;;  %10106 = vmatpush3.msra.mxu0 %v13009_v38  ;;  %v1517_v10 = vpop.f32.mrf.mxu1  ;;  %v19453_v16 = vld [vmem:[#allocation58_spill] sm:$0xff] }
 0x170   : > { %v4448_v39 = vadd.f32 %v4416_v18, %v4344_v33  ;;  %v4625_v42 = vmul.f32 %v19450_v4, %v13139_v36  ;;  %v2029_v25 = vadd.f32 %v2028_v41, %v2027_v31  ;;  %v1257_v27 = vpop.f32.mrf.mxu0  ;;  %10107 = vmatprep.subr.mxu0 %v10623_v48  ;;  %v4449_v29 = vadd.f32 %v4417_v50, %v4345_v28  ;;  %v13302_v41 = vld [vmem:[#allocation2 + $0xd0] sm:$0xff] }
 0x171   : > { %v4729_v1 = vmul.f32 %v19453_v16, %v13272_v47  ;;  %v4730_v30 = vmul.f32 %v19453_v16, %v13274_v54  ;;  %v1336_v55 = vmax.f32 %v1257_v27, 0.0  ;;  %10108 = vmatpush3.msra.mxu0 %v12971_v21  ;;  %v4833_v18 = vmul.f32 %v12671_v56, %v13281_v58  ;;  %v13304_v48 = vld [vmem:[#allocation2 + $0xc9] sm:$0xff] }
 0x172   : > { %v4552_v38 = vadd.f32 %v4520_v2, %v4448_v39  ;;  %v4834_v33 = vmul.f32 %v12671_v56, %v13283_v32  ;;  %v2031_v28 = vadd.f32 %v2030_v63, %v2029_v25  ;;  %v2038_v50 = vsel %vm724_vm0, %v1338_v3, 0.0  ;;  %v10576_v31 = vpop.f32.mrf.mxu0  ;;  %10109 = vmatprep.subr.mxu0 %v1517_v10  ;;  %v13309_v2 = vld [vmem:[#allocation2 + $0xd1] sm:$0xff] }
 0x173   : > { %v4553_v16 = vadd.f32 %v4521_v20, %v4449_v29  ;;  %v4937_v21 = vmul.f32 %v19397_v26, %v13291_v17  ;;  %v1339_v4 = vmax.f32 %v10576_v31, 0.0  ;;  %v19454_v39 = vmax.f32 %v13029_v46, 0.0  ;;  %10110 = vmatpush3.msra.mxu0 %v13022_v23  ;;  %v13316_v25 = vld [vmem:[#allocation2 + $0xca] sm:$0xff] }
 0x174   : > { %v19455_v56 = vmax.f32 %v13015_v19, 0.0  ;;  %v4656_v63 = vadd.f32 %v4624_v45, %v4552_v38  ;;  %v2033_v32 = vadd.f32 %v2032_v22, %v2031_v28  ;;  %v1260_v10 = vpop.f32.mrf.mxu0  ;;  %10111 = vmatprep.subr.mxu0 %v1514_v44  ;;  %v4938_v20 = vmul.f32 %v19397_v26, %v13302_v41  ;;  %v19457_v28 = vld [vmem:[#allocation54_spill] sm:$0xff] }
 0x175   : > { %v11183_v27 = vpack.i.bf16 %v19454_v39, %v1336_v55  ;;  %v4657_v29 = vadd.f32 %v4625_v42, %v4553_v16  ;;  %v5041_v31 = vmul.f32 %v19403_v14, %v13304_v48  ;;  %v2034_v46 = vsel %vm724_vm0, %v1336_v55, 0.0  ;;  %10112 = vmatpush3.msra.mxu0 %v12993_v62 }
 0x176   : > { %v11187_v8 = vpack.i.bf16 %v19455_v56, %v1338_v3  ;;  %v1337_v39 = vmax.f32 %v1260_v10, 0.0  ;;  %v4761_v19 = vadd.f32 %v4729_v1, %v4656_v63  ;;  %v5042_v23 = vmul.f32 %v19403_v14, %v13309_v2  ;;  %v10579_v22 = vpop.f32.mrf.mxu0  ;;  %10113 = vmatprep.subr.mxu0 %v13208_v35 }
 0x177   : > { %11184 = vxpose.xlu0.b32.start [1/16] (narrow) %v11183_v27, 32  ;;  %v2035_v3 = vadd.f32 %v2034_v46, %v2033_v32  ;;  %v4762_v44 = vadd.f32 %v4730_v30, %v4657_v29  ;;  %v5145_v26 = vmul.f32 %v19405_v60, %v13316_v25  ;;  %v3482_v45 = vmul.f32 %v12988_v34, %v19432_v15  ;;  %v13337_v30 = vld [vmem:[#allocation2 + $0xd2] sm:$0xff] }
 0x178   : > { %v2040_v42 = vsel %vm724_vm0, %v1339_v4, 0.0  ;;  %v2036_v55 = vsel %vm724_vm0, %v1337_v39, 0.0  ;;  %v19456_v62 = vmax.f32 %v13061_v7, 0.0  ;;  %10114 = vmatpush3.msra.mxu0 %v12922_v6  ;;  %v4865_v32 = vadd.f32 %v4833_v18, %v4761_v19  ;;  %v1273_v38 = vpop.f32.mrf.mxu0  ;;  %v19459_v6 = vld [vmem:[#allocation80_spill] sm:$0xff] }
 0x179   : > { %v2037_v14 = vadd.f32 %v2036_v55, %v2035_v3  ;;  %10115 = vmatprep.subr.mxu0 %v13174_v49  ;;  %v4866_v35 = vadd.f32 %v4834_v33, %v4762_v44  ;;  %v3514_v16 = vadd.f32 %v3482_v45, %v19457_v28  ;;  %v3585_v15 = vmul.f32 %v13004_v59, %v19435_v57  ;;  %v19460_v46 = vld [vmem:[#allocation52_spill] sm:$0xff] }
 0x17a   : > { %v11185_v1 = vpack.i.bf16 %v19456_v62, %v1337_v39  ;;  %v1342_v27 = vmax.f32 %v10579_v22, 0.0  ;;  %v1340_v56 = vmax.f32 %v1273_v38, 0.0  ;;  %v19458_v7 = vmax.f32 %v13038_v12, 0.0  ;;  %10116 = vmatpush3.msra.mxu0 %v19459_v6  ;;  %v10580_v29 = vpop.f32.mrf.mxu0  ;;  %v19465_v62 = vld [vmem:[#allocation51_spill] sm:$0xff]  ;;  %v19466_v38 = vld [vmem:[#allocation113_spill] sm:$0xff] }
 0x17b   : > { %v4969_v18 = vadd.f32 %v4937_v21, %v4865_v32  ;;  %v2039_v10 = vadd.f32 %v2038_v50, %v2037_v14  ;;  %10117 = vmatprep.subr.mxu0 %v13227_v52  ;;  %v4970_v49 = vadd.f32 %v4938_v20, %v4866_v35  ;;  %v3586_v33 = vmul.f32 %v13004_v59, %v19438_v61 }
 0x17c   : > { %11186 = vxpose.xlu0.b32.cont [2/16] (narrow) %v11185_v1, 32  ;;  %v11189_v63 = vpack.i.bf16 %v19458_v7, %v1339_v4  ;;  %v3617_v39 = vadd.f32 %v3585_v15, %v19460_v46  ;;  %v2042_v57 = vsel %vm724_vm0, %v1340_v56, 0.0  ;;  %v1343_v19 = vmax.f32 %v10580_v29, 0.0  ;;  %10118 = vmatpush3.msra.mxu0 %v12947_v13  ;;  %v1276_v50 = vpop.f32.mrf.mxu0  ;;  %v19470_v7 = vld [vmem:[#allocation15_spill] sm:$0xff]  ;;  %v19471_v29 = vld [vmem:[#allocation49_spill] sm:$0xff] }
 0x17d   : > { %v5073_v12 = vadd.f32 %v5041_v31, %v4969_v18  ;;  %v5146_v4 = vmul.f32 %v19405_v60, %v13337_v30  ;;  %v2041_v21 = vadd.f32 %v2040_v42, %v2039_v10  ;;  %10119 = vmatprep.subr.mxu0 %v13190_v5  ;;  %v5074_v52 = vadd.f32 %v5042_v23, %v4970_v49 }
 0x17e   : > { %v3618_v20 = vadd.f32 %v3586_v33, %v3514_v16  ;;  %v3689_v61 = vmul.f32 %v13159_v0, %v19439_v53  ;;  %v2046_v3 = vsel %vm724_vm0, %v1342_v27, 0.0  ;;  %v1341_v22 = vmax.f32 %v1276_v50, 0.0  ;;  %10120 = vmatpush3.msra.mxu0 %v12902_v43  ;;  %v10583_v23 = vpop.f32.mrf.mxu0  ;;  %v19472_v33 = vld [vmem:[#allocation109_spill] sm:$0xff]  ;;  %v19478_v50 = vld [vmem:[#allocation36_spill] sm:$0xff] }
 0x17f   : > { %v19461_v44 = vmax.f32 %v13095_v40, 0.0  ;;  %v19462_v60 = vmax.f32 %v13075_v37, 0.0  ;;  %v2043_v45 = vadd.f32 %v2042_v57, %v2041_v21  ;;  %v2048_v5 = vsel %vm724_vm0, %v1343_v19, 0.0  ;;  %10121 = vmatprep.subr.mxu0 %v13137_v9  ;;  %v19463_v40 = vld [vmem:[#allocation17_spill] sm:$0xff]  ;;  %v19477_v21 = vld [vmem:[#allocation112_spill] sm:$0xff] }
 0x180   : > { %11188 = vxpose.xlu0.b32.cont [3/16] (narrow) %v11187_v8, 32  ;;  %v3690_v53 = vmul.f32 %v13159_v0, %v19441_v51  ;;  %v3721_v42 = vadd.f32 %v3689_v61, %v3617_v39  ;;  %v2044_v8 = vsel %vm724_vm0, %v1341_v22, 0.0  ;;  %10122 = vmatpush3.msra.mxu0 %v19463_v40  ;;  %v19464_v43 = vmax.f32 %v13113_v24, 0.0  ;;  %v1289_v14 = vpop.f32.mrf.mxu0  ;;  %v19467_v51 = vld [vmem:[#allocation107_spill] sm:$0xff] }
 0x181   : > { %v11191_v13 = vpack.i.bf16 %v19461_v44, %v1340_v56  ;;  %v13362_v31 = vpack.i.bf16 %v19462_v60, %v1342_v27  ;;  %v5178_v37 = vadd.f32 %v5146_v4, %v5074_v52  ;;  %v3793_v1 = vmul.f32 %v19465_v62, %v13052_v11  ;;  %10123 = vmatprep.subr.mxu0 %v19466_v38  ;;  %v19468_v27 = vld [vmem:[#allocation68_spill] sm:$0xff]  ;;  %v19474_v39 = vld [vmem:[#allocation111_spill] sm:$0xff]  ;;  %v19480_v60 = vld [vmem:[#allocation41_spill] sm:$0xff] }
 0x182   : > { %v13372_v55 = vpack.i.bf16 %v19464_v43, %v1343_v19  ;;  %v2045_v32 = vadd.f32 %v2044_v8, %v2043_v45  ;;  %v5177_v9 = vadd.f32 %v5145_v26, %v5073_v12  ;;  %v3722_v35 = vadd.f32 %v3690_v53, %v3618_v20  ;;  %10124 = vmatpush3.msra.mxu0 %v19470_v7  ;;  %v10584_v10 = vpop.f32.mrf.mxu0  ;;  %v19473_v26 = vld [vmem:[#allocation35_spill] sm:$0xff]  ;;  %v19475_v12 = vld [vmem:[#allocation76_spill] sm:$0xff]  ;;  %v19486_v38 = vld [vmem:[#allocation106_spill] sm:$0xff] }
 0x183   : > { %v3794_v28 = vmul.f32 %v19465_v62, %v19467_v51  ;;  %v1346_v16 = vmax.f32 %v10583_v23, 0.0  ;;  %v1344_v15 = vmax.f32 %v1289_v14, 0.0  ;;  %v19469_v24 = vmax.f32 %v19468_v27, 0.0  ;;  %10125 = vmatprep.subr.mxu0 %v19471_v29  ;;  %v19482_v8 = vld [vmem:[#allocation72_spill] sm:$0xff] }
 0x184   : > { %11190 = vxpose.xlu0.b32.cont [4/16] (narrow) %v11189_v63, 32  ;;  %v3825_v6 = vadd.f32 %v3793_v1, %v3721_v42  ;;  %v2047_v18 = vadd.f32 %v2046_v3, %v2045_v32  ;;  %v3897_v46 = vmul.f32 %v19473_v26, %v19472_v33  ;;  %v3898_v57 = vmul.f32 %v19473_v26, %v19474_v39  ;;  %v1292_v61 = vpop.f32.mrf.mxu0  ;;  %v19479_v3 = vld [vmem:[#allocation115_spill] sm:$0xff]  ;;  %v19481_v42 = vld [vmem:[#allocation16_spill] sm:$0xff] }
 0x185   : > { %v11193_v56 = vpack.i.bf16 %v19469_v24, %v1341_v22  ;;  %v3826_v49 = vadd.f32 %v3794_v28, %v3722_v35  ;;  %v2054_v19 = vsel %vm724_vm0, %v1346_v16, 0.0  ;;  %v2050_v63 = vsel %vm724_vm0, %v1344_v15, 0.0  ;;  %10126 = vmatpush3.msra.mxu0 %v19475_v12  ;;  %v19485_v1 = vld [vmem:[#allocation60_spill] sm:$0xff]  ;;  %v19487_v24 = vld [vmem:[#allocation74_spill] sm:$0xff] }
 0x186   : > { %v13390_v4 = vpack.c.bf16 %v5178_v37, %v5177_v9  ;;  %v4001_v52 = vmul.f32 %v19478_v50, %v19477_v21  ;;  %v2049_v20 = vadd.f32 %v2048_v5, %v2047_v18  ;;  %10127 = vmatprep.subr.mxu0 %v19479_v3  ;;  %v3929_v22 = vadd.f32 %v3897_v46, %v3825_v6  ;;  %v19484_v37 = vld [vmem:[#allocation114_spill] sm:$0xff]  ;;  %v10587_v14 = vpop.f32.mrf.mxu0  ;;  %v13417_v18 = vld [vmem:[%s19265_s21 + $0xf] ss:$0 sm:$0xff] }
 0x187   : > { %v3930_v44 = vadd.f32 %v3898_v57, %v3826_v49  ;;  %v4002_v45 = vmul.f32 %v19478_v50, %v19480_v60  ;;  %v1347_v23 = vmax.f32 %v10584_v10, 0.0  ;;  %v1345_v53 = vmax.f32 %v1292_v61, 0.0  ;;  %10128 = vmatpush3.msra.mxu0 %v19481_v42  ;;  %19490 = vst [vmem:[#allocation70_spill] sm:$0xff] %v13417_v18  ;;  %v19491_v46 = vld [vmem:[#allocation103_spill] sm:$0xff]  ;;  %v19493_v61 = vld [vmem:[#allocation34_spill] sm:$0xff] }
 0x188   : > { %19476 = vst [vmem:[#allocation69_spill] sm:$0xff] %v13390_v4  ;;  %11192 = vxpose.xlu0.b32.cont [5/16] (narrow) %v11191_v13, 32  ;;  %v19483_v40 = vmax.f32 %v19482_v8, 0.0  ;;  %v4105_v5 = vmul.f32 %v19485_v1, %v19484_v37  ;;  %v2051_v32 = vadd.f32 %v2050_v63, %v2049_v20  ;;  %10129 = vmatprep.subr.mxu0 %v19486_v38  ;;  %v1305_v49 = vpop.f32.mrf.mxu0  ;;  %v19492_v20 = vld [vmem:[#allocation71_spill] sm:$0xff]  ;;  %v19494_v3 = vmax.f32 %v19493_v61, 0.0 }
 0x189   : > { %v4033_v9 = vadd.f32 %v4001_v52, %v3929_v22  ;;  %v4034_v35 = vadd.f32 %v4002_v45, %v3930_v44  ;;  %v4106_v28 = vmul.f32 %v19485_v1, %v13139_v36  ;;  %v2056_v13 = vsel %vm724_vm0, %v1347_v23, 0.0  ;;  %10130 = vmatpush3.msra.mxu0 %v19487_v24  ;;  %v13432_v44 = vld [vmem:[%s19265_s21 + $0x10] ss:$0 sm:$0xff]  ;;  %v13454_v24 = vld [vmem:[%s19265_s21 + $0x11] ss:$0 sm:$0xff]  ;;  %v19519_v4 = vld [vmem:[#allocation63_spill] sm:$0xff] }
 0x18a   : > { %v13400_v43 = vpack.i.bf16 %v19483_v40, %v1346_v16  ;;  %v2052_v27 = vsel %vm724_vm0, %v1345_v53, 0.0  ;;  %v19488_v16 = vld [vmem:[#allocation31_spill] sm:$0xff]  ;;  %v4210_v10 = vmul.f32 %v13417_v18, %v13272_v47  ;;  %10131 = vmatprep.subr.mxu0 %v19491_v46  ;;  %v4211_v12 = vmul.f32 %v13417_v18, %v13274_v54  ;;  %19495 = vst [vmem:[#allocation73_spill] sm:$0xff] %v13432_v44  ;;  %v10588_v8 = vpop.f32.mrf.mxu0  ;;  %v19496_v40 = vld [vmem:[#allocation110_spill] sm:$0xff] }
 0x18b   : > { %v19489_v7 = vmax.f32 %v19488_v16, 0.0  ;;  %v2053_v29 = vadd.f32 %v2052_v27, %v2051_v32  ;;  %v4137_v57 = vadd.f32 %v4105_v5, %v4033_v9  ;;  %v4138_v63 = vadd.f32 %v4106_v28, %v4034_v35  ;;  %10132 = vmatpush3.msra.mxu0 %v19492_v20  ;;  %v19497_v32 = vld [vmem:[#allocation65_spill] sm:$0xff]  ;;  %v19498_v9 = vld [vmem:[#allocation14_spill] sm:$0xff]  ;;  %v19499_v35 = vld [vmem:[#allocation32_spill] sm:$0xff]  ;;  %19503 = vst [vmem:[#allocation75_spill] sm:$0xff] %v13454_v24 }
 0x18c   : > { %v1350_v52 = vmax.f32 %v10587_v14, 0.0  ;;  %11194 = vxpose.xlu0.b32.cont [6/16] (narrow) %v11193_v56, 32  ;;  %v13427_v22 = vpack.i.bf16 %v19494_v3, %v1347_v23  ;;  %v4314_v45 = vmul.f32 %v13432_v44, %v13281_v58  ;;  %10133 = vmatprep.subr.mxu0 %v19496_v40  ;;  %v4315_v14 = vmul.f32 %v13432_v44, %v19497_v32  ;;  %v19506_v20 = vld [vmem:[#allocation40_spill] sm:$0xff] }
 0x18d   : > { %v13412_v6 = vpack.i.bf16 %v19489_v7, %v1344_v15  ;;  %v1348_v15 = vmax.f32 %v1305_v49, 0.0  ;;  %v2055_v42 = vadd.f32 %v2054_v19, %v2053_v29  ;;  %v4242_v5 = vadd.f32 %v4210_v10, %v4137_v57  ;;  %10134 = vmatpush3.msra.mxu0 %v19498_v9  ;;  %v13449_v19 = vld [vmem:[%s19501_s9 + $0x18] sm:$0xff]  ;;  %v1308_v10 = vpop.f32.mrf.mxu0 }
 0x18e   : > { %v4243_v56 = vadd.f32 %v4211_v12, %v4138_v63  ;;  %v2062_v23 = vsel %vm724_vm0, %v1350_v52, 0.0  ;;  %v19500_v28 = vmax.f32 %v19499_v35, 0.0  ;;  %19502 = vst [vmem:[#allocation56_spill] sm:$0xff] %v13449_v19  ;;  %v4418_v16 = vmul.f32 %v13454_v24, %v13291_v17  ;;  %v19504_v29 = vld [vmem:[#allocation105_spill] sm:$0xff]  ;;  %v19505_v12 = vld [vmem:[#allocation42_spill] sm:$0xff] }
 0x18f   : > { %v2058_v38 = vsel %vm724_vm0, %v1348_v15, 0.0  ;;  %v2057_v7 = vadd.f32 %v2056_v13, %v2055_v42  ;;  %10135 = vmatprep.subr.mxu0 %v19504_v29  ;;  %v4346_v49 = vadd.f32 %v4314_v45, %v4242_v5  ;;  %v4419_v46 = vmul.f32 %v13454_v24, %v13302_v41  ;;  %v13470_v13 = vld [vmem:[%s19265_s21 + $0x12] ss:$0 sm:$0xff]  ;;  %v13477_v5 = vld [vmem:[#allocation2 + $0xe6] sm:$0xff]  ;;  %v19509_v9 = vld [vmem:[#allocation61_spill] sm:$0xff] }
 0x190   : > { %v13444_v27 = vpack.i.bf16 %v19500_v28, %v1345_v53  ;;  %v4347_v53 = vadd.f32 %v4315_v14, %v4243_v56  ;;  %v1351_v57 = vmax.f32 %v10588_v8, 0.0  ;;  %v1349_v63 = vmax.f32 %v1308_v10, 0.0  ;;  %11196 = vxpose.xlu0.b32.cont [7/16] (narrow) %v13362_v31, 32  ;;  %10136 = vmatpush3.msra.mxu0 %v19505_v12  ;;  %19508 = vst [vmem:[#allocation57_spill] sm:$0xff] %v13470_v13  ;;  %v13496_v10 = vld [vmem:[#allocation2 + $0xef] sm:$0xff] }
 0x191   : > { %v19507_v61 = vmax.f32 %v19506_v20, 0.0  ;;  %v4522_v45 = vmul.f32 %v13470_v13, %v13304_v48  ;;  %v2059_v42 = vadd.f32 %v2058_v38, %v2057_v7  ;;  %10681 = vmatprep.subr.mxu0 %v13449_v19  ;;  %v4450_v8 = vadd.f32 %v4418_v16, %v4346_v49  ;;  %v13490_v38 = vld [vmem:[%s19265_s21 + $0x13] ss:$0 sm:$0xff]  ;;  %v13494_v7 = vld [vmem:[#allocation2 + $0xe7] sm:$0xff]  ;;  %19513 = vst [vmem:[#allocation30_spill] sm:$0xff] %v13496_v10 }
 0x192   : > { %v4451_v40 = vadd.f32 %v4419_v46, %v4347_v53  ;;  %v4523_v31 = vmul.f32 %v13470_v13, %v13309_v2  ;;  %v2064_v56 = vsel %vm724_vm0, %v1351_v57, 0.0  ;;  %v2060_v14 = vsel %vm724_vm0, %v1349_v63, 0.0  ;;  %19511 = vst [vmem:[#allocation28_spill] sm:$0xff] %v13490_v38  ;;  %19512 = vst [vmem:[#allocation26_spill] sm:$0xff] %v13494_v7  ;;  %v13502_v12 = vld [vmem:[#allocation2 + $0xf0] sm:$0xff] }
 0x193   : > { %v13465_v3 = vpack.i.bf16 %v19507_v61, %v1350_v52  ;;  %v13479_v52 = vld [vmem:[#allocation2 + $0xee] sm:$0xff]  ;;  %v19510_v35 = vmax.f32 %v19509_v9, 0.0  ;;  %v4626_v16 = vmul.f32 %v13490_v38, %v13316_v25  ;;  %v2061_v29 = vadd.f32 %v2060_v14, %v2059_v42  ;;  %19515 = vst [vmem:[#allocation54_spill] sm:$0xff] %v13502_v12 }
 0x194   : > { %v4554_v49 = vadd.f32 %v4522_v45, %v4450_v8  ;;  %v4555_v53 = vadd.f32 %v4523_v31, %v4451_v40  ;;  %v4627_v46 = vmul.f32 %v13490_v38, %v13337_v30  ;;  %v13504_v20 = vld [vmem:[#allocation2 + $0xe9] sm:$0xff]  ;;  %11198 = vxpose.xlu0.b32.cont [8/16] (narrow) %v13372_v55, 32  ;;  %v19520_v19 = vmax.f32 %v19519_v4, 0.0  ;;  %v13518_v45 = vld [vmem:[%s19265_s21 + $0x14] ss:$0 sm:$0xff] }
 0x195   : > { %v13485_v28 = vpack.i.bf16 %v19510_v35, %v1348_v15  ;;  %v13500_v15 = vld [vmem:[#allocation2 + $0xe8] sm:$0xff]  ;;  %19516 = vst [vmem:[#allocation80_spill] sm:$0xff] %v13504_v20  ;;  %v19517_v61 = vld [vmem:[#allocation64_spill] sm:$0xff]  ;;  %19522 = vst [vmem:[#allocation17_spill] sm:$0xff] %v13518_v45  ;;  %v4731_v8 = vmul.f32 %v13518_v45, %v13477_v5  ;;  %v4732_v40 = vmul.f32 %v13518_v45, %v13479_v52 }
 0x196   : > { %19514 = vst [vmem:[#allocation58_spill] sm:$0xff] %v13500_v15  ;;  %v19518_v9 = vmax.f32 %v19517_v61, 0.0  ;;  %v13513_v42 = vpack.i.bf16 %v19520_v19, %v1351_v57  ;;  %v2063_v55 = vadd.f32 %v2062_v23, %v2061_v29  ;;  %v4658_v31 = vadd.f32 %v4626_v16, %v4554_v49  ;;  %v13527_v4 = vld [vmem:[%s19265_s21 + $0x15] ss:$0 sm:$0xff]  ;;  %v13538_v61 = vld [vmem:[%s19265_s21 + $0x16] ss:$0 sm:$0xff] }
 0x197   : > { %v4659_v14 = vadd.f32 %v4627_v46, %v4555_v53  ;;  %19523 = vst [vmem:[#allocation51_spill] sm:$0xff] %v13527_v4  ;;  %v4835_v19 = vmul.f32 %v13527_v4, %v13494_v7  ;;  %v13531_v57 = vld [vmem:[#allocation2 + $0xf1] sm:$0xff]  ;;  %19525 = vst [vmem:[#allocation107_spill] sm:$0xff] %v13538_v61  ;;  %v4939_v23 = vmul.f32 %v13538_v61, %v13500_v15 }
 0x198   : > { %v13509_v35 = vpack.i.bf16 %v19518_v9, %v1349_v63  ;;  %19521 = vst [vmem:[#allocation52_spill] sm:$0xff] %v13513_v42  ;;  %19524 = vst [vmem:[#allocation113_spill] sm:$0xff] %v13531_v57  ;;  %v4836_v63 = vmul.f32 %v13527_v4, %v13496_v10  ;;  %v4940_v16 = vmul.f32 %v13538_v61, %v13502_v12  ;;  %v13547_v29 = vld [vmem:[%s19265_s21 + $0x17] ss:$0 sm:$0xff]  ;;  %v13554_v42 = vld [vmem:[%s19265_s21] ss:$0 sm:$0xff] }
 0x199   : > { %19526 = vst [vmem:[#allocation68_spill] sm:$0xff] %v13547_v29  ;;  %v5043_v49 = vmul.f32 %v13547_v29, %v13504_v20  ;;  %v2065_v53 = vadd.f32 %v2064_v56, %v2063_v55  ;;  %v4763_v46 = vadd.f32 %v4731_v8, %v4658_v31  ;;  %v4764_v9 = vadd.f32 %v4732_v40, %v4659_v14  ;;  %v11477_v4 = vld [vmem:[#allocation2 + $0x86] sm:$0xff]  ;;  %v11478_v13 = vld [vmem:[#allocation2 + $0x8e] sm:$0xff]  ;;  %v13566_v8 = vld [vmem:[%s19265_s21 + $0x1] ss:$0 sm:$0xff] }
 0x19a   : > { %19527 = vst [vmem:[#allocation15_spill] sm:$0xff] %v13554_v42  ;;  %v2650_v45 = vmul.f32 %v11477_v4, %v13554_v42  ;;  %11200 = vxpose.xlu0.b32.cont [9/16] (narrow) %v13412_v6, 32  ;;  %v5044_v61 = vmul.f32 %v13547_v29, %v13531_v57  ;;  %v13560_v38 = vld [vmem:[#allocation2 + $0xea] sm:$0xff]  ;;  %v2651_v56 = vmul.f32 %v11478_v13, %v13554_v42  ;;  %19529 = vst [vmem:[#allocation109_spill] sm:$0xff] %v13566_v8  ;;  %v13570_v29 = vld [vmem:[#allocation2 + $0xf2] sm:$0xff] }
 0x19b   : > { %19528 = vst [vmem:[#allocation49_spill] sm:$0xff] %v13560_v38  ;;  %v11480_v40 = vld [vmem:[#allocation2 + $0x87] sm:$0xff]  ;;  %v11481_v31 = vld [vmem:[#allocation2 + $0x8f] sm:$0xff]  ;;  %v2066_v6 = vrot.slane %v2065_v53, 4  ;;  %v4867_v4 = vadd.f32 %v4835_v19, %v4763_v46  ;;  %v4868_v20 = vadd.f32 %v4836_v63, %v4764_v9  ;;  %19530 = vst [vmem:[#allocation111_spill] sm:$0xff] %v13570_v29 }
 0x19c   : > { %v2754_v55 = vmul.f32 %v11480_v40, %v13566_v8  ;;  %v2755_v14 = vmul.f32 %v11481_v31, %v13566_v8  ;;  %v13575_v13 = vld [vmem:[%s19265_s21 + $0x2] ss:$0 sm:$0xff]  ;;  %v11483_v42 = vld [vmem:[#allocation2 + $0x88] sm:$0xff]  ;;  %v11484_v15 = vld [vmem:[#allocation2 + $0x90] sm:$0xff] }
 0x19d   : > { %19531 = vst [vmem:[#allocation76_spill] sm:$0xff] %v13575_v13  ;;  %v2858_v57 = vmul.f32 %v11483_v42, %v13575_v13  ;;  %v2859_v40 = vmul.f32 %v11484_v15, %v13575_v13  ;;  %v11485_v10 = vld [vmem:[#allocation2 + $0x89] sm:$0xff]  ;;  %v19532_v31 = vld [vmem:[#allocation89_spill] sm:$0xff]  ;;  %v2067_v19 = vadd.f32 %v2066_v6, %v2065_v53  ;;  %v4971_v63 = vadd.f32 %v4939_v23, %v4867_v4 }
 0x19e   : > { %v2786_v12 = vadd.f32 %v2754_v55, %v2650_v45  ;;  %v2787_v24 = vadd.f32 %v2755_v14, %v2651_v56  ;;  %v2962_v8 = vmul.f32 %v11485_v10, %v19532_v31  ;;  %v4972_v46 = vadd.f32 %v4940_v16, %v4868_v20  ;;  %v13583_v9 = vld [vmem:[%s19265_s21 + $0x18] ss:$0 sm:$0xff]  ;;  %11202 = vxpose.xlu0.b32.cont [10/16] (narrow) %v13444_v27, 32  ;;  %v11488_v53 = vld [vmem:[#allocation2 + $0x8a] sm:$0xff]  ;;  %v19533_v55 = vld [vmem:[#allocation90_spill] sm:$0xff] }
 0x19f   : > { %v5147_v44 = vmul.f32 %v13583_v9, %v13560_v38  ;;  %v5148_v42 = vmul.f32 %v13583_v9, %v13570_v29  ;;  %v11487_v56 = vld [vmem:[#allocation2 + $0x91] sm:$0xff]  ;;  %v2068_v23 = vrot.slane %v2067_v19, 2  ;;  %v5075_v20 = vadd.f32 %v5043_v49, %v4971_v63  ;;  %v13593_v27 = vld [vmem:[#allocation2 + $0xa6] sm:$0xff] }
 0x1a0   : > { %v2890_v15 = vadd.f32 %v2858_v57, %v2786_v12  ;;  %v2891_v45 = vadd.f32 %v2859_v40, %v2787_v24  ;;  %v2963_v10 = vmul.f32 %v11487_v56, %v19532_v31  ;;  %v5076_v16 = vadd.f32 %v5044_v61, %v4972_v46  ;;  %v11489_v13 = vld [vmem:[#allocation2 + $0x92] sm:$0xff] }
 0x1a1   : > { %v3066_v14 = vmul.f32 %v11488_v53, %v19533_v55  ;;  %v3067_v38 = vmul.f32 %v11489_v13, %v19533_v55  ;;  %v19534_v7 = vld [vmem:[#allocation93_spill] sm:$0xff]  ;;  %v2069_v24 = vadd.f32 %v2068_v23, %v2067_v19  ;;  %v13597_v40 = vld [vmem:[#allocation2 + $0xae] sm:$0xff]  ;;  %v13622_v23 = vmul.f32 %v13004_v59, %v13139_v36 }
 0x1a2   : > { %v2994_v6 = vadd.f32 %v2962_v8, %v2890_v15  ;;  %v2995_v4 = vadd.f32 %v2963_v10, %v2891_v45  ;;  %v3171_v12 = vmul.f32 %v13593_v27, %v19534_v7  ;;  %v5180_v57 = vadd.f32 %v5148_v42, %v5076_v16  ;;  %v19535_v49 = vld [vmem:[#allocation96_spill] sm:$0xff]  ;;  %11204 = vxpose.xlu0.b32.cont [11/16] (narrow) %v13400_v43, 32  ;;  %v19536_v19 = vld [vmem:[#allocation97_spill] sm:$0xff] }
 0x1a3   : > { %v3172_v61 = vmul.f32 %v13597_v40, %v19534_v7  ;;  %v3275_v31 = vmul.f32 %v19535_v49, %v13052_v11  ;;  %v5179_v8 = vadd.f32 %v5147_v44, %v5075_v20  ;;  %v3276_v46 = vmul.f32 %v19535_v49, %v19467_v51  ;;  %v19544_v49 = vld [vmem:[#allocation18_spill] sm:$0xff] }
 0x1a4   : > { %v3098_v63 = vadd.f32 %v3066_v14, %v2994_v6  ;;  %v3099_v13 = vadd.f32 %v3067_v38, %v2995_v4  ;;  %v2070_v15 = vrot.slane %v2069_v24, 1  ;;  %v3379_v42 = vmul.f32 %v19536_v19, %v19472_v33 }
 0x1a5   : > { %v3380_v45 = vmul.f32 %v19536_v19, %v19474_v39  ;;  %v3483_v7 = vmul.f32 %v12988_v34, %v19477_v21  ;;  %v13612_v56 = vpack.c.bf16 %v5180_v57, %v5179_v8  ;;  %v3484_v44 = vmul.f32 %v12988_v34, %v19480_v60 }
 0x1a6   : > { %v3203_v11 = vadd.f32 %v3171_v12, %v3098_v63  ;;  %v3204_v43 = vadd.f32 %v3172_v61, %v3099_v13  ;;  %v2071_v38 = vadd.f32 %v2070_v15, %v2069_v24  ;;  %v13618_v10 = vmul.f32 %v13004_v59, %v19484_v37  ;;  %11206 = vxpose.xlu0.b32.cont [12/16] (narrow) %v13427_v22, 32  ;;  %v19538_v59 = vld [vmem:[#allocation79_spill] sm:$0xff]  ;;  %v19541_v24 = vld [vmem:[#allocation86_spill] sm:$0xff]  ;;  %v19547_v63 = vld [vmem:[#allocation81_spill] sm:$0xff] }
 0x1a7   : > { %19537 = vst [vmem:[#allocation112_spill] sm:$0xff] %v13612_v56  ;;  %v13626_v20 = vmul.f32 %v13159_v0, %v13272_v47  ;;  %v13631_v53 = vmul.f32 %v13159_v0, %v13274_v54  ;;  %v13635_v34 = vmul.f32 %v19465_v62, %v13281_v58  ;;  %v13639_v55 = vmul.f32 %v19465_v62, %v19497_v32  ;;  %v19556_v56 = vld [vmem:[#allocation91_spill] sm:$0xff] }
 0x1a8   : > { %v3307_v16 = vadd.f32 %v3275_v31, %v3203_v11  ;;  %v19539_v14 = vmax.f32 %v19538_v59, 0.0  ;;  %v3308_v4 = vadd.f32 %v3276_v46, %v3204_v43  ;;  %v13647_v22 = vmul.f32 %v19473_v26, %v13291_v17  ;;  %v19550_v46 = vld [vmem:[#allocation94_spill] sm:$0xff]  ;;  %v19553_v43 = vld [vmem:[#allocation99_spill] sm:$0xff] }
 0x1a9   : > { %v13651_v12 = vmul.f32 %v19473_v26, %v13302_v41  ;;  %v19542_v57 = vmax.f32 %v19541_v24, 0.0  ;;  %v19545_v31 = vmax.f32 %v19544_v49, 0.0  ;;  %v19548_v13 = vmax.f32 %v19547_v63, 0.0 }
 0x1aa   : > { %v13643_v6 = vmul.f32 %v2071_v38, %v19539_v14  ;;  %v19551_v19 = vmax.f32 %v19550_v46, 0.0  ;;  %v19554_v59 = vmax.f32 %v19553_v43, 0.0  ;;  %v19557_v24 = vmax.f32 %v19556_v56, 0.0  ;;  %11208 = vxpose.xlu0.b32.cont [13/16] (narrow) %v13485_v28, 32  ;;  %v19592_v28 = vld [vmem:[#allocation33_spill] sm:$0xff] }
 0x1ab   : > { %v13655_v61 = vmul.f32 %v2071_v38, %v19542_v57  ;;  %v13659_v8 = vmul.f32 %v2071_v38, %v19545_v31  ;;  %v13663_v15 = vmul.f32 %v2071_v38, %v19548_v13 }
 0x1ac   : > { %19540 = vst [vmem:[#allocation115_spill] sm:$0xff] %v13643_v6  ;;  %v13667_v11 = vmul.f32 %v2071_v38, %v19551_v19  ;;  %v13671_v14 = vmul.f32 %v2071_v38, %v19554_v59  ;;  %v13675_v57 = vmul.f32 %v2071_v38, %v19557_v24 }
 0x1ad   : > { %19543 = vst [vmem:[#allocation41_spill] sm:$0xff] %v13655_v61  ;;  %19546 = vst [vmem:[#allocation16_spill] sm:$0xff] %v13659_v8  ;;  %v19559_v61 = vld [vmem:[#allocation98_spill] sm:$0xff]  ;;  %v19562_v8 = vld [vmem:[#allocation20_spill] sm:$0xff] }
 0x1ae   : > { %19549 = vst [vmem:[#allocation72_spill] sm:$0xff] %v13663_v15  ;;  %19552 = vst [vmem:[#allocation114_spill] sm:$0xff] %v13667_v11  ;;  %v19560_v49 = vmax.f32 %v19559_v61, 0.0  ;;  %v19563_v63 = vmax.f32 %v19562_v8, 0.0  ;;  %v19565_v15 = vld [vmem:[#allocation22_spill] sm:$0xff]  ;;  %v19568_v11 = vld [vmem:[#allocation19_spill] sm:$0xff] }
 0x1af   : > { %19555 = vst [vmem:[#allocation106_spill] sm:$0xff] %v13671_v14  ;;  %19558 = vst [vmem:[#allocation74_spill] sm:$0xff] %v13675_v57  ;;  %v19566_v46 = vmax.f32 %v19565_v15, 0.0  ;;  %v19569_v43 = vmax.f32 %v19568_v11, 0.0  ;;  %v19571_v14 = vld [vmem:[#allocation21_spill] sm:$0xff]  ;;  %v19574_v57 = vld [vmem:[#allocation24_spill] sm:$0xff] }
 0x1b0   : > { %v13679_v31 = vmul.f32 %v2071_v38, %v19560_v49  ;;  %v13683_v13 = vmul.f32 %v2071_v38, %v19563_v63  ;;  %v19572_v56 = vmax.f32 %v19571_v14, 0.0  ;;  %v19575_v61 = vmax.f32 %v19574_v57, 0.0  ;;  %v19577_v63 = vld [vmem:[#allocation29_spill] sm:$0xff]  ;;  %11210 = vxpose.xlu0.b32.cont [14/16] (narrow) %v13509_v35, 32 }
 0x1b1   : > { %v13687_v19 = vmul.f32 %v2071_v38, %v19566_v46  ;;  %v13691_v59 = vmul.f32 %v2071_v38, %v19569_v43  ;;  %v19578_v8 = vmax.f32 %v19577_v63, 0.0  ;;  %v19580_v46 = vld [vmem:[#allocation23_spill] sm:$0xff]  ;;  %v19593_v63 = vmax.f32 %v19592_v28, 0.0 }
 0x1b2   : > { %19561 = vst [vmem:[#allocation31_spill] sm:$0xff] %v13679_v31  ;;  %19564 = vst [vmem:[#allocation103_spill] sm:$0xff] %v13683_v13  ;;  %v13695_v24 = vmul.f32 %v2071_v38, %v19572_v56  ;;  %v13699_v49 = vmul.f32 %v2071_v38, %v19575_v61  ;;  %v19581_v15 = vmax.f32 %v19580_v46, 0.0  ;;  %v19583_v43 = vld [vmem:[#allocation27_spill] sm:$0xff]  ;;  %v19589_v61 = vld [vmem:[#allocation44_spill] sm:$0xff]  ;;  %v4004_v35 = vmul.f32 %v19478_v50, %v13309_v2 }
 0x1b3   : > { %19567 = vst [vmem:[#allocation71_spill] sm:$0xff] %v13687_v19  ;;  %19570 = vst [vmem:[#allocation34_spill] sm:$0xff] %v13691_v59  ;;  %v13704_v13 = vmul.f32 %v2071_v38, %v19578_v8  ;;  %v19584_v11 = vmax.f32 %v19583_v43, 0.0  ;;  %v19586_v56 = vld [vmem:[#allocation39_spill] sm:$0xff]  ;;  %v19590_v57 = vmax.f32 %v19589_v61, 0.0  ;;  %v13724_v8 = vmul.f32 %v2071_v38, %v19593_v63  ;;  %v19645_v31 = vld [vmem:[#allocation57_spill] sm:$0xff] }
 0x1b4   : > { %19573 = vst [vmem:[#allocation110_spill] sm:$0xff] %v13695_v24  ;;  %19576 = vst [vmem:[#allocation65_spill] sm:$0xff] %v13699_v49  ;;  %v13708_v19 = vmul.f32 %v2071_v38, %v19581_v15  ;;  %v19587_v14 = vmax.f32 %v19586_v56, 0.0  ;;  %11212 = vxpose.xlu0.b32.cont [15/16] (narrow) %v13465_v3, 32  ;;  %v13818_v3 = vld [vmem:[#allocation2 + $0x108] sm:$0xff] }
 0x1b5   : > { %19579 = vst [vmem:[#allocation14_spill] sm:$0xff] %v13704_v13  ;;  %v13712_v59 = vmul.f32 %v2071_v38, %v19584_v11  ;;  %v13720_v49 = vmul.f32 %v2071_v38, %v19590_v57  ;;  %19594 = vst [vmem:[#allocation61_spill] sm:$0xff] %v13724_v8  ;;  %v19595_v13 = vld [vmem:[#allocation43_spill] sm:$0xff]  ;;  %v19610_v8 = vld [vmem:[#allocation53_spill] sm:$0xff] }
 0x1b6   : > { %19582 = vst [vmem:[#allocation32_spill] sm:$0xff] %v13708_v19  ;;  %v13716_v24 = vmul.f32 %v2071_v38, %v19587_v14  ;;  %v19596_v46 = vmax.f32 %v19595_v13, 0.0  ;;  %v19598_v19 = vld [vmem:[#allocation46_spill] sm:$0xff]  ;;  %v19611_v13 = vmax.f32 %v19610_v8, 0.0  ;;  %19642 = vst [vmem:[#allocation125_spill] sm:$0xff] %v13818_v3 }
 0x1b7   : > { %19585 = vst [vmem:[#allocation105_spill] sm:$0xff] %v13712_v59  ;;  %19591 = vst [vmem:[#allocation40_spill] sm:$0xff] %v13720_v49  ;;  %v19599_v43 = vmax.f32 %v19598_v19, 0.0  ;;  %v19601_v59 = vld [vmem:[#allocation48_spill] sm:$0xff]  ;;  %v19607_v49 = vld [vmem:[#allocation47_spill] sm:$0xff] }
 0x1b8   : > { %19588 = vst [vmem:[#allocation42_spill] sm:$0xff] %v13716_v24  ;;  %v13728_v15 = vmul.f32 %v2071_v38, %v19596_v46  ;;  %v19602_v56 = vmax.f32 %v19601_v59, 0.0  ;;  %v19604_v24 = vld [vmem:[#allocation45_spill] sm:$0xff]  ;;  %v19608_v28 = vmax.f32 %v19607_v49, 0.0  ;;  %v13748_v46 = vmul.f32 %v2071_v38, %v19611_v13  ;;  %v19625_v13 = vld [vmem:[#allocation67_spill] sm:$0xff] }
 0x1b9   : > { %v13732_v11 = vmul.f32 %v2071_v38, %v19599_v43  ;;  %v19605_v61 = vmax.f32 %v19604_v24, 0.0  ;;  %v19626_v8 = vmax.f32 %v19625_v13, 0.0 }
 0x1ba   : > { %19597 = vst [vmem:[#allocation64_spill] sm:$0xff] %v13728_v15  ;;  %v13736_v14 = vmul.f32 %v2071_v38, %v19602_v56  ;;  %v13744_v63 = vmul.f32 %v2071_v38, %v19608_v28  ;;  %19612 = vst [vmem:[#allocation96_spill] sm:$0xff] %v13748_v46  ;;  %v19613_v15 = vld [vmem:[#allocation25_spill] sm:$0xff] }
 0x1bb   : > { %19600 = vst [vmem:[#allocation63_spill] sm:$0xff] %v13732_v11  ;;  %v13740_v57 = vmul.f32 %v2071_v38, %v19605_v61  ;;  %v19614_v19 = vmax.f32 %v19613_v15, 0.0  ;;  %v19616_v11 = vld [vmem:[#allocation50_spill] sm:$0xff]  ;;  %v13769_v46 = vmul.f32 %v2071_v38, %v19626_v8  ;;  %v13785_v8 = vmul.f32 %v19485_v1, %v13316_v25 }
 0x1bc   : > { %19603 = vst [vmem:[#allocation89_spill] sm:$0xff] %v13736_v14  ;;  %19609 = vst [vmem:[#allocation93_spill] sm:$0xff] %v13744_v63  ;;  %v19617_v59 = vmax.f32 %v19616_v11, 0.0  ;;  %v19619_v14 = vld [vmem:[#allocation55_spill] sm:$0xff]  ;;  %v3412_v11 = vadd.f32 %v3380_v45, %v3308_v4  ;;  %v13793_v45 = vmul.f32 %v13417_v18, %v13477_v5  ;;  %v19635_v4 = vld [vmem:[#allocation26_spill] sm:$0xff] }
 0x1bd   : > { %19606 = vst [vmem:[#allocation90_spill] sm:$0xff] %v13740_v57  ;;  %v13752_v43 = vmul.f32 %v2071_v38, %v19614_v19  ;;  %v19620_v24 = vmax.f32 %v19619_v14, 0.0  ;;  %v19622_v57 = vld [vmem:[#allocation38_spill] sm:$0xff]  ;;  %19627 = vst [vmem:[#allocation119_spill] sm:$0xff] %v13769_v46  ;;  %v19628_v19 = vld [vmem:[#allocation37_spill] sm:$0xff] }
 0x1be   : > { %v13756_v56 = vmul.f32 %v2071_v38, %v19617_v59  ;;  %v19623_v49 = vmax.f32 %v19622_v57, 0.0  ;;  %v19629_v15 = vmax.f32 %v19628_v19, 0.0  ;;  %v3411_v59 = vadd.f32 %v3379_v42, %v3307_v16  ;;  %v13814_v57 = vld [vmem:[#allocation2 + $0x10e] sm:$0xff] }
 0x1bf   : > { %19615 = vst [vmem:[#allocation97_spill] sm:$0xff] %v13752_v43  ;;  %v13760_v61 = vmul.f32 %v2071_v38, %v19620_v24  ;;  %v3516_v19 = vadd.f32 %v3484_v44, %v3412_v11  ;;  %v13789_v42 = vmul.f32 %v19485_v1, %v13337_v30  ;;  %v13800_v16 = vmul.f32 %v13417_v18, %v13479_v52  ;;  %v19637_v44 = vld [vmem:[#allocation30_spill] sm:$0xff]  ;;  %v19644_v63 = vld [vmem:[#allocation80_spill] sm:$0xff] }
 0x1c0   : > { %19618 = vst [vmem:[#allocation79_spill] sm:$0xff] %v13756_v56  ;;  %v13764_v28 = vmul.f32 %v2071_v38, %v19623_v49  ;;  %v13773_v43 = vmul.f32 %v2071_v38, %v19629_v15  ;;  %v19631_v56 = vld [vmem:[#allocation62_spill] sm:$0xff]  ;;  %v4003_v49 = vmul.f32 %v19478_v50, %v13304_v48  ;;  %v3515_v13 = vadd.f32 %v3483_v7, %v3411_v59  ;;  %v19636_v15 = vld [vmem:[#allocation73_spill] sm:$0xff]  ;;  %v19639_v59 = vld [vmem:[#allocation75_spill] sm:$0xff] }
 0x1c1   : > { %19621 = vst [vmem:[#allocation117_spill] sm:$0xff] %v13760_v61  ;;  %v19632_v14 = vmax.f32 %v19631_v56, 0.0  ;;  %v13804_v7 = vmul.f32 %v19636_v15, %v19635_v4  ;;  %v13808_v11 = vmul.f32 %v19636_v15, %v19637_v44  ;;  %19640 = vst [vmem:[#allocation123_spill] sm:$0xff] %v13814_v57  ;;  %v3620_v46 = vadd.f32 %v13622_v23, %v3516_v19  ;;  %v13830_v15 = vld [vmem:[#allocation2 + $0x10f] sm:$0xff]  ;;  %v19650_v50 = vld [vmem:[#allocation113_spill] sm:$0xff] }
 0x1c2   : > { %19624 = vst [vmem:[#allocation118_spill] sm:$0xff] %v13764_v28  ;;  %19630 = vst [vmem:[#allocation120_spill] sm:$0xff] %v13773_v43  ;;  %v3619_v43 = vadd.f32 %v13618_v10, %v3515_v13  ;;  %v19643_v28 = vld [vmem:[#allocation54_spill] sm:$0xff]  ;;  %v13828_v6 = vmul.f32 %v19645_v31, %v19644_v63  ;;  %v13832_v18 = vld [vmem:[#allocation2 + $0x110] sm:$0xff]  ;;  %v13838_v26 = vmul.f32 %v19645_v31, %v19650_v50 }
 0x1c3   : > { %v13777_v24 = vmul.f32 %v2071_v38, %v19632_v14  ;;  %v13795_v38 = vld [vmem:[#allocation2 + $0x106] sm:$0xff]  ;;  %v13824_v61 = vmul.f32 %v19639_v59, %v19643_v28  ;;  %19647 = vst [vmem:[#allocation127_spill] sm:$0xff] %v13830_v15  ;;  %19648 = vst [vmem:[#allocation128_spill] sm:$0xff] %v13832_v18  ;;  %v19651_v10 = vld [vmem:[#allocation49_spill] sm:$0xff]  ;;  %v3724_v28 = vadd.f32 %v13631_v53, %v3620_v46 }
 0x1c4   : > { %19634 = vst [vmem:[#allocation122_spill] sm:$0xff] %v13795_v38  ;;  %v19638_v14 = vld [vmem:[#allocation58_spill] sm:$0xff]  ;;  %19646 = vst [vmem:[#allocation126_spill] sm:$0xff] %v13828_v6  ;;  %v13834_v1 = vld [vmem:[#allocation2 + $0x109] sm:$0xff]  ;;  %v3723_v63 = vadd.f32 %v13626_v20, %v3619_v43 }
 0x1c5   : > { %19633 = vst [vmem:[#allocation121_spill] sm:$0xff] %v13777_v24  ;;  %v13812_v56 = vmul.f32 %v19639_v59, %v19638_v14  ;;  %v13816_v24 = vld [vmem:[#allocation2 + $0x107] sm:$0xff]  ;;  %19649 = vst [vmem:[#allocation129_spill] sm:$0xff] %v13834_v1  ;;  %v19652_v23 = vld [vmem:[#allocation28_spill] sm:$0xff] }
 0x1c6   : > { %19641 = vst [vmem:[#allocation124_spill] sm:$0xff] %v13816_v24  ;;  %v13842_v13 = vmul.f32 %v19652_v23, %v19651_v10  ;;  %v13846_v19 = vmul.f32 %v19652_v23, %v13570_v29  ;;  %v19655_v59 = vld [vmem:[#allocation17_spill] sm:$0xff]  ;;  %v19658_v50 = vld [vmem:[#allocation51_spill] sm:$0xff]  ;;  %v19667_v43 = vld [vmem:[#allocation68_spill] sm:$0xff] }
 0x1c7   : > { %v13850_v6 = vmul.f32 %v19655_v59, %v13795_v38  ;;  %v13856_v31 = vmul.f32 %v19655_v59, %v13814_v57  ;;  %v13860_v10 = vmul.f32 %v19658_v50, %v13816_v24  ;;  %v13864_v23 = vld [vmem:[#allocation2 + $0x10a] sm:$0xff]  ;;  %v13881_v59 = vmul.f32 %v19667_v43, %v13834_v1  ;;  %v19673_v1 = vld [vmem:[#allocation109_spill] sm:$0xff] }
 0x1c8   : > { %19653 = vst [vmem:[#allocation130_spill] sm:$0xff] %v13842_v13  ;;  %19654 = vst [vmem:[#allocation131_spill] sm:$0xff] %v13846_v19  ;;  %v13862_v13 = vld [vmem:[#allocation2 + $0x111] sm:$0xff]  ;;  %v19664_v20 = vld [vmem:[#allocation107_spill] sm:$0xff] }
 0x1c9   : > { %19656 = vst [vmem:[#allocation132_spill] sm:$0xff] %v13850_v6  ;;  %19657 = vst [vmem:[#allocation133_spill] sm:$0xff] %v13856_v31  ;;  %v19662_v19 = vld [vmem:[#allocation52_spill] sm:$0xff]  ;;  %v13869_v6 = vmul.f32 %v19658_v50, %v13830_v15  ;;  %v13873_v53 = vmul.f32 %v19664_v20, %v13818_v3  ;;  %v13877_v46 = vmul.f32 %v19664_v20, %v13832_v18  ;;  %v19670_v50 = vld [vmem:[#allocation15_spill] sm:$0xff] }
 0x1ca   : > { %19659 = vst [vmem:[#allocation134_spill] sm:$0xff] %v13860_v10  ;;  %19660 = vst [vmem:[#allocation135_spill] sm:$0xff] %v13862_v13  ;;  %11214 = vxpose.xlu0.b32.end [16/16] (narrow) %v19662_v19, 32  ;;  %v13883_v10 = vld [vmem:[#allocation2 + $0x112] sm:$0xff]  ;;  %v3827_v19 = vadd.f32 %v13635_v34, %v3723_v63  ;;  %v3828_v31 = vadd.f32 %v13639_v55, %v3724_v28  ;;  %v13893_v20 = vmul.f32 %v19667_v43, %v13862_v13 }
 0x1cb   : > { %19661 = vst [vmem:[#allocation136_spill] sm:$0xff] %v13864_v23  ;;  %19663 = vst [vmem:[#allocation52_spill] sm:$0xff] %v13869_v6  ;;  %v2652_v6 = vmul.f32 %v13593_v27, %v19670_v50  ;;  %v2757_v34 = vmul.f32 %v19673_v1, %v19467_v51  ;;  %v19674_v63 = vld [vmem:[#allocation76_spill] sm:$0xff]  ;;  %v13915_v51 = vld [vmem:[%s19265_s21 + $0x3] ss:$0 sm:$0xff] }
 0x1cc   : > { %19665 = vst [vmem:[#allocation137_spill] sm:$0xff] %v13873_v53  ;;  %19666 = vst [vmem:[#allocation138_spill] sm:$0xff] %v13877_v46  ;;  %v2653_v53 = vmul.f32 %v13597_v40, %v19670_v50  ;;  %v13897_v46 = vmul.f32 %v13583_v9, %v13864_v23  ;;  %v3931_v55 = vadd.f32 %v13647_v22, %v3827_v19 }
 0x1cd   : > { %19668 = vst [vmem:[#allocation68_spill] sm:$0xff] %v13881_v59  ;;  %19669 = vst [vmem:[#allocation139_spill] sm:$0xff] %v13883_v10  ;;  %v11492_v59 = vld [vmem:[#allocation2 + $0xa7] sm:$0xff]  ;;  %v3932_v27 = vadd.f32 %v13651_v12, %v3828_v31  ;;  %v13906_v40 = vmul.f32 %v13583_v9, %v13883_v10  ;;  %v2860_v28 = vmul.f32 %v19674_v63, %v19472_v33  ;;  %v13924_v33 = vld [vmem:[%s19265_s21 + $0x4] ss:$0 sm:$0xff] }
 0x1ce   : > { %19671 = vst [vmem:[#allocation140_spill] sm:$0xff] %v13893_v20  ;;  %19672 = vst [vmem:[#allocation141_spill] sm:$0xff] %v13897_v46  ;;  %v2756_v18 = vmul.f32 %v11492_v59, %v19673_v1  ;;  %v2789_v20 = vadd.f32 %v2757_v34, %v2653_v53  ;;  %v2861_v46 = vmul.f32 %v19674_v63, %v19474_v39 }
 0x1cf   : > { %19675 = vst [vmem:[#allocation109_spill] sm:$0xff] %v13915_v51  ;;  %v2964_v22 = vmul.f32 %v13915_v51, %v19477_v21  ;;  %v4035_v12 = vadd.f32 %v4003_v49, %v3931_v55  ;;  %v4036_v31 = vadd.f32 %v4004_v35, %v3932_v27  ;;  %v2965_v59 = vmul.f32 %v13915_v51, %v19480_v60  ;;  %v13933_v21 = vld [vmem:[%s19265_s21 + $0x5] ss:$0 sm:$0xff] }
 0x1d0   : > { %v2788_v50 = vadd.f32 %v2756_v18, %v2652_v6  ;;  %19676 = vst [vmem:[#allocation76_spill] sm:$0xff] %v13924_v33  ;;  %v3068_v39 = vmul.f32 %v13924_v33, %v19484_v37  ;;  %v2893_v6 = vadd.f32 %v2861_v46, %v2789_v20  ;;  %v3069_v53 = vmul.f32 %v13924_v33, %v13139_v36 }
 0x1d1   : > { %19677 = vst [vmem:[#allocation142_spill] sm:$0xff] %v13933_v21  ;;  %v3173_v60 = vmul.f32 %v13933_v21, %v13272_v47  ;;  %v4139_v49 = vadd.f32 %v13785_v8, %v4035_v12  ;;  %v4140_v35 = vadd.f32 %v13789_v42, %v4036_v31  ;;  %v3174_v37 = vmul.f32 %v13933_v21, %v13274_v54  ;;  %v13953_v8 = vld [vmem:[%s19265_s21 + $0x7] ss:$0 sm:$0xff] }
 0x1d2   : > { %v2892_v18 = vadd.f32 %v2860_v28, %v2788_v50  ;;  %v13944_v50 = vld [vmem:[%s19265_s21 + $0x6] ss:$0 sm:$0xff]  ;;  %v2997_v46 = vadd.f32 %v2965_v59, %v2893_v6  ;;  %19679 = vst [vmem:[#allocation144_spill] sm:$0xff] %v13953_v8  ;;  %v3381_v42 = vmul.f32 %v13953_v8, %v13291_v17  ;;  %v3382_v27 = vmul.f32 %v13953_v8, %v13302_v41  ;;  %v13964_v28 = vld [vmem:[%s19265_s21 + $0x8] ss:$0 sm:$0xff] }
 0x1d3   : > { %19678 = vst [vmem:[#allocation143_spill] sm:$0xff] %v13944_v50  ;;  %v3277_v36 = vmul.f32 %v13944_v50, %v13281_v58  ;;  %v3278_v19 = vmul.f32 %v13944_v50, %v19497_v32  ;;  %v4244_v34 = vadd.f32 %v13793_v45, %v4139_v49  ;;  %v4245_v55 = vadd.f32 %v13800_v16, %v4140_v35  ;;  %v13973_v45 = vld [vmem:[%s19265_s21 + $0x9] ss:$0 sm:$0xff]  ;;  %v19686_v50 = vld [vmem:[#allocation126_spill] sm:$0xff] }
 0x1d4   : > { %v2996_v20 = vadd.f32 %v2964_v22, %v2892_v18  ;;  %19680 = vst [vmem:[#allocation145_spill] sm:$0xff] %v13964_v28  ;;  %v3485_v22 = vmul.f32 %v13964_v28, %v13304_v48  ;;  %v3101_v31 = vadd.f32 %v3069_v53, %v2997_v46  ;;  %v3486_v59 = vmul.f32 %v13964_v28, %v13309_v2 }
 0x1d5   : > { %19681 = vst [vmem:[#allocation146_spill] sm:$0xff] %v13973_v45  ;;  %v3589_v16 = vmul.f32 %v13973_v45, %v13316_v25  ;;  %v4348_v18 = vadd.f32 %v13804_v7, %v4244_v34  ;;  %v4349_v6 = vadd.f32 %v13808_v11, %v4245_v55  ;;  %v3590_v49 = vmul.f32 %v13973_v45, %v13337_v30  ;;  %v19682_v34 = vld [vmem:[#allocation35_spill] sm:$0xff] }
 0x1d6   : > { %v3100_v12 = vadd.f32 %v3068_v39, %v2996_v20  ;;  %v3693_v39 = vmul.f32 %v13159_v0, %v13477_v5  ;;  %v3206_v35 = vadd.f32 %v3174_v37, %v3101_v31  ;;  %v3694_v20 = vmul.f32 %v13159_v0, %v13479_v52  ;;  %v19685_v0 = vld [vmem:[#allocation36_spill] sm:$0xff] }
 0x1d7   : > { %v3797_v46 = vmul.f32 %v19465_v62, %v19635_v4  ;;  %v4452_v28 = vadd.f32 %v13812_v56, %v4348_v18  ;;  %v4453_v7 = vadd.f32 %v13824_v61, %v4349_v6  ;;  %v3798_v11 = vmul.f32 %v19465_v62, %v19637_v44  ;;  %v19687_v18 = vld [vmem:[#allocation113_spill] sm:$0xff]  ;;  %v19689_v62 = vld [vmem:[#allocation60_spill] sm:$0xff] }
 0x1d8   : > { %v3205_v53 = vadd.f32 %v3173_v60, %v3100_v12  ;;  %v3901_v55 = vmul.f32 %v19682_v34, %v19638_v14  ;;  %v3310_v8 = vadd.f32 %v3278_v19, %v3206_v35  ;;  %v19683_v60 = vld [vmem:[#allocation54_spill] sm:$0xff]  ;;  %v19684_v12 = vld [vmem:[#allocation80_spill] sm:$0xff]  ;;  %v4006_v61 = vmul.f32 %v19685_v0, %v19687_v18  ;;  %v19688_v6 = vld [vmem:[#allocation49_spill] sm:$0xff] }
 0x1d9   : > { %v3902_v37 = vmul.f32 %v19682_v34, %v19683_v60  ;;  %v4005_v31 = vmul.f32 %v19685_v0, %v19684_v12  ;;  %v4556_v4 = vadd.f32 %v19686_v50, %v4452_v28  ;;  %v4557_v56 = vadd.f32 %v13838_v26, %v4453_v7  ;;  %v19691_v50 = vld [vmem:[#allocation130_spill] sm:$0xff]  ;;  %v19692_v26 = vld [vmem:[#allocation131_spill] sm:$0xff]  ;;  %v19693_v0 = vld [vmem:[#allocation73_spill] sm:$0xff] }
 0x1da   : > { %v3309_v45 = vadd.f32 %v3277_v36, %v3205_v53  ;;  %v14003_v44 = vmul.f32 %v19689_v62, %v19688_v6  ;;  %v3414_v36 = vadd.f32 %v3382_v27, %v3310_v8  ;;  %v14007_v19 = vmul.f32 %v19689_v62, %v13570_v29  ;;  %v19690_v53 = vld [vmem:[#allocation70_spill] sm:$0xff]  ;;  %v19694_v62 = vld [vmem:[#allocation75_spill] sm:$0xff] }
 0x1db   : > { %v14011_v35 = vmul.f32 %v19690_v53, %v13795_v38  ;;  %v4660_v28 = vadd.f32 %v19691_v50, %v4556_v4  ;;  %v4661_v7 = vadd.f32 %v19692_v26, %v4557_v56  ;;  %v14017_v34 = vmul.f32 %v19690_v53, %v13814_v57  ;;  %v14031_v4 = vld [vmem:[#allocation2 + $0x126] sm:$0xff]  ;;  %v19696_v56 = vld [vmem:[#allocation132_spill] sm:$0xff]  ;;  %v19697_v26 = vld [vmem:[#allocation133_spill] sm:$0xff] }
 0x1dc   : > { %v3413_v14 = vadd.f32 %v3381_v42, %v3309_v45  ;;  %v14021_v42 = vmul.f32 %v19693_v0, %v13816_v24  ;;  %v3518_v27 = vadd.f32 %v3486_v59, %v3414_v36  ;;  %v14025_v45 = vmul.f32 %v19693_v0, %v13830_v15  ;;  %19695 = vst [vmem:[#allocation35_spill] sm:$0xff] %v14031_v4  ;;  %v19698_v57 = vld [vmem:[#allocation128_spill] sm:$0xff]  ;;  %v14045_v0 = vld [vmem:[#allocation2 + $0x127] sm:$0xff] }
 0x1dd   : > { %v14029_v38 = vmul.f32 %v19694_v62, %v13818_v3  ;;  %v4765_v50 = vadd.f32 %v19696_v56, %v4660_v28  ;;  %v4766_v53 = vadd.f32 %v19697_v26, %v4661_v7  ;;  %v14037_v24 = vmul.f32 %v19694_v62, %v19698_v57  ;;  %v14043_v36 = vld [vmem:[#allocation2 + $0x12e] sm:$0xff]  ;;  %19703 = vst [vmem:[#allocation36_spill] sm:$0xff] %v14045_v0  ;;  %v19708_v62 = vld [vmem:[#allocation134_spill] sm:$0xff] }
 0x1de   : > { %v3517_v8 = vadd.f32 %v3485_v22, %v3413_v14  ;;  %v19699_v14 = vld [vmem:[#allocation129_spill] sm:$0xff]  ;;  %19702 = vst [vmem:[#allocation80_spill] sm:$0xff] %v14043_v36  ;;  %v3622_v15 = vadd.f32 %v3590_v49, %v3518_v27  ;;  %v19704_v28 = vld [vmem:[#allocation28_spill] sm:$0xff]  ;;  %v14057_v26 = vld [vmem:[#allocation2 + $0x128] sm:$0xff] }
 0x1df   : > { %v19700_v22 = vld [vmem:[#allocation57_spill] sm:$0xff]  ;;  %v14053_v7 = vmul.f32 %v19704_v28, %v13864_v23  ;;  %v14055_v56 = vld [vmem:[#allocation2 + $0x12f] sm:$0xff]  ;;  %19707 = vst [vmem:[#allocation49_spill] sm:$0xff] %v14057_v26 }
 0x1e0   : > { %v14041_v59 = vmul.f32 %v19700_v22, %v19699_v14  ;;  %v3621_v3 = vadd.f32 %v3589_v16, %v3517_v8  ;;  %v14049_v29 = vmul.f32 %v19700_v22, %v13862_v13  ;;  %19706 = vst [vmem:[#allocation113_spill] sm:$0xff] %v14055_v56  ;;  %v4869_v14 = vadd.f32 %v19708_v62, %v4765_v50  ;;  %v19709_v57 = vld [vmem:[#allocation52_spill] sm:$0xff]  ;;  %v19710_v49 = vld [vmem:[#allocation17_spill] sm:$0xff] }
 0x1e1   : > { %19705 = vst [vmem:[#allocation126_spill] sm:$0xff] %v14053_v7  ;;  %v14063_v16 = vmul.f32 %v19704_v28, %v13883_v10  ;;  %v14067_v8 = vmul.f32 %v19710_v49, %v14031_v4  ;;  %v14069_v27 = vld [vmem:[#allocation2 + $0x130] sm:$0xff]  ;;  %v3726_v13 = vadd.f32 %v3694_v20, %v3622_v15  ;;  %v14075_v7 = vmul.f32 %v19710_v49, %v14043_v36  ;;  %v19715_v62 = vld [vmem:[#allocation137_spill] sm:$0xff]  ;;  %v19716_v28 = vld [vmem:[#allocation138_spill] sm:$0xff] }
 0x1e2   : > { %19701 = vst [vmem:[#allocation54_spill] sm:$0xff] %v14041_v59  ;;  %v4870_v59 = vadd.f32 %v19709_v57, %v4766_v53  ;;  %19712 = vst [vmem:[#allocation130_spill] sm:$0xff] %v14069_v27  ;;  %v14071_v22 = vld [vmem:[#allocation2 + $0x129] sm:$0xff]  ;;  %v3725_v23 = vadd.f32 %v3693_v39, %v3621_v3  ;;  %v4973_v50 = vadd.f32 %v19715_v62, %v4869_v14  ;;  %v14095_v49 = vld [vmem:[#allocation2 + $0x131] sm:$0xff] }
 0x1e3   : > { %19711 = vst [vmem:[#allocation60_spill] sm:$0xff] %v14067_v8  ;;  %19713 = vst [vmem:[#allocation131_spill] sm:$0xff] %v14071_v22  ;;  %v19714_v57 = vld [vmem:[#allocation51_spill] sm:$0xff]  ;;  %v3830_v39 = vadd.f32 %v3798_v11, %v3726_v13  ;;  %v14099_v14 = vmul.f32 %v19667_v43, %v14071_v22  ;;  %v19722_v62 = vld [vmem:[#allocation140_spill] sm:$0xff] }
 0x1e4   : > { %v14079_v53 = vmul.f32 %v19714_v57, %v14045_v0  ;;  %v4974_v10 = vadd.f32 %v19716_v28, %v4870_v59  ;;  %v14085_v4 = vmul.f32 %v19714_v57, %v14055_v56  ;;  %v19718_v8 = vld [vmem:[#allocation107_spill] sm:$0xff]  ;;  %v3829_v15 = vadd.f32 %v3797_v46, %v3725_v23  ;;  %19719 = vst [vmem:[#allocation133_spill] sm:$0xff] %v14095_v49  ;;  %v19721_v59 = vld [vmem:[#allocation68_spill] sm:$0xff] }
 0x1e5   : > { %v14089_v3 = vmul.f32 %v19718_v8, %v14057_v26  ;;  %v14093_v20 = vmul.f32 %v19718_v8, %v14069_v27  ;;  %19720 = vst [vmem:[#allocation134_spill] sm:$0xff] %v14099_v14  ;;  %v5077_v28 = vadd.f32 %v19721_v59, %v4973_v50  ;;  %v3934_v46 = vadd.f32 %v3902_v37, %v3830_v39  ;;  %v14107_v11 = vld [vmem:[#allocation2 + $0x12a] sm:$0xff]  ;;  %v19726_v59 = vld [vmem:[#allocation141_spill] sm:$0xff] }
 0x1e6   : > { %19717 = vst [vmem:[#allocation132_spill] sm:$0xff] %v14085_v4  ;;  %v5078_v57 = vadd.f32 %v19722_v62, %v4974_v10  ;;  %v19723_v4 = vld [vmem:[#allocation15_spill] sm:$0xff]  ;;  %v3933_v13 = vadd.f32 %v3901_v55, %v3829_v15  ;;  %19724 = vst [vmem:[#allocation52_spill] sm:$0xff] %v14107_v11  ;;  %v2758_v8 = vmul.f32 %v19673_v1, %v13281_v58  ;;  %v14122_v15 = vld [vmem:[#allocation2 + $0x132] sm:$0xff] }
 0x1e7   : > { %v2654_v26 = vmul.f32 %v19723_v4, %v13272_v47  ;;  %v2655_v23 = vmul.f32 %v19723_v4, %v13274_v54  ;;  %v2759_v14 = vmul.f32 %v19673_v1, %v19497_v32  ;;  %v14116_v10 = vmul.f32 %v19667_v43, %v14095_v49  ;;  %19725 = vst [vmem:[#allocation137_spill] sm:$0xff] %v14122_v15 }
 0x1e8   : > { %v5182_v50 = vadd.f32 %v13906_v40, %v5078_v57  ;;  %v2862_v47 = vmul.f32 %v19674_v63, %v13291_v17  ;;  %v2863_v54 = vmul.f32 %v19674_v63, %v13302_v41  ;;  %v4037_v55 = vadd.f32 %v4005_v31, %v3933_v13 }
 0x1e9   : > { %v4038_v37 = vadd.f32 %v4006_v61, %v3934_v46  ;;  %v2790_v58 = vadd.f32 %v2758_v8, %v2654_v26  ;;  %v2791_v39 = vadd.f32 %v2759_v14, %v2655_v23  ;;  %v5181_v32 = vadd.f32 %v19726_v59, %v5077_v28  ;;  %v19728_v46 = vld [vmem:[#allocation26_spill] sm:$0xff] }
 0x1ea   : > { %v14127_v40 = vmul.f32 %v13583_v9, %v14107_v11  ;;  %v2966_v57 = vmul.f32 %v13915_v51, %v13304_v48  ;;  %v2967_v17 = vmul.f32 %v13915_v51, %v13309_v2  ;;  %v4141_v41 = vadd.f32 %v14003_v44, %v4037_v55 }
 0x1eb   : > { %v4142_v31 = vadd.f32 %v14007_v19, %v4038_v37  ;;  %v2894_v61 = vadd.f32 %v2862_v47, %v2790_v58  ;;  %v2895_v62 = vadd.f32 %v2863_v54, %v2791_v39  ;;  %v14135_v26 = vpack.c.bf16 %v5182_v50, %v5181_v32  ;;  %v19729_v50 = vld [vmem:[#allocation143_spill] sm:$0xff]  ;;  %v19730_v54 = vld [vmem:[#allocation30_spill] sm:$0xff]  ;;  %v19732_v58 = vld [vmem:[#allocation144_spill] sm:$0xff] }
 0x1ec   : > { %v14139_v8 = vmul.f32 %v13583_v9, %v14122_v15  ;;  %v3070_v14 = vmul.f32 %v13924_v33, %v13316_v25  ;;  %v3071_v48 = vmul.f32 %v13924_v33, %v13337_v30  ;;  %v4246_v2 = vadd.f32 %v14011_v35, %v4141_v41  ;;  %v19731_v37 = vld [vmem:[#allocation58_spill] sm:$0xff]  ;;  %v19733_v32 = vld [vmem:[#allocation145_spill] sm:$0xff] }
 0x1ed   : > { %19727 = vst [vmem:[#allocation138_spill] sm:$0xff] %v14135_v26  ;;  %v4247_v44 = vadd.f32 %v14017_v34, %v4142_v31  ;;  %v2998_v28 = vadd.f32 %v2966_v57, %v2894_v61  ;;  %v2999_v19 = vadd.f32 %v2967_v17, %v2895_v62  ;;  %v3175_v23 = vmul.f32 %v13933_v21, %v13477_v5  ;;  %v19734_v61 = vld [vmem:[#allocation146_spill] sm:$0xff] }
 0x1ee   : > { %v3176_v13 = vmul.f32 %v13933_v21, %v13479_v52  ;;  %v3279_v47 = vmul.f32 %v19729_v50, %v19728_v46  ;;  %v3280_v25 = vmul.f32 %v19729_v50, %v19730_v54  ;;  %v4350_v30 = vadd.f32 %v14021_v42, %v4246_v2  ;;  %v14174_v2 = vld [vmem:[%s19265_s21 + $0xa] ss:$0 sm:$0xff]  ;;  %v19756_v21 = vld [vmem:[#allocation73_spill] sm:$0xff] }
 0x1ef   : > { %v4351_v35 = vadd.f32 %v14025_v45, %v4247_v44  ;;  %v3102_v55 = vadd.f32 %v3070_v14, %v2998_v28  ;;  %v3103_v34 = vadd.f32 %v3071_v48, %v2999_v19  ;;  %v3383_v39 = vmul.f32 %v19732_v58, %v19731_v37  ;;  %v19735_v14 = vld [vmem:[#allocation111_spill] sm:$0xff]  ;;  %19736 = vst [vmem:[#allocation68_spill] sm:$0xff] %v14174_v2  ;;  %v19737_v44 = vld [vmem:[#allocation122_spill] sm:$0xff] }
 0x1f0   : > { %v3384_v59 = vmul.f32 %v19732_v58, %v19683_v60  ;;  %v3487_v57 = vmul.f32 %v19733_v32, %v19684_v12  ;;  %v3488_v17 = vmul.f32 %v19733_v32, %v19687_v18  ;;  %v4454_v41 = vadd.f32 %v14029_v38, %v4350_v30  ;;  %v19738_v19 = vld [vmem:[#allocation123_spill] sm:$0xff] }
 0x1f1   : > { %v4455_v42 = vadd.f32 %v14037_v24, %v4351_v35  ;;  %v3207_v31 = vadd.f32 %v3175_v23, %v3102_v55  ;;  %v3208_v45 = vadd.f32 %v3176_v13, %v3103_v34  ;;  %v3591_v62 = vmul.f32 %v19734_v61, %v19688_v6  ;;  %v19739_v24 = vld [vmem:[#allocation54_spill] sm:$0xff]  ;;  %v14185_v55 = vld [vmem:[%s19265_s21 + $0xb] ss:$0 sm:$0xff]  ;;  %v19741_v34 = vld [vmem:[#allocation124_spill] sm:$0xff] }
 0x1f2   : > { %v3592_v48 = vmul.f32 %v19734_v61, %v19735_v14  ;;  %v3695_v28 = vmul.f32 %v14174_v2, %v19737_v44  ;;  %v3696_v38 = vmul.f32 %v14174_v2, %v19738_v19  ;;  %v4558_v23 = vadd.f32 %v19739_v24, %v4454_v41  ;;  %19740 = vst [vmem:[#allocation140_spill] sm:$0xff] %v14185_v55  ;;  %v19742_v61 = vld [vmem:[#allocation127_spill] sm:$0xff]  ;;  %v19744_v41 = vld [vmem:[#allocation125_spill] sm:$0xff]  ;;  %v19755_v19 = vld [vmem:[#allocation70_spill] sm:$0xff] }
 0x1f3   : > { %v4559_v13 = vadd.f32 %v14049_v29, %v4455_v42  ;;  %v3311_v30 = vadd.f32 %v3279_v47, %v3207_v31  ;;  %v3312_v35 = vadd.f32 %v3280_v25, %v3208_v45  ;;  %v3799_v26 = vmul.f32 %v14185_v55, %v19741_v34  ;;  %v14194_v2 = vld [vmem:[%s19265_s21 + $0xc] ss:$0 sm:$0xff]  ;;  %v19745_v47 = vld [vmem:[#allocation128_spill] sm:$0xff]  ;;  %v19746_v42 = vld [vmem:[#allocation126_spill] sm:$0xff] }
 0x1f4   : > { %v3800_v32 = vmul.f32 %v14185_v55, %v19742_v61  ;;  %19743 = vst [vmem:[#allocation15_spill] sm:$0xff] %v14194_v2  ;;  %v3903_v29 = vmul.f32 %v14194_v2, %v19744_v41  ;;  %v3904_v25 = vmul.f32 %v14194_v2, %v19745_v47  ;;  %v4662_v31 = vadd.f32 %v19746_v42, %v4558_v23  ;;  %v14205_v55 = vld [vmem:[%s19265_s21 + $0xd] ss:$0 sm:$0xff]  ;;  %v19748_v61 = vld [vmem:[#allocation129_spill] sm:$0xff]  ;;  %v14214_v2 = vld [vmem:[%s19265_s21 + $0xe] ss:$0 sm:$0xff] }
 0x1f5   : > { %v4663_v45 = vadd.f32 %v14063_v16, %v4559_v13  ;;  %v3415_v24 = vadd.f32 %v3383_v39, %v3311_v30  ;;  %v3416_v58 = vadd.f32 %v3384_v59, %v3312_v35  ;;  %19747 = vst [vmem:[#allocation141_spill] sm:$0xff] %v14205_v55  ;;  %v4007_v50 = vmul.f32 %v14205_v55, %v19748_v61  ;;  %v19749_v34 = vld [vmem:[#allocation135_spill] sm:$0xff]  ;;  %v19751_v23 = vld [vmem:[#allocation136_spill] sm:$0xff] }
 0x1f6   : > { %v4008_v41 = vmul.f32 %v14205_v55, %v19749_v34  ;;  %19750 = vst [vmem:[#allocation26_spill] sm:$0xff] %v14214_v2  ;;  %v4111_v16 = vmul.f32 %v14214_v2, %v19751_v23  ;;  %v19752_v39 = vld [vmem:[#allocation139_spill] sm:$0xff]  ;;  %v19753_v13 = vld [vmem:[#allocation60_spill] sm:$0xff]  ;;  %v4217_v34 = vmul.f32 %v19755_v19, %v14043_v36  ;;  %v14228_v44 = vmul.f32 %v19756_v21, %v14045_v0 }
 0x1f7   : > { %v4112_v59 = vmul.f32 %v14214_v2, %v19752_v39  ;;  %v4767_v30 = vadd.f32 %v19753_v13, %v4662_v31  ;;  %v4768_v35 = vadd.f32 %v14075_v7, %v4663_v45  ;;  %v3519_v42 = vadd.f32 %v3487_v57, %v3415_v24  ;;  %v19754_v47 = vld [vmem:[#allocation35_spill] sm:$0xff]  ;;  %v19757_v13 = vld [vmem:[#allocation132_spill] sm:$0xff]  ;;  %v19760_v24 = vld [vmem:[#allocation49_spill] sm:$0xff] }
 0x1f8   : > { %v3520_v61 = vadd.f32 %v3488_v17, %v3416_v58  ;;  %v4216_v55 = vmul.f32 %v19755_v19, %v19754_v47  ;;  %v14232_v23 = vmul.f32 %v19756_v21, %v14055_v56  ;;  %v14236_v17 = vld [vmem:[#allocation2 + $0x146] sm:$0xff]  ;;  %v14238_v45 = vld [vmem:[#allocation2 + $0x14e] sm:$0xff]  ;;  %v19762_v21 = vld [vmem:[#allocation57_spill] sm:$0xff] }
 0x1f9   : > { %v4871_v31 = vadd.f32 %v14079_v53, %v4767_v30  ;;  %v4872_v7 = vadd.f32 %v19757_v13, %v4768_v35  ;;  %v3623_v57 = vadd.f32 %v3591_v62, %v3519_v42  ;;  %19758 = vst [vmem:[#allocation30_spill] sm:$0xff] %v14236_v17  ;;  %19759 = vst [vmem:[#allocation58_spill] sm:$0xff] %v14238_v45  ;;  %v19761_v19 = vld [vmem:[#allocation75_spill] sm:$0xff] }
 0x1fa   : > { %v3624_v58 = vadd.f32 %v3592_v48, %v3520_v61  ;;  %v14242_v2 = vmul.f32 %v19761_v19, %v19760_v24  ;;  %v14246_v0 = vmul.f32 %v19761_v19, %v14069_v27  ;;  %v14250_v56 = vmul.f32 %v19762_v21, %v14071_v22  ;;  %v14256_v61 = vld [vmem:[#allocation2 + $0x147] sm:$0xff]  ;;  %v14260_v42 = vld [vmem:[#allocation2 + $0x14f] sm:$0xff] }
 0x1fb   : > { %v14254_v53 = vmul.f32 %v19762_v21, %v14095_v49  ;;  %v4975_v62 = vadd.f32 %v14089_v3, %v4871_v31  ;;  %v4976_v48 = vadd.f32 %v14093_v20, %v4872_v7  ;;  %v3727_v30 = vadd.f32 %v3695_v28, %v3623_v57  ;;  %v14262_v13 = vld [vmem:[#allocation2 + $0x148] sm:$0xff]  ;;  %v14264_v19 = vld [vmem:[#allocation2 + $0x150] sm:$0xff]  ;;  %v19764_v3 = vld [vmem:[#allocation17_spill] sm:$0xff] }
 0x1fc   : > { %v3728_v35 = vadd.f32 %v3696_v38, %v3624_v58  ;;  %v19763_v22 = vld [vmem:[#allocation28_spill] sm:$0xff]  ;;  %v14276_v31 = vmul.f32 %v19764_v3, %v14236_v17  ;;  %v14280_v20 = vmul.f32 %v19764_v3, %v14238_v45  ;;  %v19768_v3 = vld [vmem:[#allocation107_spill] sm:$0xff] }
 0x1fd   : > { %v14268_v27 = vmul.f32 %v19763_v22, %v14107_v11  ;;  %v14272_v21 = vmul.f32 %v19763_v22, %v14122_v15  ;;  %v14282_v28 = vld [vmem:[#allocation2 + $0x149] sm:$0xff]  ;;  %v14284_v38 = vld [vmem:[#allocation2 + $0x151] sm:$0xff]  ;;  %v5080_v7 = vadd.f32 %v14116_v10, %v4976_v48  ;;  %v3831_v57 = vadd.f32 %v3799_v26, %v3727_v30  ;;  %v19767_v15 = vld [vmem:[#allocation134_spill] sm:$0xff] }
 0x1fe   : > { %19765 = vst [vmem:[#allocation111_spill] sm:$0xff] %v14280_v20  ;;  %v3832_v58 = vadd.f32 %v3800_v32, %v3728_v35  ;;  %v19766_v11 = vld [vmem:[#allocation51_spill] sm:$0xff]  ;;  %v5079_v49 = vadd.f32 %v19767_v15, %v4975_v62  ;;  %v14298_v45 = vmul.f32 %v19768_v3, %v14262_v13  ;;  %v14302_v20 = vmul.f32 %v19768_v3, %v14264_v19 }
 0x1ff   : > { %v14289_v22 = vmul.f32 %v19766_v11, %v14256_v61  ;;  %v14294_v17 = vmul.f32 %v19766_v11, %v14260_v42  ;;  %v14304_v10 = vld [vmem:[#allocation2 + $0x14a] sm:$0xff]  ;;  %v3935_v26 = vadd.f32 %v3903_v29, %v3831_v57  ;;  %v14308_v48 = vmul.f32 %v19667_v43, %v14282_v28  ;;  %v14321_v57 = vld [vmem:[#allocation2 + $0x152] sm:$0xff] }
 0x200   : > { %v3936_v32 = vadd.f32 %v3904_v25, %v3832_v58  ;;  %v14312_v11 = vmul.f32 %v19667_v43, %v14284_v38  ;;  %v5184_v15 = vadd.f32 %v14139_v8, %v5080_v7  ;;  %v2656_v62 = vmul.f32 %v19723_v4, %v13477_v5 }
 0x201   : > { %v2657_v30 = vmul.f32 %v19723_v4, %v13479_v52  ;;  %v2760_v29 = vmul.f32 %v19673_v1, %v19728_v46  ;;  %v4039_v25 = vadd.f32 %v4007_v50, %v3935_v26  ;;  %v14325_v58 = vmul.f32 %v13583_v9, %v14304_v10 }
 0x202   : > { %v4040_v35 = vadd.f32 %v4008_v41, %v3936_v32  ;;  %v2761_v43 = vmul.f32 %v19673_v1, %v19730_v54  ;;  %v5183_v8 = vadd.f32 %v14127_v40, %v5079_v49  ;;  %v2864_v52 = vmul.f32 %v19674_v63, %v19731_v37 }
 0x203   : > { %v2792_v5 = vadd.f32 %v2760_v29, %v2656_v62  ;;  %v2968_v4 = vmul.f32 %v13915_v51, %v19684_v12  ;;  %v4143_v46 = vadd.f32 %v4111_v16, %v4039_v25  ;;  %v2865_v7 = vmul.f32 %v19674_v63, %v19683_v60  ;;  %v19770_v60 = vld [vmem:[#allocation122_spill] sm:$0xff]  ;;  %v19774_v29 = vld [vmem:[#allocation143_spill] sm:$0xff] }
 0x204   : > { %v4144_v50 = vadd.f32 %v4112_v59, %v4040_v35  ;;  %v2793_v41 = vadd.f32 %v2761_v43, %v2657_v30  ;;  %v14336_v3 = vpack.c.bf16 %v5184_v15, %v5183_v8  ;;  %v14340_v1 = vmul.f32 %v13583_v9, %v14321_v57  ;;  %v19771_v59 = vld [vmem:[#allocation142_spill] sm:$0xff]  ;;  %v19772_v15 = vld [vmem:[#allocation123_spill] sm:$0xff]  ;;  %v19776_v8 = vld [vmem:[#allocation125_spill] sm:$0xff] }
 0x205   : > { %v2896_v49 = vadd.f32 %v2864_v52, %v2792_v5  ;;  %v2969_v40 = vmul.f32 %v13915_v51, %v19687_v18  ;;  %v4248_v54 = vadd.f32 %v4216_v55, %v4143_v46  ;;  %v3072_v12 = vmul.f32 %v13924_v33, %v19688_v6  ;;  %v19775_v6 = vld [vmem:[#allocation127_spill] sm:$0xff]  ;;  %v19778_v52 = vld [vmem:[#allocation128_spill] sm:$0xff] }
 0x206   : > { %19769 = vst [vmem:[#allocation54_spill] sm:$0xff] %v14336_v3  ;;  %v4249_v37 = vadd.f32 %v4217_v34, %v4144_v50  ;;  %v2897_v26 = vadd.f32 %v2865_v7, %v2793_v41  ;;  %v3073_v63 = vmul.f32 %v13924_v33, %v19735_v14  ;;  %v3177_v32 = vmul.f32 %v19771_v59, %v19770_v60  ;;  %v19773_v34 = vld [vmem:[#allocation124_spill] sm:$0xff]  ;;  %v19780_v41 = vld [vmem:[#allocation145_spill] sm:$0xff] }
 0x207   : > { %v3000_v16 = vadd.f32 %v2968_v4, %v2896_v49  ;;  %v3178_v62 = vmul.f32 %v19771_v59, %v19772_v15  ;;  %v4352_v30 = vadd.f32 %v14228_v44, %v4248_v54  ;;  %v3281_v25 = vmul.f32 %v19774_v29, %v19773_v34  ;;  %v19777_v14 = vld [vmem:[#allocation144_spill] sm:$0xff] }
 0x208   : > { %v4353_v18 = vadd.f32 %v14232_v23, %v4249_v37  ;;  %v3001_v55 = vadd.f32 %v2969_v40, %v2897_v26  ;;  %v3282_v43 = vmul.f32 %v19774_v29, %v19775_v6  ;;  %v3385_v5 = vmul.f32 %v19777_v14, %v19776_v8  ;;  %v19779_v23 = vld [vmem:[#allocation129_spill] sm:$0xff]  ;;  %v19781_v40 = vld [vmem:[#allocation135_spill] sm:$0xff]  ;;  %v19782_v37 = vld [vmem:[#allocation136_spill] sm:$0xff] }
 0x209   : > { %v3104_v35 = vadd.f32 %v3072_v12, %v3000_v16  ;;  %v3386_v4 = vmul.f32 %v19777_v14, %v19778_v52  ;;  %v4456_v46 = vadd.f32 %v14242_v2, %v4352_v30  ;;  %v3489_v7 = vmul.f32 %v19780_v41, %v19779_v23  ;;  %v19783_v26 = vld [vmem:[#allocation146_spill] sm:$0xff]  ;;  %v19787_v14 = vld [vmem:[#allocation113_spill] sm:$0xff] }
 0x20a   : > { %v4457_v44 = vadd.f32 %v14246_v0, %v4353_v18  ;;  %v3105_v50 = vadd.f32 %v3073_v63, %v3001_v55  ;;  %v3490_v54 = vmul.f32 %v19780_v41, %v19781_v40  ;;  %v3593_v12 = vmul.f32 %v19783_v26, %v19782_v37  ;;  %v19784_v0 = vld [vmem:[#allocation68_spill] sm:$0xff] }
 0x20b   : > { %v3209_v49 = vadd.f32 %v3177_v32, %v3104_v35  ;;  %v3594_v16 = vmul.f32 %v19783_v26, %v19752_v39  ;;  %v4560_v3 = vadd.f32 %v14250_v56, %v4456_v46  ;;  %v3697_v63 = vmul.f32 %v19784_v0, %v19754_v47  ;;  %v19785_v55 = vld [vmem:[#allocation36_spill] sm:$0xff]  ;;  %v11215_v26 = vpop.trf.xlu0  ;;  %v19788_v46 = vld [vmem:[#allocation15_spill] sm:$0xff] }
 0x20c   : > { %v4561_v2 = vadd.f32 %v14254_v53, %v4457_v44  ;;  %v3210_v30 = vadd.f32 %v3178_v62, %v3105_v50  ;;  %v3698_v32 = vmul.f32 %v19784_v0, %v14043_v36  ;;  %v19786_v35 = vld [vmem:[#allocation140_spill] sm:$0xff]  ;;  %v3905_v44 = vmul.f32 %v19788_v46, %v19760_v24  ;;  %v19789_v0 = vld [vmem:[#allocation111_spill] sm:$0xff] }
 0x20d   : > { %v3313_v18 = vadd.f32 %v3281_v25, %v3209_v49  ;;  %v3801_v41 = vmul.f32 %v19786_v35, %v19785_v55  ;;  %v14382_v29 = vmul.f32 %v19786_v35, %v19787_v14  ;;  %v4664_v56 = vadd.f32 %v14268_v27, %v4560_v3  ;;  %v706_v35 = vld [vmem:[%s19501_s9 + $0x10] sm:$0xff]  ;;  %v19790_v27 = vld [vmem:[#allocation130_spill] sm:$0xff]  ;;  %v19791_v3 = vld [vmem:[#allocation131_spill] sm:$0xff] }
 0x20e   : > { %v4665_v53 = vadd.f32 %v14272_v21, %v4561_v2  ;;  %v3314_v62 = vadd.f32 %v3282_v43, %v3210_v30  ;;  %v11219_v25 = vunpack.i.h.bf16 %v11215_v26  ;;  %v11216_v50 = vunpack.i.l.bf16 %v11215_v26  ;;  %v19792_v43 = vld [vmem:[#allocation141_spill] sm:$0xff] }
 0x20f   : > { %v4769_v49 = vadd.f32 %v14276_v31, %v4664_v56  ;;  %v3417_v55 = vadd.f32 %v3385_v5, %v3313_v18  ;;  %v3906_v21 = vmul.f32 %v19788_v46, %v19790_v27  ;;  %v4009_v2 = vmul.f32 %v19792_v43, %v19791_v3  ;;  %v19793_v30 = vld [vmem:[#allocation133_spill] sm:$0xff]  ;;  %v19794_v31 = vld [vmem:[#allocation52_spill] sm:$0xff]  ;;  %v19795_v56 = vld [vmem:[#allocation26_spill] sm:$0xff]  ;;  %v11220_v5 = vpop.trf.xlu0 }
 0x210   : > { %v4770_v36 = vadd.f32 %v19789_v0, %v4665_v53  ;;  %v3418_v59 = vadd.f32 %v3386_v4, %v3314_v62  ;;  %1657 = vmatprep.mubr.f32.mxu0 %v11216_v50  ;;  %v14399_v26 = vmul.f32 %v19792_v43, %v19793_v30  ;;  %v14403_v0 = vmul.f32 %v19795_v56, %v19794_v31  ;;  %v19796_v27 = vld [vmem:[#allocation56_spill] sm:$0xff]  ;;  %v705_v43 = vld [vmem:[%s19501_s9 + $0x8] sm:$0xff] }
 0x211   : > { %1658 = vmatmul.mubr.f32.vlgmr.msra.gmra.mxu0 %v11219_v25  ;;  %v4873_v4 = vadd.f32 %v14289_v22, %v4769_v49  ;;  %v3521_v53 = vadd.f32 %v3489_v7, %v3417_v55  ;;  %v11221_v50 = vunpack.i.l.bf16 %v11220_v5  ;;  %v11224_v46 = vunpack.i.h.bf16 %v11220_v5  ;;  %v19800_v7 = vld [vmem:[#allocation58_spill] sm:$0xff] }
 0x212   : > { %v4874_v18 = vadd.f32 %v14294_v17, %v4770_v36  ;;  %v3522_v62 = vadd.f32 %v3490_v54, %v3418_v59  ;;  %10682 = vmatpush3.msra.mxu0 %v19796_v27  ;;  %v704_v36 = vld [vmem:[%s19501_s9] sm:$0xff]  ;;  %v19797_v17 = vld [vmem:[#allocation137_spill] sm:$0xff]  ;;  %v14423_v59 = vld [vmem:[%s19265_s21 + $0xf] ss:$0 sm:$0xff] }
 0x213   : > { %10683 = vmatprep.subr.mxu0 %v706_v35  ;;  %v4977_v31 = vadd.f32 %v14298_v45, %v4873_v4  ;;  %v3625_v25 = vadd.f32 %v3593_v12, %v3521_v53  ;;  %1662 = vmatprep.mubr.f32.mxu0 %v11221_v50  ;;  %v14418_v22 = vmul.f32 %v19795_v56, %v19797_v17  ;;  %v19799_v45 = vld [vmem:[#allocation30_spill] sm:$0xff]  ;;  %v11225_v12 = vpop.trf.xlu0  ;;  %v14472_v50 = vld [vmem:[#allocation2 + $0x16e] sm:$0xff] }
 0x214   : > { %v4978_v30 = vadd.f32 %v14302_v20, %v4874_v18  ;;  %v3626_v3 = vadd.f32 %v3594_v16, %v3522_v62  ;;  %10684 = vmatpush3.msra.mxu0 %v706_v35  ;;  %19798 = vst [vmem:[#allocation126_spill] sm:$0xff] %v14423_v59  ;;  %v14427_v20 = vmul.f32 %v14423_v59, %v19799_v45  ;;  %v14436_v16 = vld [vmem:[%s19801_s7 + $0x28] sm:$0xff]   ;;  %v11226_v27 = vunpack.i.l.bf16 %v11225_v12 }
 0x215   : > { %v14431_v54 = vmul.f32 %v14423_v59, %v19800_v7  ;;  %1663 = vmatmul.mubr.f32.gmra.mxu0 %v11224_v46  ;;  %10685 = vmatprep.subr.mxu0 %v705_v43  ;;  %v5081_v55 = vadd.f32 %v14308_v48, %v4977_v31  ;;  %v3729_v49 = vadd.f32 %v3697_v63, %v3625_v25  ;;  %v11229_v5 = vunpack.i.h.bf16 %v11225_v12  ;;  %v14443_v46 = vld [vmem:[%s19265_s21 + $0x10] ss:$0 sm:$0xff]  ;;  %v14474_v25 = vld [vmem:[#allocation2 + $0x167] sm:$0xff] }
 0x216   : > { %v5082_v35 = vadd.f32 %v14312_v11, %v4978_v30  ;;  %10686 = vmatpush3.msra.mxu0 %v705_v43  ;;  %v3730_v4 = vadd.f32 %v3698_v32, %v3626_v3  ;;  %19802 = vst [vmem:[#allocation139_spill] sm:$0xff] %v14443_v46  ;;  %v14447_v53 = vmul.f32 %v14443_v46, %v14256_v61  ;;  %19805 = vst [vmem:[#allocation70_spill] sm:$0xff] %v14474_v25 }
 0x217   : > { %10687 = vmatprep.subr.mxu0 %v704_v36  ;;  %v3833_v18 = vadd.f32 %v3801_v41, %v3729_v49  ;;  %v14451_v48 = vmul.f32 %v14443_v46, %v14260_v42  ;;  %1667 = vmatprep.mubr.f32.mxu0 %v11226_v27  ;;  %v5185_v11 = vadd.f32 %v14325_v58, %v5081_v55  ;;  %v14458_v41 = vld [vmem:[%s19265_s21 + $0x11] ss:$0 sm:$0xff]  ;;  %v11230_v3 = vpop.trf.xlu0  ;;  %v14586_v46 = vld [vmem:[#allocation2 + $0x172] sm:$0xff] }
 0x218   : > { %10688 = vmatpush3.msra.mxu0 %v704_v36  ;;  %v5186_v63 = vadd.f32 %v14340_v1, %v5082_v35  ;;  %19803 = vst [vmem:[#allocation60_spill] sm:$0xff] %v14458_v41  ;;  %v14462_v32 = vmul.f32 %v14458_v41, %v14262_v13  ;;  %v3834_v43 = vadd.f32 %v14382_v29, %v3730_v4  ;;  %v14470_v1 = vld [vmem:[#allocation2 + $0x166] sm:$0xff]  ;;  %v11234_v31 = vunpack.i.h.bf16 %v11230_v3  ;;  %v14481_v29 = vld [vmem:[%s19265_s21 + $0x12] ss:$0 sm:$0xff] }
 0x219   : > { %1668 = vmatmul.mubr.f32.gmra.mxu0 %v11229_v5  ;;  %10781 = vmatprep.subr.bf16.mxu0 %v14436_v16  ;;  %v3937_v30 = vadd.f32 %v3905_v44, %v3833_v18  ;;  %v14468_v58 = vmul.f32 %v14458_v41, %v14264_v19  ;;  %19804 = vst [vmem:[#allocation35_spill] sm:$0xff] %v14470_v1  ;;  %v11231_v62 = vunpack.i.l.bf16 %v11230_v3  ;;  %v14476_v36 = vld [vmem:[#allocation2 + $0x168] sm:$0xff]  ;;  %19807 = vst [vmem:[#allocation132_spill] sm:$0xff] %v14481_v29  ;;  %v14493_v27 = vld [vmem:[#allocation2 + $0x170] sm:$0xff] }
 0x21a   : > { %19806 = vst [vmem:[#allocation73_spill] sm:$0xff] %v14476_v36  ;;  %v3938_v12 = vadd.f32 %v3906_v21, %v3834_v43  ;;  %v14485_v44 = vmul.f32 %v14481_v29, %v14282_v28  ;;  %v14489_v35 = vmul.f32 %v14481_v29, %v14284_v38  ;;  %v14491_v49 = vld [vmem:[#allocation2 + $0x16f] sm:$0xff]  ;;  %19809 = vst [vmem:[#allocation75_spill] sm:$0xff] %v14493_v27  ;;  %v11296_v29 = vld [vmem:[%s19801_s7 + $0x20] sm:$0xff]  }
 0x21b   : > { %v4041_v55 = vadd.f32 %v4009_v2, %v3937_v30  ;;  %19808 = vst [vmem:[#allocation49_spill] sm:$0xff] %v14491_v49  ;;  %v14495_v5 = vld [vmem:[#allocation2 + $0x169] sm:$0xff]  ;;  %1672 = vmatprep.mubr.f32.mxu0 %v11231_v62  ;;  %v14497_v21 = vpack.c.bf16 %v5186_v63, %v5185_v11  ;;  %v14502_v2 = vld [vmem:[%s19265_s21 + $0x13] ss:$0 sm:$0xff]  ;;  %v14515_v3 = vld [vmem:[%s19265_s21 + $0x14] ss:$0 sm:$0xff] }
 0x21c   : > { %19810 = vst [vmem:[#allocation57_spill] sm:$0xff] %v14495_v5  ;;  %19812 = vst [vmem:[#allocation17_spill] sm:$0xff] %v14502_v2  ;;  %v14506_v4 = vmul.f32 %v14502_v2, %v14304_v10  ;;  %v14510_v18 = vmul.f32 %v14502_v2, %v14321_v57  ;;  %v14519_v11 = vmul.f32 %v14515_v3, %v14470_v1  ;;  %v14530_v62 = vld [vmem:[%s19265_s21 + $0x15] ss:$0 sm:$0xff] }
 0x21d   : > { %19811 = vst [vmem:[#allocation28_spill] sm:$0xff] %v14497_v21  ;;  %19813 = vst [vmem:[#allocation51_spill] sm:$0xff] %v14515_v3  ;;  %1673 = vmatmul.mubr.f32.gmra.mxu0 %v11234_v31  ;;  %v4042_v63 = vadd.f32 %v14399_v26, %v3938_v12  ;;  %v4145_v43 = vadd.f32 %v14403_v0, %v4041_v55  ;;  %v14525_v30 = vmul.f32 %v14515_v3, %v14472_v50  ;;  %v14536_v2 = vld [vmem:[#allocation2 + $0x171] sm:$0xff]  ;;  %v19816_v26 = vld [vmem:[#allocation115_spill] sm:$0xff] }
 0x21e   : > { %19814 = vst [vmem:[#allocation134_spill] sm:$0xff] %v14530_v62  ;;  %v14534_v21 = vmul.f32 %v14530_v62, %v14474_v25  ;;  %v14538_v31 = vld [vmem:[#allocation2 + $0x16a] sm:$0xff]  ;;  %10689 = vmatprep.mubr.msk.f32.mxu0 %vm724_vm0, %v19816_v26  ;;  %v14544_v0 = vmul.f32 %v14530_v62, %v14491_v49  ;;  %v14549_v12 = vld [vmem:[%s19265_s21 + $0x16] ss:$0 sm:$0xff]  ;;  %v14562_v26 = vld [vmem:[%s19265_s21 + $0x17] ss:$0 sm:$0xff] }
 0x21f   : > { %19815 = vst [vmem:[#allocation107_spill] sm:$0xff] %v14538_v31  ;;  %19817 = vst [vmem:[#allocation122_spill] sm:$0xff] %v14549_v12  ;;  %v14553_v55 = vmul.f32 %v14549_v12, %v14476_v36  ;;  %v14557_v3 = vmul.f32 %v14549_v12, %v14493_v27  ;;  %v14566_v62 = vmul.f32 %v14562_v26, %v14495_v5  ;;  %v14576_v12 = vld [vmem:[%s19265_s21] ss:$0 sm:$0xff] }
 0x220   : > { %19818 = vst [vmem:[#allocation123_spill] sm:$0xff] %v14562_v26  ;;  %v4146_v41 = vadd.f32 %v14418_v22, %v4042_v63  ;;  %v4250_v36 = vadd.f32 %v14427_v20, %v4145_v43  ;;  %19819 = vst [vmem:[#allocation124_spill] sm:$0xff] %v14576_v12  ;;  %v2658_v27 = vmul.f32 %v14576_v12, %v19770_v60  ;;  %v14595_v20 = vld [vmem:[%s19265_s21 + $0x1] ss:$0 sm:$0xff]  ;;  %v19822_v63 = vld [vmem:[#allocation41_spill] sm:$0xff] }
 0x221   : > { %v2659_v5 = vmul.f32 %v14576_v12, %v19772_v15  ;;  %v14584_v49 = vmul.f32 %v14562_v26, %v14536_v2  ;;  %19820 = vst [vmem:[#allocation127_spill] sm:$0xff] %v14586_v46  ;;  %v14590_v22 = vmul.f32 %v13583_v9, %v14538_v31  ;;  %19821 = vst [vmem:[#allocation125_spill] sm:$0xff] %v14595_v20  ;;  %10690 = vmatmul.mubr.msk.f32.vlgmr.msra.gmra.mxu0 %vm724_vm0, %v19822_v63  ;;  %v14608_v9 = vld [vmem:[%s19265_s21 + $0x2] ss:$0 sm:$0xff]  ;;  %v19824_v31 = vld [vmem:[#allocation16_spill] sm:$0xff] }
 0x222   : > { %v2762_v60 = vmul.f32 %v14595_v20, %v19773_v34  ;;  %v2763_v15 = vmul.f32 %v14595_v20, %v19775_v6  ;;  %v4251_v43 = vadd.f32 %v14431_v54, %v4146_v41  ;;  %v4354_v12 = vadd.f32 %v14447_v53, %v4250_v36  ;;  %19823 = vst [vmem:[#allocation128_spill] sm:$0xff] %v14608_v9  ;;  %v11297_v41 = vld [vmem:[%s19801_s7 + $0x18] sm:$0xff]  }
 0x223   : > { %v2866_v26 = vmul.f32 %v14608_v9, %v19776_v8  ;;  %v2867_v34 = vmul.f32 %v14608_v9, %v19778_v52  ;;  %10692 = vmatprep.mubr.msk.f32.mxu0 %vm724_vm0, %v19824_v31  ;;  %10782 = vmatpush3.bf16.msra.mxu0 %v14436_v16  ;;  %v2970_v53 = vmul.f32 %v13915_v51, %v19779_v23  ;;  %v14627_v52 = vld [vmem:[%s19265_s21 + $0x18] ss:$0 sm:$0xff]  ;;  %v19838_v9 = vld [vmem:[#allocation146_spill] sm:$0xff] }
 0x224   : > { %v2794_v6 = vadd.f32 %v2762_v60, %v2658_v27  ;;  %v2795_v54 = vadd.f32 %v2763_v15, %v2659_v5  ;;  %10783 = vmatprep.subr.bf16.mxu0 %v11296_v29  ;;  %v4355_v8 = vadd.f32 %v14451_v48, %v4251_v43  ;;  %v4458_v36 = vadd.f32 %v14462_v32, %v4354_v12  ;;  %v19825_v32 = vld [vmem:[#allocation72_spill] sm:$0xff]  ;;  %v19826_v15 = vld [vmem:[#allocation142_spill] sm:$0xff] }
 0x225   : > { %v14631_v16 = vmul.f32 %v14627_v52, %v14586_v46  ;;  %v2971_v23 = vmul.f32 %v13915_v51, %v19781_v40  ;;  %v3074_v31 = vmul.f32 %v13924_v33, %v19782_v37  ;;  %v3075_v48 = vmul.f32 %v13924_v33, %v19752_v39  ;;  %10693 = vmatmul.mubr.msk.f32.gmra.mxu0 %vm724_vm0, %v19825_v32  ;;  %v19827_v43 = vld [vmem:[#allocation80_spill] sm:$0xff]  ;;  %v19835_v51 = vld [vmem:[#allocation106_spill] sm:$0xff] }
 0x226   : > { %v2898_v27 = vadd.f32 %v2866_v26, %v2794_v6  ;;  %v2899_v5 = vadd.f32 %v2867_v34, %v2795_v54  ;;  %v4459_v12 = vadd.f32 %v14468_v58, %v4355_v8  ;;  %v4562_v60 = vadd.f32 %v14485_v44, %v4458_v36  ;;  %v19828_v26 = vld [vmem:[#allocation114_spill] sm:$0xff]  ;;  %v19829_v39 = vld [vmem:[#allocation36_spill] sm:$0xff]  ;;  %v19830_v6 = vld [vmem:[#allocation143_spill] sm:$0xff] }
 0x227   : > { %v3179_v63 = vmul.f32 %v19826_v15, %v19754_v47  ;;  %v3180_v40 = vmul.f32 %v19826_v15, %v19827_v43  ;;  %10695 = vmatprep.mubr.msk.f32.mxu0 %vm724_vm0, %v19828_v26  ;;  %10784 = vmatpush3.bf16.msra.mxu0 %v11296_v29  ;;  %v3283_v54 = vmul.f32 %v19830_v6, %v19829_v39  ;;  %v11298_v58 = vld [vmem:[%s19801_s7 + $0x10] sm:$0xff]   ;;  %v19833_v26 = vld [vmem:[#allocation131_spill] sm:$0xff]  ;;  %v19834_v15 = vld [vmem:[#allocation145_spill] sm:$0xff] }
 0x228   : > { %v3002_v37 = vadd.f32 %v2970_v53, %v2898_v27  ;;  %v3003_v34 = vadd.f32 %v2971_v23, %v2899_v5  ;;  %10785 = vmatprep.subr.bf16.mxu0 %v11297_v41  ;;  %v4563_v44 = vadd.f32 %v14489_v35, %v4459_v12  ;;  %v4666_v8 = vadd.f32 %v14506_v4, %v4562_v60  ;;  %v19831_v32 = vld [vmem:[#allocation144_spill] sm:$0xff]  ;;  %v19832_v27 = vld [vmem:[#allocation130_spill] sm:$0xff]  ;;  %v19836_v12 = vld [vmem:[#allocation133_spill] sm:$0xff] }
 0x229   : > { %v3284_v36 = vmul.f32 %v19830_v6, %v19787_v14  ;;  %v3387_v29 = vmul.f32 %v19831_v32, %v19760_v24  ;;  %v3388_v5 = vmul.f32 %v19831_v32, %v19832_v27  ;;  %v3491_v33 = vmul.f32 %v19834_v15, %v19833_v26  ;;  %10696 = vmatmul.mubr.msk.f32.gmra.mxu0 %vm724_vm0, %v19835_v51  ;;  %v19837_v6 = vld [vmem:[#allocation52_spill] sm:$0xff]  ;;  %v11299_v51 = vld [vmem:[%s19801_s7 + $0x8] sm:$0xff]  }
 0x22a   : > { %v3106_v53 = vadd.f32 %v3074_v31, %v3002_v37  ;;  %v3107_v23 = vadd.f32 %v3075_v48, %v3003_v34  ;;  %v4667_v35 = vadd.f32 %v14510_v18, %v4563_v44  ;;  %v4771_v4 = vadd.f32 %v14519_v11, %v4666_v8  ;;  %v19839_v48 = vld [vmem:[#allocation74_spill] sm:$0xff]  ;;  %v19840_v44 = vld [vmem:[#allocation68_spill] sm:$0xff] }
 0x22b   : > { %v3492_v60 = vmul.f32 %v19834_v15, %v19836_v12  ;;  %v3595_v31 = vmul.f32 %v19838_v9, %v19837_v6  ;;  %10698 = vmatprep.mubr.msk.f32.mxu0 %vm724_vm0, %v19839_v48  ;;  %10786 = vmatpush3.bf16.msra.mxu0 %v11297_v41  ;;  %v3596_v32 = vmul.f32 %v19838_v9, %v19797_v17  ;;  %v19842_v48 = vld [vmem:[#allocation31_spill] sm:$0xff] }
 0x22c   : > { %v3211_v37 = vadd.f32 %v3179_v63, %v3106_v53  ;;  %v3212_v34 = vadd.f32 %v3180_v40, %v3107_v23  ;;  %10787 = vmatprep.subr.bf16.mxu0 %v11298_v58  ;;  %v4772_v18 = vadd.f32 %v14525_v30, %v4667_v35  ;;  %v4875_v11 = vadd.f32 %v14534_v21, %v4771_v4  ;;  %v19841_v53 = vld [vmem:[#allocation140_spill] sm:$0xff]  ;;  %v19843_v35 = vld [vmem:[#allocation15_spill] sm:$0xff] }
 0x22d   : > { %v3699_v8 = vmul.f32 %v19840_v44, %v19799_v45  ;;  %v3700_v41 = vmul.f32 %v19840_v44, %v19800_v7  ;;  %v3803_v9 = vmul.f32 %v19841_v53, %v14256_v61  ;;  %v3804_v23 = vmul.f32 %v19841_v53, %v14260_v42  ;;  %10699 = vmatmul.mubr.msk.f32.gmra.mxu0 %vm724_vm0, %v19842_v48  ;;  %v19845_v53 = vld [vmem:[#allocation141_spill] sm:$0xff] }
 0x22e   : > { %v3315_v63 = vadd.f32 %v3283_v54, %v3211_v37  ;;  %v3316_v40 = vadd.f32 %v3284_v36, %v3212_v34  ;;  %v4876_v30 = vadd.f32 %v14544_v0, %v4772_v18  ;;  %v4979_v21 = vadd.f32 %v14553_v55, %v4875_v11  ;;  %v19844_v36 = vld [vmem:[#allocation103_spill] sm:$0xff]  ;;  %v11300_v0 = vld [vmem:[%s19801_s7] sm:$0xff]  }
 0x22f   : > { %v3907_v4 = vmul.f32 %v19843_v35, %v14262_v13  ;;  %v3908_v54 = vmul.f32 %v19843_v35, %v14264_v19  ;;  %10701 = vmatprep.mubr.msk.f32.mxu0 %vm724_vm0, %v19844_v36  ;;  %10788 = vmatpush3.bf16.msra.mxu0 %v11298_v58  ;;  %v14701_v44 = vmul.f32 %v19845_v53, %v14282_v28  ;;  %v19849_v36 = vld [vmem:[#allocation34_spill] sm:$0xff] }
 0x230   : > { %v3419_v37 = vadd.f32 %v3387_v29, %v3315_v63  ;;  %v3420_v34 = vadd.f32 %v3388_v5, %v3316_v40  ;;  %10789 = vmatprep.subr.bf16.mxu0 %v11299_v51  ;;  %v4980_v55 = vadd.f32 %v14557_v3, %v4876_v30  ;;  %v5083_v18 = vadd.f32 %v14566_v62, %v4979_v21  ;;  %v19846_v3 = vld [vmem:[#allocation71_spill] sm:$0xff]  ;;  %v19848_v30 = vld [vmem:[#allocation49_spill] sm:$0xff] }
 0x231   : > { %v4012_v11 = vmul.f32 %v19845_v53, %v14284_v38  ;;  %v14712_v58 = vmul.f32 %v19795_v56, %v14304_v10  ;;  %v14716_v63 = vmul.f32 %v19795_v56, %v14321_v57  ;;  %v14720_v40 = vmul.f32 %v14423_v59, %v14470_v1  ;;  %10702 = vmatmul.mubr.msk.f32.gmra.mxu0 %vm724_vm0, %v19846_v3  ;;  %v14742_v3 = vld [vmem:[#allocation2 + $0x18e] sm:$0xff]  ;;  %v19852_v56 = vld [vmem:[#allocation73_spill] sm:$0xff] }
 0x232   : > { %v3523_v29 = vadd.f32 %v3491_v33, %v3419_v37  ;;  %v3524_v5 = vadd.f32 %v3492_v60, %v3420_v34  ;;  %v5084_v62 = vadd.f32 %v14584_v49, %v4980_v55  ;;  %v14727_v48 = vmul.f32 %v14423_v59, %v14472_v50  ;;  %v19847_v33 = vld [vmem:[#allocation139_spill] sm:$0xff]  ;;  %10704 = vmatprep.mubr.msk.f32.mxu0 %vm724_vm0, %v19849_v36  ;;  %v19853_v53 = vld [vmem:[#allocation60_spill] sm:$0xff] }
 0x233   : > { %v14731_v60 = vmul.f32 %v19847_v33, %v14474_v25  ;;  %v14735_v21 = vmul.f32 %v19847_v33, %v19848_v30  ;;  %10790 = vmatpush3.bf16.msra.mxu0 %v11299_v51  ;;  %v5187_v37 = vadd.f32 %v14590_v22, %v5083_v18  ;;  %v14740_v55 = vld [vmem:[#allocation2 + $0x186] sm:$0xff]  ;;  %19851 = vst [vmem:[#allocation135_spill] sm:$0xff] %v14742_v3  ;;  %v19855_v51 = vld [vmem:[#allocation57_spill] sm:$0xff]  ;;  %v19856_v36 = vld [vmem:[#allocation132_spill] sm:$0xff] }
 0x234   : > { %v3627_v34 = vadd.f32 %v3595_v31, %v3523_v29  ;;  %v3628_v49 = vadd.f32 %v3596_v32, %v3524_v5  ;;  %19850 = vst [vmem:[#allocation129_spill] sm:$0xff] %v14740_v55  ;;  %10791 = vmatprep.subr.bf16.mxu0 %v11300_v0  ;;  %v5188_v59 = vadd.f32 %v14631_v16, %v5084_v62  ;;  %v19854_v33 = vld [vmem:[#allocation75_spill] sm:$0xff]  ;;  %v19861_v62 = vld [vmem:[#allocation17_spill] sm:$0xff] }
 0x235   : > { %v14747_v35 = vmul.f32 %v19853_v53, %v19852_v56  ;;  %v14751_v30 = vmul.f32 %v19853_v53, %v19854_v33  ;;  %v14755_v22 = vmul.f32 %v19856_v36, %v19855_v51  ;;  %v14757_v32 = vld [vmem:[#allocation2 + $0x187] sm:$0xff]  ;;  %v14763_v16 = vmul.f32 %v19856_v36, %v14536_v2  ;;  %v14769_v53 = vld [vmem:[#allocation2 + $0x18f] sm:$0xff]  ;;  %v19869_v36 = vld [vmem:[#allocation65_spill] sm:$0xff] }
 0x236   : > { %19858 = vst [vmem:[#allocation113_spill] sm:$0xff] %v14757_v32  ;;  %v14759_v31 = vld [vmem:[#allocation2 + $0x188] sm:$0xff]  ;;  %v3731_v18 = vadd.f32 %v3699_v8, %v3627_v34  ;;  %v3732_v29 = vadd.f32 %v3700_v41, %v3628_v49  ;;  %19862 = vst [vmem:[#allocation56_spill] sm:$0xff] %v14769_v53  ;;  %v14771_v33 = vld [vmem:[#allocation2 + $0x190] sm:$0xff]  ;;  %v14777_v25 = vpack.c.bf16 %v5188_v59, %v5187_v37 }
 0x237   : > { %19857 = vst [vmem:[#allocation136_spill] sm:$0xff] %v14755_v22  ;;  %19859 = vst [vmem:[#allocation111_spill] sm:$0xff] %v14759_v31  ;;  %v19860_v5 = vld [vmem:[#allocation107_spill] sm:$0xff]  ;;  %v19865_v22 = vld [vmem:[#allocation110_spill] sm:$0xff]  ;;  %v14781_v8 = vmul.f32 %v19861_v62, %v14586_v46  ;;  %10792 = vmatpush3.bf16.msra.mxu0 %v11300_v0 }
 0x238   : > { %v14767_v56 = vmul.f32 %v19861_v62, %v19860_v5  ;;  %19863 = vst [vmem:[#allocation137_spill] sm:$0xff] %v14771_v33  ;;  %v14773_v51 = vld [vmem:[#allocation2 + $0x189] sm:$0xff]  ;;  %10705 = vmatmul.mubr.msk.f32.gmra.mxu0 %vm724_vm0, %v19865_v22  ;;  %19866 = vst [vmem:[#allocation58_spill] sm:$0xff] %v14777_v25  ;;  %v3835_v5 = vadd.f32 %v3803_v9, %v3731_v18  ;;  %v3836_v22 = vadd.f32 %v3804_v23, %v3732_v29  ;;  %v19870_v59 = vld [vmem:[#allocation134_spill] sm:$0xff] }
 0x239   : > { %19864 = vst [vmem:[#allocation30_spill] sm:$0xff] %v14773_v51  ;;  %v19867_v41 = vld [vmem:[#allocation51_spill] sm:$0xff]  ;;  %10707 = vmatprep.mubr.msk.f32.mxu0 %vm724_vm0, %v19869_v36  ;;  %v14795_v37 = vmul.f32 %v19870_v59, %v14757_v32  ;;  %v14797_v25 = vld [vmem:[#allocation2 + $0x191] sm:$0xff] }
 0x23a   : > { %v14785_v34 = vmul.f32 %v19867_v41, %v14740_v55  ;;  %v14789_v49 = vmul.f32 %v19867_v41, %v14742_v3  ;;  %19872 = vst [vmem:[#allocation16_spill] sm:$0xff] %v14797_v25  ;;  %v14799_v62 = vld [vmem:[#allocation2 + $0x18a] sm:$0xff]  ;;  %v19875_v41 = vld [vmem:[#allocation122_spill] sm:$0xff]  ;;  %v14817_v36 = vld [vmem:[#allocation2 + $0x192] sm:$0xff]  ;;  %v3939_v18 = vadd.f32 %v3907_v4, %v3835_v5  ;;  %v3940_v29 = vadd.f32 %v3908_v54, %v3836_v22 }
 0x23b   : > { %19871 = vst [vmem:[#allocation41_spill] sm:$0xff] %v14795_v37  ;;  %19873 = vst [vmem:[#allocation72_spill] sm:$0xff] %v14799_v62  ;;  %v14807_v3 = vmul.f32 %v19875_v41, %v14759_v31  ;;  %v14811_v9 = vmul.f32 %v19875_v41, %v14771_v33  ;;  %v19876_v23 = vld [vmem:[#allocation123_spill] sm:$0xff]  ;;  %v19879_v37 = vld [vmem:[#allocation124_spill] sm:$0xff]  ;;  %v2764_v4 = vmul.f32 %v14595_v20, %v19829_v39 }
 0x23c   : > { %19868 = vst [vmem:[#allocation115_spill] sm:$0xff] %v14785_v34  ;;  %v14803_v34 = vmul.f32 %v19870_v59, %v14769_v53  ;;  %v14815_v0 = vmul.f32 %v19876_v23, %v14773_v51  ;;  %19878 = vst [vmem:[#allocation36_spill] sm:$0xff] %v14817_v36  ;;  %v2660_v59 = vmul.f32 %v19879_v37, %v19754_v47  ;;  %v19880_v31 = vld [vmem:[#allocation14_spill] sm:$0xff]  ;;  %v19882_v54 = vld [vmem:[#allocation32_spill] sm:$0xff] }
 0x23d   : > { %10708 = vmatmul.mubr.msk.f32.gmra.mxu0 %vm724_vm0, %v19880_v31  ;;  %v14827_v41 = vmul.f32 %v19876_v23, %v14797_v25  ;;  %v2765_v47 = vmul.f32 %v14595_v20, %v19787_v14  ;;  %v4044_v31 = vadd.f32 %v4012_v11, %v3940_v29  ;;  %v14842_v5 = vmul.f32 %v14627_v52, %v14817_v36  ;;  %v19883_v22 = vld [vmem:[#allocation128_spill] sm:$0xff]  ;;  %v19884_v14 = vld [vmem:[#allocation109_spill] sm:$0xff]  ;;  %v14855_v11 = vld [vmem:[%s19265_s21 + $0x3] ss:$0 sm:$0xff] }
 0x23e   : > { %19874 = vst [vmem:[#allocation80_spill] sm:$0xff] %v14803_v34  ;;  %19877 = vst [vmem:[#allocation114_spill] sm:$0xff] %v14815_v0  ;;  %v2661_v34 = vmul.f32 %v19879_v37, %v19827_v43  ;;  %v14831_v0 = vmul.f32 %v14627_v52, %v14799_v62  ;;  %10710 = vmatprep.mubr.msk.f32.mxu0 %vm724_vm0, %v19882_v54  ;;  %v4043_v43 = vadd.f32 %v14701_v44, %v3939_v18  ;;  %v19886_v18 = vld [vmem:[#allocation105_spill] sm:$0xff]  ;;  %v19888_v29 = vld [vmem:[#allocation142_spill] sm:$0xff] }
 0x23f   : > { %v2868_v37 = vmul.f32 %v19883_v22, %v19760_v24  ;;  %v2869_v39 = vmul.f32 %v19883_v22, %v19832_v27  ;;  %v2972_v20 = vmul.f32 %v19884_v14, %v19833_v26  ;;  %v4148_v44 = vadd.f32 %v14716_v63, %v4044_v31 }
 0x240   : > { %19881 = vst [vmem:[#allocation130_spill] sm:$0xff] %v14831_v0  ;;  %v2796_v0 = vadd.f32 %v2764_v4, %v2660_v59  ;;  %v2797_v23 = vadd.f32 %v2765_v47, %v2661_v34  ;;  %v4147_v54 = vadd.f32 %v14712_v58, %v4043_v43  ;;  %v2973_v24 = vmul.f32 %v14855_v11, %v19836_v12  ;;  %v19885_v34 = vld [vmem:[#allocation76_spill] sm:$0xff]  ;;  %v14866_v58 = vld [vmem:[%s19265_s21 + $0x4] ss:$0 sm:$0xff] }
 0x241   : > { %v3076_v59 = vmul.f32 %v19885_v34, %v19837_v6  ;;  %10711 = vmatmul.mubr.msk.f32.gmra.mxu0 %vm724_vm0, %v19886_v18  ;;  %19887 = vst [vmem:[#allocation131_spill] sm:$0xff] %v14866_v58  ;;  %v3077_v63 = vmul.f32 %v14866_v58, %v19797_v17  ;;  %v3181_v4 = vmul.f32 %v19888_v29, %v19799_v45  ;;  %v19889_v12 = vld [vmem:[#allocation42_spill] sm:$0xff]  ;;  %v19891_v17 = vld [vmem:[#allocation143_spill] sm:$0xff]  ;;  %v19895_v18 = vld [vmem:[#allocation40_spill] sm:$0xff] }
 0x242   : > { %v2900_v27 = vadd.f32 %v2868_v37, %v2796_v0  ;;  %v2901_v26 = vadd.f32 %v2869_v39, %v2797_v23  ;;  %10713 = vmatprep.mubr.msk.f32.mxu0 %vm724_vm0, %v19889_v12  ;;  %v4252_v6 = vadd.f32 %v14720_v40, %v4147_v54  ;;  %v4253_v47 = vadd.f32 %v14727_v48, %v4148_v44  ;;  %v14879_v37 = vld [vmem:[%s19265_s21 + $0x5] ss:$0 sm:$0xff]  ;;  %v14888_v39 = vld [vmem:[%s19265_s21 + $0x6] ss:$0 sm:$0xff]  ;;  %v19893_v48 = vld [vmem:[#allocation144_spill] sm:$0xff] }
 0x243   : > { %19890 = vst [vmem:[#allocation145_spill] sm:$0xff] %v14879_v37  ;;  %v3182_v23 = vmul.f32 %v14879_v37, %v19800_v7  ;;  %v3285_v0 = vmul.f32 %v19891_v17, %v14256_v61  ;;  %19892 = vst [vmem:[#allocation106_spill] sm:$0xff] %v14888_v39  ;;  %v3286_v40 = vmul.f32 %v14888_v39, %v14260_v42  ;;  %v14917_v29 = vld [vmem:[%s19265_s21 + $0x9] ss:$0 sm:$0xff]  ;;  %v19898_v12 = vld [vmem:[#allocation61_spill] sm:$0xff] }
 0x244   : > { %v3004_v43 = vadd.f32 %v2972_v20, %v2900_v27  ;;  %v3005_v31 = vadd.f32 %v2973_v24, %v2901_v26  ;;  %v3389_v14 = vmul.f32 %v19893_v48, %v14262_v13  ;;  %v4356_v54 = vadd.f32 %v14731_v60, %v4252_v6  ;;  %v14899_v20 = vld [vmem:[%s19265_s21 + $0x7] ss:$0 sm:$0xff]  ;;  %v14910_v60 = vld [vmem:[%s19265_s21 + $0x8] ss:$0 sm:$0xff]  ;;  %19897 = vst [vmem:[#allocation146_spill] sm:$0xff] %v14917_v29  ;;  %v19902_v39 = vld [vmem:[#allocation136_spill] sm:$0xff] }
 0x245   : > { %v4357_v44 = vadd.f32 %v14735_v21, %v4253_v47  ;;  %19894 = vst [vmem:[#allocation133_spill] sm:$0xff] %v14899_v20  ;;  %v3390_v24 = vmul.f32 %v14899_v20, %v14264_v19  ;;  %v3493_v34 = vmul.f32 %v19834_v15, %v14282_v28  ;;  %10714 = vmatmul.mubr.msk.f32.gmra.mxu0 %vm724_vm0, %v19895_v18  ;;  %19896 = vst [vmem:[#allocation52_spill] sm:$0xff] %v14910_v60  ;;  %v19899_v47 = vld [vmem:[#allocation68_spill] sm:$0xff]  ;;  %v19900_v18 = vld [vmem:[#allocation70_spill] sm:$0xff] }
 0x246   : > { %v3108_v27 = vadd.f32 %v3076_v59, %v3004_v43  ;;  %v3109_v26 = vadd.f32 %v3077_v63, %v3005_v31  ;;  %v3494_v21 = vmul.f32 %v14910_v60, %v14284_v38  ;;  %v3597_v15 = vmul.f32 %v14917_v29, %v14304_v10  ;;  %10716 = vmatprep.mubr.msk.f32.mxu0 %vm724_vm0, %v19898_v12  ;;  %v19901_v60 = vld [vmem:[#allocation140_spill] sm:$0xff] }
 0x247   : > { %v4460_v59 = vadd.f32 %v14747_v35, %v4356_v54  ;;  %v4461_v63 = vadd.f32 %v14751_v30, %v4357_v44  ;;  %v3598_v6 = vmul.f32 %v14917_v29, %v14321_v57  ;;  %v3701_v17 = vmul.f32 %v19899_v47, %v14470_v1  ;;  %v19903_v54 = vld [vmem:[#allocation49_spill] sm:$0xff]  ;;  %v19905_v29 = vld [vmem:[#allocation15_spill] sm:$0xff]  ;;  %v19906_v1 = vld [vmem:[#allocation64_spill] sm:$0xff] }
 0x248   : > { %v3213_v43 = vadd.f32 %v3181_v4, %v3108_v27  ;;  %v3214_v31 = vadd.f32 %v3182_v23, %v3109_v26  ;;  %v3702_v48 = vmul.f32 %v19899_v47, %v14472_v50  ;;  %v3805_v20 = vmul.f32 %v19901_v60, %v19900_v18  ;;  %v19904_v44 = vld [vmem:[#allocation73_spill] sm:$0xff]  ;;  %v19907_v27 = vld [vmem:[#allocation75_spill] sm:$0xff] }
 0x249   : > { %v4564_v12 = vadd.f32 %v19902_v39, %v4460_v59  ;;  %v4565_v35 = vadd.f32 %v14763_v16, %v4461_v63  ;;  %v3806_v30 = vmul.f32 %v19901_v60, %v19903_v54  ;;  %v14939_v37 = vmul.f32 %v19905_v29, %v19904_v44  ;;  %10717 = vmatmul.mubr.msk.f32.gmra.mxu0 %vm724_vm0, %v19906_v1  ;;  %v19908_v47 = vld [vmem:[#allocation57_spill] sm:$0xff]  ;;  %v19910_v16 = vld [vmem:[#allocation63_spill] sm:$0xff] }
 0x24a   : > { %v3317_v4 = vadd.f32 %v3285_v0, %v3213_v43  ;;  %v3318_v23 = vadd.f32 %v3286_v40, %v3214_v31  ;;  %v3910_v26 = vmul.f32 %v19905_v29, %v19907_v27  ;;  %v19909_v18 = vld [vmem:[#allocation141_spill] sm:$0xff]  ;;  %10719 = vmatprep.mubr.msk.f32.mxu0 %vm724_vm0, %v19910_v16  ;;  %v19911_v1 = vld [vmem:[#allocation107_spill] sm:$0xff]  ;;  %v19912_v0 = vld [vmem:[#allocation26_spill] sm:$0xff] }
 0x24b   : > { %v14947_v39 = vmul.f32 %v19909_v18, %v19908_v47  ;;  %v4668_v60 = vadd.f32 %v14767_v56, %v4564_v12  ;;  %v4669_v59 = vadd.f32 %v14781_v8, %v4565_v35  ;;  %v14955_v63 = vmul.f32 %v19909_v18, %v14536_v2  ;;  %v19913_v16 = vld [vmem:[#allocation126_spill] sm:$0xff]  ;;  %v19914_v56 = vld [vmem:[#allocation115_spill] sm:$0xff] }
 0x24c   : > { %v14959_v40 = vmul.f32 %v19912_v0, %v19911_v1  ;;  %v3421_v29 = vadd.f32 %v3389_v14, %v3317_v4  ;;  %v3422_v43 = vadd.f32 %v3390_v24, %v3318_v23  ;;  %v14963_v31 = vmul.f32 %v19912_v0, %v14586_v46  ;;  %v19915_v18 = vld [vmem:[#allocation135_spill] sm:$0xff]  ;;  %v19917_v24 = vld [vmem:[#allocation89_spill] sm:$0xff] }
 0x24d   : > { %v14967_v47 = vmul.f32 %v19913_v16, %v14740_v55  ;;  %v4773_v8 = vadd.f32 %v19914_v56, %v4668_v60  ;;  %v4774_v12 = vadd.f32 %v14789_v49, %v4669_v59  ;;  %v14973_v35 = vmul.f32 %v19913_v16, %v19915_v18  ;;  %v19916_v1 = vld [vmem:[#allocation139_spill] sm:$0xff]  ;;  %10720 = vmatmul.mubr.msk.f32.gmra.mxu0 %vm724_vm0, %v19917_v24  ;;  %v19919_v56 = vld [vmem:[#allocation60_spill] sm:$0xff]  ;;  %v19921_v16 = vld [vmem:[#allocation90_spill] sm:$0xff] }
 0x24e   : > { %v14977_v14 = vmul.f32 %v19916_v1, %v14757_v32  ;;  %v3525_v4 = vadd.f32 %v3493_v34, %v3421_v29  ;;  %v3526_v23 = vadd.f32 %v3494_v21, %v3422_v43  ;;  %v14983_v0 = vmul.f32 %v19916_v1, %v14769_v53  ;;  %v19918_v60 = vld [vmem:[#allocation111_spill] sm:$0xff]  ;;  %10722 = vmatprep.mubr.msk.f32.mxu0 %vm724_vm0, %v19921_v16  ;;  %v19922_v32 = vld [vmem:[#allocation41_spill] sm:$0xff]  ;;  %v19923_v55 = vld [vmem:[#allocation80_spill] sm:$0xff] }
 0x24f   : > { %v14987_v49 = vmul.f32 %v19919_v56, %v19918_v60  ;;  %v14989_v59 = vld [vmem:[#allocation2 + $0x1a6] sm:$0xff]  ;;  %v4877_v18 = vadd.f32 %v19922_v32, %v4773_v8  ;;  %v4878_v46 = vadd.f32 %v19923_v55, %v4774_v12  ;;  %v14997_v34 = vmul.f32 %v19919_v56, %v14771_v33  ;;  %v19924_v21 = vld [vmem:[#allocation132_spill] sm:$0xff]  ;;  %v19927_v55 = vld [vmem:[#allocation17_spill] sm:$0xff] }
 0x250   : > { %19920 = vst [vmem:[#allocation74_spill] sm:$0xff] %v14989_v59  ;;  %v15001_v29 = vmul.f32 %v19924_v21, %v14773_v51  ;;  %v15003_v43 = vld [vmem:[#allocation2 + $0x1ae] sm:$0xff]  ;;  %v3629_v1 = vadd.f32 %v3597_v15, %v3525_v4  ;;  %v3630_v60 = vadd.f32 %v3598_v6, %v3526_v23  ;;  %v15009_v16 = vmul.f32 %v19924_v21, %v14797_v25 }
 0x251   : > { %19925 = vst [vmem:[#allocation31_spill] sm:$0xff] %v15003_v43  ;;  %v15005_v24 = vld [vmem:[#allocation2 + $0x1a7] sm:$0xff]  ;;  %v15013_v32 = vmul.f32 %v19927_v55, %v14799_v62  ;;  %v15015_v8 = vld [vmem:[#allocation2 + $0x1af] sm:$0xff]  ;;  %v4981_v56 = vadd.f32 %v14807_v3, %v4877_v18  ;;  %v4982_v51 = vadd.f32 %v14811_v9, %v4878_v46  ;;  %v15023_v15 = vmul.f32 %v19927_v55, %v14817_v36  ;;  %v19934_v62 = vld [vmem:[#allocation93_spill] sm:$0xff] }
 0x252   : > { %19926 = vst [vmem:[#allocation103_spill] sm:$0xff] %v15005_v24  ;;  %19929 = vst [vmem:[#allocation34_spill] sm:$0xff] %v15015_v8  ;;  %v15017_v12 = vld [vmem:[#allocation2 + $0x1a8] sm:$0xff]  ;;  %v15029_v23 = vld [vmem:[#allocation2 + $0x1b0] sm:$0xff]  ;;  %10723 = vmatmul.mubr.msk.f32.gmra.mxu0 %vm724_vm0, %v19934_v62  ;;  %v3734_v25 = vadd.f32 %v3702_v48, %v3630_v60 }
 0x253   : > { %19928 = vst [vmem:[#allocation71_spill] sm:$0xff] %v15013_v32  ;;  %19930 = vst [vmem:[#allocation110_spill] sm:$0xff] %v15017_v12  ;;  %v19931_v6 = vld [vmem:[#allocation51_spill] sm:$0xff]  ;;  %v3733_v32 = vadd.f32 %v3701_v17, %v3629_v1  ;;  %v19935_v3 = vld [vmem:[#allocation134_spill] sm:$0xff]  ;;  %v5086_v36 = vadd.f32 %v14827_v41, %v4982_v51 }
 0x254   : > { %v15027_v4 = vmul.f32 %v19931_v6, %v14989_v59  ;;  %v15031_v21 = vld [vmem:[#allocation2 + $0x1a9] sm:$0xff]  ;;  %v15037_v46 = vmul.f32 %v19931_v6, %v15003_v43  ;;  %v15041_v9 = vmul.f32 %v19935_v3, %v15005_v24  ;;  %v15043_v18 = vld [vmem:[#allocation2 + $0x1b1] sm:$0xff]  ;;  %v15051_v62 = vmul.f32 %v19935_v3, %v15015_v8  ;;  %v19940_v17 = vld [vmem:[#allocation122_spill] sm:$0xff] }
 0x255   : > { %19933 = vst [vmem:[#allocation14_spill] sm:$0xff] %v15031_v21  ;;  %19937 = vst [vmem:[#allocation128_spill] sm:$0xff] %v15043_v18  ;;  %v19938_v55 = vld [vmem:[#allocation96_spill] sm:$0xff]  ;;  %v15055_v48 = vmul.f32 %v19940_v17, %v15017_v12  ;;  %v3837_v1 = vadd.f32 %v3805_v20, %v3733_v32  ;;  %v3838_v60 = vadd.f32 %v3806_v30, %v3734_v25  ;;  %v19944_v20 = vld [vmem:[#allocation97_spill] sm:$0xff] }
 0x256   : > { %19932 = vst [vmem:[#allocation65_spill] sm:$0xff] %v15027_v4  ;;  %19936 = vst [vmem:[#allocation32_spill] sm:$0xff] %v15041_v9  ;;  %10725 = vmatprep.mubr.msk.f32.mxu0 %vm724_vm0, %v19938_v55  ;;  %v19939_v4 = vld [vmem:[#allocation114_spill] sm:$0xff]  ;;  %v15059_v6 = vmul.f32 %v19940_v17, %v15029_v23  ;;  %v19941_v55 = vld [vmem:[#allocation123_spill] sm:$0xff]  ;;  %v5190_v51 = vadd.f32 %v14842_v5, %v5086_v36 }
 0x257   : > { %v5085_v59 = vadd.f32 %v19939_v4, %v4981_v56  ;;  %v15063_v9 = vmul.f32 %v19941_v55, %v15031_v21  ;;  %v15068_v41 = vmul.f32 %v19941_v55, %v15043_v18  ;;  %v19943_v56 = vld [vmem:[#allocation124_spill] sm:$0xff]  ;;  %10726 = vmatmul.mubr.msk.f32.gmra.mxu0 %vm724_vm0, %v19944_v20  ;;  %v3941_v30 = vadd.f32 %v14939_v37, %v3837_v1  ;;  %v19947_v36 = vld [vmem:[#allocation125_spill] sm:$0xff] }
 0x258   : > { %v2662_v4 = vmul.f32 %v19943_v56, %v19799_v45  ;;  %v2663_v25 = vmul.f32 %v19943_v56, %v19800_v7  ;;  %v3942_v32 = vadd.f32 %v3910_v26, %v3838_v60  ;;  %v15077_v17 = vld [vmem:[#allocation2 + $0x1aa] sm:$0xff]  ;;  %v2766_v5 = vmul.f32 %v19947_v36, %v14256_v61  ;;  %v19949_v7 = vld [vmem:[#allocation130_spill] sm:$0xff] }
 0x259   : > { %19942 = vst [vmem:[#allocation109_spill] sm:$0xff] %v15063_v9  ;;  %19945 = vst [vmem:[#allocation76_spill] sm:$0xff] %v15077_v17  ;;  %v15079_v9 = vld [vmem:[#allocation2 + $0x1b2] sm:$0xff]  ;;  %v2767_v55 = vmul.f32 %v19947_v36, %v14260_v42  ;;  %v19948_v45 = vld [vmem:[#allocation79_spill] sm:$0xff]  ;;  %v5189_v56 = vadd.f32 %v19949_v7, %v5085_v59  ;;  %v2870_v20 = vmul.f32 %v19883_v22, %v14262_v13 }
 0x25a   : > { %19946 = vst [vmem:[#allocation105_spill] sm:$0xff] %v15079_v9  ;;  %10728 = vmatprep.mubr.msk.f32.mxu0 %vm724_vm0, %v19948_v45  ;;  %v2871_v37 = vmul.f32 %v19883_v22, %v14264_v19  ;;  %v2974_v26 = vmul.f32 %v14855_v11, %v14282_v28  ;;  %v4045_v1 = vadd.f32 %v14947_v39, %v3941_v30  ;;  %v19951_v28 = vld [vmem:[#allocation117_spill] sm:$0xff]  ;;  %v19953_v30 = vld [vmem:[#allocation35_spill] sm:$0xff] }
 0x25b   : > { %v4046_v61 = vadd.f32 %v14955_v63, %v3942_v32  ;;  %v2798_v60 = vadd.f32 %v2766_v5, %v2662_v4  ;;  %v2799_v42 = vadd.f32 %v2767_v55, %v2663_v25  ;;  %v15096_v36 = vpack.c.bf16 %v5190_v51, %v5189_v56  ;;  %10729 = vmatmul.mubr.msk.f32.gmra.mxu0 %vm724_vm0, %v19951_v28  ;;  %v19952_v56 = vld [vmem:[#allocation118_spill] sm:$0xff]  ;;  %v19959_v28 = vld [vmem:[#allocation120_spill] sm:$0xff] }
 0x25c   : > { %v15100_v59 = vmul.f32 %v14627_v52, %v15077_v17  ;;  %v15104_v13 = vmul.f32 %v14627_v52, %v15079_v9  ;;  %v2975_v19 = vmul.f32 %v14855_v11, %v14284_v38  ;;  %v4149_v39 = vadd.f32 %v14959_v40, %v4045_v1  ;;  %10731 = vmatprep.mubr.msk.f32.mxu0 %vm724_vm0, %v19952_v56  ;;  %v19954_v38 = vld [vmem:[#allocation145_spill] sm:$0xff]  ;;  %v19962_v56 = vld [vmem:[#allocation107_spill] sm:$0xff] }
 0x25d   : > { %19950 = vst [vmem:[#allocation142_spill] sm:$0xff] %v15096_v36  ;;  %v4150_v63 = vadd.f32 %v14963_v31, %v4046_v61  ;;  %v2902_v55 = vadd.f32 %v2870_v20, %v2798_v60  ;;  %v2903_v51 = vadd.f32 %v2871_v37, %v2799_v42  ;;  %v3078_v4 = vmul.f32 %v14866_v58, %v14304_v10  ;;  %v19955_v20 = vld [vmem:[#allocation70_spill] sm:$0xff]  ;;  %v19958_v42 = vld [vmem:[#allocation119_spill] sm:$0xff] }
 0x25e   : > { %v3079_v25 = vmul.f32 %v14866_v58, %v14321_v57  ;;  %v3183_v32 = vmul.f32 %v19954_v38, %v19953_v30  ;;  %v3184_v5 = vmul.f32 %v19954_v38, %v14472_v50  ;;  %v4254_v40 = vadd.f32 %v14967_v47, %v4149_v39  ;;  %v19956_v37 = vld [vmem:[#allocation106_spill] sm:$0xff]  ;;  %v19957_v57 = vld [vmem:[#allocation133_spill] sm:$0xff] }
 0x25f   : > { %v4255_v31 = vadd.f32 %v14973_v35, %v4150_v63  ;;  %v3006_v45 = vadd.f32 %v2974_v26, %v2902_v55  ;;  %v3007_v7 = vadd.f32 %v2975_v19, %v2903_v51  ;;  %v3287_v1 = vmul.f32 %v19956_v37, %v19955_v20  ;;  %10732 = vmatmul.mubr.msk.f32.gmra.mxu0 %vm724_vm0, %v19958_v42  ;;  %v19960_v39 = vld [vmem:[#allocation57_spill] sm:$0xff]  ;;  %v19961_v63 = vld [vmem:[#allocation52_spill] sm:$0xff]  ;;  %v19963_v36 = vld [vmem:[#allocation146_spill] sm:$0xff] }
 0x260   : > { %v3288_v10 = vmul.f32 %v19956_v37, %v19903_v54  ;;  %v3391_v61 = vmul.f32 %v19957_v57, %v19904_v44  ;;  %v3392_v60 = vmul.f32 %v19957_v57, %v19907_v27  ;;  %v4358_v47 = vadd.f32 %v14977_v14, %v4254_v40  ;;  %10734 = vmatprep.mubr.msk.f32.mxu0 %vm724_vm0, %v19959_v28  ;;  %v19964_v37 = vld [vmem:[#allocation127_spill] sm:$0xff] }
 0x261   : > { %v4359_v35 = vadd.f32 %v14983_v0, %v4255_v31  ;;  %v3110_v26 = vadd.f32 %v3078_v4, %v3006_v45  ;;  %v3111_v19 = vadd.f32 %v3079_v25, %v3007_v7  ;;  %v3495_v55 = vmul.f32 %v19961_v63, %v19960_v39  ;;  %v15151_v40 = vld [vmem:[%s19265_s21 + $0xa] ss:$0 sm:$0xff]  ;;  %v19966_v31 = vld [vmem:[#allocation129_spill] sm:$0xff] }
 0x262   : > { %v3496_v51 = vmul.f32 %v19961_v63, %v14536_v2  ;;  %v3599_v57 = vmul.f32 %v19963_v36, %v19962_v56  ;;  %v3600_v42 = vmul.f32 %v19963_v36, %v19964_v37  ;;  %v4462_v14 = vadd.f32 %v14987_v49, %v4358_v47  ;;  %19965 = vst [vmem:[#allocation42_spill] sm:$0xff] %v15151_v40  ;;  %v19967_v7 = vld [vmem:[#allocation135_spill] sm:$0xff]  ;;  %v19969_v49 = vld [vmem:[#allocation113_spill] sm:$0xff] }
 0x263   : > { %v4463_v0 = vadd.f32 %v14997_v34, %v4359_v35  ;;  %v3215_v4 = vadd.f32 %v3183_v32, %v3110_v26  ;;  %v3216_v25 = vadd.f32 %v3184_v5, %v3111_v19  ;;  %v3703_v45 = vmul.f32 %v15151_v40, %v19966_v31  ;;  %v15160_v36 = vld [vmem:[%s19265_s21 + $0xb] ss:$0 sm:$0xff]  ;;  %v19970_v5 = vld [vmem:[#allocation121_spill] sm:$0xff]  ;;  %v15175_v63 = vld [vmem:[%s19265_s21 + $0xc] ss:$0 sm:$0xff] }
 0x264   : > { %v3704_v28 = vmul.f32 %v15151_v40, %v19967_v7  ;;  %19968 = vst [vmem:[#allocation143_spill] sm:$0xff] %v15160_v36  ;;  %v3807_v34 = vmul.f32 %v15160_v36, %v19969_v49  ;;  %v3808_v32 = vmul.f32 %v15160_v36, %v14769_v53  ;;  %10735 = vmatmul.mubr.msk.f32.gmra.mxu0 %vm724_vm0, %v19970_v5  ;;  %v19971_v40 = vld [vmem:[#allocation116_spill] sm:$0xff]  ;;  %19972 = vst [vmem:[#allocation144_spill] sm:$0xff] %v15175_v63  ;;  %v19973_v49 = vld [vmem:[#allocation111_spill] sm:$0xff] }
 0x265   : > { %v4566_v47 = vadd.f32 %v15001_v29, %v4462_v14  ;;  %v4567_v35 = vadd.f32 %v15009_v16, %v4463_v0  ;;  %v3319_v26 = vadd.f32 %v3287_v1, %v3215_v4  ;;  %v3320_v19 = vadd.f32 %v3288_v10, %v3216_v25  ;;  %10793 = vmatprep.mubr.msk.bf16.mxu0 %vm2489_vm1, %v19971_v40  ;;  %v15184_v29 = vld [vmem:[%s19265_s21 + $0xd] ss:$0 sm:$0xff]  ;;  %v19975_v16 = vld [vmem:[#allocation30_spill] sm:$0xff]  ;;  %v19976_v10 = vld [vmem:[#allocation16_spill] sm:$0xff] }
 0x266   : > { %v3911_v36 = vmul.f32 %v15175_v63, %v19973_v49  ;;  %v3912_v5 = vmul.f32 %v15175_v63, %v14771_v33  ;;  %19974 = vst [vmem:[#allocation40_spill] sm:$0xff] %v15184_v29  ;;  %v15188_v1 = vmul.f32 %v15184_v29, %v19975_v16  ;;  %v15192_v14 = vmul.f32 %v15184_v29, %v19976_v10  ;;  %v19977_v0 = vld [vmem:[#allocation71_spill] sm:$0xff]  ;;  %v19979_v33 = vld [vmem:[#allocation72_spill] sm:$0xff]  ;;  %v19981_v29 = vld [vmem:[#allocation74_spill] sm:$0xff] }
 0x267   : > { %v4670_v4 = vadd.f32 %v19977_v0, %v4566_v47  ;;  %v4671_v25 = vadd.f32 %v15023_v15, %v4567_v35  ;;  %v3423_v40 = vadd.f32 %v3391_v61, %v3319_v26  ;;  %v3424_v49 = vadd.f32 %v3392_v60, %v3320_v19  ;;  %v15199_v63 = vld [vmem:[%s19265_s21 + $0xe] ss:$0 sm:$0xff]  ;;  %v19980_v16 = vld [vmem:[#allocation36_spill] sm:$0xff]  ;;  %v19982_v10 = vld [vmem:[#allocation126_spill] sm:$0xff] }
 0x268   : > { %19978 = vst [vmem:[#allocation61_spill] sm:$0xff] %v15199_v63  ;;  %v15203_v53 = vmul.f32 %v15199_v63, %v19979_v33  ;;  %v15207_v7 = vmul.f32 %v15199_v63, %v19980_v16  ;;  %v15211_v47 = vmul.f32 %v19982_v10, %v19981_v29  ;;  %v15215_v15 = vmul.f32 %v19982_v10, %v15003_v43  ;;  %v19983_v61 = vld [vmem:[#allocation59_spill] sm:$0xff]  ;;  %v19984_v60 = vld [vmem:[#allocation65_spill] sm:$0xff]  ;;  %v19987_v43 = vld [vmem:[#allocation60_spill] sm:$0xff] }
 0x269   : > { %10794 = vmatmul.mubr.msk.bf16.vlgmr.msra.gmra.mxu0 %vm2489_vm1, %v19983_v61  ;;  %v4775_v35 = vadd.f32 %v19984_v60, %v4670_v4  ;;  %v4776_v26 = vadd.f32 %v15037_v46, %v4671_v25  ;;  %v3527_v19 = vadd.f32 %v3495_v55, %v3423_v40  ;;  %v3528_v0 = vadd.f32 %v3496_v51, %v3424_v49  ;;  %v19985_v33 = vld [vmem:[#allocation69_spill] sm:$0xff]  ;;  %v19986_v63 = vld [vmem:[#allocation139_spill] sm:$0xff]  ;;  %v19989_v51 = vld [vmem:[#allocation32_spill] sm:$0xff] }
 0x26a   : > { %10797 = vmatprep.mubr.msk.bf16.mxu0 %vm2489_vm1, %v19985_v33  ;;  %v15225_v29 = vmul.f32 %v19986_v63, %v15005_v24  ;;  %v15229_v10 = vmul.f32 %v19986_v63, %v15015_v8  ;;  %v15233_v61 = vmul.f32 %v19987_v43, %v15017_v12  ;;  %v15237_v46 = vmul.f32 %v19987_v43, %v15029_v23  ;;  %v15239_v55 = vld [vmem:[#allocation2 + $0x1c6] sm:$0xff]  ;;  %v15243_v60 = vld [vmem:[#allocation2 + $0x1ce] sm:$0xff] }
 0x26b   : > { %19988 = vst [vmem:[#allocation68_spill] sm:$0xff] %v15239_v55  ;;  %v4879_v40 = vadd.f32 %v19989_v51, %v4775_v35  ;;  %v4880_v49 = vadd.f32 %v15051_v62, %v4776_v26  ;;  %v3631_v4 = vadd.f32 %v3599_v57, %v3527_v19  ;;  %v3632_v25 = vadd.f32 %v3600_v42, %v3528_v0  ;;  %v15245_v33 = vld [vmem:[#allocation2 + $0x1c7] sm:$0xff]  ;;  %v15247_v63 = vld [vmem:[#allocation2 + $0x1cf] sm:$0xff]  ;;  %v19994_v35 = vld [vmem:[#allocation17_spill] sm:$0xff] }
 0x26c   : > { %19990 = vst [vmem:[#allocation140_spill] sm:$0xff] %v15243_v60  ;;  %19991 = vst [vmem:[#allocation136_spill] sm:$0xff] %v15245_v33  ;;  %v19993_v12 = vld [vmem:[#allocation132_spill] sm:$0xff]  ;;  %v15259_v51 = vmul.f32 %v19994_v35, %v15077_v17  ;;  %v15263_v62 = vmul.f32 %v19994_v35, %v15079_v9  ;;  %v15267_v0 = vld [vmem:[#allocation2 + $0x1c8] sm:$0xff] }
 0x26d   : > { %19992 = vst [vmem:[#allocation49_spill] sm:$0xff] %v15247_v63  ;;  %v15251_v8 = vmul.f32 %v19993_v12, %v15031_v21  ;;  %v15255_v43 = vmul.f32 %v19993_v12, %v15043_v18  ;;  %v4983_v57 = vadd.f32 %v15055_v48, %v4879_v40  ;;  %v4984_v42 = vadd.f32 %v15059_v6, %v4880_v49  ;;  %v15269_v21 = vld [vmem:[#allocation2 + $0x1d0] sm:$0xff]  ;;  %v19998_v18 = vld [vmem:[#allocation51_spill] sm:$0xff] }
 0x26e   : > { %v3735_v26 = vadd.f32 %v3703_v45, %v3631_v4  ;;  %v3736_v19 = vadd.f32 %v3704_v28, %v3632_v25  ;;  %19995 = vst [vmem:[#allocation73_spill] sm:$0xff] %v15267_v0  ;;  %19996 = vst [vmem:[#allocation15_spill] sm:$0xff] %v15269_v21  ;;  %v15271_v12 = vld [vmem:[#allocation2 + $0x1c9] sm:$0xff]  ;;  %v15275_v17 = vmul.f32 %v19998_v18, %v15239_v55  ;;  %v15289_v45 = vld [vmem:[#allocation2 + $0x1d1] sm:$0xff] }
 0x26f   : > { %19997 = vst [vmem:[#allocation64_spill] sm:$0xff] %v15271_v12  ;;  %v15279_v35 = vmul.f32 %v19998_v18, %v15243_v60  ;;  %v15283_v48 = vmul.f32 %v19935_v3, %v15245_v33  ;;  %v15287_v6 = vmul.f32 %v19935_v3, %v15247_v63  ;;  %20000 = vst [vmem:[#allocation141_spill] sm:$0xff] %v15289_v45  ;;  %v20001_v28 = vld [vmem:[#allocation109_spill] sm:$0xff]  ;;  %v15293_v55 = vld [vmem:[#allocation2 + $0x1ca] sm:$0xff] }
 0x270   : > { %v5087_v40 = vadd.f32 %v20001_v28, %v4983_v57  ;;  %v5088_v49 = vadd.f32 %v15068_v41, %v4984_v42  ;;  %v3839_v4 = vadd.f32 %v3807_v34, %v3735_v26  ;;  %v3840_v25 = vadd.f32 %v3808_v32, %v3736_v19  ;;  %20002 = vst [vmem:[#allocation63_spill] sm:$0xff] %v15293_v55  ;;  %v20003_v18 = vld [vmem:[#allocation122_spill] sm:$0xff]  ;;  %v20004_v3 = vld [vmem:[#allocation123_spill] sm:$0xff]  ;;  %v20006_v57 = vld [vmem:[#allocation124_spill] sm:$0xff] }
 0x271   : > { %19999 = vst [vmem:[#allocation75_spill] sm:$0xff] %v15283_v48  ;;  %v15297_v60 = vmul.f32 %v20003_v18, %v15267_v0  ;;  %v15301_v48 = vmul.f32 %v20003_v18, %v15269_v21  ;;  %v15305_v63 = vmul.f32 %v20004_v3, %v15271_v12  ;;  %v2664_v28 = vmul.f32 %v20006_v57, %v19953_v30  ;;  %v20007_v41 = vld [vmem:[#allocation112_spill] sm:$0xff]  ;;  %v20008_v19 = vld [vmem:[#allocation138_spill] sm:$0xff] }
 0x272   : > { %10798 = vmatmul.mubr.msk.bf16.gmra.mxu0 %vm2489_vm1, %v20007_v41  ;;  %v5192_v34 = vadd.f32 %v15104_v13, %v5088_v49  ;;  %v3943_v32 = vadd.f32 %v3911_v36, %v3839_v4  ;;  %v3944_v42 = vadd.f32 %v3912_v5, %v3840_v25  ;;  %v15314_v26 = vmul.f32 %v20004_v3, %v15289_v45  ;;  %v15318_v18 = vld [vmem:[#allocation2 + $0x1d2] sm:$0xff] }
 0x273   : > { %20005 = vst [vmem:[#allocation26_spill] sm:$0xff] %v15305_v63  ;;  %10801 = vmatprep.mubr.msk.bf16.mxu0 %vm2489_vm1, %v20008_v19  ;;  %20009 = vst [vmem:[#allocation115_spill] sm:$0xff] %v15318_v18  ;;  %v15322_v63 = vmul.f32 %v14627_v52, %v15293_v55  ;;  %v2665_v30 = vmul.f32 %v20006_v57, %v14472_v50  ;;  %v20010_v13 = vld [vmem:[#allocation125_spill] sm:$0xff]  ;;  %v5191_v49 = vadd.f32 %v15100_v59, %v5087_v40 }
 0x274   : > { %v2768_v36 = vmul.f32 %v20010_v13, %v19955_v20  ;;  %v2769_v5 = vmul.f32 %v20010_v13, %v19903_v54  ;;  %v4047_v4 = vadd.f32 %v15188_v1, %v3943_v32  ;;  %v4048_v25 = vadd.f32 %v15192_v14, %v3944_v42  ;;  %v20013_v42 = vld [vmem:[#allocation113_spill] sm:$0xff] }
 0x275   : > { %v2872_v19 = vmul.f32 %v19883_v22, %v19904_v44  ;;  %v2873_v50 = vmul.f32 %v19883_v22, %v19907_v27  ;;  %v2976_v20 = vmul.f32 %v14855_v11, %v19960_v39  ;;  %v15339_v57 = vpack.c.bf16 %v5192_v34, %v5191_v49 }
 0x276   : > { %v2800_v41 = vadd.f32 %v2768_v36, %v2664_v28  ;;  %v2801_v3 = vadd.f32 %v2769_v5, %v2665_v30  ;;  %v4151_v54 = vadd.f32 %v15203_v53, %v4047_v4  ;;  %v4152_v59 = vadd.f32 %v15207_v7, %v4048_v25  ;;  %v20015_v30 = vld [vmem:[#allocation54_spill] sm:$0xff]  ;;  %v20017_v36 = vld [vmem:[#allocation111_spill] sm:$0xff]  ;;  %v20018_v5 = vld [vmem:[#allocation133_spill] sm:$0xff] }
 0x277   : > { %20011 = vst [vmem:[#allocation89_spill] sm:$0xff] %v15339_v57  ;;  %v15345_v1 = vmul.f32 %v14627_v52, %v15318_v18  ;;  %v2977_v40 = vmul.f32 %v14855_v11, %v14536_v2  ;;  %v3080_v27 = vmul.f32 %v14866_v58, %v19962_v56  ;;  %v3081_v53 = vmul.f32 %v14866_v58, %v19964_v37  ;;  %v20014_v2 = vld [vmem:[#allocation106_spill] sm:$0xff]  ;;  %v20019_v4 = vld [vmem:[#allocation28_spill] sm:$0xff] }
 0x278   : > { %v2904_v14 = vadd.f32 %v2872_v19, %v2800_v41  ;;  %v2905_v44 = vadd.f32 %v2873_v50, %v2801_v3  ;;  %v4256_v39 = vadd.f32 %v15211_v47, %v4151_v54  ;;  %v4257_v28 = vadd.f32 %v15215_v15, %v4152_v59  ;;  %v20012_v41 = vld [vmem:[#allocation135_spill] sm:$0xff]  ;;  %v20016_v15 = vld [vmem:[#allocation56_spill] sm:$0xff]  ;;  %v20021_v59 = vld [vmem:[#allocation30_spill] sm:$0xff] }
 0x279   : > { %v3185_v7 = vmul.f32 %v19954_v38, %v19966_v31  ;;  %v3186_v3 = vmul.f32 %v19954_v38, %v20012_v41  ;;  %v3289_v19 = vmul.f32 %v20014_v2, %v20013_v42  ;;  %v3290_v37 = vmul.f32 %v20014_v2, %v20016_v15 }
 0x27a   : > { %v3008_v34 = vadd.f32 %v2976_v20, %v2904_v14  ;;  %v3009_v32 = vadd.f32 %v2977_v40, %v2905_v44  ;;  %10802 = vmatmul.mubr.msk.bf16.gmra.mxu0 %vm2489_vm1, %v20015_v30  ;;  %v4360_v56 = vadd.f32 %v15225_v29, %v4256_v39  ;;  %v4361_v47 = vadd.f32 %v15229_v10, %v4257_v28  ;;  %v20020_v20 = vld [vmem:[#allocation137_spill] sm:$0xff]  ;;  %v20022_v14 = vld [vmem:[#allocation52_spill] sm:$0xff]  ;;  %v20025_v30 = vld [vmem:[#allocation146_spill] sm:$0xff] }
 0x27b   : > { %v3393_v49 = vmul.f32 %v20018_v5, %v20017_v36  ;;  %10805 = vmatprep.mubr.msk.bf16.mxu0 %vm2489_vm1, %v20019_v4  ;;  %v3394_v54 = vmul.f32 %v20018_v5, %v20020_v20  ;;  %v3497_v44 = vmul.f32 %v20022_v14, %v20021_v59  ;;  %v20023_v40 = vld [vmem:[#allocation16_spill] sm:$0xff] }
 0x27c   : > { %v3112_v25 = vadd.f32 %v3080_v27, %v3008_v34  ;;  %v3113_v50 = vadd.f32 %v3081_v53, %v3009_v32  ;;  %v4464_v29 = vadd.f32 %v15233_v61, %v4360_v56  ;;  %v4465_v10 = vadd.f32 %v15237_v46, %v4361_v47  ;;  %v20024_v28 = vld [vmem:[#allocation72_spill] sm:$0xff]  ;;  %v20026_v53 = vld [vmem:[#allocation74_spill] sm:$0xff]  ;;  %v20028_v56 = vld [vmem:[#allocation31_spill] sm:$0xff] }
 0x27d   : > { %v3498_v39 = vmul.f32 %v20022_v14, %v20023_v40  ;;  %v3601_v2 = vmul.f32 %v20025_v30, %v20024_v28  ;;  %v3602_v27 = vmul.f32 %v20025_v30, %v19980_v16  ;;  %v20027_v34 = vld [vmem:[#allocation42_spill] sm:$0xff]  ;;  %v20029_v47 = vld [vmem:[#allocation143_spill] sm:$0xff] }
 0x27e   : > { %v3217_v38 = vadd.f32 %v3185_v7, %v3112_v25  ;;  %v3218_v4 = vadd.f32 %v3186_v3, %v3113_v50  ;;  %v3705_v32 = vmul.f32 %v20027_v34, %v20026_v53  ;;  %v4568_v5 = vadd.f32 %v15251_v8, %v4464_v29  ;;  %v20030_v7 = vld [vmem:[#allocation34_spill] sm:$0xff]  ;;  %v20032_v50 = vld [vmem:[#allocation144_spill] sm:$0xff] }
 0x27f   : > { %v4569_v61 = vadd.f32 %v15255_v43, %v4465_v10  ;;  %v3706_v46 = vmul.f32 %v20027_v34, %v20028_v56  ;;  %v3809_v14 = vmul.f32 %v20029_v47, %v15005_v24  ;;  %v3810_v3 = vmul.f32 %v20029_v47, %v20030_v7  ;;  %v20031_v25 = vld [vmem:[#allocation110_spill] sm:$0xff]  ;;  %v20034_v10 = vld [vmem:[#allocation40_spill] sm:$0xff] }
 0x280   : > { %v3321_v58 = vadd.f32 %v3289_v19, %v3217_v38  ;;  %v3322_v28 = vadd.f32 %v3290_v37, %v3218_v4  ;;  %v3913_v30 = vmul.f32 %v20032_v50, %v20031_v25  ;;  %v4672_v53 = vadd.f32 %v15259_v51, %v4568_v5  ;;  %v20033_v29 = vld [vmem:[#allocation14_spill] sm:$0xff]  ;;  %v20035_v38 = vld [vmem:[#allocation128_spill] sm:$0xff]  ;;  %v20037_v4 = vld [vmem:[#allocation61_spill] sm:$0xff] }
 0x281   : > { %v4673_v8 = vadd.f32 %v15263_v62, %v4569_v61  ;;  %v3914_v43 = vmul.f32 %v20032_v50, %v15029_v23  ;;  %v4017_v34 = vmul.f32 %v20034_v10, %v20033_v29  ;;  %v4018_v19 = vmul.f32 %v20034_v10, %v20035_v38  ;;  %v20036_v37 = vld [vmem:[#allocation76_spill] sm:$0xff]  ;;  %v20038_v25 = vld [vmem:[#allocation58_spill] sm:$0xff] }
 0x282   : > { %v3425_v56 = vadd.f32 %v3393_v49, %v3321_v58  ;;  %v3426_v24 = vadd.f32 %v3394_v54, %v3322_v28  ;;  %v15405_v47 = vmul.f32 %v20037_v4, %v20036_v37  ;;  %10806 = vmatmul.mubr.msk.bf16.gmra.mxu0 %vm2489_vm1, %v20038_v25  ;;  %v4777_v51 = vadd.f32 %v15275_v17, %v4672_v53  ;;  %v20039_v58 = vld [vmem:[#allocation68_spill] sm:$0xff]  ;;  %v20040_v49 = vld [vmem:[#allocation126_spill] sm:$0xff]  ;;  %v20043_v17 = vld [vmem:[#allocation139_spill] sm:$0xff] }
 0x283   : > { %v4778_v62 = vadd.f32 %v15279_v35, %v4673_v8  ;;  %v15413_v5 = vmul.f32 %v20037_v4, %v15079_v9  ;;  %v15417_v54 = vmul.f32 %v20040_v49, %v20039_v58  ;;  %v20041_v28 = vld [vmem:[#allocation142_spill] sm:$0xff]  ;;  %v20042_v50 = vld [vmem:[#allocation140_spill] sm:$0xff]  ;;  %v15427_v35 = vmul.f32 %v20043_v17, %v15245_v33  ;;  %v20044_v53 = vld [vmem:[#allocation75_spill] sm:$0xff] }
 0x284   : > { %10809 = vmatprep.mubr.msk.bf16.mxu0 %vm2489_vm1, %v20041_v28  ;;  %v3529_v61 = vadd.f32 %v3497_v44, %v3425_v56  ;;  %v3530_v10 = vadd.f32 %v3498_v39, %v3426_v24  ;;  %v15423_v25 = vmul.f32 %v20040_v49, %v20042_v50  ;;  %v4881_v8 = vadd.f32 %v20044_v53, %v4777_v51  ;;  %v20045_v9 = vld [vmem:[#allocation49_spill] sm:$0xff]  ;;  %v20046_v28 = vld [vmem:[#allocation60_spill] sm:$0xff]  ;;  %v15439_v24 = vld [vmem:[#allocation2 + $0x1e6] sm:$0xff] }
 0x285   : > { %v4882_v4 = vadd.f32 %v15287_v6, %v4778_v62  ;;  %v15433_v58 = vmul.f32 %v20043_v17, %v20045_v9  ;;  %v15437_v44 = vmul.f32 %v20046_v28, %v15267_v0  ;;  %20047 = vst [vmem:[#allocation90_spill] sm:$0xff] %v15439_v24  ;;  %v15443_v49 = vmul.f32 %v20046_v28, %v15269_v21  ;;  %v20048_v51 = vld [vmem:[#allocation132_spill] sm:$0xff]  ;;  %v15451_v62 = vld [vmem:[#allocation2 + $0x1e7] sm:$0xff] }
 0x286   : > { %v3633_v39 = vadd.f32 %v3601_v2, %v3529_v61  ;;  %v3634_v56 = vadd.f32 %v3602_v27, %v3530_v10  ;;  %v15447_v53 = vmul.f32 %v20048_v51, %v15271_v12  ;;  %v15449_v6 = vld [vmem:[#allocation2 + $0x1ee] sm:$0xff]  ;;  %v4985_v17 = vadd.f32 %v15297_v60, %v4881_v8  ;;  %v20049_v27 = vld [vmem:[#allocation17_spill] sm:$0xff] }
 0x287   : > { %v4986_v0 = vadd.f32 %v15301_v48, %v4882_v4  ;;  %v15457_v2 = vmul.f32 %v20048_v51, %v15289_v45  ;;  %v15461_v10 = vmul.f32 %v20049_v27, %v15293_v55  ;;  %v15463_v28 = vld [vmem:[#allocation2 + $0x1ef] sm:$0xff]  ;;  %v15469_v9 = vmul.f32 %v20049_v27, %v15318_v18  ;;  %v20055_v51 = vld [vmem:[#allocation26_spill] sm:$0xff] }
 0x288   : > { %20050 = vst [vmem:[#allocation41_spill] sm:$0xff] %v15463_v28  ;;  %v15465_v61 = vld [vmem:[#allocation2 + $0x1e8] sm:$0xff]  ;;  %v3737_v12 = vadd.f32 %v3705_v32, %v3633_v39  ;;  %v3738_v21 = vadd.f32 %v3706_v46, %v3634_v56  ;;  %v15475_v4 = vld [vmem:[#allocation2 + $0x1f0] sm:$0xff]  ;;  %v5089_v55 = vadd.f32 %v20055_v51, %v4985_v17  ;;  %v20056_v46 = vld [vmem:[#allocation134_spill] sm:$0xff] }
 0x289   : > { %v20051_v60 = vld [vmem:[#allocation51_spill] sm:$0xff]  ;;  %20053 = vst [vmem:[#allocation93_spill] sm:$0xff] %v15475_v4  ;;  %v5090_v45 = vadd.f32 %v15314_v26, %v4986_v0  ;;  %v15487_v39 = vmul.f32 %v20056_v46, %v15451_v62  ;;  %v15497_v17 = vld [vmem:[#allocation2 + $0x1f1] sm:$0xff] }
 0x28a   : > { %v15473_v48 = vmul.f32 %v20051_v60, %v15439_v24  ;;  %v15477_v8 = vld [vmem:[#allocation2 + $0x1e9] sm:$0xff]  ;;  %v15483_v32 = vmul.f32 %v20051_v60, %v15449_v6  ;;  %v3841_v56 = vadd.f32 %v3809_v14, %v3737_v12  ;;  %v3842_v27 = vadd.f32 %v3810_v3, %v3738_v21  ;;  %20059 = vst [vmem:[#allocation97_spill] sm:$0xff] %v15497_v17 }
 0x28b   : > { %20054 = vst [vmem:[#allocation96_spill] sm:$0xff] %v15477_v8  ;;  %v15491_v24 = vmul.f32 %v20056_v46, %v15463_v28  ;;  %10810 = vmatmul.mubr.msk.bf16.gmra.mxu0 %vm2489_vm1, %v15339_v57  ;;  %v5193_v0 = vadd.f32 %v15322_v63, %v5089_v55  ;;  %v5194_v26 = vadd.f32 %v15345_v1, %v5090_v45  ;;  %v20060_v12 = vld [vmem:[#allocation123_spill] sm:$0xff]  ;;  %v20062_v46 = vld [vmem:[#allocation124_spill] sm:$0xff] }
 0x28c   : > { %20052 = vst [vmem:[#allocation80_spill] sm:$0xff] %v15473_v48  ;;  %v20057_v48 = vld [vmem:[#allocation122_spill] sm:$0xff]  ;;  %v15509_v14 = vmul.f32 %v20060_v12, %v15477_v8  ;;  %v15511_v3 = vld [vmem:[#allocation2 + $0x1ea] sm:$0xff]  ;;  %v3945_v60 = vadd.f32 %v3913_v30, %v3841_v56  ;;  %v3946_v51 = vadd.f32 %v3914_v43, %v3842_v27  ;;  %v2667_v63 = vmul.f32 %v20062_v46, %v20012_v41  ;;  %v15523_v1 = vld [vmem:[#allocation2 + $0x1f2] sm:$0xff] }
 0x28d   : > { %v15495_v18 = vmul.f32 %v20057_v48, %v15465_v61  ;;  %v15505_v21 = vmul.f32 %v20057_v48, %v15475_v4  ;;  %20061 = vst [vmem:[#allocation79_spill] sm:$0xff] %v15511_v3  ;;  %v15517_v55 = vpack.c.bf16 %v5194_v26, %v5193_v0  ;;  %v15521_v45 = vmul.f32 %v20060_v12, %v15497_v17  ;;  %v20065_v12 = vld [vmem:[#allocation72_spill] sm:$0xff] }
 0x28e   : > { %20064 = vst [vmem:[#allocation117_spill] sm:$0xff] %v15523_v1  ;;  %v2770_v48 = vmul.f32 %v20010_v13, %v20013_v42  ;;  %v2771_v30 = vmul.f32 %v20010_v13, %v20016_v15  ;;  %v4049_v43 = vadd.f32 %v4017_v34, %v3945_v60  ;;  %v4050_v56 = vadd.f32 %v4018_v19, %v3946_v51  ;;  %v20066_v60 = vld [vmem:[#allocation131_spill] sm:$0xff] }
 0x28f   : > { %20058 = vst [vmem:[#allocation114_spill] sm:$0xff] %v15495_v18  ;;  %v2666_v18 = vmul.f32 %v20062_v46, %v19966_v31  ;;  %20063 = vst [vmem:[#allocation130_spill] sm:$0xff] %v15517_v55  ;;  %v15531_v31 = vmul.f32 %v14627_v52, %v15511_v3  ;;  %v2874_v41 = vmul.f32 %v19883_v22, %v20017_v36  ;;  %10813 = vmatprep.mubr.msk.bf16.mxu0 %vm2489_vm1, %v15517_v55 }
 0x290   : > { %v2803_v0 = vadd.f32 %v2771_v30, %v2667_v63  ;;  %v2875_v42 = vmul.f32 %v19883_v22, %v20020_v20  ;;  %v2978_v13 = vmul.f32 %v14855_v11, %v20021_v59  ;;  %v4153_v15 = vadd.f32 %v15405_v47, %v4049_v43  ;;  %v20067_v47 = vld [vmem:[#allocation74_spill] sm:$0xff]  ;;  %v20070_v30 = vld [vmem:[#allocation103_spill] sm:$0xff] }
 0x291   : > { %v2802_v27 = vadd.f32 %v2770_v48, %v2666_v18  ;;  %v4154_v34 = vadd.f32 %v15413_v5, %v4050_v56  ;;  %v15545_v19 = vmul.f32 %v14627_v52, %v15523_v1  ;;  %v2979_v36 = vmul.f32 %v14855_v11, %v20023_v40  ;;  %v20068_v5 = vld [vmem:[#allocation145_spill] sm:$0xff]  ;;  %v20069_v52 = vld [vmem:[#allocation31_spill] sm:$0xff]  ;;  %v20071_v43 = vld [vmem:[#allocation106_spill] sm:$0xff] }
 0x292   : > { %v2907_v18 = vadd.f32 %v2875_v42, %v2803_v0  ;;  %v3082_v51 = vmul.f32 %v20066_v60, %v20065_v12  ;;  %v3083_v22 = vmul.f32 %v20066_v60, %v19980_v16  ;;  %v4258_v20 = vadd.f32 %v15417_v54, %v4153_v15 }
 0x293   : > { %v2906_v26 = vadd.f32 %v2874_v41, %v2802_v27  ;;  %v4259_v59 = vadd.f32 %v15423_v25, %v4154_v34  ;;  %v3187_v46 = vmul.f32 %v20068_v5, %v20067_v47  ;;  %v3188_v63 = vmul.f32 %v20068_v5, %v20069_v52  ;;  %v20072_v27 = vld [vmem:[#allocation110_spill] sm:$0xff]  ;;  %v20073_v25 = vld [vmem:[#allocation133_spill] sm:$0xff] }
 0x294   : > { %v3011_v40 = vadd.f32 %v2979_v36, %v2907_v18  ;;  %v3291_v56 = vmul.f32 %v20071_v43, %v20070_v30  ;;  %v3292_v41 = vmul.f32 %v20071_v43, %v20030_v7  ;;  %v4362_v16 = vadd.f32 %v15427_v35, %v4258_v20  ;;  %v20076_v20 = vld [vmem:[#allocation105_spill] sm:$0xff] }
 0x295   : > { %v3010_v48 = vadd.f32 %v2978_v13, %v2906_v26  ;;  %v4363_v54 = vadd.f32 %v15433_v58, %v4259_v59  ;;  %v3395_v0 = vmul.f32 %v20073_v25, %v20072_v27  ;;  %v3396_v42 = vmul.f32 %v20073_v25, %v15029_v23  ;;  %v20074_v13 = vld [vmem:[#allocation52_spill] sm:$0xff]  ;;  %v20075_v58 = vld [vmem:[#allocation146_spill] sm:$0xff] }
 0x296   : > { %v3115_v34 = vadd.f32 %v3083_v22, %v3011_v40  ;;  %v3499_v36 = vmul.f32 %v20074_v13, %v20033_v29  ;;  %v3500_v26 = vmul.f32 %v20074_v13, %v20035_v38  ;;  %v4466_v18 = vadd.f32 %v15437_v44, %v4362_v16  ;;  %v20078_v22 = vld [vmem:[#allocation42_spill] sm:$0xff] }
 0x297   : > { %v3114_v15 = vadd.f32 %v3082_v51, %v3010_v48  ;;  %v4467_v35 = vadd.f32 %v15443_v49, %v4363_v54  ;;  %v3603_v12 = vmul.f32 %v20075_v58, %v20036_v37  ;;  %v3604_v59 = vmul.f32 %v20075_v58, %v20076_v20  ;;  %v20077_v51 = vld [vmem:[#allocation68_spill] sm:$0xff]  ;;  %v20079_v49 = vld [vmem:[#allocation143_spill] sm:$0xff]  ;;  %v20080_v54 = vld [vmem:[#allocation49_spill] sm:$0xff] }
 0x298   : > { %v3220_v57 = vadd.f32 %v3188_v63, %v3115_v34  ;;  %v3707_v48 = vmul.f32 %v20078_v22, %v20077_v51  ;;  %v3708_v40 = vmul.f32 %v20078_v22, %v20042_v50  ;;  %v4570_v13 = vadd.f32 %v15447_v53, %v4466_v18  ;;  %v20082_v63 = vld [vmem:[#allocation144_spill] sm:$0xff]  ;;  %v20083_v34 = vld [vmem:[#allocation15_spill] sm:$0xff] }
 0x299   : > { %v3219_v55 = vadd.f32 %v3187_v46, %v3114_v15  ;;  %v4571_v44 = vadd.f32 %v15457_v2, %v4467_v35  ;;  %v3811_v16 = vmul.f32 %v20079_v49, %v15245_v33  ;;  %v3812_v25 = vmul.f32 %v20079_v49, %v20080_v54  ;;  %v20081_v46 = vld [vmem:[#allocation73_spill] sm:$0xff]  ;;  %v20084_v18 = vld [vmem:[#allocation64_spill] sm:$0xff] }
 0x29a   : > { %v3324_v58 = vadd.f32 %v3292_v41, %v3220_v57  ;;  %v15591_v15 = vmul.f32 %v20082_v63, %v20081_v46  ;;  %v15595_v5 = vmul.f32 %v20082_v63, %v20083_v34  ;;  %v4674_v53 = vadd.f32 %v15461_v10, %v4570_v13  ;;  %v20085_v35 = vld [vmem:[#allocation40_spill] sm:$0xff]  ;;  %v20086_v33 = vld [vmem:[#allocation141_spill] sm:$0xff]  ;;  %v20087_v41 = vld [vmem:[#allocation63_spill] sm:$0xff] }
 0x29b   : > { %v3323_v43 = vadd.f32 %v3291_v56, %v3219_v55  ;;  %v4675_v2 = vadd.f32 %v15469_v9, %v4571_v44  ;;  %v15601_v22 = vmul.f32 %v20085_v35, %v20084_v18  ;;  %v15605_v55 = vmul.f32 %v20085_v35, %v20086_v33  ;;  %v20088_v49 = vld [vmem:[#allocation61_spill] sm:$0xff]  ;;  %v20089_v63 = vld [vmem:[#allocation115_spill] sm:$0xff]  ;;  %v20090_v10 = vld [vmem:[#allocation80_spill] sm:$0xff] }
 0x29c   : > { %v3428_v56 = vadd.f32 %v3396_v42, %v3324_v58  ;;  %v15609_v46 = vmul.f32 %v20088_v49, %v20087_v41  ;;  %v15613_v34 = vmul.f32 %v20088_v49, %v20089_v63  ;;  %v4779_v9 = vadd.f32 %v20090_v10, %v4674_v53  ;;  %v15620_v44 = vld [vmem:[%s19265_s21 + $0xf] ss:$0 sm:$0xff]  ;;  %v20092_v35 = vld [vmem:[#allocation90_spill] sm:$0xff]  ;;  %v15633_v53 = vld [vmem:[%s19265_s21 + $0x10] ss:$0 sm:$0xff] }
 0x29d   : > { %v3427_v57 = vadd.f32 %v3395_v0, %v3323_v43  ;;  %v4780_v13 = vadd.f32 %v15483_v32, %v4675_v2  ;;  %20091 = vst [vmem:[#allocation118_spill] sm:$0xff] %v15620_v44  ;;  %v15624_v43 = vmul.f32 %v15620_v44, %v20092_v35  ;;  %v15628_v0 = vmul.f32 %v15620_v44, %v15449_v6 }
 0x29e   : > { %v3532_v58 = vadd.f32 %v3500_v26, %v3428_v56  ;;  %20093 = vst [vmem:[#allocation35_spill] sm:$0xff] %v15633_v53  ;;  %v15637_v32 = vmul.f32 %v15633_v53, %v15451_v62  ;;  %v15641_v2 = vmul.f32 %v15633_v53, %v15463_v28  ;;  %v4883_v10 = vadd.f32 %v15487_v39, %v4779_v9  ;;  %v4709_v56 = vld [vmem:[#allocation2 + $0x206] sm:$0xff]  ;;  %v4710_v53 = vld [vmem:[#allocation2 + $0x20e] sm:$0xff] }
 0x29f   : > { %v3531_v42 = vadd.f32 %v3499_v36, %v3427_v57  ;;  %v4884_v44 = vadd.f32 %v15491_v24, %v4780_v13  ;;  %v15648_v36 = vld [vmem:[%s19265_s21 + $0x11] ss:$0 sm:$0xff]  ;;  %v15661_v24 = vld [vmem:[%s19265_s21 + $0x12] ss:$0 sm:$0xff]  ;;  %v15671_v13 = vld [vmem:[#allocation2 + $0x207] sm:$0xff] }
 0x2a0   : > { %20094 = vst [vmem:[#allocation70_spill] sm:$0xff] %v15648_v36  ;;  %v15652_v26 = vmul.f32 %v15648_v36, %v15465_v61  ;;  %v15656_v57 = vmul.f32 %v15648_v36, %v15475_v4  ;;  %v3636_v28 = vadd.f32 %v3604_v59, %v3532_v58  ;;  %20095 = vst [vmem:[#allocation119_spill] sm:$0xff] %v15661_v24  ;;  %v15673_v36 = vld [vmem:[#allocation2 + $0x20f] sm:$0xff]  ;;  %v20096_v4 = vld [vmem:[#allocation114_spill] sm:$0xff] }
 0x2a1   : > { %v3635_v49 = vadd.f32 %v3603_v12, %v3531_v42  ;;  %v15665_v39 = vmul.f32 %v15661_v24, %v15477_v8  ;;  %v15669_v9 = vmul.f32 %v15661_v24, %v15497_v17  ;;  %v4987_v12 = vadd.f32 %v20096_v4, %v4883_v10  ;;  %v15680_v42 = vld [vmem:[%s19265_s21 + $0x13] ss:$0 sm:$0xff]  ;;  %v15690_v17 = vld [vmem:[#allocation2 + $0x208] sm:$0xff] }
 0x2a2   : > { %v4988_v59 = vadd.f32 %v15505_v21, %v4884_v44  ;;  %20097 = vst [vmem:[#allocation120_spill] sm:$0xff] %v15680_v42  ;;  %v15684_v58 = vmul.f32 %v15680_v42, %v15511_v3  ;;  %v15688_v24 = vmul.f32 %v15680_v42, %v15523_v1  ;;  %v15692_v8 = vld [vmem:[#allocation2 + $0x210] sm:$0xff]  ;;  %v3740_v10 = vadd.f32 %v3708_v40, %v3636_v28 }
 0x2a3   : > { %v3739_v4 = vadd.f32 %v3707_v48, %v3635_v49  ;;  %v15697_v21 = vld [vmem:[%s19265_s21 + $0x14] ss:$0 sm:$0xff]  ;;  %v5091_v42 = vadd.f32 %v15509_v14, %v4987_v12  ;;  %v15712_v28 = vld [vmem:[%s19265_s21 + $0x15] ss:$0 sm:$0xff]  ;;  %v15725_v14 = vld [vmem:[%s19265_s21 + $0x16] ss:$0 sm:$0xff] }
 0x2a4   : > { %20098 = vst [vmem:[#allocation57_spill] sm:$0xff] %v15684_v58  ;;  %20099 = vst [vmem:[#allocation107_spill] sm:$0xff] %v15697_v21  ;;  %v15700_v44 = vmul.f32 %v15697_v21, %v4709_v56  ;;  %v15703_v3 = vmul.f32 %v15697_v21, %v4710_v53  ;;  %v15705_v58 = vld [vmem:[#allocation2 + $0x209] sm:$0xff]  ;;  %v5092_v1 = vadd.f32 %v15521_v45, %v4988_v59  ;;  %v15735_v12 = vld [vmem:[#allocation2 + $0x211] sm:$0xff] }
 0x2a5   : > { %20100 = vst [vmem:[#allocation127_spill] sm:$0xff] %v15712_v28  ;;  %v15716_v48 = vmul.f32 %v15712_v28, %v15671_v13  ;;  %v15720_v40 = vmul.f32 %v15712_v28, %v15673_v36  ;;  %v3843_v49 = vadd.f32 %v3811_v16, %v3739_v4  ;;  %v3844_v53 = vadd.f32 %v3812_v25, %v3740_v10  ;;  %v15742_v25 = vld [vmem:[%s19265_s21 + $0x17] ss:$0 sm:$0xff]  ;;  %v11539_v10 = vld [vmem:[%s19265_s21] ss:$0 sm:$0xff] }
 0x2a6   : > { %20101 = vst [vmem:[#allocation129_spill] sm:$0xff] %v15725_v14  ;;  %v15729_v45 = vmul.f32 %v15725_v14, %v15690_v17  ;;  %v15733_v56 = vmul.f32 %v15725_v14, %v15692_v8  ;;  %v5195_v59 = vadd.f32 %v15531_v31, %v5091_v42  ;;  %v5196_v16 = vadd.f32 %v15545_v19, %v5092_v1  ;;  %v15754_v1 = vld [vmem:[#allocation2 + $0x20a] sm:$0xff]  ;;  %v15756_v19 = vld [vmem:[#allocation2 + $0x212] sm:$0xff] }
 0x2a7   : > { %v15746_v4 = vmul.f32 %v15742_v25, %v15705_v58  ;;  %v2668_v14 = vmul.f32 %v11539_v10, %v20067_v47  ;;  %v3947_v28 = vadd.f32 %v15591_v15, %v3843_v49  ;;  %v3948_v31 = vadd.f32 %v15595_v5, %v3844_v53  ;;  %v11541_v15 = vld [vmem:[%s19265_s21 + $0x2] ss:$0 sm:$0xff] }
 0x2a8   : > { %20102 = vst [vmem:[#allocation121_spill] sm:$0xff] %v15733_v56  ;;  %v2669_v42 = vmul.f32 %v11539_v10, %v20069_v52  ;;  %v15763_v56 = vpack.c.bf16 %v5196_v16, %v5195_v59  ;;  %v15767_v47 = vmul.f32 %v15742_v25, %v15735_v12  ;;  %v2876_v52 = vmul.f32 %v11541_v15, %v20072_v27 }
 0x2a9   : > { %20103 = vst [vmem:[#allocation71_spill] sm:$0xff] %v15746_v4  ;;  %v11540_v4 = vld [vmem:[%s19265_s21 + $0x1] ss:$0 sm:$0xff]  ;;  %v4051_v49 = vadd.f32 %v15601_v22, %v3947_v28  ;;  %v4052_v53 = vadd.f32 %v15605_v55, %v3948_v31  ;;  %v2877_v55 = vmul.f32 %v11541_v15, %v15029_v23  ;;  %v3085_v31 = vmul.f32 %v20066_v60, %v20076_v20 }
 0x2aa   : > { %v2772_v21 = vmul.f32 %v11540_v4, %v20070_v30  ;;  %20104 = vst [vmem:[#allocation36_spill] sm:$0xff] %v15763_v56  ;;  %v2773_v5 = vmul.f32 %v11540_v4, %v20030_v7  ;;  %v2980_v30 = vmul.f32 %v14855_v11, %v20033_v29  ;;  %10814 = vmatmul.mubr.msk.bf16.gmra.mxu0 %vm2489_vm1, %v15763_v56  ;;  %v15783_v7 = vld [vmem:[%s19265_s21 + $0x18] ss:$0 sm:$0xff] }
 0x2ab   : > { %v15787_v59 = vmul.f32 %v15783_v7, %v15754_v1  ;;  %v15791_v27 = vmul.f32 %v15783_v7, %v15756_v19  ;;  %v4155_v29 = vadd.f32 %v15609_v46, %v4051_v49  ;;  %v3084_v4 = vmul.f32 %v20066_v60, %v20036_v37  ;;  %v20105_v56 = vld [vmem:[#allocation145_spill] sm:$0xff] }
 0x2ac   : > { %v2804_v10 = vadd.f32 %v2772_v21, %v2668_v14  ;;  %v2805_v22 = vadd.f32 %v2773_v5, %v2669_v42  ;;  %v4156_v21 = vadd.f32 %v15613_v34, %v4052_v53  ;;  %v2981_v14 = vmul.f32 %v14855_v11, %v20035_v38  ;;  %v20106_v11 = vld [vmem:[#allocation136_spill] sm:$0xff]  ;;  %v20107_v38 = vld [vmem:[#allocation106_spill] sm:$0xff]  ;;  %v20108_v49 = vld [vmem:[#allocation73_spill] sm:$0xff] }
 0x2ad   : > { %v3189_v42 = vmul.f32 %v20105_v56, %v20077_v51  ;;  %v4260_v23 = vadd.f32 %v15624_v43, %v4155_v29  ;;  %v3190_v34 = vmul.f32 %v20105_v56, %v20042_v50  ;;  %v3294_v37 = vmul.f32 %v20107_v38, %v20080_v54  ;;  %v20109_v60 = vld [vmem:[#allocation133_spill] sm:$0xff]  ;;  %v20111_v50 = vld [vmem:[#allocation52_spill] sm:$0xff]  ;;  %v20112_v54 = vld [vmem:[#allocation146_spill] sm:$0xff] }
 0x2ae   : > { %v2908_v28 = vadd.f32 %v2876_v52, %v2804_v10  ;;  %v2909_v16 = vadd.f32 %v2877_v55, %v2805_v22  ;;  %v4261_v46 = vadd.f32 %v15628_v0, %v4156_v21  ;;  %v3293_v52 = vmul.f32 %v20107_v38, %v20106_v11  ;;  %v20110_v0 = vld [vmem:[#allocation15_spill] sm:$0xff]  ;;  %v20120_v11 = vld [vmem:[#allocation57_spill] sm:$0xff] }
 0x2af   : > { %v3397_v20 = vmul.f32 %v20109_v60, %v20108_v49  ;;  %v4364_v51 = vadd.f32 %v15637_v32, %v4260_v23  ;;  %v3398_v10 = vmul.f32 %v20109_v60, %v20110_v0  ;;  %v3501_v56 = vmul.f32 %v20111_v50, %v20084_v18  ;;  %v20122_v60 = vld [vmem:[#allocation79_spill] sm:$0xff]  ;;  %v20125_v0 = vld [vmem:[#allocation118_spill] sm:$0xff] }
 0x2b0   : > { %v3012_v5 = vadd.f32 %v2980_v30, %v2908_v28  ;;  %v3013_v15 = vadd.f32 %v2981_v14, %v2909_v16  ;;  %v4365_v43 = vadd.f32 %v15641_v2, %v4261_v46  ;;  %v3502_v22 = vmul.f32 %v20111_v50, %v20086_v33  ;;  %v20113_v14 = vld [vmem:[#allocation42_spill] sm:$0xff]  ;;  %v20114_v33 = vld [vmem:[#allocation143_spill] sm:$0xff] }
 0x2b1   : > { %v3605_v55 = vmul.f32 %v20112_v54, %v20087_v41  ;;  %v4468_v29 = vadd.f32 %v15652_v26, %v4364_v51  ;;  %v3606_v2 = vmul.f32 %v20112_v54, %v20089_v63  ;;  %v3709_v16 = vmul.f32 %v20113_v14, %v20092_v35  ;;  %v20116_v63 = vld [vmem:[#allocation144_spill] sm:$0xff] }
 0x2b2   : > { %v3116_v53 = vadd.f32 %v3084_v4, %v3012_v5  ;;  %v3117_v30 = vadd.f32 %v3085_v31, %v3013_v15  ;;  %v4469_v32 = vadd.f32 %v15656_v57, %v4365_v43  ;;  %v3710_v18 = vmul.f32 %v20113_v14, %v15449_v6  ;;  %v20115_v57 = vld [vmem:[#allocation41_spill] sm:$0xff]  ;;  %v20119_v6 = vld [vmem:[#allocation40_spill] sm:$0xff]  ;;  %v20127_v14 = vld [vmem:[#allocation70_spill] sm:$0xff] }
 0x2b3   : > { %v3813_v4 = vmul.f32 %v20114_v33, %v15451_v62  ;;  %v4572_v41 = vadd.f32 %v15665_v39, %v4468_v29  ;;  %v3917_v46 = vmul.f32 %v20116_v63, %v15465_v61  ;;  %v20117_v5 = vld [vmem:[#allocation93_spill] sm:$0xff]  ;;  %v11544_v54 = vld [vmem:[#allocation2 + $0x20e] sm:$0xff] }
 0x2b4   : > { %v3221_v21 = vadd.f32 %v3189_v42, %v3116_v53  ;;  %v3222_v28 = vadd.f32 %v3190_v34, %v3117_v30  ;;  %v4573_v26 = vadd.f32 %v15669_v9, %v4469_v32  ;;  %v3814_v42 = vmul.f32 %v20114_v33, %v20115_v57  ;;  %v20118_v34 = vld [vmem:[#allocation96_spill] sm:$0xff]  ;;  %v20121_v9 = vld [vmem:[#allocation97_spill] sm:$0xff]  ;;  %v11543_v53 = vld [vmem:[#allocation2 + $0x206] sm:$0xff] }
 0x2b5   : > { %v3918_v35 = vmul.f32 %v20116_v63, %v20117_v5  ;;  %v4021_v15 = vmul.f32 %v20119_v6, %v20118_v34  ;;  %v4676_v62 = vadd.f32 %v20120_v11, %v4572_v41  ;;  %v20124_v61 = vld [vmem:[#allocation117_spill] sm:$0xff]  ;;  %v15857_v30 = vmul.f32 %v11543_v53, %v20125_v0  ;;  %v20126_v32 = vld [vmem:[#allocation35_spill] sm:$0xff]  ;;  %v4920_v34 = vld [vmem:[#allocation2 + $0x230] sm:$0xff] }
 0x2b6   : > { %v3325_v31 = vadd.f32 %v3293_v52, %v3221_v21  ;;  %v3326_v23 = vadd.f32 %v3294_v37, %v3222_v28  ;;  %v4677_v39 = vadd.f32 %v15688_v24, %v4573_v26  ;;  %v4022_v52 = vmul.f32 %v20119_v6, %v20121_v9  ;;  %v20123_v37 = vld [vmem:[#allocation61_spill] sm:$0xff]  ;;  %v4711_v41 = vld [vmem:[#allocation2 + $0x226] sm:$0xff] }
 0x2b7   : > { %v15850_v51 = vmul.f32 %v20123_v37, %v20122_v60  ;;  %v15854_v43 = vmul.f32 %v20123_v37, %v20124_v61  ;;  %v4781_v50 = vadd.f32 %v15700_v44, %v4676_v62  ;;  %v15866_v21 = vmul.f32 %v20126_v32, %v15671_v13  ;;  %v4712_v13 = vld [vmem:[#allocation2 + $0x22e] sm:$0xff] }
 0x2b8   : > { %v3429_v38 = vadd.f32 %v3397_v20, %v3325_v31  ;;  %v3430_v49 = vadd.f32 %v3398_v10, %v3326_v23  ;;  %v4782_v24 = vadd.f32 %v15703_v3, %v4677_v39  ;;  %v15862_v10 = vmul.f32 %v11544_v54, %v20125_v0  ;;  %v4815_v26 = vld [vmem:[#allocation2 + $0x227] sm:$0xff]  ;;  %v20130_v23 = vld [vmem:[#allocation121_spill] sm:$0xff] }
 0x2b9   : > { %v15870_v28 = vmul.f32 %v20126_v32, %v15673_v36  ;;  %v15874_v33 = vmul.f32 %v20127_v14, %v15690_v17  ;;  %v4885_v3 = vadd.f32 %v15716_v48, %v4781_v50  ;;  %v20128_v36 = vld [vmem:[#allocation119_spill] sm:$0xff]  ;;  %v20129_v48 = vld [vmem:[#allocation120_spill] sm:$0xff] }
 0x2ba   : > { %v3533_v20 = vadd.f32 %v3501_v56, %v3429_v38  ;;  %v3534_v29 = vadd.f32 %v3502_v22, %v3430_v49  ;;  %v4886_v44 = vadd.f32 %v15720_v40, %v4782_v24  ;;  %v15880_v22 = vmul.f32 %v20127_v14, %v15692_v8  ;;  %v5023_v11 = vld [vmem:[#allocation2 + $0x229] sm:$0xff]  ;;  %v5024_v50 = vld [vmem:[#allocation2 + $0x231] sm:$0xff] }
 0x2bb   : > { %v15884_v57 = vmul.f32 %v20128_v36, %v15705_v58  ;;  %v15888_v17 = vmul.f32 %v20128_v36, %v15735_v12  ;;  %v15892_v40 = vmul.f32 %v20129_v48, %v15754_v1  ;;  %v4989_v8 = vadd.f32 %v15729_v45, %v4885_v3  ;;  %v4919_v58 = vld [vmem:[#allocation2 + $0x228] sm:$0xff] }
 0x2bc   : > { %v3637_v56 = vadd.f32 %v3605_v55, %v3533_v20  ;;  %v3638_v31 = vadd.f32 %v3606_v2, %v3534_v29  ;;  %v4816_v55 = vld [vmem:[#allocation2 + $0x22f] sm:$0xff]  ;;  %v4990_v63 = vadd.f32 %v20130_v23, %v4886_v44  ;;  %v15898_v2 = vmul.f32 %v20129_v48, %v15756_v19  ;;  %v20134_v20 = vld [vmem:[#allocation129_spill] sm:$0xff] }
 0x2bd   : > { %v20131_v12 = vld [vmem:[#allocation107_spill] sm:$0xff]  ;;  %v15915_v54 = vmul.f32 %v20134_v20, %v4919_v58  ;;  %v15918_v29 = vmul.f32 %v20134_v20, %v4920_v34  ;;  %v15921_v3 = vmul.f32 %v15742_v25, %v5023_v11 }
 0x2be   : > { %v3741_v5 = vadd.f32 %v3709_v16, %v3637_v56  ;;  %v3742_v62 = vadd.f32 %v3710_v18, %v3638_v31  ;;  %v15901_v39 = vmul.f32 %v20131_v12, %v4711_v41  ;;  %v15904_v38 = vmul.f32 %v20131_v12, %v4712_v13  ;;  %v20132_v9 = vld [vmem:[#allocation127_spill] sm:$0xff]  ;;  %v5128_v56 = vld [vmem:[#allocation2 + $0x232] sm:$0xff] }
 0x2bf   : > { %v15907_v49 = vmul.f32 %v20132_v9, %v4815_v26  ;;  %v20133_v45 = vld [vmem:[#allocation71_spill] sm:$0xff]  ;;  %v5094_v16 = vadd.f32 %v15767_v47, %v4990_v63  ;;  %v15912_v53 = vmul.f32 %v20132_v9, %v4816_v55  ;;  %20135 = vst [vmem:[#allocation65_spill] sm:$0xff] %v15918_v29  ;;  %20136 = vst [vmem:[#allocation32_spill] sm:$0xff] %v15921_v3  ;;  %v20137_v31 = vld [vmem:[#allocation100_spill] sm:$0xff] }
 0x2c0   : > { %v5093_v60 = vadd.f32 %v20133_v45, %v4989_v8  ;;  %v3845_v61 = vadd.f32 %v3813_v4, %v3741_v5  ;;  %v5127_v24 = vld [vmem:[#allocation2 + $0x22a] sm:$0xff]  ;;  %v3846_v18 = vadd.f32 %v3814_v42, %v3742_v62  ;;  %v20138_v8 = vld [vmem:[#allocation82_spill] sm:$0xff]  ;;  %v15928_v42 = vmul.f32 %v15742_v25, %v5024_v50  ;;  %v20141_v45 = vld [vmem:[#allocation101_spill] sm:$0xff] }
 0x2c1   : > { %v5198_v47 = vadd.f32 %v15791_v27, %v5094_v16  ;;  %v3847_v23 = vadd.f32 %v20138_v8, %v20137_v31  ;;  %v15931_v5 = vmul.f32 %v15783_v7, %v5127_v24  ;;  %v20140_v62 = vld [vmem:[#allocation108_spill] sm:$0xff] }
 0x2c2   : > { %v5197_v44 = vadd.f32 %v15787_v59, %v5093_v60  ;;  %v3949_v4 = vadd.f32 %v3917_v46, %v3845_v61  ;;  %v3950_v63 = vadd.f32 %v3918_v35, %v3846_v18  ;;  %v3848_v29 = vadd.f32 %v20141_v45, %v20140_v62  ;;  %v20142_v60 = vld [vmem:[#allocation83_spill] sm:$0xff]  ;;  %v20143_v18 = vld [vmem:[#allocation102_spill] sm:$0xff]  ;;  %v11546_v8 = vld [vmem:[#allocation2 + $0x211] sm:$0xff] }
 0x2c3   : > { %20139 = vst [vmem:[#allocation109_spill] sm:$0xff] %v15931_v5  ;;  %v3951_v27 = vadd.f32 %v20142_v60, %v3847_v23  ;;  %v11545_v46 = vld [vmem:[#allocation2 + $0x209] sm:$0xff]  ;;  %v15940_v35 = vmul.f32 %v15783_v7, %v5128_v56  ;;  %v4024_v5 = vmul.f32 %v11546_v8, %v20119_v6  ;;  %v4336_v45 = vmul.f32 %v20126_v32, %v4815_v26 }
 0x2c4   : > { %v15935_v3 = vpack.c.bf16 %v5198_v47, %v5197_v44  ;;  %v4053_v59 = vadd.f32 %v4021_v15, %v3949_v4  ;;  %v4023_v16 = vmul.f32 %v11545_v46, %v20119_v6  ;;  %v4054_v61 = vadd.f32 %v4022_v52, %v3950_v63 }
 0x2c5   : > { %v3952_v31 = vadd.f32 %v20143_v18, %v3848_v29  ;;  %v4127_v47 = vmul.f32 %v20123_v37, %v15754_v1  ;;  %v4128_v52 = vmul.f32 %v20123_v37, %v15756_v19  ;;  %v4232_v29 = vmul.f32 %v20125_v0, %v4711_v41  ;;  %v4921_v18 = vld [vmem:[#allocation2 + $0x248] sm:$0xff] }
 0x2c6   : > { %10817 = vmatprep.mubr.msk.bf16.mxu0 %vm2489_vm1, %v15935_v3  ;;  %v4157_v44 = vadd.f32 %v15850_v51, %v4053_v59  ;;  %v4055_v15 = vadd.f32 %v4023_v16, %v3951_v27  ;;  %v4158_v4 = vadd.f32 %v15854_v43, %v4054_v61  ;;  %v4233_v63 = vmul.f32 %v20125_v0, %v4712_v13  ;;  %v4714_v27 = vld [vmem:[#allocation2 + $0x24e] sm:$0xff] }
 0x2c7   : > { %v4056_v23 = vadd.f32 %v4024_v5, %v3952_v31  ;;  %v4337_v51 = vmul.f32 %v20126_v32, %v4816_v55  ;;  %v4440_v60 = vmul.f32 %v20127_v14, %v4919_v58  ;;  %v4441_v19 = vmul.f32 %v20127_v14, %v4920_v34  ;;  %v4817_v16 = vld [vmem:[#allocation2 + $0x247] sm:$0xff] }
 0x2c8   : > { %v4262_v6 = vadd.f32 %v15857_v30, %v4157_v44  ;;  %v4159_v62 = vadd.f32 %v4127_v47, %v4055_v15  ;;  %v4263_v59 = vadd.f32 %v15862_v10, %v4158_v4  ;;  %v4544_v41 = vmul.f32 %v20128_v36, %v5023_v11  ;;  %v4713_v10 = vld [vmem:[#allocation2 + $0x246] sm:$0xff]  ;;  %v4818_v11 = vld [vmem:[#allocation2 + $0x24f] sm:$0xff] }
 0x2c9   : > { %v4160_v1 = vadd.f32 %v4128_v52, %v4056_v23  ;;  %v4545_v13 = vmul.f32 %v20128_v36, %v5024_v50  ;;  %v4648_v26 = vmul.f32 %v20129_v48, %v5127_v24  ;;  %v4649_v55 = vmul.f32 %v20129_v48, %v5128_v56  ;;  %v4922_v56 = vld [vmem:[#allocation2 + $0x250] sm:$0xff] }
 0x2ca   : > { %v4366_v37 = vadd.f32 %v15866_v21, %v4262_v6  ;;  %v4264_v43 = vadd.f32 %v4232_v29, %v4159_v62  ;;  %v4367_v30 = vadd.f32 %v15870_v28, %v4263_v59  ;;  %v4753_v34 = vmul.f32 %v20131_v12, %v4713_v10  ;;  %v5025_v15 = vld [vmem:[#allocation2 + $0x249] sm:$0xff]  ;;  %v5026_v4 = vld [vmem:[#allocation2 + $0x251] sm:$0xff] }
 0x2cb   : > { %v4265_v5 = vadd.f32 %v4233_v63, %v4160_v1  ;;  %v4754_v21 = vmul.f32 %v20131_v12, %v4714_v27  ;;  %v4857_v28 = vmul.f32 %v20132_v9, %v4817_v16  ;;  %v4858_v24 = vmul.f32 %v20132_v9, %v4818_v11  ;;  %v20144_v23 = vld [vmem:[#allocation104_spill] sm:$0xff]  ;;  %v20145_v29 = vld [vmem:[#allocation77_spill] sm:$0xff] }
 0x2cc   : > { %v4470_v58 = vadd.f32 %v15874_v33, %v4366_v37  ;;  %v4368_v46 = vadd.f32 %v4336_v45, %v4264_v43  ;;  %v4471_v50 = vadd.f32 %v15880_v22, %v4367_v30  ;;  %v4961_v33 = vmul.f32 %v20134_v20, %v4921_v18  ;;  %v5129_v45 = vld [vmem:[#allocation2 + $0x24a] sm:$0xff]  ;;  %v20148_v43 = vld [vmem:[#allocation78_spill] sm:$0xff] }
 0x2cd   : > { %v4369_v61 = vadd.f32 %v4337_v51, %v4265_v5  ;;  %v4962_v44 = vmul.f32 %v20134_v20, %v4922_v56  ;;  %v5065_v22 = vmul.f32 %v15742_v25, %v5025_v15  ;;  %v3849_v63 = vadd.f32 %v20145_v29, %v20144_v23  ;;  %v20146_v51 = vld [vmem:[#allocation66_spill] sm:$0xff]  ;;  %v20147_v59 = vld [vmem:[#allocation84_spill] sm:$0xff] }
 0x2ce   : > { %v4574_v31 = vadd.f32 %v15884_v57, %v4470_v58  ;;  %v4472_v8 = vadd.f32 %v4440_v60, %v4368_v46  ;;  %v4575_v47 = vadd.f32 %v15888_v17, %v4471_v50  ;;  %v5066_v57 = vmul.f32 %v15742_v25, %v5026_v4  ;;  %v5130_v17 = vld [vmem:[#allocation2 + $0x252] sm:$0xff] }
 0x2cf   : > { %v4473_v52 = vadd.f32 %v4441_v19, %v4369_v61  ;;  %v3850_v1 = vadd.f32 %v20147_v59, %v20146_v51  ;;  %v5169_v19 = vmul.f32 %v15783_v7, %v5129_v45  ;;  %v3953_v30 = vadd.f32 %v20148_v43, %v3849_v63  ;;  %v20152_v63 = vld [vmem:[#allocation92_spill] sm:$0xff]  ;;  %v20153_v51 = vld [vmem:[#allocation95_spill] sm:$0xff] }
 0x2d0   : > { %v4678_v6 = vadd.f32 %v15892_v40, %v4574_v31  ;;  %v4576_v62 = vadd.f32 %v4544_v41, %v4472_v8  ;;  %v4679_v60 = vadd.f32 %v15898_v2, %v4575_v47  ;;  %v5170_v40 = vmul.f32 %v15783_v7, %v5130_v17  ;;  %v20149_v41 = vld [vmem:[#allocation85_spill] sm:$0xff]  ;;  %v20150_v31 = vld [vmem:[#allocation87_spill] sm:$0xff] }
 0x2d1   : > { %v4577_v37 = vadd.f32 %v4545_v13, %v4473_v52  ;;  %v3954_v46 = vadd.f32 %v20149_v41, %v3850_v1  ;;  %v4057_v8 = vadd.f32 %v20150_v31, %v3953_v30  ;;  %v4234_v2 = vmul.f32 %v20125_v0, %v4713_v10  ;;  %v20151_v52 = vld [vmem:[#allocation88_spill] sm:$0xff] }
 0x2d2   : > { %v4783_v5 = vadd.f32 %v15901_v39, %v4678_v6  ;;  %v4680_v58 = vadd.f32 %v4648_v26, %v4576_v62  ;;  %v4784_v50 = vadd.f32 %v15904_v38, %v4679_v60  ;;  %v4235_v29 = vmul.f32 %v20125_v0, %v4714_v27  ;;  %v20155_v27 = vld [vmem:[#allocation32_spill] sm:$0xff] }
 0x2d3   : > { %v4681_v61 = vadd.f32 %v4649_v55, %v4577_v37  ;;  %v4058_v23 = vadd.f32 %v20151_v52, %v3954_v46  ;;  %v4161_v6 = vadd.f32 %v20152_v63, %v4057_v8  ;;  %v4338_v62 = vmul.f32 %v20126_v32, %v4817_v16 }
 0x2d4   : > { %v4887_v13 = vadd.f32 %v15907_v49, %v4783_v5  ;;  %v4785_v47 = vadd.f32 %v4753_v34, %v4680_v58  ;;  %v4888_v39 = vadd.f32 %v15912_v53, %v4784_v50  ;;  %v4339_v10 = vmul.f32 %v20126_v32, %v4818_v11  ;;  %v20154_v49 = vld [vmem:[#allocation65_spill] sm:$0xff]  ;;  %v4715_v5 = vld [vmem:[#allocation2 + $0x266] sm:$0xff] }
 0x2d5   : > { %v4786_v26 = vadd.f32 %v4754_v21, %v4681_v61  ;;  %v4162_v59 = vadd.f32 %v20153_v51, %v4058_v23  ;;  %v4266_v60 = vadd.f32 %v4234_v2, %v4161_v6  ;;  %v4442_v0 = vmul.f32 %v20127_v14, %v4921_v18  ;;  %v20156_v18 = vld [vmem:[#allocation109_spill] sm:$0xff]  ;;  %v4923_v2 = vld [vmem:[#allocation2 + $0x268] sm:$0xff] }
 0x2d6   : > { %v4991_v38 = vadd.f32 %v15915_v54, %v4887_v13  ;;  %v4889_v55 = vadd.f32 %v4857_v28, %v4785_v47  ;;  %v4992_v34 = vadd.f32 %v20154_v49, %v4888_v39  ;;  %v4443_v43 = vmul.f32 %v20127_v14, %v4922_v56  ;;  %v4716_v14 = vld [vmem:[#allocation2 + $0x26e] sm:$0xff] }
 0x2d7   : > { %v4890_v1 = vadd.f32 %v4858_v24, %v4786_v26  ;;  %v4267_v37 = vadd.f32 %v4235_v29, %v4162_v59  ;;  %v4370_v28 = vadd.f32 %v4338_v62, %v4266_v60  ;;  %v4546_v30 = vmul.f32 %v20128_v36, %v5025_v15  ;;  %v4819_v15 = vld [vmem:[#allocation2 + $0x267] sm:$0xff]  ;;  %v5028_v23 = vld [vmem:[#allocation2 + $0x271] sm:$0xff] }
 0x2d8   : > { %v5095_v53 = vadd.f32 %v20155_v27, %v4991_v38  ;;  %v4993_v21 = vadd.f32 %v4961_v33, %v4889_v55  ;;  %v5096_v16 = vadd.f32 %v15928_v42, %v4992_v34  ;;  %v4547_v24 = vmul.f32 %v20128_v36, %v5026_v4  ;;  %v4820_v4 = vld [vmem:[#allocation2 + $0x26f] sm:$0xff] }
 0x2d9   : > { %v4994_v54 = vadd.f32 %v4962_v44, %v4890_v1  ;;  %v4371_v11 = vadd.f32 %v4339_v10, %v4267_v37  ;;  %v4650_v58 = vmul.f32 %v20129_v48, %v5129_v45  ;;  %v4474_v50 = vadd.f32 %v4442_v0, %v4370_v28  ;;  %v5131_v62 = vld [vmem:[#allocation2 + $0x26a] sm:$0xff]  ;;  %v5132_v38 = vld [vmem:[#allocation2 + $0x272] sm:$0xff] }
 0x2da   : > { %v5097_v32 = vadd.f32 %v5065_v22, %v4993_v21  ;;  %v5199_v41 = vadd.f32 %v20156_v18, %v5095_v53  ;;  %v5200_v33 = vadd.f32 %v15940_v35, %v5096_v16  ;;  %v4651_v42 = vmul.f32 %v20129_v48, %v5130_v17  ;;  %v4924_v17 = vld [vmem:[#allocation2 + $0x270] sm:$0xff] }
 0x2db   : > { %v5098_v46 = vadd.f32 %v5066_v57, %v4994_v54  ;;  %v4475_v56 = vadd.f32 %v4443_v43, %v4371_v11  ;;  %v4755_v44 = vmul.f32 %v20131_v12, %v4715_v5  ;;  %v4578_v36 = vadd.f32 %v4546_v30, %v4474_v50  ;;  %v16063_v50 = vld [vmem:[%s19501_s9] sm:$0xff] }
 0x2dc   : > { %v16013_v61 = vpack.c.bf16 %v5200_v33, %v5199_v41  ;;  %v5201_v22 = vadd.f32 %v5169_v19, %v5097_v32  ;;  %v4756_v8 = vmul.f32 %v20131_v12, %v4716_v14  ;;  %v4859_v48 = vmul.f32 %v20132_v9, %v4819_v15  ;;  %v5027_v19 = vld [vmem:[#allocation2 + $0x269] sm:$0xff] }
 0x2dd   : > { %v5202_v31 = vadd.f32 %v5170_v40, %v5098_v46  ;;  %v4579_v45 = vadd.f32 %v4547_v24, %v4475_v56  ;;  %v4682_v57 = vadd.f32 %v4650_v58, %v4578_v36  ;;  %v4860_v47 = vmul.f32 %v20132_v9, %v4820_v4  ;;  %v10137_v40 = vpop.f32.mrf.mxu0  ;;  %v16047_v24 = vld [vmem:[%s19501_s9 + $0x10] sm:$0xff]  ;;  %v16055_v41 = vld [vmem:[%s19501_s9 + $0x8] sm:$0xff]  ;;  %v20161_v36 = vld [vmem:[#allocation18_spill] sm:$0xff] }
 0x2de   : > { %10818 = vmatmul.mubr.msk.bf16.gmra.mxu0 %vm2489_vm1, %v16013_v61  ;;  %v4963_v12 = vmul.f32 %v20134_v20, %v4923_v2  ;;  %v4964_v39 = vmul.f32 %v20134_v20, %v4924_v17  ;;  %v5067_v6 = vmul.f32 %v15742_v25, %v5027_v19  ;;  %v5068_v9 = vmul.f32 %v15742_v25, %v5028_v23  ;;  %v11301_v56 = vld [vmem:[%s20158_s6 + $0x28] sm:$0xff]   ;;  %v20166_v17 = vld [vmem:[#allocation94_spill] sm:$0xff]  ;;  %v11304_v19 = vld [vmem:[%s20158_s6 + $0x10] sm:$0xff]  }
 0x2df   : > { %v16018_v35 = vpack.c.bf16 %v5202_v31, %v5201_v22  ;;  %v4683_v13 = vadd.f32 %v4651_v42, %v4579_v45  ;;  %v4787_v52 = vadd.f32 %v4755_v44, %v4682_v57  ;;  %v10138_v26 = vpop.f32.mrf.mxu0  ;;  %v5171_v49 = vmul.f32 %v15783_v7, %v5131_v62  ;;  %v11302_v44 = vld [vmem:[%s20158_s6 + $0x20] sm:$0xff]   ;;  %v20164_v57 = vld [vmem:[#allocation81_spill] sm:$0xff]  ;;  %v20170_v23 = vld [vmem:[#allocation91_spill] sm:$0xff] }
 0x2e0   : > { %v5172_v34 = vmul.f32 %v15783_v7, %v5132_v38  ;;  %v16039_v7 = vld [vmem:[%s19501_s9 + $0x18] sm:$0xff]  ;;  %v10139_v11 = vadd.f32 %v10138_v26, %v10137_v40  ;;  %v20159_v22 = vld [vmem:[#allocation86_spill] sm:$0xff]  ;;  %v20162_v4 = vmax.f32 %v20161_v36, 0.0  ;;  %v11305_v26 = vld [vmem:[%s20158_s6 + $0x8] sm:$0xff]  }
 0x2e1   : > { %10821 = vmatprep.mubr.msk.bf16.mxu0 %vm2489_vm1, %v16018_v35  ;;  %v4788_v29 = vadd.f32 %v4756_v8, %v4683_v13  ;;  %v4891_v63 = vadd.f32 %v4859_v48, %v4787_v52  ;;  %v10140_v51 = vpop.f32.mrf.mxu0  ;;  %v20160_v31 = vmax.f32 %v20159_v22, 0.0  ;;  %v11303_v8 = vld [vmem:[%s20158_s6 + $0x18] sm:$0xff]   ;;  %v20165_v48 = vmax.f32 %v20164_v57, 0.0  ;;  %v20168_v52 = vld [vmem:[#allocation99_spill] sm:$0xff]  ;;  %v20175_v38 = vld [vmem:[#allocation20_spill] sm:$0xff] }
 0x2e2   : > { %v1678_v14 = vmul.f32 %v16063_v50, %v10139_v11  ;;  %v20167_v13 = vmax.f32 %v20166_v17, 0.0  ;;  %v20199_v36 = vld [vmem:[#allocation44_spill] sm:$0xff] }
 0x2e3   : > { %v4892_v55 = vadd.f32 %v4860_v47, %v4788_v29  ;;  %v4995_v59 = vadd.f32 %v4963_v12, %v4891_v63  ;;  %v10141_v1 = vpop.f32.mrf.mxu0  ;;  %v20169_v12 = vmax.f32 %v20168_v52, 0.0  ;;  %v20171_v29 = vmax.f32 %v20170_v23, 0.0  ;;  %v20207_v52 = vld [vmem:[#allocation46_spill] sm:$0xff] }
 0x2e4   : > { %v10142_v30 = vadd.f32 %v10141_v1, %v10140_v51  ;;  %v11306_v51 = vld [vmem:[%s20158_s6] sm:$0xff]  }
 0x2e5   : > { %v4996_v10 = vadd.f32 %v4964_v39, %v4892_v55  ;;  %v5099_v60 = vadd.f32 %v5067_v6, %v4995_v59  ;;  %v10143_v20 = vpop.f32.mrf.mxu0  ;;  %v20173_v6 = vld [vmem:[#allocation98_spill] sm:$0xff]  ;;  %v20176_v55 = vmax.f32 %v20175_v38, 0.0 }
 0x2e6   : > { %v1679_v33 = vmul.f32 %v16055_v41, %v10142_v30  ;;  %v20174_v62 = vmax.f32 %v20173_v6, 0.0  ;;  %v20189_v30 = vld [vmem:[#allocation23_spill] sm:$0xff] }
 0x2e7   : > { %v5100_v0 = vadd.f32 %v5068_v9, %v4996_v10  ;;  %v5203_v27 = vadd.f32 %v5171_v49, %v5099_v60  ;;  %v10144_v21 = vpop.f32.mrf.mxu0  ;;  %v20177_v10 = vld [vmem:[#allocation22_spill] sm:$0xff] }
 0x2e8   : > { %v10145_v16 = vadd.f32 %v10144_v21, %v10143_v20  ;;  %v20178_v49 = vmax.f32 %v20177_v10, 0.0  ;;  %v20182_v20 = vld [vmem:[#allocation21_spill] sm:$0xff] }
 0x2e9   : > { %v5204_v53 = vadd.f32 %v5172_v34, %v5100_v0  ;;  %v10146_v43 = vpop.f32.mrf.mxu0  ;;  %v20179_v34 = vld [vmem:[#allocation19_spill] sm:$0xff] }
 0x2ea   : > { %v1680_v58 = vmul.f32 %v16047_v24, %v10145_v16  ;;  %v20180_v1 = vmax.f32 %v20179_v34, 0.0  ;;  %v20187_v16 = vld [vmem:[#allocation29_spill] sm:$0xff] }
 0x2eb   : > { %v16030_v37 = vpack.c.bf16 %v5204_v53, %v5203_v27  ;;  %v10147_v25 = vpop.f32.mrf.mxu0  ;;  %v20183_v27 = vmax.f32 %v20182_v20, 0.0  ;;  %v20184_v53 = vld [vmem:[#allocation24_spill] sm:$0xff] }
 0x2ec   : > { %v10148_v54 = vadd.f32 %v10147_v25, %v10146_v43  ;;  %v20185_v21 = vmax.f32 %v20184_v53, 0.0 }
 0x2ed   : > { %10822 = vmatmul.mubr.msk.bf16.gmra.mxu0 %vm2489_vm1, %v16030_v37  ;;  %v16034_v28 = vpop.f32.mrf.mxu0 }
 0x2ee   : > { %v1681_v5 = vmul.f32 %v16039_v7, %v10148_v54  ;;  %v20188_v54 = vmax.f32 %v20187_v16, 0.0 }
 0x2ef   : > { %v16042_v32 = vpop.f32.mrf.mxu0 }
 0x2f0   : > { %10625 = vmatprep.subr.mxu1 %v1681_v5 }
 0x2f1   : > { %10626 = vmatpush3.msra.mxu1 %v1681_v5  ;;  %v16050_v18 = vpop.f32.mrf.mxu0  ;;  %v20190_v5 = vmax.f32 %v20189_v30, 0.0 }
 0x2f2   : > { %10627 = vmatprep.subr.mxu1 %v1680_v58 }
 0x2f3   : > { %10628 = vmatpush3.msra.mxu1 %v1680_v58  ;;  %v16058_v46 = vpop.f32.mrf.mxu0 }
 0x2f4   : > { %20157 = vst [vmem:[#allocation125_spill] sm:$0xff] %v16058_v46  ;;  %10629 = vmatprep.subr.mxu1 %v1679_v33 }
 0x2f5   : > { %10630 = vmatpush3.msra.mxu1 %v1679_v33  ;;  %v16069_v42 = vpop.f32.mrf.mxu0  ;;  %v20193_v33 = vld [vmem:[#allocation27_spill] sm:$0xff] }
 0x2f6   : > { %10631 = vmatprep.subr.mxu1 %v1678_v14 }
 0x2f7   : > { %10632 = vmatpush3.msra.mxu1 %v1678_v14  ;;  %v16074_v15 = vpop.f32.mrf.mxu0  ;;  %v20194_v14 = vmax.f32 %v20193_v33, 0.0 }
 0x2f8   : > { %10634 = vmatmul.mubr.msk.f32.vlgmr.msra.gmra.mxu1 %vm724_vm0, %v20160_v31  ;;  %10737 = vmatprep.subr.bf16.mxu1 %v11301_v56 }
 0x2f9   : > { %10636 = vmatprep.mubr.msk.f32.mxu1 %vm724_vm0, %v20162_v4  ;;  %v16082_v45 = vpop.f32.mrf.mxu0  ;;  %10738 = vmatpush3.bf16.msra.mxu1 %v11301_v56  ;;  %v20195_v56 = vld [vmem:[#allocation39_spill] sm:$0xff]  ;;  %v20200_v4 = vmax.f32 %v20199_v36, 0.0 }
 0x2fa   : > { %10739 = vmatprep.subr.bf16.mxu1 %v11302_v44 }
 0x2fb   : > { %v16087_v2 = vpop.f32.mrf.mxu0 }
 0x2fc   : > { %20163 = vst [vmem:[#allocation135_spill] sm:$0xff] %v16087_v2  ;;  %10637 = vmatmul.mubr.msk.f32.gmra.mxu1 %vm724_vm0, %v20165_v48  ;;  %v20248_v2 = vld [vmem:[#allocation28_spill] sm:$0xff] }
 0x2fd   : > { %10639 = vmatprep.mubr.msk.f32.mxu1 %vm724_vm0, %v20167_v13  ;;  %v16095_v47 = vpop.f32.mrf.mxu0  ;;  %10740 = vmatpush3.bf16.msra.mxu1 %v11302_v44  ;;  %v20196_v44 = vmax.f32 %v20195_v56, 0.0  ;;  %v20205_v13 = vld [vmem:[#allocation43_spill] sm:$0xff] }
 0x2fe   : > { %10741 = vmatprep.subr.bf16.mxu1 %v11303_v8 }
 0x2ff   : > { %v16100_v40 = vpop.f32.mrf.mxu0 }
 0x300   : > { %10640 = vmatmul.mubr.msk.f32.gmra.mxu1 %vm724_vm0, %v20169_v12  ;;  %v20208_v12 = vmax.f32 %v20207_v52, 0.0 }
 0x301   : > { %10642 = vmatprep.mubr.msk.f32.mxu1 %vm724_vm0, %v20171_v29  ;;  %v16108_v39 = vpop.f32.mrf.mxu0  ;;  %10742 = vmatpush3.bf16.msra.mxu1 %v11303_v8  ;;  %v20201_v8 = vld [vmem:[#allocation33_spill] sm:$0xff] }
 0x302   : > { %10743 = vmatprep.subr.bf16.mxu1 %v11304_v19  ;;  %v20202_v57 = vmax.f32 %v20201_v8, 0.0 }
 0x303   : > { %v16113_v63 = vpop.f32.mrf.mxu0 }
 0x304   : > { %20172 = vst [vmem:[#allocation113_spill] sm:$0xff] %v16113_v63  ;;  %10643 = vmatmul.mubr.msk.f32.gmra.mxu1 %vm724_vm0, %v20174_v62  ;;  %v20213_v62 = vld [vmem:[#allocation45_spill] sm:$0xff]  ;;  %v20247_v63 = vld [vmem:[#allocation54_spill] sm:$0xff] }
 0x305   : > { %10645 = vmatprep.mubr.msk.f32.mxu1 %vm724_vm0, %v20176_v55  ;;  %v16121_v9 = vpop.f32.mrf.mxu0  ;;  %10744 = vmatpush3.bf16.msra.mxu1 %v11304_v19  ;;  %v20206_v19 = vmax.f32 %v20205_v13, 0.0  ;;  %v20214_v38 = vmax.f32 %v20213_v62, 0.0 }
 0x306   : > { %10745 = vmatprep.subr.bf16.mxu1 %v11305_v26 }
 0x307   : > { %v16126_v59 = vpop.f32.mrf.mxu0 }
 0x308   : > { %10646 = vmatmul.mubr.msk.f32.gmra.mxu1 %vm724_vm0, %v20178_v49  ;;  %v20218_v49 = vld [vmem:[#allocation47_spill] sm:$0xff] }
 0x309   : > { %10648 = vmatprep.mubr.msk.f32.mxu1 %vm724_vm0, %v20180_v1  ;;  %v16134_v60 = vpop.f32.mrf.mxu0  ;;  %10746 = vmatpush3.bf16.msra.mxu1 %v11305_v26  ;;  %v20211_v26 = vld [vmem:[#allocation48_spill] sm:$0xff]  ;;  %v20219_v34 = vmax.f32 %v20218_v49, 0.0  ;;  %v20220_v1 = vld [vmem:[#allocation53_spill] sm:$0xff]  ;;  %v20238_v49 = vld [vmem:[#allocation62_spill] sm:$0xff] }
 0x30a   : > { %10747 = vmatprep.subr.bf16.mxu1 %v11306_v51  ;;  %v20212_v6 = vmax.f32 %v20211_v26, 0.0  ;;  %v20221_v20 = vmax.f32 %v20220_v1, 0.0  ;;  %v20240_v1 = vld [vmem:[#allocation116_spill] sm:$0xff] }
 0x30b   : > { %v16136_v0 = vpop.f32.mrf.mxu0 }
 0x30c   : > { %20181 = vst [vmem:[#allocation56_spill] sm:$0xff] %v16136_v0  ;;  %10649 = vmatmul.mubr.msk.f32.gmra.mxu1 %vm724_vm0, %v20183_v27 }
 0x30d   : > { %10651 = vmatprep.mubr.msk.f32.mxu1 %vm724_vm0, %v20185_v21  ;;  %v16144_v43 = vpop.f32.mrf.mxu0  ;;  %10748 = vmatpush3.bf16.msra.mxu1 %v11306_v51  ;;  %v11307_v51 = vld [vmem:[%s20216_s8 + $0x28] sm:$0xff]   ;;  %v20224_v21 = vld [vmem:[#allocation25_spill] sm:$0xff] }
 0x30e   : > { %10825 = vmatprep.subr.bf16.mxu1 %v11307_v51  ;;  %v20225_v16 = vmax.f32 %v20224_v21, 0.0 }
 0x30f   : > { %v16146_v25 = vpop.f32.mrf.mxu0 }
 0x310   : > { %20186 = vst [vmem:[#allocation111_spill] sm:$0xff] %v16146_v25  ;;  %10652 = vmatmul.mubr.msk.f32.gmra.mxu1 %vm724_vm0, %v20188_v54  ;;  %v20226_v54 = vld [vmem:[#allocation50_spill] sm:$0xff] }
 0x311   : > { %10654 = vmatprep.mubr.msk.f32.mxu1 %vm724_vm0, %v20190_v5  ;;  %v16154_v11 = vpop.f32.mrf.mxu0  ;;  %v20227_v30 = vmax.f32 %v20226_v54, 0.0 }
 0x312   : > { %20191 = vst [vmem:[#allocation137_spill] sm:$0xff] %v16154_v11 }
 0x313   : > { %v16156_v58 = vpop.f32.mrf.mxu0 }
 0x314   : > { %20192 = vst [vmem:[#allocation30_spill] sm:$0xff] %v16156_v58  ;;  %10655 = vmatmul.mubr.msk.f32.gmra.mxu1 %vm724_vm0, %v20194_v14  ;;  %v20230_v14 = vld [vmem:[#allocation55_spill] sm:$0xff] }
 0x315   : > { %10657 = vmatprep.mubr.msk.f32.mxu1 %vm724_vm0, %v20196_v44  ;;  %v16164_v22 = vpop.f32.mrf.mxu0  ;;  %v20231_v56 = vmax.f32 %v20230_v14, 0.0  ;;  %v20232_v44 = vld [vmem:[#allocation38_spill] sm:$0xff] }
 0x316   : > { %20197 = vst [vmem:[#allocation16_spill] sm:$0xff] %v16164_v22  ;;  %v20233_v36 = vmax.f32 %v20232_v44, 0.0 }
 0x317   : > { %v16166_v31 = vpop.f32.mrf.mxu0 }
 0x318   : > { %20198 = vst [vmem:[#allocation34_spill] sm:$0xff] %v16166_v31  ;;  %10658 = vmatmul.mubr.msk.f32.gmra.mxu1 %vm724_vm0, %v20200_v4 }
 0x319   : > { %10660 = vmatprep.mubr.msk.f32.mxu1 %vm724_vm0, %v20202_v57  ;;  %v16174_v48 = vpop.f32.mrf.mxu0  ;;  %v20234_v57 = vld [vmem:[#allocation67_spill] sm:$0xff] }
 0x31a   : > { %20203 = vst [vmem:[#allocation14_spill] sm:$0xff] %v16174_v48  ;;  %v20235_v13 = vmax.f32 %v20234_v57, 0.0  ;;  %v20241_v57 = vld [vmem:[#allocation59_spill] sm:$0xff] }
 0x31b   : > { %v16176_v17 = vpop.f32.mrf.mxu0 }
 0x31c   : > { %20204 = vst [vmem:[#allocation128_spill] sm:$0xff] %v16176_v17  ;;  %10661 = vmatmul.mubr.msk.f32.gmra.mxu1 %vm724_vm0, %v20206_v19  ;;  %v20236_v19 = vld [vmem:[#allocation37_spill] sm:$0xff] }
 0x31d   : > { %10663 = vmatprep.mubr.msk.f32.mxu1 %vm724_vm0, %v20208_v12  ;;  %v16184_v23 = vpop.f32.mrf.mxu0  ;;  %v20237_v52 = vmax.f32 %v20236_v19, 0.0  ;;  %v20242_v19 = vld [vmem:[#allocation69_spill] sm:$0xff] }
 0x31e   : > { %20209 = vst [vmem:[#allocation76_spill] sm:$0xff] %v16184_v23 }
 0x31f   : > { %v16186_v29 = vpop.f32.mrf.mxu0 }
 0x320   : > { %20210 = vst [vmem:[#allocation126_spill] sm:$0xff] %v16186_v29  ;;  %10664 = vmatmul.mubr.msk.f32.gmra.mxu1 %vm724_vm0, %v20212_v6 }
 0x321   : > { %10666 = vmatprep.mubr.msk.f32.mxu1 %vm724_vm0, %v20214_v38  ;;  %v16194_v55 = vpop.f32.mrf.mxu0 }
 0x322   : > { %20215 = vst [vmem:[#allocation140_spill] sm:$0xff] %v16194_v55 }
 0x323   : > { %v16199_v10 = vpop.f32.mrf.mxu0 }
 0x324   : > { %20217 = vst [vmem:[#allocation139_spill] sm:$0xff] %v16199_v10  ;;  %10667 = vmatmul.mubr.msk.f32.gmra.mxu1 %vm724_vm0, %v20219_v34  ;;  %v20239_v34 = vmax.f32 %v20238_v49, 0.0 }
 0x325   : > { %10669 = vmatprep.mubr.msk.f32.mxu1 %vm724_vm0, %v20221_v20  ;;  %v16207_v27 = vpop.f32.mrf.mxu0 }
 0x326   : > { %20222 = vst [vmem:[#allocation75_spill] sm:$0xff] %v16207_v27 }
 0x327   : > { %v16209_v53 = vpop.f32.mrf.mxu0 }
 0x328   : > { %20223 = vst [vmem:[#allocation60_spill] sm:$0xff] %v16209_v53  ;;  %10670 = vmatmul.mubr.msk.f32.gmra.mxu1 %vm724_vm0, %v20225_v16 }
 0x329   : > { %10672 = vmatprep.mubr.msk.f32.mxu1 %vm724_vm0, %v20227_v30  ;;  %v16217_v5 = vpop.f32.mrf.mxu0  ;;  %v11308_v30 = vld [vmem:[%s20216_s8 + $0x20] sm:$0xff]  }
 0x32a   : > { %20228 = vst [vmem:[#allocation132_spill] sm:$0xff] %v16217_v5 }
 0x32b   : > { %v16219_v33 = vpop.f32.mrf.mxu0 }
 0x32c   : > { %20229 = vst [vmem:[#allocation17_spill] sm:$0xff] %v16219_v33  ;;  %10673 = vmatmul.mubr.msk.f32.gmra.mxu1 %vm724_vm0, %v20231_v56 }
 0x32d   : > { %10675 = vmatprep.mubr.msk.f32.mxu1 %vm724_vm0, %v20233_v36  ;;  %v16227_v4 = vpop.f32.mrf.mxu0 }
 0x32e   : > { %v19142_v62 = vmax.f32 %v16227_v4, 0.0 }
 0x32f   : > { %v16229_v8 = vpop.f32.mrf.mxu0 }
 0x330   : > { %10676 = vmatmul.mubr.msk.f32.gmra.mxu1 %vm724_vm0, %v20235_v13  ;;  %v19145_v26 = vmax.f32 %v16229_v8, 0.0  ;;  %v6437_v44 = vsel %vm724_vm0, %v19142_v62, 0.0 }
 0x331   : > { %10678 = vmatprep.mubr.msk.f32.mxu1 %vm724_vm0, %v20237_v52  ;;  %v16237_v12 = vpop.f32.mrf.mxu0 }
 0x332   : > { %v6434_v21 = vsel %vm724_vm0, %v19145_v26, 0.0  ;;  %v19144_v16 = vmax.f32 %v16237_v12, 0.0 }
 0x333   : > { %v16240_v6 = vpop.f32.mrf.mxu0 }
 0x334   : > { %v19143_v38 = vmax.f32 %v16240_v6, 0.0  ;;  %10679 = vmatmul.mubr.msk.f32.gmra.mxu1 %vm724_vm0, %v20239_v34  ;;  %v6439_v49 = vsel %vm724_vm0, %v19144_v16, 0.0  ;;  %v11309_v34 = vld [vmem:[%s20216_s8 + $0x18] sm:$0xff]   ;;  %v20254_v11 = vmax.f32 %v16240_v6, 0.0 }
 0x335   : > { %10749 = vmatprep.mubr.msk.bf16.mxu1 %vm2489_vm1, %v20240_v1  ;;  %v16249_v20 = vpop.f32.mrf.mxu0 }
 0x336   : > { %v6435_v54 = vsel %vm724_vm0, %v19143_v38, 0.0 }
 0x337   : > { %v6436_v14 = vadd.f32 %v6435_v54, %v6434_v21  ;;  %v16261_v56 = vpop.f32.mrf.mxu0 }
 0x338   : > { %v19146_v36 = vmax.f32 %v16261_v56, 0.0  ;;  %10750 = vmatmul.mubr.msk.bf16.vlgmr.msra.gmra.mxu1 %vm2489_vm1, %v20241_v57 }
 0x339   : > { %v6438_v13 = vadd.f32 %v6437_v44, %v6436_v14  ;;  %10753 = vmatprep.mubr.msk.bf16.mxu1 %vm2489_vm1, %v20242_v19  ;;  %v16271_v52 = vpop.f32.mrf.mxu0  ;;  %10826 = vmatpush3.bf16.msra.mxu1 %v11307_v51  ;;  %v19148_v14 = vmax.f32 %v16249_v20, 0.0 }
 0x33a   : > { %10827 = vmatprep.subr.bf16.mxu1 %v11308_v30  ;;  %v6441_v44 = vsel %vm724_vm0, %v19146_v36, 0.0 }
 0x33b   : > { %v6440_v21 = vadd.f32 %v6439_v49, %v6438_v13  ;;  %v16279_v54 = vpop.f32.mrf.mxu0  ;;  %v6445_v36 = vsel %vm724_vm0, %v19148_v14, 0.0 }
 0x33c   : > { %v19147_v51 = vmax.f32 %v16279_v54, 0.0 }
 0x33d   : > { %v6442_v62 = vadd.f32 %v6441_v44, %v6440_v21  ;;  %v16286_v38 = vpop.f32.mrf.mxu0  ;;  %10828 = vmatpush3.bf16.msra.mxu1 %v11308_v30  ;;  %v20243_v21 = vld [vmem:[#allocation112_spill] sm:$0xff]  ;;  %v20244_v44 = vld [vmem:[#allocation138_spill] sm:$0xff] }
 0x33e   : > { %v6443_v13 = vsel %vm724_vm0, %v19147_v51, 0.0  ;;  %10829 = vmatprep.subr.bf16.mxu1 %v11309_v34 }
 0x33f   : > { %v6444_v49 = vadd.f32 %v6443_v13, %v6442_v62  ;;  %v16292_v26 = vpop.f32.mrf.mxu0  ;;  %v20245_v62 = vmax.f32 %v16271_v52, 0.0 }
 0x340   : > { %v19149_v33 = vmax.f32 %v16292_v26, 0.0  ;;  %10754 = vmatmul.mubr.msk.bf16.gmra.mxu1 %vm2489_vm1, %v20243_v21 }
 0x341   : > { %v6446_v30 = vadd.f32 %v6445_v36, %v6444_v49  ;;  %10757 = vmatprep.mubr.msk.bf16.mxu1 %vm2489_vm1, %v20244_v44  ;;  %v16302_v16 = vpop.f32.mrf.mxu0  ;;  %10830 = vmatpush3.bf16.msra.mxu1 %v11309_v34  ;;  %v6447_v13 = vsel %vm724_vm0, %v20245_v62, 0.0  ;;  %v11310_v34 = vld [vmem:[%s20216_s8 + $0x10] sm:$0xff]  }
 0x342   : > { %v6449_v17 = vsel %vm724_vm0, %v19149_v33, 0.0  ;;  %10831 = vmatprep.subr.bf16.mxu1 %v11310_v34 }
 0x343   : > { %v6448_v51 = vadd.f32 %v6447_v13, %v6446_v30  ;;  %v16307_v10 = vpop.f32.mrf.mxu0  ;;  %v11311_v13 = vld [vmem:[%s20216_s8 + $0x8] sm:$0xff]  }
 0x344   : > { %v19150_v36 = vmax.f32 %v16307_v10, 0.0 }
 0x345   : > { %v6450_v49 = vadd.f32 %v6449_v17, %v6448_v51  ;;  %v16314_v58 = vpop.f32.mrf.mxu0  ;;  %v20246_v17 = vmax.f32 %v16286_v38, 0.0  ;;  %10832 = vmatpush3.bf16.msra.mxu1 %v11310_v34 }
 0x346   : > { %v6451_v30 = vsel %vm724_vm0, %v19150_v36, 0.0  ;;  %10833 = vmatprep.subr.bf16.mxu1 %v11311_v13 }
 0x347   : > { %v6452_v33 = vadd.f32 %v6451_v30, %v6450_v49  ;;  %v16326_v14 = vpop.f32.mrf.mxu0  ;;  %v6453_v51 = vsel %vm724_vm0, %v20246_v17, 0.0  ;;  %v20249_v49 = vmax.f32 %v16302_v16, 0.0  ;;  %v11312_v17 = vld [vmem:[%s20216_s8] sm:$0xff]  }
 0x348   : > { %10758 = vmatmul.mubr.msk.bf16.gmra.mxu1 %vm2489_vm1, %v20247_v63 }
 0x349   : > { %v6454_v62 = vadd.f32 %v6453_v51, %v6452_v33  ;;  %10761 = vmatprep.mubr.msk.bf16.mxu1 %vm2489_vm1, %v20248_v2  ;;  %v16336_v36 = vpop.f32.mrf.mxu0  ;;  %v6455_v30 = vsel %vm724_vm0, %v20249_v49, 0.0  ;;  %v19152_v33 = vmax.f32 %v16314_v58, 0.0  ;;  %v20250_v51 = vmax.f32 %v16326_v14, 0.0  ;;  %10834 = vmatpush3.bf16.msra.mxu1 %v11311_v13 }
 0x34a   : > { %v19153_v49 = vmax.f32 %v16336_v36, 0.0  ;;  %10835 = vmatprep.subr.bf16.mxu1 %v11312_v17 }
 0x34b   : > { %v6456_v0 = vadd.f32 %v6455_v30, %v6454_v62  ;;  %v16344_v46 = vpop.f32.mrf.mxu0  ;;  %v6457_v5 = vsel %vm724_vm0, %v20250_v51, 0.0  ;;  %v6461_v29 = vsel %vm724_vm0, %v19152_v33, 0.0  ;;  %v20251_v51 = vld [vmem:[#allocation58_spill] sm:$0xff] }
 0x34c   : > { %v19151_v34 = vmax.f32 %v16344_v46, 0.0 }
 0x34d   : > { %v6458_v53 = vadd.f32 %v6457_v5, %v6456_v0  ;;  %v10811_v27 = vpop.f32.mrf.mxu0  ;;  %v20252_v5 = vld [vmem:[#allocation142_spill] sm:$0xff]  ;;  %10836 = vmatpush3.bf16.msra.mxu1 %v11312_v17 }
 0x34e   : > { %v6459_v55 = vsel %vm724_vm0, %v19151_v34, 0.0  ;;  %v6463_v34 = vsel %vm724_vm0, %v19153_v49, 0.0  ;;  %10925 = vmatprep.subr.mxu1 %v16039_v7  ;;  %v5737_v48 = vmax.f32 %v10811_v27, 0.0  ;;  %v20256_v27 = vld [vmem:[#allocation130_spill] sm:$0xff] }
 0x34f   : > { %v6460_v62 = vadd.f32 %v6459_v55, %v6458_v53  ;;  %v5656_v30 = vpop.f32.mrf.mxu0  ;;  %v20253_v55 = vmax.f32 %v16229_v8, 0.0 }
 0x350   : > { %v5735_v23 = vmax.f32 %v5656_v30, 0.0  ;;  %10762 = vmatmul.mubr.msk.bf16.gmra.mxu1 %vm2489_vm1, %v20251_v51  ;;  %v6469_v8 = vsel %vm724_vm0, %v5737_v48, 0.0 }
 0x351   : > { %v6462_v0 = vadd.f32 %v6461_v29, %v6460_v62  ;;  %10765 = vmatprep.mubr.msk.bf16.mxu1 %vm2489_vm1, %v20252_v5  ;;  %v10812_v13 = vpop.f32.mrf.mxu0 }
 0x352   : > { %v11235_v53 = vpack.i.bf16 %v20253_v55, %v5735_v23  ;;  %v6465_v31 = vsel %vm724_vm0, %v5735_v23, 0.0  ;;  %v5738_v22 = vmax.f32 %v10812_v13, 0.0  ;;  %v20255_v55 = vld [vmem:[#allocation89_spill] sm:$0xff]  ;;  %v20259_v13 = vld [vmem:[#allocation36_spill] sm:$0xff] }
 0x353   : > { %v6464_v33 = vadd.f32 %v6463_v34, %v6462_v0  ;;  %v5659_v30 = vpop.f32.mrf.mxu0 }
 0x354   : > { %v5736_v29 = vmax.f32 %v5659_v30, 0.0  ;;  %11236 = vxpose.xlu1.b32.start [1/16] (narrow) %v11235_v53, 32  ;;  %v6471_v23 = vsel %vm724_vm0, %v5738_v22, 0.0 }
 0x355   : > { %v6466_v62 = vadd.f32 %v6465_v31, %v6464_v33  ;;  %v20257_v31 = vmax.f32 %v16227_v4, 0.0 }
 0x356   : > { %v6467_v17 = vsel %vm724_vm0, %v5736_v29, 0.0  ;;  %v11237_v25 = vpack.i.bf16 %v20254_v11, %v5736_v29  ;;  %v20258_v11 = vmax.f32 %v16237_v12, 0.0 }
 0x357   : > { %v6468_v49 = vadd.f32 %v6467_v17, %v6466_v62  ;;  %v11239_v33 = vpack.i.bf16 %v20257_v31, %v5737_v48 }
 0x358   : > { %11238 = vxpose.xlu1.b32.cont [2/16] (narrow) %v11237_v25, 32  ;;  %10766 = vmatmul.mubr.msk.bf16.gmra.mxu1 %vm2489_vm1, %v20255_v55  ;;  %v11241_v6 = vpack.i.bf16 %v20258_v11, %v5738_v22  ;;  %v20260_v22 = vmax.f32 %v16261_v56, 0.0 }
 0x359   : > { %v6470_v34 = vadd.f32 %v6469_v8, %v6468_v49  ;;  %10769 = vmatprep.mubr.msk.bf16.mxu1 %vm2489_vm1, %v20256_v27 }
 0x35b   : > { %v6472_v0 = vadd.f32 %v6471_v23, %v6470_v34  ;;  %v20261_v23 = vmax.f32 %v16279_v54, 0.0 }
 0x35c   : > { %11240 = vxpose.xlu1.b32.cont [3/16] (narrow) %v11239_v33, 32 }
 0x360   : > { %11242 = vxpose.xlu1.b32.cont [4/16] (narrow) %v11241_v6, 32  ;;  %10770 = vmatmul.mubr.msk.bf16.gmra.mxu1 %vm2489_vm1, %v20259_v13  ;;  %v20262_v6 = vmax.f32 %v16249_v20, 0.0 }
 0x361   : > { %10773 = vmatprep.mubr.msk.bf16.mxu1 %vm2489_vm1, %v15935_v3 }
 0x368   : > { %10774 = vmatmul.mubr.msk.bf16.gmra.mxu1 %vm2489_vm1, %v16013_v61 }
 0x369   : > { %10777 = vmatprep.mubr.msk.bf16.mxu1 %vm2489_vm1, %v16018_v35 }
 0x36a   : > { %v10815_v25 = vpop.f32.mrf.mxu0 }
 0x36b   : > { %v5741_v62 = vmax.f32 %v10815_v25, 0.0 }
 0x36c   : > { %v5672_v48 = vpop.f32.mrf.mxu0 }
 0x36d   : > { %v5739_v4 = vmax.f32 %v5672_v48, 0.0  ;;  %v6477_v56 = vsel %vm724_vm0, %v5741_v62, 0.0  ;;  %v11247_v25 = vpack.i.bf16 %v20262_v6, %v5741_v62  ;;  %v2307_v62 = vadd.f32 1e-05, %v16100_v40  ;;  %v16509_v40 = vld [vmem:[%s18592_s10 + $0x8] sm:$0xff]  }
 0x36e   : > { %v10816_v49 = vpop.f32.mrf.mxu0 }
 0x36f   : > { %v6473_v12 = vsel %vm724_vm0, %v5739_v4, 0.0  ;;  %v11243_v53 = vpack.i.bf16 %v20260_v22, %v5739_v4  ;;  %v5742_v8 = vmax.f32 %v10816_v49, 0.0  ;;  %v2292_v4 = vadd.f32 1e-05, %v16069_v42 }
 0x370   : > { %v6474_v30 = vadd.f32 %v6473_v12, %v6472_v0  ;;  %v5675_v29 = vpop.f32.mrf.mxu0  ;;  %10778 = vmatmul.mubr.msk.bf16.gmra.mxu1 %vm2489_vm1, %v16030_v37  ;;  %v2302_v42 = vadd.f32 1e-05, %v16082_v45  ;;  %v20270_v45 = vmax.f32 %v16314_v58, 0.0  ;;  %v20271_v58 = vmax.f32 %v16336_v36, 0.0 }
 0x371   : > { %v5740_v17 = vmax.f32 %v5675_v29, 0.0  ;;  %11244 = vxpose.xlu1.b32.cont [5/16] (narrow) %v11243_v53, 32  ;;  %10837 = vmatprep.mubr.msk.bf16.mxu1 %vm2489_vm1, %v20240_v1  ;;  %v6479_v11 = vsel %vm724_vm0, %v5742_v8, 0.0  ;;  %v20263_v1 = vmax.f32 %v16271_v52, 0.0 }
 0x373   : > { %v6475_v34 = vsel %vm724_vm0, %v5740_v17, 0.0  ;;  %v11245_v31 = vpack.i.bf16 %v20261_v23, %v5740_v17  ;;  %v11249_v54 = vpack.i.bf16 %v20263_v1, %v5742_v8 }
 0x374   : > { %v6476_v33 = vadd.f32 %v6475_v34, %v6474_v30  ;;  %v2312_v30 = vadd.f32 1e-05, %v16095_v47 }
 0x375   : > { %11246 = vxpose.xlu1.b32.cont [6/16] (narrow) %v11245_v31, 32  ;;  %v2322_v31 = vadd.f32 1e-05, %v16108_v39 }
 0x376   : > { %v6478_v0 = vadd.f32 %v6477_v56, %v6476_v33 }
 0x378   : > { %v6480_v48 = vadd.f32 %v6479_v11, %v6478_v0  ;;  %10838 = vmatmul.mubr.msk.bf16.vlgmr.msra.gmra.mxu1 %vm2489_vm1, %v20241_v57 }
 0x379   : > { %11248 = vxpose.xlu1.b32.cont [7/16] (narrow) %v11247_v25, 32  ;;  %10841 = vmatprep.mubr.msk.bf16.mxu1 %vm2489_vm1, %v20242_v19  ;;  %v2332_v25 = vadd.f32 1e-05, %v16121_v9 }
 0x37a   : > { %10926 = vmatpush3.msra.mxu1 %v16039_v7 }
 0x37b   : > { %10927 = vmatprep.subr.mxu1 %v16047_v24 }
 0x37c   : > { %10928 = vmatpush3.msra.mxu1 %v16047_v24 }
 0x37d   : > { %11250 = vxpose.xlu1.b32.cont [8/16] (narrow) %v11249_v54, 32  ;;  %10929 = vmatprep.subr.mxu1 %v16055_v41  ;;  %v2327_v54 = vadd.f32 1e-05, %v16126_v59  ;;  %v2352_v59 = vadd.f32 1e-05, %v16144_v43 }
 0x37e   : > { %10930 = vmatpush3.msra.mxu1 %v16055_v41 }
 0x37f   : > { %10931 = vmatprep.subr.mxu1 %v16063_v50 }
 0x380   : > { %10842 = vmatmul.mubr.msk.bf16.gmra.mxu1 %vm2489_vm1, %v20243_v21 }
 0x381   : > { %10845 = vmatprep.mubr.msk.bf16.mxu1 %vm2489_vm1, %v20244_v44  ;;  %10932 = vmatpush3.msra.mxu1 %v16063_v50  ;;  %v20265_v44 = vmax.f32 %v16307_v10, 0.0  ;;  %v2282_v10 = vadd.f32 1e-05, %v16050_v18  ;;  %v2287_v18 = vadd.f32 1e-05, %v16074_v15 }
 0x382   : > { %11017 = vmatprep.subr.bf16.mxu1 %v16509_v40 }
 0x388   : > { %10846 = vmatmul.mubr.msk.bf16.gmra.mxu1 %vm2489_vm1, %v20247_v63  ;;  %v20264_v63 = vmax.f32 %v16292_v26, 0.0  ;;  %v2272_v26 = vadd.f32 1e-05, %v16034_v28 }
 0x389   : > { %10849 = vmatprep.mubr.msk.bf16.mxu1 %vm2489_vm1, %v20248_v2 }
 0x38a   : > { %11327 = vrcp.f32 %v2272_v26 }
 0x390   : > { %10850 = vmatmul.mubr.msk.bf16.gmra.mxu1 %vm2489_vm1, %v20251_v51 }
 0x391   : > { %10853 = vmatprep.mubr.msk.bf16.mxu1 %vm2489_vm1, %v20252_v5 }
 0x398   : > { %10854 = vmatmul.mubr.msk.bf16.gmra.mxu1 %vm2489_vm1, %v20255_v55  ;;  %v20266_v55 = vmax.f32 %v16286_v38, 0.0 }
 0x399   : > { %10857 = vmatprep.mubr.msk.bf16.mxu1 %vm2489_vm1, %v20256_v27 }
 0x39e   : > { %v16433_v7 = vpop.f32.mrf.mxu0 }
 0x39f   : > { %v5745_v21 = vmax.f32 %v16433_v7, 0.0 }
 0x3a0   : > { %v5688_v24 = vpop.f32.mrf.mxu0  ;;  %10858 = vmatmul.mubr.msk.bf16.gmra.mxu1 %vm2489_vm1, %v20259_v13 }
 0x3a1   : > { %v5743_v41 = vmax.f32 %v5688_v24, 0.0  ;;  %10861 = vmatprep.mubr.msk.bf16.mxu1 %vm2489_vm1, %v15935_v3  ;;  %v2267_v3 = vadd.f32 1e-05, %v16042_v32  ;;  %v11255_v27 = vpack.i.bf16 %v20266_v55, %v5745_v21  ;;  %v20267_v32 = vmax.f32 %v16302_v16, 0.0 }
 0x3a2   : > { %v16435_v50 = vpop.f32.mrf.mxu0  ;;  %v20268_v16 = vmax.f32 %v16326_v14, 0.0  ;;  %v11328_v14 = vpop.eup %11327 }
 0x3a3   : > { %v6481_v2 = vsel %vm724_vm0, %v5743_v41, 0.0  ;;  %v11251_v20 = vpack.i.bf16 %v20264_v63, %v5743_v41  ;;  %v5746_v5 = vmax.f32 %v16435_v50, 0.0  ;;  %11329 = vrcp.f32 %v2267_v3 }
 0x3a4   : > { %v16444_v57 = vadd.f32 %v6481_v2, %v6480_v48  ;;  %v16446_v19 = vpop.f32.mrf.mxu0  ;;  %11331 = vrcp.f32 %v2282_v10  ;;  %v2342_v2 = vadd.f32 1e-05, %v16134_v60 }
 0x3a5   : > { %v5744_v52 = vmax.f32 %v16446_v19, 0.0  ;;  %11252 = vxpose.xlu1.b32.cont [9/16] (narrow) %v11251_v20, 32  ;;  %v11257_v13 = vpack.i.bf16 %v20267_v32, %v5746_v5  ;;  %11333 = vrcp.f32 %v2292_v4 }
 0x3a6   : > { %11335 = vrcp.f32 %v2287_v18  ;;  %v20273_v18 = vld [vmem:[#allocation137_spill] sm:$0xff] }
 0x3a7   : > { %v11253_v51 = vpack.i.bf16 %v20265_v44, %v5744_v52  ;;  %11337 = vrcp.f32 %v2302_v42  ;;  %v6483_v60 = vsel %vm724_vm0, %v5744_v52, 0.0 }
 0x3a8   : > { %10862 = vmatmul.mubr.msk.bf16.gmra.mxu1 %vm2489_vm1, %v16013_v61  ;;  %11339 = vrcp.f32 %v2312_v30 }
 0x3a9   : > { %11254 = vxpose.xlu1.b32.cont [10/16] (narrow) %v11253_v51, 32  ;;  %10865 = vmatprep.mubr.msk.bf16.mxu1 %vm2489_vm1, %v16018_v35  ;;  %11341 = vrcp.f32 %v2307_v62 }
 0x3aa   : > { %11343 = vrcp.f32 %v2322_v31 }
 0x3ab   : > { %11345 = vrcp.f32 %v2332_v25 }
 0x3ac   : > { %11347 = vrcp.f32 %v2327_v54 }
 0x3ad   : > { %v16466_v28 = vpop.f32.mrf.mxu0  ;;  %11256 = vxpose.xlu1.b32.cont [11/16] (narrow) %v11255_v27, 32  ;;  %11349 = vrcp.f32 %v2342_v2  ;;  %v20272_v27 = vld [vmem:[#allocation111_spill] sm:$0xff] }
 0x3ae   : > { %v5749_v53 = vmax.f32 %v16466_v28, 0.0  ;;  %v2347_v10 = vadd.f32 1e-05, %v20272_v27  ;;  %11351 = vrcp.f32 %v2352_v59 }
 0x3af   : > { %v16468_v61 = vpop.f32.mrf.mxu0 }
 0x3b0   : > { %v5747_v38 = vmax.f32 %v16468_v61, 0.0  ;;  %10866 = vmatmul.mubr.msk.bf16.gmra.mxu1 %vm2489_vm1, %v16030_v37  ;;  %v20269_v37 = vmax.f32 %v16344_v46, 0.0  ;;  %v11263_v8 = vpack.i.bf16 %v20270_v45, %v5749_v53  ;;  %v11330_v23 = vpop.eup %11329  ;;  %11353 = vrcp.f32 %v2347_v10 }
 0x3b1   : > { %v16476_v35 = vpop.f32.mrf.mxu0  ;;  %11258 = vxpose.xlu1.b32.cont [12/16] (narrow) %v11257_v13, 32  ;;  %v11332_v33 = vpop.eup %11331 }
 0x3b2   : > { %v11259_v12 = vpack.i.bf16 %v20268_v16, %v5747_v38  ;;  %v5750_v17 = vmax.f32 %v16476_v35, 0.0  ;;  %v11334_v48 = vpop.eup %11333  ;;  %v2362_v16 = vadd.f32 1e-05, %v20273_v18  ;;  %v6489_v50 = vsel %vm724_vm0, %v5747_v38, 0.0  ;;  %v20279_v38 = vld [vmem:[#allocation140_spill] sm:$0xff] }
 0x3b3   : > { %v16481_v49 = vpop.f32.mrf.mxu0  ;;  %v11336_v36 = vpop.eup %11335  ;;  %v2402_v10 = vadd.f32 1e-05, %v20279_v38 }
 0x3b4   : > { %v5748_v22 = vmax.f32 %v16481_v49, 0.0  ;;  %v11265_v0 = vpack.i.bf16 %v20271_v58, %v5750_v17  ;;  %v11338_v20 = vpop.eup %11337  ;;  %11355 = vrcp.f32 %v2362_v16 }
 0x3b5   : > { %11260 = vxpose.xlu1.b32.cont [13/16] (narrow) %v11259_v12, 32  ;;  %v11340_v3 = vpop.eup %11339  ;;  %v6484_v12 = vadd.f32 %v6483_v60, %v16444_v57 }
 0x3b6   : > { %v11261_v15 = vpack.i.bf16 %v20269_v37, %v5748_v22  ;;  %v11342_v13 = vpop.eup %11341 }
 0x3b7   : > { %v11344_v43 = vpop.eup %11343 }
 0x3b8   : > { %v10635_v29 = vpop.f32.mrf.mxu1  ;;  %v11346_v62 = vpop.eup %11345 }
 0x3b9   : > { %11262 = vxpose.xlu1.b32.cont [14/16] (narrow) %v11261_v15, 32  ;;  %v16501_v34 = vmul.f32 %v11328_v14, %v10635_v29  ;;  %v6485_v15 = vsel %vm724_vm0, %v5745_v21, 0.0  ;;  %v20274_v14 = vld [vmem:[#allocation16_spill] sm:$0xff]  ;;  %v11348_v31 = vpop.eup %11347  ;;  %v20276_v21 = vld [vmem:[#allocation14_spill] sm:$0xff] }
 0x3ba   : > { %v1844_v46 = vpop.f32.mrf.mxu1  ;;  %v2372_v29 = vadd.f32 1e-05, %v20274_v14  ;;  %v6486_v57 = vadd.f32 %v6485_v15, %v6484_v12  ;;  %v11350_v25 = vpop.eup %11349  ;;  %v6493_v12 = vsel %vm724_vm0, %v5749_v53, 0.0  ;;  %v20282_v53 = vld [vmem:[#allocation132_spill] sm:$0xff] }
 0x3bb   : > { %v16504_v47 = vmul.f32 %v11330_v23, %v1844_v46 }
 0x3bc   : > { %v10638_v56 = vpop.f32.mrf.mxu1  ;;  %11357 = vrcp.f32 %v2372_v29 }
 0x3bd   : > { %11264 = vxpose.xlu1.b32.cont [15/16] (narrow) %v11263_v8, 32  ;;  %v16517_v39 = vmul.f32 %v11332_v33, %v10638_v56  ;;  %v20275_v8 = vld [vmem:[#allocation34_spill] sm:$0xff]  ;;  %v6487_v33 = vsel %vm724_vm0, %v5746_v5, 0.0  ;;  %v2382_v56 = vadd.f32 1e-05, %v20276_v21 }
 0x3be   : > { %v16520_v6 = vpop.f32.mrf.mxu1  ;;  %v2367_v23 = vadd.f32 1e-05, %v20275_v8  ;;  %v6488_v58 = vadd.f32 %v6487_v33, %v6486_v57  ;;  %v2422_v33 = vadd.f32 1e-05, %v20282_v53 }
 0x3c0   : > { %v10641_v1 = vpop.f32.mrf.mxu1  ;;  %11359 = vrcp.f32 %v2367_v23  ;;  %v6490_v2 = vadd.f32 %v6489_v50, %v6488_v58 }
 0x3c1   : > { %11266 = vxpose.xlu1.b32.end [16/16] (narrow) %v11265_v0, 32  ;;  %v16524_v24 = vmul.f32 %v11334_v48, %v10641_v1  ;;  %11361 = vrcp.f32 %v2382_v56 }
 0x3c2   : > { %v1864_v41 = vpop.f32.mrf.mxu1 }
 0x3c3   : > { %v16527_v63 = vmul.f32 %v11336_v36, %v1864_v41  ;;  %v20277_v36 = vld [vmem:[#allocation76_spill] sm:$0xff] }
 0x3c4   : > { %v10644_v44 = vpop.f32.mrf.mxu1  ;;  %v2392_v41 = vadd.f32 1e-05, %v20277_v36 }
 0x3c5   : > { %v16531_v51 = vmul.f32 %v11338_v20, %v10644_v44  ;;  %v11352_v20 = vpop.eup %11351  ;;  %v6491_v44 = vsel %vm724_vm0, %v5748_v22, 0.0 }
 0x3c6   : > { %v16533_v26 = vpop.f32.mrf.mxu1  ;;  %v11354_v27 = vpop.eup %11353  ;;  %11363 = vrcp.f32 %v2392_v41 }
 0x3c7   : > { %v11356_v18 = vpop.eup %11355 }
 0x3c8   : > { %v10647_v55 = vpop.f32.mrf.mxu1 }
 0x3c9   : > { %v16540_v32 = vmul.f32 %v11340_v3, %v10647_v55  ;;  %v20278_v3 = vld [vmem:[#allocation126_spill] sm:$0xff]  ;;  %v11358_v29 = vpop.eup %11357 }
 0x3ca   : > { %v1884_v4 = vpop.f32.mrf.mxu1  ;;  %v2387_v60 = vadd.f32 1e-05, %v20278_v3 }
 0x3cb   : > { %v16544_v42 = vmul.f32 %v11342_v13, %v1884_v4  ;;  %v6492_v13 = vadd.f32 %v6491_v44, %v6490_v2 }
 0x3cc   : > { %v10650_v37 = vpop.f32.mrf.mxu1  ;;  %11365 = vrcp.f32 %v2387_v60 }
 0x3cd   : > { %v16548_v52 = vmul.f32 %v11344_v43, %v10650_v37  ;;  %11367 = vrcp.f32 %v2402_v10  ;;  %v20280_v37 = vld [vmem:[#allocation75_spill] sm:$0xff]  ;;  %v6494_v14 = vadd.f32 %v6493_v12, %v6492_v13  ;;  %v11360_v23 = vpop.eup %11359 }
 0x3ce   : > { %v16553_v30 = vpop.f32.mrf.mxu1  ;;  %v2412_v15 = vadd.f32 1e-05, %v20280_v37  ;;  %v11362_v56 = vpop.eup %11361 }
 0x3d0   : > { %v10653_v45 = vpop.f32.mrf.mxu1  ;;  %11369 = vrcp.f32 %v2412_v15 }
 0x3d1   : > { %v16557_v46 = vmul.f32 %v11346_v62, %v10653_v45  ;;  %v20281_v62 = vld [vmem:[#allocation60_spill] sm:$0xff] }
 0x3d2   : > { %v1904_v7 = vpop.f32.mrf.mxu1  ;;  %v2407_v45 = vadd.f32 1e-05, %v20281_v62 }
 0x3d3   : > { %v16563_v0 = vmul.f32 %v11348_v31, %v1904_v7  ;;  %v6495_v31 = vsel %vm724_vm0, %v5750_v17, 0.0  ;;  %v11364_v17 = vpop.eup %11363 }
 0x3d4   : > { %v10656_v48 = vpop.f32.mrf.mxu1  ;;  %v6496_v7 = vadd.f32 %v6495_v31, %v6494_v14  ;;  %11371 = vrcp.f32 %v2407_v45 }
 0x3d5   : > { %v16567_v54 = vmul.f32 %v11350_v25, %v10656_v48  ;;  %11373 = vrcp.f32 %v2422_v33 }
 0x3d6   : > { %v16572_v5 = vpop.f32.mrf.mxu1  ;;  %v6497_v35 = vrot.slane %v6496_v7, 4 }
 0x3d8   : > { %v10659_v59 = vpop.f32.mrf.mxu1  ;;  %v6498_v44 = vadd.f32 %v6497_v35, %v6496_v7 }
 0x3d9   : > { %v16579_v55 = vmul.f32 %v11352_v20, %v10659_v59  ;;  %v11366_v2 = vpop.eup %11365 }
 0x3da   : > { %v1924_v61 = vpop.f32.mrf.mxu1  ;;  %v11368_v3 = vpop.eup %11367  ;;  %v6499_v10 = vrot.slane %v6498_v44, 2 }
 0x3db   : > { %v16582_v4 = vmul.f32 %v11354_v27, %v1924_v61 }
 0x3dc   : > { %v10662_v16 = vpop.f32.mrf.mxu1  ;;  %v6500_v15 = vadd.f32 %v6499_v10, %v6498_v44 }
 0x3dd   : > { %v16586_v22 = vmul.f32 %v11356_v18, %v10662_v16  ;;  %v11370_v13 = vpop.eup %11369 }
 0x3de   : > { %v16591_v43 = vpop.f32.mrf.mxu1  ;;  %v6501_v31 = vrot.slane %v6500_v15, 1 }
 0x3e0   : > { %v10665_v57 = vpop.f32.mrf.mxu1  ;;  %v16633_v33 = vadd.f32 %v6501_v31, %v6500_v15 }
 0x3e1   : > { %v16595_v8 = vmul.f32 %v11358_v29, %v10665_v57  ;;  %v11372_v12 = vpop.eup %11371 }
 0x3e2   : > { %v1944_v28 = vpop.f32.mrf.mxu1  ;;  %v11374_v29 = vpop.eup %11373 }
 0x3e3   : > { %v16601_v21 = vmul.f32 %v11360_v23, %v1944_v28 }
 0x3e4   : > { %v10668_v58 = vpop.f32.mrf.mxu1 }
 0x3e5   : > { %v16605_v48 = vmul.f32 %v11362_v56, %v10668_v58 }
 0x3e6   : > { %v16607_v50 = vpop.f32.mrf.mxu1 }
 0x3e8   : > { %v10671_v36 = vpop.f32.mrf.mxu1 }
 0x3e9   : > { %v16609_v41 = vmul.f32 %v11364_v17, %v10671_v36 }
 0x3ea   : > { %v1964_v20 = vpop.f32.mrf.mxu1 }
 0x3eb   : > { %v16611_v59 = vmul.f32 %v11366_v2, %v1964_v20 }
 0x3ec   : > { %v10674_v60 = vpop.f32.mrf.mxu1 }
 0x3ed   : > { %v16615_v61 = vmul.f32 %v11368_v3, %v10674_v60  ;;  %v11314_v3 = vld [vmem:[%s18592_s10] sm:$0xff]  }
 0x3ee   : > { %v16617_v38 = vpop.f32.mrf.mxu1 }
 0x3f0   : > { %v10677_v18 = vpop.f32.mrf.mxu1 }
 0x3f1   : > { %v16619_v16 = vmul.f32 %v11370_v13, %v10677_v18 }
 0x3f2   : > { %v1984_v37 = vpop.f32.mrf.mxu1 }
 0x3f3   : > { %v16621_v14 = vmul.f32 %v11372_v12, %v1984_v37 }
 0x3f4   : > { %v10680_v57 = vpop.f32.mrf.mxu1 }
 0x3f5   : > { %v16625_v45 = vmul.f32 %v11374_v29, %v10680_v57 }
 0x3f6   : > { %v16627_v23 = vpop.f32.mrf.mxu1 }
 0x3f8   : > { %v16629_v28 = vpop.f32.mrf.mxu1 }
 0x3f9   : > { %v19160_v35 = vmax.f32 %v16629_v28, 0.0 }
 0x3fa   : > { %v16631_v53 = vpop.f32.mrf.mxu1 }
 0x3fb   : > { %v19162_v7 = vmax.f32 %v16631_v53, 0.0  ;;  %v6505_v60 = vmul.f32 %v16633_v33, %v19160_v35 }
 0x3fc   : > { %v16636_v56 = vpop.f32.mrf.mxu1 }
 0x3fd   : > { %v6503_v58 = vmul.f32 %v16633_v33, %v19162_v7  ;;  %v19157_v20 = vmax.f32 %v16636_v56, 0.0 }
 0x3fe   : > { %v16642_v17 = vpop.f32.mrf.mxu1 }
 0x3ff   : > { %v19161_v36 = vmax.f32 %v16642_v17, 0.0  ;;  %10933 = vmatprep.mubr.msk.f32.mxu1 %vm724_vm0, %v6503_v58  ;;  %v6506_v12 = vmul.f32 %v16633_v33, %v19157_v20 }
 0x400   : > { %v16646_v2 = vpop.f32.mrf.mxu1 }
 0x401   : > { %v6504_v44 = vmul.f32 %v16633_v33, %v19161_v36  ;;  %v19155_v15 = vmax.f32 %v16646_v2, 0.0 }
 0x402   : > { %v16658_v10 = vpop.f32.mrf.mxu1 }
 0x403   : > { %v19154_v13 = vmax.f32 %v16658_v10, 0.0  ;;  %10934 = vmatmul.mubr.msk.f32.vlgmr.msra.gmra.mxu1 %vm724_vm0, %v6504_v44  ;;  %v6509_v44 = vmul.f32 %v16633_v33, %v19155_v15 }
 0x404   : > { %v16662_v18 = vpop.f32.mrf.mxu1  ;;  %10936 = vmatprep.mubr.msk.f32.mxu1 %vm724_vm0, %v6505_v60  ;;  %11018 = vmatpush3.bf16.msra.mxu1 %v16509_v40 }
 0x405   : > { %v6507_v37 = vmul.f32 %v16633_v33, %v19154_v13  ;;  %11019 = vmatprep.subr.bf16.mxu1 %v11314_v3  ;;  %v19158_v40 = vmax.f32 %v16662_v18, 0.0 }
 0x406   : > { %v16673_v29 = vpop.f32.mrf.mxu1 }
 0x407   : > { %v19156_v57 = vmax.f32 %v16673_v29, 0.0  ;;  %10937 = vmatmul.mubr.msk.f32.gmra.mxu1 %vm724_vm0, %v6506_v12 }
 0x408   : > { %v16677_v31 = vpop.f32.mrf.mxu1  ;;  %10939 = vmatprep.mubr.msk.f32.mxu1 %vm724_vm0, %v6507_v37  ;;  %11020 = vmatpush3.bf16.msra.mxu1 %v11314_v3  ;;  %v6510_v3 = vmul.f32 %v16633_v33, %v19158_v40 }
 0x409   : > { %v6508_v58 = vmul.f32 %v16633_v33, %v19156_v57  ;;  %v19164_v15 = vmax.f32 %v16677_v31, 0.0 }
 0x40a   : > { %v16687_v60 = vpop.f32.mrf.mxu1 }
 0x40b   : > { %v19159_v13 = vmax.f32 %v16687_v60, 0.0  ;;  %10940 = vmatmul.mubr.msk.f32.gmra.mxu1 %vm724_vm0, %v6508_v58  ;;  %v6513_v35 = vmul.f32 %v16633_v33, %v19164_v15 }
 0x40c   : > { %v16691_v12 = vpop.f32.mrf.mxu1  ;;  %10942 = vmatprep.mubr.msk.f32.mxu1 %vm724_vm0, %v6509_v44  ;;  %v16708_v44 = vpop.trf.xlu1 }
 0x40d   : > { %v6511_v37 = vmul.f32 %v16633_v33, %v19159_v13  ;;  %v19165_v40 = vmax.f32 %v16691_v12, 0.0 }
 0x40e   : > { %v16701_v57 = vpop.f32.mrf.mxu1 }
 0x40f   : > { %v19163_v20 = vmax.f32 %v16701_v57, 0.0  ;;  %10943 = vmatmul.mubr.msk.f32.gmra.mxu1 %vm724_vm0, %v6510_v3 }
 0x410   : > { %v16705_v58 = vpop.f32.mrf.mxu1  ;;  %10945 = vmatprep.mubr.msk.f32.mxu1 %vm724_vm0, %v6511_v37  ;;  %v11268_v37 = vunpack.i.l.bf16 %v16708_v44  ;;  %v16725_v62 = vpop.trf.xlu1 }
 0x411   : > { %20283 = vst [vmem:[#allocation51_spill] sm:$0xff] %v16705_v58  ;;  %v6512_v13 = vmul.f32 %v16633_v33, %v19163_v20  ;;  %v6514_v20 = vmul.f32 %v16633_v33, %v19165_v40  ;;  %v19168_v27 = vmax.f32 %v16705_v58, 0.0 }
 0x412   : > { %v16717_v36 = vpop.f32.mrf.mxu1  ;;  %6088 = vmatprep.mubr.f32.mxu0 %v11268_v37 }
 0x413   : > { %20284 = vst [vmem:[#allocation26_spill] sm:$0xff] %v16717_v36  ;;  %v19166_v3 = vmax.f32 %v16717_v36, 0.0  ;;  %10946 = vmatmul.mubr.msk.f32.gmra.mxu1 %vm724_vm0, %v6512_v13  ;;  %v6517_v37 = vmul.f32 %v16633_v33, %v19168_v27 }
 0x414   : > { %v16721_v7 = vpop.f32.mrf.mxu1  ;;  %10948 = vmatprep.mubr.msk.f32.mxu1 %vm724_vm0, %v6513_v35  ;;  %v16741_v49 = vpop.trf.xlu1 }
 0x415   : > { %20285 = vst [vmem:[#allocation134_spill] sm:$0xff] %v16721_v7  ;;  %v6515_v15 = vmul.f32 %v16633_v33, %v19166_v3  ;;  %v19170_v40 = vmax.f32 %v16721_v7, 0.0 }
 0x416   : > { %v16734_v25 = vpop.f32.mrf.mxu1 }
 0x417   : > { %20286 = vst [vmem:[#allocation122_spill] sm:$0xff] %v16734_v25  ;;  %v19167_v13 = vmax.f32 %v16734_v25, 0.0  ;;  %10949 = vmatmul.mubr.msk.f32.gmra.mxu1 %vm724_vm0, %v6514_v20 }
 0x418   : > { %v16738_v35 = vpop.f32.mrf.mxu1  ;;  %10951 = vmatprep.mubr.msk.f32.mxu1 %vm724_vm0, %v6515_v15  ;;  %v16757_v15 = vpop.trf.xlu1 }
 0x419   : > { %20287 = vst [vmem:[#allocation123_spill] sm:$0xff] %v16738_v35  ;;  %v6516_v3 = vmul.f32 %v16633_v33, %v19167_v13  ;;  %v6518_v13 = vmul.f32 %v16633_v33, %v19170_v40  ;;  %v19175_v9 = vmax.f32 %v16738_v35, 0.0 }
 0x41a   : > { %v16750_v1 = vpop.f32.mrf.mxu1 }
 0x41b   : > { %20288 = vst [vmem:[#allocation124_spill] sm:$0xff] %v16750_v1  ;;  %v19171_v20 = vmax.f32 %v16750_v1, 0.0  ;;  %10952 = vmatmul.mubr.msk.f32.gmra.mxu1 %vm724_vm0, %v6516_v3 }
 0x41c   : > { %v16754_v19 = vpop.f32.mrf.mxu1  ;;  %10954 = vmatprep.mubr.msk.f32.mxu1 %vm724_vm0, %v6517_v37 }
 0x41d   : > { %20289 = vst [vmem:[#allocation72_spill] sm:$0xff] %v16754_v19  ;;  %v6519_v27 = vmul.f32 %v16633_v33, %v19171_v20  ;;  %v19178_v37 = vmax.f32 %v16754_v19, 0.0  ;;  %v6521_v20 = vmul.f32 %v16633_v33, %v19175_v9  ;;  %v20297_v19 = vld [vmem:[#allocation125_spill] sm:$0xff] }
 0x41e   : > { %v16766_v11 = vpop.f32.mrf.mxu1  ;;  %v2277_v25 = vadd.f32 1e-05, %v20297_v19 }
 0x41f   : > { %20290 = vst [vmem:[#allocation131_spill] sm:$0xff] %v16766_v11  ;;  %v19174_v3 = vmax.f32 %v16766_v11, 0.0  ;;  %10955 = vmatmul.mubr.msk.f32.gmra.mxu1 %vm724_vm0, %v6518_v13 }
 0x420   : > { %v16770_v58 = vpop.f32.mrf.mxu1  ;;  %10957 = vmatprep.mubr.msk.f32.mxu1 %vm724_vm0, %v6519_v27  ;;  %v6522_v27 = vmul.f32 %v16633_v33, %v19178_v37  ;;  %11375 = vrcp.f32 %v2277_v25  ;;  %v20302_v25 = vld [vmem:[#allocation135_spill] sm:$0xff] }
 0x421   : > { %20291 = vst [vmem:[#allocation74_spill] sm:$0xff] %v16770_v58  ;;  %v6520_v40 = vmul.f32 %v16633_v33, %v19174_v3  ;;  %v19184_v9 = vmax.f32 %v16770_v58, 0.0 }
 0x422   : > { %v16780_v1 = vpop.f32.mrf.mxu1 }
 0x423   : > { %20292 = vst [vmem:[#allocation31_spill] sm:$0xff] %v16780_v1  ;;  %v19179_v7 = vmax.f32 %v16780_v1, 0.0  ;;  %10958 = vmatmul.mubr.msk.f32.gmra.mxu1 %vm724_vm0, %v6520_v40 }
 0x424   : > { %v16784_v13 = vpop.f32.mrf.mxu1  ;;  %10960 = vmatprep.mubr.msk.f32.mxu1 %vm724_vm0, %v6521_v20 }
 0x425   : > { %20293 = vst [vmem:[#allocation103_spill] sm:$0xff] %v16784_v13  ;;  %v6523_v3 = vmul.f32 %v16633_v33, %v19179_v7  ;;  %v19187_v20 = vmax.f32 %v16784_v13, 0.0  ;;  %v6525_v7 = vmul.f32 %v16633_v33, %v19184_v9  ;;  %v2297_v13 = vadd.f32 1e-05, %v20302_v25 }
 0x426   : > { %v16794_v35 = vpop.f32.mrf.mxu1 }
 0x427   : > { %20294 = vst [vmem:[#allocation110_spill] sm:$0xff] %v16794_v35  ;;  %v19185_v11 = vmax.f32 %v16794_v35, 0.0  ;;  %10961 = vmatmul.mubr.msk.f32.gmra.mxu1 %vm724_vm0, %v6522_v27  ;;  %11377 = vrcp.f32 %v2297_v13  ;;  %v20305_v13 = vld [vmem:[#allocation113_spill] sm:$0xff] }
 0x428   : > { %v16798_v40 = vpop.f32.mrf.mxu1  ;;  %10963 = vmatprep.mubr.msk.f32.mxu1 %vm724_vm0, %v6523_v3  ;;  %v6526_v3 = vmul.f32 %v16633_v33, %v19187_v20 }
 0x429   : > { %20295 = vst [vmem:[#allocation105_spill] sm:$0xff] %v16798_v40  ;;  %v6524_v37 = vmul.f32 %v16633_v33, %v19185_v11  ;;  %v19192_v11 = vmax.f32 %v16798_v40, 0.0 }
 0x42a   : > { %v16808_v1 = vpop.f32.mrf.mxu1 }
 0x42b   : > { %20296 = vst [vmem:[#allocation68_spill] sm:$0xff] %v16808_v1  ;;  %v19188_v27 = vmax.f32 %v16808_v1, 0.0  ;;  %10964 = vmatmul.mubr.msk.f32.gmra.mxu1 %vm724_vm0, %v6524_v37 }
 0x42c   : > { %v16813_v36 = vpop.f32.mrf.mxu1  ;;  %10966 = vmatprep.mubr.msk.f32.mxu1 %vm724_vm0, %v6525_v7 }
 0x42d   : > { %20298 = vst [vmem:[#allocation49_spill] sm:$0xff] %v16813_v36  ;;  %v6527_v9 = vmul.f32 %v16633_v33, %v19188_v27  ;;  %v19195_v7 = vmax.f32 %v16813_v36, 0.0  ;;  %v6529_v27 = vmul.f32 %v16633_v33, %v19192_v11  ;;  %v2317_v36 = vadd.f32 1e-05, %v20305_v13 }
 0x42e   : > { %v16823_v58 = vpop.f32.mrf.mxu1 }
 0x42f   : > { %20299 = vst [vmem:[#allocation64_spill] sm:$0xff] %v16823_v58  ;;  %v19193_v19 = vmax.f32 %v16823_v58, 0.0  ;;  %10967 = vmatmul.mubr.msk.f32.gmra.mxu1 %vm724_vm0, %v6526_v3  ;;  %11379 = vrcp.f32 %v2317_v36  ;;  %v20308_v36 = vpack.c.bf16 %v16524_v24, %v16527_v63  ;;  %v20310_v24 = vpack.c.bf16 %v16540_v32, %v16544_v42 }
 0x430   : > { %v16827_v37 = vpop.f32.mrf.mxu1  ;;  %10969 = vmatprep.mubr.msk.f32.mxu1 %vm724_vm0, %v6527_v9  ;;  %v6530_v9 = vmul.f32 %v16633_v33, %v19195_v7  ;;  %v20312_v32 = vpack.c.bf16 %v16557_v46, %v16563_v0  ;;  %v20314_v46 = vpack.c.bf16 %v16579_v55, %v16582_v4 }
 0x431   : > { %20300 = vst [vmem:[#allocation141_spill] sm:$0xff] %v16827_v37  ;;  %v6528_v20 = vmul.f32 %v16633_v33, %v19193_v19  ;;  %v19202_v19 = vmax.f32 %v16827_v37, 0.0 }
 0x432   : > { %v16837_v1 = vpop.f32.mrf.mxu1 }
 0x433   : > { %20301 = vst [vmem:[#allocation63_spill] sm:$0xff] %v16837_v1  ;;  %v19196_v3 = vmax.f32 %v16837_v1, 0.0  ;;  %10970 = vmatmul.mubr.msk.f32.gmra.mxu1 %vm724_vm0, %v6528_v20 }
 0x434   : > { %v16842_v35 = vpop.f32.mrf.mxu1  ;;  %10972 = vmatprep.mubr.msk.f32.mxu1 %vm724_vm0, %v6529_v27 }
 0x435   : > { %20303 = vst [vmem:[#allocation115_spill] sm:$0xff] %v16842_v35  ;;  %v6531_v11 = vmul.f32 %v16633_v33, %v19196_v3  ;;  %v19203_v27 = vmax.f32 %v16842_v35, 0.0  ;;  %v6533_v3 = vmul.f32 %v16633_v33, %v19202_v19 }
 0x436   : > { %v16852_v40 = vpop.f32.mrf.mxu1 }
 0x437   : > { %20304 = vst [vmem:[#allocation80_spill] sm:$0xff] %v16852_v40  ;;  %v19200_v25 = vmax.f32 %v16852_v40, 0.0  ;;  %10973 = vmatmul.mubr.msk.f32.gmra.mxu1 %vm724_vm0, %v6530_v9  ;;  %v11376_v9 = vpop.eup %11375  ;;  %v20316_v40 = vpack.c.bf16 %v16595_v8, %v16601_v21 }
 0x438   : > { %v16856_v20 = vpop.f32.mrf.mxu1  ;;  %10975 = vmatprep.mubr.msk.f32.mxu1 %vm724_vm0, %v6531_v11  ;;  %v2459_v11 = vmul.f32 %v11376_v9, %v16520_v6  ;;  %v20307_v6 = vld [vmem:[#allocation56_spill] sm:$0xff] }
 0x439   : > { %v6532_v7 = vmul.f32 %v16633_v33, %v19200_v25  ;;  %v6534_v25 = vmul.f32 %v16633_v33, %v19203_v27  ;;  %v2337_v9 = vadd.f32 1e-05, %v20307_v6  ;;  %v11378_v33 = vpop.eup %11377 }
 0x43a   : > { %v16866_v1 = vpop.f32.mrf.mxu1 }
 0x43b   : > { %10976 = vmatmul.mubr.msk.f32.gmra.mxu1 %vm724_vm0, %v6532_v7  ;;  %v20306_v7 = vpack.c.bf16 %v16501_v34, %v16504_v47  ;;  %v2463_v34 = vmul.f32 %v11378_v33, %v16533_v26  ;;  %11381 = vrcp.f32 %v2337_v9 }
 0x43c   : > { %v16870_v58 = vpop.f32.mrf.mxu1  ;;  %10978 = vmatprep.mubr.msk.f32.mxu1 %vm724_vm0, %v6533_v3  ;;  %v6921_v3 = vpack.c.bf16 %v16517_v39, %v2459_v11  ;;  %v11380_v6 = vpop.eup %11379 }
 0x43d   : > { %v2467_v63 = vmul.f32 %v11380_v6, %v16553_v30 }
 0x43e   : > { %v16877_v37 = vpop.f32.mrf.mxu1 }
 0x43f   : > { %10979 = vmatmul.mubr.msk.f32.gmra.mxu1 %vm724_vm0, %v6534_v25  ;;  %v6923_v25 = vpack.c.bf16 %v16531_v51, %v2463_v34  ;;  %v6925_v9 = vpack.c.bf16 %v16548_v52, %v2467_v63 }
 0x440   : > { %v16880_v19 = vpop.f32.mrf.mxu1  ;;  %11021 = vmatprep.mubr.msk.bf16.mxu1 %vm724_vm0, %v20306_v7  ;;  %v20309_v7 = vld [vmem:[#allocation30_spill] sm:$0xff] }
 0x442   : > { %v16887_v13 = vpop.f32.mrf.mxu1 }
 0x443   : > { %11022 = vmatmul.mubr.msk.bf16.vlgmr.msra.gmra.mxu1 %vm724_vm0, %v6921_v3  ;;  %v2357_v3 = vadd.f32 1e-05, %v20309_v7 }
 0x444   : > { %v16891_v27 = vpop.f32.mrf.mxu1  ;;  %11025 = vmatprep.mubr.msk.bf16.mxu1 %vm724_vm0, %v20308_v36  ;;  %v20311_v36 = vld [vmem:[#allocation128_spill] sm:$0xff] }
 0x445   : > { %11383 = vrcp.f32 %v2357_v3  ;;  %v2377_v34 = vadd.f32 1e-05, %v20311_v36 }
 0x446   : > { %v16898_v47 = vpop.f32.mrf.mxu1 }
 0x447   : > { %11385 = vrcp.f32 %v2377_v34 }
 0x448   : > { %v16900_v39 = vpop.f32.mrf.mxu1 }
 0x44a   : > { %v16903_v11 = vpop.f32.mrf.mxu1 }
 0x44b   : > { %11026 = vmatmul.mubr.msk.bf16.gmra.mxu1 %vm724_vm0, %v6923_v25  ;;  %v11382_v25 = vpop.eup %11381 }
 0x44c   : > { %v16907_v35 = vpop.f32.mrf.mxu1  ;;  %11029 = vmatprep.mubr.msk.bf16.mxu1 %vm724_vm0, %v20310_v24  ;;  %v2471_v42 = vmul.f32 %v11382_v25, %v16572_v5  ;;  %v20313_v24 = vld [vmem:[#allocation139_spill] sm:$0xff] }
 0x44d   : > { %v2397_v63 = vadd.f32 1e-05, %v20313_v24 }
 0x44e   : > { %v16914_v26 = vpop.f32.mrf.mxu1  ;;  %v6927_v52 = vpack.c.bf16 %v16567_v54, %v2471_v42 }
 0x44f   : > { %11387 = vrcp.f32 %v2397_v63 }
 0x450   : > { %v10851_v51 = vpop.f32.mrf.mxu1 }
 0x452   : > { %v5881_v33 = vpop.f32.mrf.mxu1 }
 0x453   : > { %11030 = vmatmul.mubr.msk.bf16.gmra.mxu1 %vm724_vm0, %v6925_v9  ;;  %v11384_v9 = vpop.eup %11383 }
 0x454   : > { %v10852_v7 = vpop.f32.mrf.mxu1  ;;  %11033 = vmatprep.mubr.msk.bf16.mxu1 %vm724_vm0, %v20312_v32  ;;  %v2475_v0 = vmul.f32 %v11384_v9, %v16591_v43  ;;  %v20315_v32 = vld [vmem:[#allocation17_spill] sm:$0xff] }
 0x455   : > { %v2417_v42 = vadd.f32 1e-05, %v20315_v32 }
 0x456   : > { %v5884_v30 = vpop.f32.mrf.mxu1  ;;  %v6929_v54 = vpack.c.bf16 %v16586_v22, %v2475_v0  ;;  %v20317_v0 = vpack.c.bf16 %v16609_v41, %v16611_v59 }
 0x457   : > { %11389 = vrcp.f32 %v2417_v42  ;;  %v20318_v42 = vpack.c.bf16 %v16619_v16, %v16621_v14  ;;  %v11273_v16 = vunpack.i.l.bf16 %v16725_v62  ;;  %v11276_v14 = vunpack.i.h.bf16 %v16725_v62 }
 0x458   : > { %v16924_v3 = vpop.f32.mrf.mxu1 }
 0x45a   : > { %v16927_v6 = vpop.f32.mrf.mxu1 }
 0x45b   : > { %11034 = vmatmul.mubr.msk.bf16.gmra.mxu1 %vm724_vm0, %v6927_v52  ;;  %v11386_v52 = vpop.eup %11385 }
 0x45c   : > { %v10856_v36 = vpop.f32.mrf.mxu1  ;;  %11037 = vmatprep.mubr.msk.bf16.mxu1 %vm724_vm0, %v20314_v46  ;;  %v2479_v55 = vmul.f32 %v11386_v52, %v16607_v50  ;;  %v11388_v9 = vpop.eup %11387  ;;  %v20324_v52 = vmax.f32 %v16673_v29, 0.0  ;;  %v20329_v29 = vmax.f32 %v16677_v31, 0.0 }
 0x45d   : > { %v2483_v8 = vmul.f32 %v11388_v9, %v16617_v38 }
 0x45e   : > { %v5900_v5 = vpop.f32.mrf.mxu1  ;;  %v6931_v63 = vpack.c.bf16 %v16605_v48, %v2479_v55  ;;  %v20333_v55 = vld [vmem:[#allocation122_spill] sm:$0xff] }
 0x45f   : > { %v6933_v50 = vpack.c.bf16 %v16615_v61, %v2483_v8  ;;  %v11271_v61 = vunpack.i.h.bf16 %v16708_v44  ;;  %v11286_v44 = vunpack.i.h.bf16 %v16757_v15  ;;  %v20345_v8 = vld [vmem:[#allocation72_spill] sm:$0xff] }
 0x460   : > { %v10859_v34 = vpop.f32.mrf.mxu1 }
 0x462   : > { %v5913_v25 = vpop.f32.mrf.mxu1 }
 0x463   : > { %11038 = vmatmul.mubr.msk.bf16.gmra.mxu1 %vm724_vm0, %v6929_v54 }
 0x464   : > { %v10860_v24 = vpop.f32.mrf.mxu1  ;;  %11041 = vmatprep.mubr.msk.bf16.mxu1 %vm724_vm0, %v20316_v40  ;;  %v11390_v48 = vpop.eup %11389 }
 0x465   : > { %v2487_v41 = vmul.f32 %v11390_v48, %v16627_v23  ;;  %v11281_v23 = vunpack.i.h.bf16 %v16741_v49 }
 0x466   : > { %v5916_v4 = vpop.f32.mrf.mxu1 }
 0x467   : > { %v6935_v38 = vpack.c.bf16 %v16625_v45, %v2487_v41  ;;  %v11278_v45 = vunpack.i.l.bf16 %v16741_v49  ;;  %v20353_v41 = vld [vmem:[#allocation103_spill] sm:$0xff] }
 0x468   : > { %v10863_v43 = vpop.f32.mrf.mxu1 }
 0x46a   : > { %v5929_v22 = vpop.f32.mrf.mxu1 }
 0x46b   : > { %11042 = vmatmul.mubr.msk.bf16.gmra.mxu1 %vm724_vm0, %v6931_v63  ;;  %v20339_v63 = vld [vmem:[#allocation124_spill] sm:$0xff] }
 0x46c   : > { %v10864_v46 = vpop.f32.mrf.mxu1  ;;  %11045 = vmatprep.mubr.msk.bf16.mxu1 %vm724_vm0, %v20317_v0 }
 0x46e   : > { %v5932_v21 = vpop.f32.mrf.mxu1 }
 0x470   : > { %v10867_v40 = vpop.f32.mrf.mxu1 }
 0x472   : > { %v5945_v54 = vpop.f32.mrf.mxu1 }
 0x473   : > { %11046 = vmatmul.mubr.msk.bf16.gmra.mxu1 %vm724_vm0, %v6933_v50 }
 0x474   : > { %v10868_v32 = vpop.f32.mrf.mxu1  ;;  %11049 = vmatprep.mubr.msk.bf16.mxu1 %vm724_vm0, %v20318_v42 }
 0x475   : > { %10287 = vmatprep.subr.mxu0 %v10868_v32  ;;  %v20351_v32 = vld [vmem:[#allocation74_spill] sm:$0xff] }
 0x476   : > { %10288 = vmatpush3.msra.mxu0 %v10852_v7  ;;  %v5948_v59 = vpop.f32.mrf.mxu1  ;;  %v11553_v7 = vld [vmem:[%s19501_s9 + $0x8] sm:$0xff]  ;;  %v20352_v42 = vmax.f32 %v20351_v32, 0.0 }
 0x477   : > { %10289 = vmatprep.subr.mxu0 %v10867_v40  ;;  %v20347_v40 = vld [vmem:[#allocation31_spill] sm:$0xff] }
 0x478   : > { %10290 = vmatpush3.msra.mxu0 %v10851_v51  ;;  %v20348_v50 = vmax.f32 %v20347_v40, 0.0 }
 0x479   : > { %10291 = vmatprep.subr.mxu0 %v5948_v59  ;;  %v20354_v59 = vmax.f32 %v20353_v41, 0.0 }
 0x47a   : > { %10292 = vmatpush3.msra.mxu0 %v5884_v30 }
 0x47b   : > { %10293 = vmatprep.subr.mxu0 %v5945_v54  ;;  %11050 = vmatmul.mubr.msk.bf16.gmra.mxu1 %vm724_vm0, %v6935_v38  ;;  %v20349_v54 = vld [vmem:[#allocation110_spill] sm:$0xff]  ;;  %v20355_v38 = vld [vmem:[#allocation68_spill] sm:$0xff] }
 0x47c   : > { %10294 = vmatpush3.msra.mxu0 %v5881_v33  ;;  %v20350_v48 = vmax.f32 %v20349_v54, 0.0 }
 0x47d   : > { %10295 = vmatprep.subr.mxu0 %v10864_v46  ;;  %v20343_v46 = vld [vmem:[#allocation123_spill] sm:$0xff] }
 0x47e   : > { %10296 = vmatpush3.msra.mxu0 %v16907_v35  ;;  %v20319_v35 = vmax.f32 %v16631_v53, 0.0  ;;  %v11552_v53 = vld [vmem:[%s19501_s9 + $0x10] sm:$0xff]  ;;  %v20344_v0 = vmax.f32 %v20343_v46, 0.0 }
 0x47f   : > { %10297 = vmatprep.subr.mxu0 %v10863_v43  ;;  %v20337_v43 = vld [vmem:[#allocation134_spill] sm:$0xff] }
 0x480   : > { %10298 = vmatpush3.msra.mxu0 %v16900_v39  ;;  %v20338_v31 = vmax.f32 %v20337_v43, 0.0 }
 0x481   : > { %10299 = vmatprep.subr.mxu0 %v5932_v21  ;;  %v20346_v21 = vmax.f32 %v20345_v8, 0.0 }
 0x482   : > { %10300 = vmatpush3.msra.mxu0 %v16914_v26 }
 0x483   : > { %10301 = vmatprep.subr.mxu0 %v5929_v22  ;;  %v20341_v22 = vld [vmem:[#allocation131_spill] sm:$0xff] }
 0x484   : > { %10302 = vmatpush3.msra.mxu0 %v16903_v11  ;;  %v20342_v9 = vmax.f32 %v20341_v22, 0.0 }
 0x485   : > { %10303 = vmatprep.subr.mxu0 %v10860_v24  ;;  %v20331_v24 = vld [vmem:[#allocation26_spill] sm:$0xff] }
 0x486   : > { %10304 = vmatpush3.msra.mxu0 %v16891_v27 }
 0x487   : > { %10305 = vmatprep.subr.mxu0 %v10859_v34  ;;  %v20322_v34 = vmax.f32 %v16636_v56, 0.0  ;;  %v20327_v56 = vmax.f32 %v16687_v60, 0.0  ;;  %v20334_v60 = vmax.f32 %v20333_v55, 0.0 }
 0x488   : > { %10306 = vmatpush3.msra.mxu0 %v16880_v19 }
 0x489   : > { %10307 = vmatprep.subr.mxu0 %v5916_v4  ;;  %v20335_v4 = vld [vmem:[#allocation51_spill] sm:$0xff] }
 0x48a   : > { %10308 = vmatpush3.msra.mxu0 %v16898_v47 }
 0x48b   : > { %10309 = vmatprep.subr.mxu0 %v5913_v25  ;;  %v20323_v25 = vmax.f32 %v16658_v10, 0.0  ;;  %v20328_v10 = vmax.f32 %v16701_v57, 0.0  ;;  %v20336_v57 = vmax.f32 %v20335_v4, 0.0 }
 0x48c   : > { %10310 = vmatpush3.msra.mxu0 %v16887_v13 }
 0x48d   : > { %10311 = vmatprep.subr.mxu0 %v10856_v36  ;;  %v20320_v36 = vmax.f32 %v16642_v17, 0.0  ;;  %v20325_v17 = vmax.f32 %v16646_v2, 0.0  ;;  %v20330_v2 = vmax.f32 %v16691_v12, 0.0  ;;  %v20340_v12 = vmax.f32 %v20339_v63, 0.0 }
 0x48e   : > { %10312 = vmatpush3.msra.mxu0 %v16870_v58  ;;  %v11283_v58 = vunpack.i.l.bf16 %v16757_v15  ;;  %v11551_v15 = vld [vmem:[%s19501_s9 + $0x18] sm:$0xff] }
 0x48f   : > { %10313 = vmatprep.subr.mxu0 %v16924_v3  ;;  %v11554_v3 = vld [vmem:[%s19501_s9] sm:$0xff] }
 0x490   : > { %10314 = vmatpush3.msra.mxu0 %v16856_v20 }
 0x491   : > { %10315 = vmatprep.subr.mxu0 %v5900_v5  ;;  %v20321_v5 = vmax.f32 %v16629_v28, 0.0  ;;  %v20326_v28 = vmax.f32 %v16662_v18, 0.0  ;;  %v20332_v18 = vmax.f32 %v20331_v24, 0.0 }
 0x492   : > { %10316 = vmatpush3.msra.mxu0 %v16877_v37 }
 0x493   : > { %10317 = vmatprep.subr.mxu0 %v16927_v6 }
 0x494   : > { %10318 = vmatpush3.msra.mxu0 %v16866_v1 }
 0x495   : > { %6089 = vmatmul.mubr.f32.vlgmr.msra.gmra.mxu0 %v11271_v61  ;;  %v20356_v61 = vmax.f32 %v20355_v38, 0.0 }
 0x496   : > { %6093 = vmatprep.mubr.f32.mxu0 %v11273_v16  ;;  %v20357_v16 = vld [vmem:[#allocation64_spill] sm:$0xff] }
 0x499   : > { %6094 = vmatmul.mubr.f32.gmra.mxu0 %v11276_v14  ;;  %v20358_v14 = vmax.f32 %v20357_v16, 0.0 }
 0x49a   : > { %6098 = vmatprep.mubr.f32.mxu0 %v11278_v45  ;;  %v20359_v45 = vld [vmem:[#allocation105_spill] sm:$0xff] }
 0x49d   : > { %6099 = vmatmul.mubr.f32.gmra.mxu0 %v11281_v23  ;;  %v20360_v23 = vmax.f32 %v20359_v45, 0.0 }
 0x49e   : > { %6103 = vmatprep.mubr.f32.mxu0 %v11283_v58  ;;  %v20361_v58 = vld [vmem:[#allocation49_spill] sm:$0xff] }
 0x4a1   : > { %6104 = vmatmul.mubr.f32.gmra.mxu0 %v11286_v44  ;;  %v20362_v44 = vmax.f32 %v20361_v58, 0.0 }
 0x4a2   : > { %10877 = vmatprep.mubr.msk.f32.mxu0 %vm724_vm0, %v20319_v35  ;;  %v20363_v35 = vld [vmem:[#allocation63_spill] sm:$0xff] }
 0x555   : > { %v10319_v1 = vpop.f32.mrf.mxu0 }
 0x557   : > { %v10320_v62 = vpop.f32.mrf.mxu0 }
 0x558   : > { %v10321_v51 = vadd.f32 %v10320_v62, %v10319_v1  ;;  %v20364_v1 = vmax.f32 %v20363_v35, 0.0  ;;  %v20365_v62 = vld [vmem:[#allocation80_spill] sm:$0xff] }
 0x559   : > { %v10322_v19 = vpop.f32.mrf.mxu0 }
 0x55a   : > { %v6109_v6 = vmul.f32 %v11554_v3, %v10321_v51 }
 0x55b   : > { %v10323_v37 = vpop.f32.mrf.mxu0 }
 0x55c   : > { %v10324_v11 = vadd.f32 %v10323_v37, %v10322_v19  ;;  %v20366_v19 = vmax.f32 %v20365_v62, 0.0  ;;  %v20367_v37 = vld [vmem:[#allocation141_spill] sm:$0xff] }
 0x55d   : > { %v10325_v20 = vpop.f32.mrf.mxu0 }
 0x55e   : > { %v6110_v30 = vmul.f32 %v11553_v7, %v10324_v11 }
 0x55f   : > { %v10326_v27 = vpop.f32.mrf.mxu0 }
 0x560   : > { %v10327_v47 = vadd.f32 %v10326_v27, %v10325_v20  ;;  %v20368_v20 = vmax.f32 %v20367_v37, 0.0  ;;  %v20369_v27 = vld [vmem:[#allocation115_spill] sm:$0xff] }
 0x561   : > { %v10328_v49 = vpop.f32.mrf.mxu0 }
 0x562   : > { %v6111_v33 = vmul.f32 %v11552_v53, %v10327_v47  ;;  %v11316_v47 = vld [vmem:[%s18593_s11] sm:$0xff]  }
 0x563   : > { %v10329_v13 = vpop.f32.mrf.mxu0 }
 0x564   : > { %v10330_v39 = vadd.f32 %v10329_v13, %v10328_v49  ;;  %v20370_v49 = vmax.f32 %v20369_v27, 0.0  ;;  %v11315_v13 = vld [vmem:[%s18593_s11 + $0x8] sm:$0xff]  }
 0x566   : > { %v6112_v26 = vmul.f32 %v11551_v15, %v10330_v39  ;;  %v10935_v39 = vpop.f32.mrf.mxu1 }
 0x568   : > { %10869 = vmatprep.subr.mxu0 %v6112_v26  ;;  %v6697_v11 = vpop.f32.mrf.mxu1 }
 0x569   : > { %10870 = vmatpush3.msra.mxu0 %v6112_v26 }
 0x56a   : > { %10871 = vmatprep.subr.mxu0 %v6111_v33  ;;  %v10938_v15 = vpop.f32.mrf.mxu1 }
 0x56b   : > { %10872 = vmatpush3.msra.mxu0 %v6111_v33 }
 0x56c   : > { %10873 = vmatprep.subr.mxu0 %v6110_v30  ;;  %v6707_v26 = vpop.f32.mrf.mxu1 }
 0x56d   : > { %10874 = vmatpush3.msra.mxu0 %v6110_v30 }
 0x56e   : > { %10875 = vmatprep.subr.mxu0 %v6109_v6  ;;  %v10941_v51 = vpop.f32.mrf.mxu1 }
 0x56f   : > { %10876 = vmatpush3.msra.mxu0 %v6109_v6 }
 0x570   : > { %10878 = vmatmul.mubr.msk.f32.vlgmr.msra.gmra.mxu0 %vm724_vm0, %v20320_v36  ;;  %10981 = vmatprep.subr.bf16.mxu0 %v11315_v13  ;;  %v6717_v53 = vpop.f32.mrf.mxu1 }
 0x571   : > { %10880 = vmatprep.mubr.msk.f32.mxu0 %vm724_vm0, %v20321_v5  ;;  %10982 = vmatpush3.bf16.msra.mxu0 %v11315_v13  ;;  %v6718_v55 = vadd.f32 1e-05, %v6717_v53 }
 0x572   : > { %10983 = vmatprep.subr.bf16.mxu0 %v11316_v47  ;;  %v10944_v33 = vpop.f32.mrf.mxu1 }
 0x573   : > { %v6733_v4 = vadd.f32 1e-05, %v10944_v33 }
 0x574   : > { %10881 = vmatmul.mubr.msk.f32.gmra.mxu0 %vm724_vm0, %v20322_v34  ;;  %v6727_v7 = vpop.f32.mrf.mxu1 }
 0x575   : > { %10883 = vmatprep.mubr.msk.f32.mxu0 %vm724_vm0, %v20323_v25  ;;  %10984 = vmatpush3.bf16.msra.mxu0 %v11316_v47 }
 0x576   : > { %v10947_v30 = vpop.f32.mrf.mxu1 }
 0x578   : > { %10884 = vmatmul.mubr.msk.f32.gmra.mxu0 %vm724_vm0, %v20324_v52  ;;  %v6737_v3 = vpop.f32.mrf.mxu1 }
 0x579   : > { %10886 = vmatprep.mubr.msk.f32.mxu0 %vm724_vm0, %v20325_v17  ;;  %v6738_v22 = vadd.f32 1e-05, %v6737_v3 }
 0x57a   : > { %v10950_v6 = vpop.f32.mrf.mxu1 }
 0x57b   : > { %v6753_v40 = vadd.f32 1e-05, %v10950_v6 }
 0x57c   : > { %10887 = vmatmul.mubr.msk.f32.gmra.mxu0 %vm724_vm0, %v20326_v28  ;;  %v6747_v36 = vpop.f32.mrf.mxu1  ;;  %v6703_v28 = vadd.f32 1e-05, %v10935_v39 }
 0x57d   : > { %10889 = vmatprep.mubr.msk.f32.mxu0 %vm724_vm0, %v20327_v56  ;;  %v6698_v56 = vadd.f32 1e-05, %v6697_v11 }
 0x57e   : > { %v10953_v5 = vpop.f32.mrf.mxu1  ;;  %11391 = vrcp.f32 %v6703_v28 }
 0x57f   : > { %11393 = vrcp.f32 %v6698_v56  ;;  %v6763_v16 = vadd.f32 1e-05, %v10953_v5 }
 0x580   : > { %10890 = vmatmul.mubr.msk.f32.gmra.mxu0 %vm724_vm0, %v20328_v10  ;;  %v6757_v34 = vpop.f32.mrf.mxu1 }
 0x581   : > { %10892 = vmatprep.mubr.msk.f32.mxu0 %vm724_vm0, %v20329_v29  ;;  %v6713_v29 = vadd.f32 1e-05, %v10938_v15 }
 0x582   : > { %v10956_v25 = vpop.f32.mrf.mxu1 }
 0x583   : > { %11395 = vrcp.f32 %v6713_v29  ;;  %v6773_v37 = vadd.f32 1e-05, %v10956_v25 }
 0x584   : > { %10893 = vmatmul.mubr.msk.f32.gmra.mxu0 %vm724_vm0, %v20330_v2  ;;  %v6767_v52 = vpop.f32.mrf.mxu1  ;;  %v6708_v2 = vadd.f32 1e-05, %v6707_v26 }
 0x585   : > { %10895 = vmatprep.mubr.msk.f32.mxu0 %vm724_vm0, %v20332_v18  ;;  %v6723_v18 = vadd.f32 1e-05, %v10941_v51 }
 0x586   : > { %v17095_v17 = vpop.f32.mrf.mxu1  ;;  %11397 = vrcp.f32 %v6708_v2 }
 0x587   : > { %11399 = vrcp.f32 %v6723_v18  ;;  %v6783_v51 = vadd.f32 1e-05, %v17095_v17 }
 0x588   : > { %10896 = vmatmul.mubr.msk.f32.gmra.mxu0 %vm724_vm0, %v20334_v60  ;;  %v17097_v10 = vpop.f32.mrf.mxu1  ;;  %11401 = vrcp.f32 %v6718_v55 }
 0x589   : > { %10898 = vmatprep.mubr.msk.f32.mxu0 %vm724_vm0, %v20336_v57  ;;  %v6728_v57 = vadd.f32 1e-05, %v6727_v7  ;;  %11403 = vrcp.f32 %v6733_v4  ;;  %v6778_v7 = vadd.f32 1e-05, %v17097_v10 }
 0x58a   : > { %v17099_v24 = vpop.f32.mrf.mxu1 }
 0x58b   : > { %11405 = vrcp.f32 %v6728_v57  ;;  %v6793_v25 = vadd.f32 1e-05, %v17099_v24 }
 0x58c   : > { %10899 = vmatmul.mubr.msk.f32.gmra.mxu0 %vm724_vm0, %v20338_v31  ;;  %v17101_v60 = vpop.f32.mrf.mxu1  ;;  %v6743_v31 = vadd.f32 1e-05, %v10947_v30 }
 0x58d   : > { %10901 = vmatprep.mubr.msk.f32.mxu0 %vm724_vm0, %v20340_v12  ;;  %v11392_v12 = vpop.eup %11391  ;;  %v6788_v17 = vadd.f32 1e-05, %v17101_v60 }
 0x58e   : > { %v17103_v43 = vpop.f32.mrf.mxu1  ;;  %11407 = vrcp.f32 %v6743_v31 }
 0x58f   : > { %11409 = vrcp.f32 %v6738_v22  ;;  %v6803_v4 = vadd.f32 1e-05, %v17103_v43 }
 0x590   : > { %10902 = vmatmul.mubr.msk.f32.gmra.mxu0 %vm724_vm0, %v20342_v9  ;;  %v11394_v9 = vpop.eup %11393  ;;  %v17105_v46 = vpop.f32.mrf.mxu1  ;;  %11411 = vrcp.f32 %v6753_v40 }
 0x591   : > { %10904 = vmatprep.mubr.msk.f32.mxu0 %vm724_vm0, %v20344_v0  ;;  %v11396_v54 = vpop.eup %11395  ;;  %v6798_v24 = vadd.f32 1e-05, %v17105_v46 }
 0x592   : > { %v17107_v41 = vpop.f32.mrf.mxu1 }
 0x594   : > { %10905 = vmatmul.mubr.msk.f32.gmra.mxu0 %vm724_vm0, %v20346_v21  ;;  %v6807_v35 = vpop.f32.mrf.mxu1 }
 0x595   : > { %10907 = vmatprep.mubr.msk.f32.mxu0 %vm724_vm0, %v20348_v50  ;;  %v6808_v43 = vadd.f32 1e-05, %v6807_v35 }
 0x596   : > { %v10971_v39 = vpop.f32.mrf.mxu1 }
 0x598   : > { %10908 = vmatmul.mubr.msk.f32.gmra.mxu0 %vm724_vm0, %v20350_v48  ;;  %v6748_v48 = vadd.f32 1e-05, %v6747_v36  ;;  %v6817_v6 = vpop.f32.mrf.mxu1 }
 0x599   : > { %10910 = vmatprep.mubr.msk.f32.mxu0 %vm724_vm0, %v20352_v42  ;;  %v11398_v42 = vpop.eup %11397 }
 0x59a   : > { %v11400_v45 = vpop.eup %11399  ;;  %11413 = vrcp.f32 %v6748_v48  ;;  %v10974_v2 = vpop.f32.mrf.mxu1 }
 0x59b   : > { %11415 = vrcp.f32 %v6763_v16  ;;  %v6818_v16 = vadd.f32 1e-05, %v6817_v6  ;;  %v6833_v35 = vadd.f32 1e-05, %v10974_v2 }
 0x59c   : > { %10911 = vmatmul.mubr.msk.f32.gmra.mxu0 %vm724_vm0, %v20354_v59  ;;  %v6827_v22 = vpop.f32.mrf.mxu1 }
 0x59d   : > { %10913 = vmatprep.mubr.msk.f32.mxu0 %vm724_vm0, %v20356_v61 }
 0x59e   : > { %v10977_v48 = vpop.f32.mrf.mxu1 }
 0x5a0   : > { %10914 = vmatmul.mubr.msk.f32.gmra.mxu0 %vm724_vm0, %v20358_v14 }
 0x5a1   : > { %10916 = vmatprep.mubr.msk.f32.mxu0 %vm724_vm0, %v20360_v23  ;;  %v6758_v23 = vadd.f32 1e-05, %v6757_v34 }
 0x5a3   : > { %11417 = vrcp.f32 %v6758_v23 }
 0x5a4   : > { %10917 = vmatmul.mubr.msk.f32.gmra.mxu0 %vm724_vm0, %v20362_v44  ;;  %v11402_v44 = vpop.eup %11401  ;;  %11419 = vrcp.f32 %v6773_v37 }
 0x5a5   : > { %10919 = vmatprep.mubr.msk.f32.mxu0 %vm724_vm0, %v20364_v1  ;;  %v11404_v27 = vpop.eup %11403 }
 0x5a6   : > { %v11406_v47 = vpop.eup %11405 }
 0x5a7   : > { %v11408_v33 = vpop.eup %11407 }
 0x5a8   : > { %10920 = vmatmul.mubr.msk.f32.gmra.mxu0 %vm724_vm0, %v20366_v19  ;;  %v11410_v3 = vpop.eup %11409 }
 0x5a9   : > { %10922 = vmatprep.mubr.msk.f32.mxu0 %vm724_vm0, %v20368_v20  ;;  %v11412_v28 = vpop.eup %11411 }
 0x5aa   : > { %v11414_v29 = vpop.eup %11413 }
 0x5ab   : > { %v11416_v31 = vpop.eup %11415 }
 0x5ac   : > { %10923 = vmatmul.mubr.msk.f32.gmra.mxu0 %vm724_vm0, %v20370_v49  ;;  %v6768_v49 = vadd.f32 1e-05, %v6767_v52 }
 0x5ae   : > { %11421 = vrcp.f32 %v6768_v49 }
 0x5af   : > { %11423 = vrcp.f32 %v6783_v51 }
 0x5b0   : > { %11425 = vrcp.f32 %v6778_v7 }
 0x5b1   : > { %11427 = vrcp.f32 %v6793_v25 }
 0x5b2   : > { %11429 = vrcp.f32 %v6788_v17 }
 0x5b3   : > { %11431 = vrcp.f32 %v6803_v4 }
 0x5b4   : > { %11433 = vrcp.f32 %v6798_v24 }
 0x630   : > { %v10879_v63 = vpop.f32.mrf.mxu0 }
 0x631   : > { %v6889_v8 = vmul.f32 %v11392_v12, %v10879_v63  ;;  %v11418_v12 = vpop.eup %11417 }
 0x632   : > { %v6275_v0 = vpop.f32.mrf.mxu0  ;;  %v11420_v40 = vpop.eup %11419 }
 0x633   : > { %v6888_v21 = vmul.f32 %v11394_v9, %v6275_v0 }
 0x634   : > { %v10882_v50 = vpop.f32.mrf.mxu0 }
 0x635   : > { %v6940_v32 = vpack.c.bf16 %v6889_v8, %v6888_v21  ;;  %v6891_v38 = vmul.f32 %v11396_v54, %v10882_v50  ;;  %v6813_v8 = vadd.f32 1e-05, %v17107_v41  ;;  %v11422_v54 = vpop.eup %11421 }
 0x636   : > { %v6285_v59 = vpop.f32.mrf.mxu0 }
 0x637   : > { %v6890_v61 = vmul.f32 %v11398_v42, %v6285_v59  ;;  %10985 = vmatprep.mubr.msk.bf16.mxu0 %vm724_vm0, %v6940_v32  ;;  %11435 = vrcp.f32 %v6813_v8  ;;  %v6823_v59 = vadd.f32 1e-05, %v10971_v39  ;;  %v6843_v39 = vadd.f32 1e-05, %v10977_v48 }
 0x638   : > { %v10885_v14 = vpop.f32.mrf.mxu0  ;;  %11437 = vrcp.f32 %v6808_v43 }
 0x639   : > { %v6941_v58 = vpack.c.bf16 %v6891_v38, %v6890_v61  ;;  %v6893_v62 = vmul.f32 %v11400_v45, %v10885_v14  ;;  %v11424_v61 = vpop.eup %11423  ;;  %v6837_v45 = vpop.f32.mrf.mxu1  ;;  %11439 = vrcp.f32 %v6823_v59 }
 0x63a   : > { %v6295_v1 = vpop.f32.mrf.mxu0  ;;  %v11426_v41 = vpop.eup %11425  ;;  %11441 = vrcp.f32 %v6818_v16 }
 0x63b   : > { %v6892_v19 = vmul.f32 %v11402_v44, %v6295_v1  ;;  %10986 = vmatmul.mubr.msk.bf16.vlgmr.msra.gmra.mxu0 %vm724_vm0, %v6941_v58  ;;  %11443 = vrcp.f32 %v6833_v35 }
 0x63c   : > { %v10888_v20 = vpop.f32.mrf.mxu0 }
 0x63d   : > { %v6942_v13 = vpack.c.bf16 %v6893_v62, %v6892_v19  ;;  %v6895_v15 = vmul.f32 %v11404_v27, %v10888_v20  ;;  %v11428_v62 = vpop.eup %11427  ;;  %v6828_v19 = vadd.f32 1e-05, %v6827_v22  ;;  %v10980_v27 = vpop.f32.mrf.mxu1 }
 0x63e   : > { %v6305_v11 = vpop.f32.mrf.mxu0  ;;  %v11430_v20 = vpop.eup %11429  ;;  %v6853_v6 = vadd.f32 1e-05, %v10980_v27 }
 0x63f   : > { %v6894_v26 = vmul.f32 %v11406_v47, %v6305_v11  ;;  %10989 = vmatprep.mubr.msk.bf16.mxu0 %vm724_vm0, %v6942_v13  ;;  %11445 = vrcp.f32 %v6828_v19 }
 0x640   : > { %v10891_v53 = vpop.f32.mrf.mxu0  ;;  %11447 = vrcp.f32 %v6843_v39 }
 0x641   : > { %v6943_v30 = vpack.c.bf16 %v6895_v15, %v6894_v26  ;;  %v6897_v5 = vmul.f32 %v11408_v33, %v10891_v53  ;;  %v11432_v15 = vpop.eup %11431  ;;  %v6838_v26 = vadd.f32 1e-05, %v6837_v45  ;;  %v6847_v33 = vpop.f32.mrf.mxu1 }
 0x642   : > { %v6315_v36 = vpop.f32.mrf.mxu0  ;;  %v11434_v53 = vpop.eup %11433 }
 0x643   : > { %v6896_v34 = vmul.f32 %v11410_v3, %v6315_v36  ;;  %10990 = vmatmul.mubr.msk.bf16.gmra.mxu0 %vm724_vm0, %v6943_v30  ;;  %11449 = vrcp.f32 %v6838_v26  ;;  %v11023_v45 = vpop.f32.mrf.mxu1 }
 0x644   : > { %v10894_v52 = vpop.f32.mrf.mxu0  ;;  %11451 = vrcp.f32 %v6853_v6 }
 0x645   : > { %v6944_v56 = vpack.c.bf16 %v6897_v5, %v6896_v34  ;;  %v6899_v18 = vmul.f32 %v11412_v28, %v10894_v52  ;;  %v11436_v5 = vpop.eup %11435  ;;  %v6848_v34 = vadd.f32 1e-05, %v6847_v33  ;;  %v17155_v33 = vld [vmem:[%s18594_s12] ss:$0 sm:$0xff] }
 0x646   : > { %v6325_v10 = vpop.f32.mrf.mxu0  ;;  %v11438_v52 = vpop.eup %11437 }
 0x647   : > { %v6898_v55 = vmul.f32 %v11414_v29, %v6325_v10  ;;  %10993 = vmatprep.mubr.msk.bf16.mxu0 %vm724_vm0, %v6944_v56  ;;  %v11440_v2 = vpop.eup %11439  ;;  %11453 = vrcp.f32 %v6848_v34 }
 0x648   : > { %v10897_v57 = vpop.f32.mrf.mxu0 }
 0x649   : > { %v6945_v63 = vpack.c.bf16 %v6899_v18, %v6898_v55  ;;  %v6901_v9 = vmul.f32 %v11416_v31, %v10897_v57  ;;  %v11442_v18 = vpop.eup %11441 }
 0x64a   : > { %v6335_v60 = vpop.f32.mrf.mxu0  ;;  %v11444_v24 = vpop.eup %11443 }
 0x64b   : > { %v6900_v0 = vmul.f32 %v11418_v12, %v6335_v60  ;;  %10994 = vmatmul.mubr.msk.bf16.gmra.mxu0 %vm724_vm0, %v6945_v63 }
 0x64c   : > { %v10900_v21 = vpop.f32.mrf.mxu0  ;;  %v11446_v12 = vpop.eup %11445 }
 0x64d   : > { %v6946_v50 = vpack.c.bf16 %v6901_v9, %v6900_v0  ;;  %v6903_v46 = vmul.f32 %v11420_v40, %v10900_v21  ;;  %v11448_v8 = vpop.eup %11447 }
 0x64e   : > { %v6345_v32 = vpop.f32.mrf.mxu0 }
 0x64f   : > { %v6902_v42 = vmul.f32 %v11422_v54, %v6345_v32  ;;  %10997 = vmatprep.mubr.msk.bf16.mxu0 %vm724_vm0, %v6946_v50 }
 0x650   : > { %v10903_v38 = vpop.f32.mrf.mxu0  ;;  %v11450_v40 = vpop.eup %11449 }
 0x651   : > { %v6947_v14 = vpack.c.bf16 %v6903_v46, %v6902_v42  ;;  %v6905_v58 = vmul.f32 %v11424_v61, %v10903_v38  ;;  %v11452_v32 = vpop.eup %11451 }
 0x652   : > { %v6355_v23 = vpop.f32.mrf.mxu0 }
 0x653   : > { %v6904_v44 = vmul.f32 %v11426_v41, %v6355_v23  ;;  %10998 = vmatmul.mubr.msk.bf16.gmra.mxu0 %vm724_vm0, %v6947_v14  ;;  %v11317_v14 = vld [vmem:[%s18596_s14 + $0x8] sm:$0xff]   ;;  %v11318_v41 = vld [vmem:[%s18596_s14] sm:$0xff]   ;;  %v7275_v23 = vpop.f32.mrf.mxu1 }
 0x654   : > { %v10906_v1 = vpop.f32.mrf.mxu0  ;;  %v11454_v42 = vpop.eup %11453  ;;  %11053 = vmatprep.subr.bf16.mxu0 %v11317_v14 }
 0x655   : > { %v6948_v37 = vpack.c.bf16 %v6905_v58, %v6904_v44  ;;  %v6907_v13 = vmul.f32 %v11428_v62, %v10906_v1  ;;  %11054 = vmatpush3.bf16.msra.mxu0 %v11317_v14  ;;  %v11024_v58 = vpop.f32.mrf.mxu1 }
 0x656   : > { %v6365_v49 = vpop.f32.mrf.mxu0  ;;  %11055 = vmatprep.subr.bf16.mxu0 %v11318_v41 }
 0x657   : > { %v6906_v47 = vmul.f32 %v11430_v20, %v6365_v49  ;;  %11001 = vmatprep.mubr.msk.bf16.mxu0 %vm724_vm0, %v6948_v37  ;;  %v7278_v44 = vpop.f32.mrf.mxu1 }
 0x658   : > { %v10909_v11 = vpop.f32.mrf.mxu0 }
 0x659   : > { %v6949_v51 = vpack.c.bf16 %v6907_v13, %v6906_v47  ;;  %v6909_v30 = vmul.f32 %v11432_v15, %v10909_v11  ;;  %11056 = vmatpush3.bf16.msra.mxu0 %v11318_v41  ;;  %v11027_v35 = vpop.f32.mrf.mxu1 }
 0x65a   : > { %v6375_v7 = vpop.f32.mrf.mxu0 }
 0x65b   : > { %v6908_v3 = vmul.f32 %v11434_v53, %v6375_v7  ;;  %11002 = vmatmul.mubr.msk.bf16.gmra.mxu0 %vm724_vm0, %v6949_v51  ;;  %v7291_v1 = vpop.f32.mrf.mxu1 }
 0x65c   : > { %v10912_v36 = vpop.f32.mrf.mxu0 }
 0x65d   : > { %v6950_v25 = vpack.c.bf16 %v6909_v30, %v6908_v3  ;;  %v6911_v17 = vmul.f32 %v11436_v5, %v10912_v36  ;;  %v11028_v62 = vpop.f32.mrf.mxu1 }
 0x65e   : > { %v6385_v28 = vpop.f32.mrf.mxu0 }
 0x65f   : > { %v6910_v56 = vmul.f32 %v11438_v52, %v6385_v28  ;;  %11005 = vmatprep.mubr.msk.bf16.mxu0 %vm724_vm0, %v6950_v25  ;;  %v7294_v19 = vpop.f32.mrf.mxu1  ;;  %v17164_v25 = vld [vmem:[%s18595_s13] ss:$0 sm:$0xff] }
 0x660   : > { %v10915_v29 = vpop.f32.mrf.mxu0 }
 0x661   : > { %v6951_v10 = vpack.c.bf16 %v6911_v17, %v6910_v56  ;;  %v6913_v4 = vmul.f32 %v11440_v2, %v10915_v29  ;;  %v11031_v37 = vpop.f32.mrf.mxu1 }
 0x662   : > { %v6395_v55 = vpop.f32.mrf.mxu0 }
 0x663   : > { %v6912_v57 = vmul.f32 %v11442_v18, %v6395_v55  ;;  %11006 = vmatmul.mubr.msk.bf16.gmra.mxu0 %vm724_vm0, %v6951_v10  ;;  %v7307_v20 = vpop.f32.mrf.mxu1 }
 0x664   : > { %v10918_v31 = vpop.f32.mrf.mxu0 }
 0x665   : > { %v6952_v63 = vpack.c.bf16 %v6913_v4, %v6912_v57  ;;  %v6915_v60 = vmul.f32 %v11444_v24, %v10918_v31  ;;  %v17138_v27 = vpop.f32.mrf.mxu1  ;;  %v11555_v24 = vld [vmem:[%s11841_s5 + $0x18] sm:$0xff] }
 0x666   : > { %v6405_v22 = vpop.f32.mrf.mxu0 }
 0x667   : > { %v6914_v9 = vmul.f32 %v11446_v12, %v6405_v22  ;;  %11009 = vmatprep.mubr.msk.bf16.mxu0 %vm724_vm0, %v6952_v63  ;;  %v17140_v49 = vpop.f32.mrf.mxu1  ;;  %v11556_v22 = vld [vmem:[%s11841_s5] sm:$0xff] }
 0x668   : > { %v10921_v0 = vpop.f32.mrf.mxu0 }
 0x669   : > { %v6953_v21 = vpack.c.bf16 %v6915_v60, %v6914_v9  ;;  %v6917_v50 = vmul.f32 %v11448_v8, %v10921_v0  ;;  %v17142_v13 = vpop.f32.mrf.mxu1  ;;  %v11557_v9 = vld [vmem:[%s11841_s5 + $0x8] sm:$0xff] }
 0x66a   : > { %v6415_v43 = vpop.f32.mrf.mxu0 }
 0x66b   : > { %v6916_v54 = vmul.f32 %v11450_v40, %v6415_v43  ;;  %11010 = vmatmul.mubr.msk.bf16.gmra.mxu0 %vm724_vm0, %v6953_v21  ;;  %v17144_v47 = vpop.f32.mrf.mxu1  ;;  %v11558_v21 = vld [vmem:[%s11841_s5 + $0x10] sm:$0xff] }
 0x66c   : > { %v10924_v48 = vpop.f32.mrf.mxu0 }
 0x66d   : > { %v6954_v46 = vpack.c.bf16 %v6917_v50, %v6916_v54  ;;  %v6919_v38 = vmul.f32 %v11452_v32, %v10924_v48  ;;  %v17146_v39 = vpop.f32.mrf.mxu1 }
 0x66e   : > { %v6425_v59 = vpop.f32.mrf.mxu0 }
 0x66f   : > { %v6918_v61 = vmul.f32 %v11454_v42, %v6425_v59  ;;  %11013 = vmatprep.mubr.msk.bf16.mxu0 %vm724_vm0, %v6954_v46  ;;  %v17148_v11 = vpop.f32.mrf.mxu1 }
 0x671   : > { %v6955_v16 = vpack.c.bf16 %v6919_v38, %v6918_v61  ;;  %v17150_v26 = vpop.f32.mrf.mxu1 }
 0x673   : > { %11014 = vmatmul.mubr.msk.bf16.gmra.mxu0 %vm724_vm0, %v6955_v16  ;;  %v17158_v36 = vpop.f32.mrf.mxu1 }
 0x675   : > { %v17170_v10 = vpop.f32.mrf.mxu1 }
 0x677   : > { %v17183_v8 = vpop.f32.mrf.mxu1 }
 0x679   : > { %v17197_v16 = vpop.f32.mrf.mxu1 }
 0x6fb   : > { %v10987_v15 = vpop.f32.mrf.mxu0 }
 0x6fc   : > { %v7284_v51 = vadd.f32 %v11023_v45, %v10987_v15  ;;  %v11560_v15 = vld [vmem:[%s11841_s5 + $0x28] sm:$0xff] }
 0x6fd   : > { %v7054_v53 = vpop.f32.mrf.mxu0 }
 0x6fe   : > { %v7276_v7 = vadd.f32 %v7275_v23, %v7054_v53  ;;  %v7411_v5 = vmul.f32 %v17155_v33, %v7284_v51 }
 0x6ff   : > { %v10988_v30 = vpop.f32.mrf.mxu0 }
 0x700   : > { %v7409_v3 = vmul.f32 %v17155_v33, %v7276_v7  ;;  %v7287_v6 = vadd.f32 %v11024_v58, %v10988_v30  ;;  %v7450_v18 = vadd.f32 %v17164_v25, %v7411_v5  ;;  %v17212_v30 = vpop.f32.mrf.mxu1 }
 0x701   : > { %v7057_v34 = vpop.f32.mrf.mxu0 }
 0x702   : > { %v7412_v52 = vmul.f32 %v17155_v33, %v7287_v6  ;;  %v7279_v28 = vadd.f32 %v7278_v44, %v7057_v34  ;;  %v7448_v56 = vadd.f32 %v17164_v25, %v7409_v3  ;;  %v17186_v40 = vadd.f32 %v11558_v21, %v7450_v18  ;;  %v11561_v3 = vld [vmem:[%s11841_s5 + $0x20] sm:$0xff]  ;;  %v11562_v34 = vld [vmem:[%s11841_s5 + $0x30] sm:$0xff]  ;;  %v11564_v21 = vld [vmem:[%s11841_s5 + $0x58] sm:$0xff] }
 0x703   : > { %v10991_v17 = vpop.f32.mrf.mxu0 }
 0x704   : > { %v7451_v29 = vadd.f32 %v17164_v25, %v7412_v52  ;;  %v7410_v2 = vmul.f32 %v17155_v33, %v7279_v28  ;;  %v7300_v57 = vadd.f32 %v11027_v35, %v10991_v17  ;;  %v17178_v60 = vadd.f32 %v11556_v22, %v7448_v56  ;;  %v11563_v22 = vld [vmem:[%s11841_s5 + $0x40] sm:$0xff] }
 0x705   : > { %v7070_v55 = vpop.f32.mrf.mxu0 }
 0x706   : > { %v7449_v4 = vadd.f32 %v17164_v25, %v7410_v2  ;;  %v7292_v31 = vadd.f32 %v7291_v1, %v7070_v55  ;;  %v17175_v63 = vadd.f32 %v11555_v24, %v7451_v29  ;;  %20372 = vst [vmem:[#allocation114_spill] sm:$0xff] %v17178_v60  ;;  %v7415_v48 = vmul.f32 %v17155_v33, %v7300_v57  ;;  %v17230_v55 = vpop.f32.mrf.mxu1 }
 0x707   : > { %v10992_v12 = vpop.f32.mrf.mxu0 }
 0x708   : > { %20371 = vst [vmem:[#allocation90_spill] sm:$0xff] %v17175_v63  ;;  %v17181_v0 = vadd.f32 %v11557_v9, %v7449_v4  ;;  %v7413_v43 = vmul.f32 %v17155_v33, %v7292_v31  ;;  %v7303_v50 = vadd.f32 %v11028_v62, %v10992_v12  ;;  %v7513_v42 = vpack.c.bf16 %v17175_v63, %v17186_v40  ;;  %v11559_v62 = vld [vmem:[%s11841_s5 + $0x38] sm:$0xff] }
 0x709   : > { %v7073_v54 = vpop.f32.mrf.mxu0  ;;  %v7454_v23 = vadd.f32 %v17164_v25, %v7415_v48  ;;  %v17247_v48 = vpop.f32.mrf.mxu1 }
 0x70a   : > { %20373 = vst [vmem:[#allocation145_spill] sm:$0xff] %v17181_v0  ;;  %v7295_v32 = vadd.f32 %v7294_v19, %v7073_v54  ;;  %v7512_v46 = vpack.c.bf16 %v17181_v0, %v17178_v60  ;;  %v7416_v59 = vmul.f32 %v17155_v33, %v7303_v50  ;;  %v7452_v14 = vadd.f32 %v17164_v25, %v7413_v43  ;;  %v11565_v50 = vld [vmem:[%s11841_s5 + $0x48] sm:$0xff] }
 0x70b   : > { %v10995_v38 = vpop.f32.mrf.mxu0 }
 0x70c   : > { %v7414_v61 = vmul.f32 %v17155_v33, %v7295_v32  ;;  %11057 = vmatprep.mubr.msk.bf16.mxu0 %vm724_vm0, %v7512_v46  ;;  %v7455_v41 = vadd.f32 %v17164_v25, %v7416_v59  ;;  %v7316_v44 = vadd.f32 %v11031_v37, %v10995_v38  ;;  %v17215_v6 = vadd.f32 %v11561_v3, %v7452_v14 }
 0x70d   : > { %v7086_v45 = vpop.f32.mrf.mxu0  ;;  %11058 = vmatmul.mubr.msk.bf16.vlgmr.msra.gmra.mxu0 %vm724_vm0, %v7513_v42  ;;  %v17218_v37 = vadd.f32 %v11562_v34, %v7454_v23  ;;  %v17263_v23 = vpop.f32.mrf.mxu1 }
 0x70e   : > { %v7453_v58 = vadd.f32 %v17164_v25, %v7414_v61  ;;  %v7308_v35 = vadd.f32 %v7307_v20, %v7086_v45  ;;  %v17205_v19 = vadd.f32 %v11559_v62, %v7455_v41  ;;  %20376 = vst [vmem:[#allocation73_spill] sm:$0xff] %v17215_v6  ;;  %v7419_v20 = vmul.f32 %v17155_v33, %v7316_v44 }
 0x70f   : > { %v10996_v1 = vpop.f32.mrf.mxu0  ;;  %20377 = vst [vmem:[#allocation133_spill] sm:$0xff] %v17218_v37 }
 0x710   : > { %20374 = vst [vmem:[#allocation136_spill] sm:$0xff] %v17205_v19  ;;  %v17208_v51 = vadd.f32 %v11560_v15, %v7453_v58  ;;  %v7417_v53 = vmul.f32 %v17155_v33, %v7308_v35  ;;  %v7319_v7 = vadd.f32 %v17138_v27, %v10996_v1  ;;  %v7515_v56 = vpack.c.bf16 %v17205_v19, %v17218_v37 }
 0x711   : > { %v7089_v5 = vpop.f32.mrf.mxu0  ;;  %v7458_v4 = vadd.f32 %v17164_v25, %v7419_v20 }
 0x712   : > { %20375 = vst [vmem:[#allocation106_spill] sm:$0xff] %v17208_v51  ;;  %v7420_v52 = vmul.f32 %v17155_v33, %v7319_v7  ;;  %v7311_v28 = vadd.f32 %v17140_v49, %v7089_v5  ;;  %v7514_v27 = vpack.c.bf16 %v17208_v51, %v17215_v6  ;;  %v7456_v29 = vadd.f32 %v17164_v25, %v7417_v53  ;;  %v11567_v7 = vld [vmem:[%s11841_s5 + $0x78] sm:$0xff]  ;;  %v11568_v5 = vld [vmem:[%s11841_s5 + $0x68] sm:$0xff] }
 0x713   : > { %v10999_v17 = vpop.f32.mrf.mxu0 }
 0x714   : > { %v7459_v2 = vadd.f32 %v17164_v25, %v7420_v52  ;;  %v7418_v18 = vmul.f32 %v17155_v33, %v7311_v28  ;;  %11061 = vmatprep.mubr.msk.bf16.mxu0 %vm724_vm0, %v7514_v27  ;;  %v7332_v31 = vadd.f32 %v17142_v13, %v10999_v17  ;;  %v17239_v9 = vadd.f32 %v11563_v22, %v7456_v29  ;;  %v7371_v28 = vpop.f32.mrf.mxu1  ;;  %v11569_v17 = vld [vmem:[%s11841_s5 + $0x60] sm:$0xff] }
 0x715   : > { %v7102_v49 = vpop.f32.mrf.mxu0  ;;  %11062 = vmatmul.mubr.msk.bf16.gmra.mxu0 %vm724_vm0, %v7515_v56  ;;  %v11570_v56 = vld [vmem:[%s11841_s5 + $0x70] sm:$0xff] }
 0x716   : > { %v7457_v57 = vadd.f32 %v17164_v25, %v7418_v18  ;;  %v7324_v24 = vadd.f32 %v17144_v47, %v7102_v49  ;;  %20378 = vst [vmem:[#allocation15_spill] sm:$0xff] %v17239_v9  ;;  %v17242_v43 = vadd.f32 %v11564_v21, %v7459_v2  ;;  %v11566_v47 = vld [vmem:[%s11841_s5 + $0x50] sm:$0xff]  ;;  %v7423_v59 = vmul.f32 %v17155_v33, %v7332_v31 }
 0x717   : > { %v11000_v12 = vpop.f32.mrf.mxu0  ;;  %v17252_v42 = vadd.f32 %v11566_v47, %v7458_v4 }
 0x718   : > { %20379 = vst [vmem:[#allocation52_spill] sm:$0xff] %v17242_v43  ;;  %v17245_v54 = vadd.f32 %v11565_v50, %v7457_v57  ;;  %v7421_v32 = vmul.f32 %v17155_v33, %v7324_v24  ;;  %v7335_v13 = vadd.f32 %v17146_v39, %v11000_v12  ;;  %v7462_v35 = vadd.f32 %v17164_v25, %v7423_v59  ;;  %v11048_v12 = vpop.f32.mrf.mxu1  ;;  %v11572_v59 = vld [vmem:[%s11841_s5 + $0x98] sm:$0xff] }
 0x719   : > { %v7105_v46 = vpop.f32.mrf.mxu0  ;;  %20381 = vst [vmem:[#allocation42_spill] sm:$0xff] %v17252_v42  ;;  %v7517_v45 = vpack.c.bf16 %v17242_v43, %v17252_v42 }
 0x71a   : > { %20380 = vst [vmem:[#allocation146_spill] sm:$0xff] %v17245_v54  ;;  %v7327_v38 = vadd.f32 %v17148_v11, %v7105_v46  ;;  %v7516_v61 = vpack.c.bf16 %v17245_v54, %v17239_v9  ;;  %v7424_v14 = vmul.f32 %v17155_v33, %v7335_v13  ;;  %v7460_v58 = vadd.f32 %v17164_v25, %v7421_v32  ;;  %v11571_v46 = vld [vmem:[%s11841_s5 + $0x80] sm:$0xff] }
 0x71b   : > { %v11003_v41 = vpop.f32.mrf.mxu0 }
 0x71c   : > { %v7422_v39 = vmul.f32 %v17155_v33, %v7327_v38  ;;  %11065 = vmatprep.mubr.msk.bf16.mxu0 %vm724_vm0, %v7516_v61  ;;  %v7463_v11 = vadd.f32 %v17164_v25, %v7424_v14  ;;  %v7348_v62 = vadd.f32 %v17150_v26, %v11003_v41  ;;  %v17281_v27 = vadd.f32 %v11569_v17, %v7460_v58  ;;  %v11573_v61 = vld [vmem:[%s11841_s5 + $0x88] sm:$0xff]  ;;  %v7374_v41 = vpop.f32.mrf.mxu1  ;;  %v11574_v58 = vld [vmem:[%s11841_s5 + $0x90] sm:$0xff] }
 0x71d   : > { %v7118_v44 = vpop.f32.mrf.mxu0  ;;  %11066 = vmatmul.mubr.msk.bf16.gmra.mxu0 %vm724_vm0, %v7517_v45 }
 0x71e   : > { %v7461_v1 = vadd.f32 %v17164_v25, %v7422_v39  ;;  %v7340_v15 = vadd.f32 %v17158_v36, %v7118_v44  ;;  %v17273_v3 = vadd.f32 %v11567_v7, %v7463_v11  ;;  %20384 = vst [vmem:[#allocation144_spill] sm:$0xff] %v17281_v27  ;;  %v17284_v36 = vadd.f32 %v11570_v56, %v7462_v35 }
 0x71f   : > { %v11004_v53 = vpop.f32.mrf.mxu0  ;;  %v7427_v29 = vmul.f32 %v17155_v33, %v7348_v62 }
 0x720   : > { %20382 = vst [vmem:[#allocation143_spill] sm:$0xff] %v17273_v3  ;;  %v17276_v34 = vadd.f32 %v11568_v5, %v7461_v1  ;;  %v7425_v20 = vmul.f32 %v17155_v33, %v7340_v15  ;;  %v7351_v52 = vadd.f32 %v17170_v10, %v11004_v53  ;;  %20385 = vst [vmem:[#allocation93_spill] sm:$0xff] %v17284_v36  ;;  %v11051_v53 = vpop.f32.mrf.mxu1 }
 0x721   : > { %v7121_v26 = vpop.f32.mrf.mxu0  ;;  %v7519_v10 = vpack.c.bf16 %v17273_v3, %v17284_v36  ;;  %v7466_v22 = vadd.f32 %v17164_v25, %v7427_v29  ;;  %v11575_v29 = vld [vmem:[%s11841_s5 + $0xb8] sm:$0xff] }
 0x722   : > { %20383 = vst [vmem:[#allocation41_spill] sm:$0xff] %v17276_v34  ;;  %v7428_v2 = vmul.f32 %v17155_v33, %v7351_v52  ;;  %v7343_v18 = vadd.f32 %v17183_v8, %v7121_v26  ;;  %v7518_v4 = vpack.c.bf16 %v17276_v34, %v17281_v27  ;;  %v7464_v57 = vadd.f32 %v17164_v25, %v7425_v20 }
 0x723   : > { %v11007_v49 = vpop.f32.mrf.mxu0 }
 0x724   : > { %v7467_v31 = vadd.f32 %v17164_v25, %v7428_v2  ;;  %v7426_v24 = vmul.f32 %v17155_v33, %v7343_v18  ;;  %11069 = vmatprep.mubr.msk.bf16.mxu0 %vm724_vm0, %v7518_v4  ;;  %v7364_v50 = vadd.f32 %v17197_v16, %v11007_v49  ;;  %v17303_v47 = vadd.f32 %v11571_v46, %v7464_v57  ;;  %v11576_v18 = vld [vmem:[%s11841_s5 + $0xa8] sm:$0xff]  ;;  %v7387_v57 = vpop.f32.mrf.mxu1 }
 0x725   : > { %v7134_v8 = vpop.f32.mrf.mxu0  ;;  %11070 = vmatmul.mubr.msk.bf16.gmra.mxu0 %vm724_vm0, %v7519_v10 }
 0x726   : > { %v7465_v21 = vadd.f32 %v17164_v25, %v7426_v24  ;;  %v7356_v32 = vadd.f32 %v17212_v30, %v7134_v8  ;;  %20386 = vst [vmem:[#allocation96_spill] sm:$0xff] %v17303_v47  ;;  %v17306_v38 = vadd.f32 %v11572_v59, %v7467_v31  ;;  %v17314_v30 = vadd.f32 %v11574_v58, %v7466_v22  ;;  %v11577_v31 = vld [vmem:[%s11841_s5 + $0xa0] sm:$0xff]  ;;  %v11578_v22 = vld [vmem:[%s11841_s5 + $0xb0] sm:$0xff] }
 0x727   : > { %v11008_v13 = vpop.f32.mrf.mxu0  ;;  %v7431_v11 = vmul.f32 %v17155_v33, %v7364_v50 }
 0x728   : > { %20387 = vst [vmem:[#allocation40_spill] sm:$0xff] %v17306_v38  ;;  %v17309_v14 = vadd.f32 %v11573_v61, %v7465_v21  ;;  %v7429_v45 = vmul.f32 %v17155_v33, %v7356_v32  ;;  %v7367_v39 = vadd.f32 %v17230_v55, %v11008_v13  ;;  %20389 = vst [vmem:[#allocation97_spill] sm:$0xff] %v17314_v30 }
 0x729   : > { %v7137_v16 = vpop.f32.mrf.mxu0  ;;  %v7521_v15 = vpack.c.bf16 %v17306_v38, %v17314_v30  ;;  %v7470_v20 = vadd.f32 %v17164_v25, %v7431_v11 }
 0x72a   : > { %20388 = vst [vmem:[#allocation57_spill] sm:$0xff] %v17309_v14  ;;  %v7359_v44 = vadd.f32 %v17247_v48, %v7137_v16  ;;  %v7520_v35 = vpack.c.bf16 %v17309_v14, %v17303_v47  ;;  %v7432_v1 = vmul.f32 %v17155_v33, %v7367_v39  ;;  %v7468_v7 = vadd.f32 %v17164_v25, %v7429_v45  ;;  %v11052_v45 = vpop.f32.mrf.mxu1 }
 0x72b   : > { %v11011_v62 = vpop.f32.mrf.mxu0 }
 0x72c   : > { %v7430_v55 = vmul.f32 %v17155_v33, %v7359_v44  ;;  %11073 = vmatprep.mubr.msk.bf16.mxu0 %vm724_vm0, %v7520_v35  ;;  %v7471_v48 = vadd.f32 %v17164_v25, %v7432_v1  ;;  %v7380_v17 = vadd.f32 %v17263_v23, %v11011_v62  ;;  %v17339_v24 = vadd.f32 %v11577_v31, %v7468_v7  ;;  %v11579_v35 = vld [vmem:[%s11841_s5 + $0xc0] sm:$0xff]  ;;  %v11580_v62 = vld [vmem:[%s11841_s5 + $0xd8] sm:$0xff] }
 0x72d   : > { %v7150_v5 = vpop.f32.mrf.mxu0  ;;  %11074 = vmatmul.mubr.msk.bf16.gmra.mxu0 %vm724_vm0, %v7521_v15  ;;  %v17342_v23 = vadd.f32 %v11578_v22, %v7470_v20 }
 0x72e   : > { %v7469_v52 = vadd.f32 %v17164_v25, %v7430_v55  ;;  %v7372_v26 = vadd.f32 %v7371_v28, %v7150_v5  ;;  %v17332_v2 = vadd.f32 %v11575_v29, %v7471_v48  ;;  %20392 = vst [vmem:[#allocation117_spill] sm:$0xff] %v17339_v24  ;;  %v7435_v28 = vmul.f32 %v17155_v33, %v7380_v17  ;;  %v11581_v55 = vld [vmem:[%s11841_s5 + $0xc8] sm:$0xff]  ;;  %v7390_v5 = vpop.f32.mrf.mxu1 }
 0x72f   : > { %v11012_v56 = vpop.f32.mrf.mxu0  ;;  %20393 = vst [vmem:[#allocation118_spill] sm:$0xff] %v17342_v23 }
 0x730   : > { %20390 = vst [vmem:[#allocation79_spill] sm:$0xff] %v17332_v2  ;;  %v17335_v49 = vadd.f32 %v11576_v18, %v7469_v52  ;;  %v7433_v4 = vmul.f32 %v17155_v33, %v7372_v26  ;;  %v7383_v10 = vadd.f32 %v11048_v12, %v11012_v56  ;;  %v7523_v12 = vpack.c.bf16 %v17332_v2, %v17342_v23  ;;  %v17537_v23 = vld [vmem:[%s18598_s16 + $0x8] ss:$0 sm:$0xff] }
 0x731   : > { %v7153_v8 = vpop.f32.mrf.mxu0  ;;  %v7474_v39 = vadd.f32 %v17164_v25, %v7435_v28  ;;  %v11583_v28 = vld [vmem:[%s11841_s5 + $0xe0] sm:$0xff] }
 0x732   : > { %20391 = vst [vmem:[#allocation61_spill] sm:$0xff] %v17335_v49  ;;  %v7436_v21 = vmul.f32 %v17155_v33, %v7383_v10  ;;  %v7375_v50 = vadd.f32 %v7374_v41, %v7153_v8  ;;  %v7522_v13 = vpack.c.bf16 %v17335_v49, %v17339_v24  ;;  %v7472_v46 = vadd.f32 %v17164_v25, %v7433_v4 }
 0x733   : > { %v11015_v32 = vpop.f32.mrf.mxu0 }
 0x734   : > { %v7475_v59 = vadd.f32 %v17164_v25, %v7436_v21  ;;  %v7434_v61 = vmul.f32 %v17155_v33, %v7375_v50  ;;  %11077 = vmatprep.mubr.msk.bf16.mxu0 %vm724_vm0, %v7522_v13  ;;  %v7396_v58 = vadd.f32 %v11051_v53, %v11015_v32  ;;  %v17358_v1 = vadd.f32 %v11579_v35, %v7472_v46  ;;  %v11582_v53 = vld [vmem:[%s11841_s5 + $0xd0] sm:$0xff]  ;;  %v11584_v50 = vld [vmem:[%s11841_s5 + $0xf8] sm:$0xff]  ;;  %v11585_v13 = vld [vmem:[%s11841_s5 + $0xe8] sm:$0xff] }
 0x735   : > { %v7166_v41 = vpop.f32.mrf.mxu0  ;;  %11078 = vmatmul.mubr.msk.bf16.gmra.mxu0 %vm724_vm0, %v7523_v12  ;;  %v17368_v17 = vadd.f32 %v11582_v53, %v7474_v39  ;;  %v11322_v39 = vld [vmem:[%s18600_s18 + $0x20] sm:$0xff]  }
 0x736   : > { %v7473_v16 = vadd.f32 %v17164_v25, %v7434_v61  ;;  %v7388_v11 = vadd.f32 %v7387_v57, %v7166_v41  ;;  %20394 = vst [vmem:[#allocation35_spill] sm:$0xff] %v17358_v1  ;;  %v17361_v15 = vadd.f32 %v11580_v62, %v7475_v59  ;;  %v7439_v26 = vmul.f32 %v17155_v33, %v7396_v58  ;;  %v11319_v61 = vld [vmem:[%s18600_s18 + $0x38] sm:$0xff]   ;;  %v11321_v41 = vld [vmem:[%s18600_s18 + $0x28] sm:$0xff]   ;;  %v11324_v58 = vld [vmem:[%s18600_s18 + $0x10] sm:$0xff]  }
 0x737   : > { %v11016_v44 = vpop.f32.mrf.mxu0  ;;  %20397 = vst [vmem:[#allocation120_spill] sm:$0xff] %v17368_v17  ;;  %11089 = vmatprep.subr.bf16.mxu1 %v11319_v61  ;;  %v17428_v35 = vld [vmem:[%s18597_s15] ss:$0 sm:$0xff] }
 0x738   : > { %20395 = vst [vmem:[#allocation70_spill] sm:$0xff] %v17361_v15  ;;  %v17364_v7 = vadd.f32 %v11581_v55, %v7473_v16  ;;  %v7437_v48 = vmul.f32 %v17155_v33, %v7388_v11  ;;  %v7399_v20 = vadd.f32 %v11052_v45, %v11016_v44  ;;  %v7525_v4 = vpack.c.bf16 %v17361_v15, %v17368_v17  ;;  %v11320_v45 = vld [vmem:[%s18600_s18 + $0x30] sm:$0xff]   ;;  %v11323_v16 = vld [vmem:[%s18600_s18 + $0x18] sm:$0xff]   ;;  %v11325_v11 = vld [vmem:[%s18600_s18 + $0x8] sm:$0xff]  }
 0x739   : > { %v7169_v52 = vpop.f32.mrf.mxu0  ;;  %v7478_v8 = vadd.f32 %v17164_v25, %v7439_v26  ;;  %11090 = vmatpush3.bf16.msra.mxu1 %v11319_v61  ;;  %v11326_v44 = vld [vmem:[%s18600_s18] sm:$0xff]  }
 0x73a   : > { %20396 = vst [vmem:[#allocation119_spill] sm:$0xff] %v17364_v7  ;;  %v7391_v56 = vadd.f32 %v7390_v5, %v7169_v52  ;;  %v7524_v29 = vpack.c.bf16 %v17364_v7, %v17358_v1  ;;  %v7440_v18 = vmul.f32 %v17155_v33, %v7399_v20  ;;  %v7476_v10 = vadd.f32 %v17164_v25, %v7437_v48  ;;  %v17434_v48 = vld [vmem:[%s18598_s16] ss:$0 sm:$0xff]  ;;  %v8025_v5 = vld [vmem:[#allocation3 + $0x7] sm:$0xff]  ;;  %v8026_v20 = vld [vmem:[#allocation3 + $0xf] sm:$0xff] }
 0x73b   : > { %11091 = vmatprep.subr.bf16.mxu1 %v11320_v45 }
 0x73c   : > { %v7438_v57 = vmul.f32 %v17155_v33, %v7391_v56  ;;  %11081 = vmatprep.mubr.msk.bf16.mxu0 %vm724_vm0, %v7524_v29  ;;  %v7479_v31 = vadd.f32 %v17164_v25, %v7440_v18  ;;  %v17384_v21 = vadd.f32 %v11583_v28, %v7476_v10  ;;  %v11586_v33 = vld [vmem:[%s11841_s5 + $0xf0] sm:$0xff]  ;;  %v17440_v56 = vld [vmem:[%s18598_s16 + $0x1] ss:$0 sm:$0xff]  ;;  %v8064_v18 = vmul.f32 %v17434_v48, %v8025_v5  ;;  %s18375_s5 = scalar_lea.vmem [#allocation4], %s9623_s1  ;;  %s18531_s1 = scalar_lea.hbm %s20433_s23, %s10032_s30 }
 0x73d   : > { %11082 = vmatmul.mubr.msk.bf16.gmra.mxu0 %vm724_vm0, %v7525_v4  ;;  %v17393_v46 = vadd.f32 %v11586_v33, %v7478_v8  ;;  %11092 = vmatpush3.bf16.msra.mxu1 %v11320_v45  ;;  %v8065_v4 = vmul.f32 %v17434_v48, %v8026_v20  ;;  %v11587_v10 = vld [vmem:[#allocation3] sm:$0xff]  ;;  %v8232_v28 = vld [vmem:[#allocation3 + $0x9] sm:$0xff]  ;;  %s9557_s27 = sshll.u32 %s18375_s5, 4  ;;  %s11663_s30 = smov [#allocation4]   ;;  %s18533_s27 = int_to_ptr.vmem [resolvable:$true] %s9557_s27 }
 0x73e   : > { %v7477_v22 = vadd.f32 %v17164_v25, %v7438_v57  ;;  %20398 = vst [vmem:[#allocation121_spill] sm:$0xff] %v17384_v21  ;;  %v17387_v32 = vadd.f32 %v11584_v50, %v7479_v31  ;;  %11093 = vmatprep.subr.bf16.mxu1 %v11321_v41  ;;  %v8168_v57 = vmul.f32 %v11587_v10, %v17440_v56  ;;  %v8233_v50 = vld [vmem:[#allocation3 + $0x11] sm:$0xff]  ;;  %s11600_s4 = scalar_lea.vmem %s18533_s27, 4096  ;;  %s11604_s28 = sshll.u32 %s11663_s30, 4  ;;  %s11605_s28 = int_to_ptr.vmem [resolvable:$false] %s11604_s28 }
 0x73f   : > { %20401 = vst [vmem:[#allocation71_spill] sm:$0xff] %v17393_v46  ;;  %p11601_p11 = scmp.ne.s32.totalorder %s18533_s27, %s11600_s4  ;;  %s11606_s0 = scalar_lea.vmem %s11605_s28, 8192 }
 0x740   : > { %20399 = vst [vmem:[#allocation107_spill] sm:$0xff] %v17387_v32  ;;  %v17390_v12 = vadd.f32 %v11585_v13, %v7477_v22  ;;  %v7527_v25 = vpack.c.bf16 %v17387_v32, %v17393_v46  ;;  %v17449_v13 = vld [vmem:[%s18598_s16 + $0x2] ss:$0 sm:$0xff]  ;;  %p11607_p0 = scmp.lt.s32.totalorder %s18533_s27, %s11605_s28  ;;  %p11608_p1 = scmp.lt.s32.totalorder %s11606_s0, %s11600_s4 }
 0x741   : > { %11094 = vmatpush3.bf16.msra.mxu1 %v11321_v41  ;;  %v8200_v41 = vadd.f32 %v8168_v57, %v8064_v18  ;;  %p11602_p12 = pnand %p11601_p11, %p11814_p5 }
 0x742   : > { %20400 = vst [vmem:[#allocation127_spill] sm:$0xff] %v17390_v12  ;;  %v7526_v59 = vpack.c.bf16 %v17390_v12, %v17384_v21  ;;  %11095 = vmatprep.subr.bf16.mxu1 %v11322_v39  ;;  %p11609_p2 = por %p11608_p1, %p11607_p0 }
 0x743   : > { %p11603_p13 = pneg %p11602_p12 }
 0x744   : > { %11085 = vmatprep.mubr.msk.bf16.mxu0 %vm724_vm0, %v7526_v59 }
 0x745   : > { %11086 = vmatmul.mubr.msk.bf16.gmra.mxu0 %vm724_vm0, %v7527_v25  ;;  %11096 = vmatpush3.bf16.msra.mxu1 %v11322_v39  ;;  %v8201_v39 = vadd.f32 %v8168_v57, %v8065_v4  ;;  %p11610_p3 = pnand %p11609_p2, %p11603_p13 }
 0x746   : > { %11097 = vmatprep.subr.bf16.mxu1 %v11323_v16 }
 0x749   : > { %11098 = vmatpush3.bf16.msra.mxu1 %v11323_v16  ;;  %v8272_v16 = vmul.f32 %v17449_v13, %v8232_v28 }
 0x74a   : > { %11099 = vmatprep.subr.bf16.mxu1 %v11324_v58 }
 0x74b   : > { %v17466_v28 = vadd.f32 %v8272_v16, %v8200_v41 }
 0x74d   : > { %11100 = vmatpush3.bf16.msra.mxu1 %v11324_v58  ;;  %v8273_v58 = vmul.f32 %v17449_v13, %v8233_v50 }
 0x74e   : > { %11101 = vmatprep.subr.bf16.mxu1 %v11325_v11 }
 0x74f   : > { %v17468_v50 = vadd.f32 %v8273_v58, %v8201_v39 }
 0x751   : > { %11102 = vmatpush3.bf16.msra.mxu1 %v11325_v11 }
 0x752   : > { %11103 = vmatprep.subr.bf16.mxu1 %v11326_v44 }
 0x755   : > { %11104 = vmatpush3.bf16.msra.mxu1 %v11326_v44 }
 0x7cd   : > { %v11059_v62 = vpop.f32.mrf.mxu0 }
 0x7ce   : > { %v7642_v55 = vadd.f32 %v11059_v62, %v17428_v35 }
 0x7cf   : > { %v7633_v52 = vpop.f32.mrf.mxu0 }
 0x7d0   : > { %v7762_v53 = vadd.f32 3.0, %v7642_v55  ;;  %v7634_v26 = vadd.f32 %v17428_v35, %v7633_v52 }
 0x7d1   : > { %v11060_v29 = vpop.f32.mrf.mxu0 }
 0x7d2   : > { %v7794_v31 = vmax.f32 %v7762_v53, 0.0  ;;  %v7760_v8 = vadd.f32 3.0, %v7634_v26  ;;  %v7645_v22 = vadd.f32 %v11060_v29, %v17428_v35  ;;  %v17458_v53 = vld [vmem:[%s18598_s16 + $0x7] ss:$0 sm:$0xff] }
 0x7d3   : > { %v7636_v33 = vpop.f32.mrf.mxu0 }
 0x7d4   : > { %v7826_v59 = vmin.f32 %v7794_v31, 6.0  ;;  %v7792_v25 = vmax.f32 %v7760_v8, 0.0  ;;  %v7763_v61 = vadd.f32 3.0, %v7645_v22  ;;  %v7637_v45 = vadd.f32 %v17428_v35, %v7636_v33 }
 0x7d5   : > { %v11063_v20 = vpop.f32.mrf.mxu0 }
 0x7d6   : > { %v7858_v11 = vmul.f32 %v7826_v59, %v7642_v55  ;;  %v7824_v44 = vmin.f32 %v7792_v25, 6.0  ;;  %v7795_v62 = vmax.f32 %v7763_v61, 0.0  ;;  %v7761_v5 = vadd.f32 3.0, %v7637_v45  ;;  %v17463_v55 = vld [vmem:[%s18598_s16 + $0x4] ss:$0 sm:$0xff] }
 0x7d7   : > { %v7658_v52 = vadd.f32 %v11063_v20, %v17428_v35  ;;  %v7649_v57 = vpop.f32.mrf.mxu0 }
 0x7d8   : > { %v7890_v29 = vmul.f32 0.16666667, %v7858_v11  ;;  %v7856_v10 = vmul.f32 %v7824_v44, %v7634_v26  ;;  %v7827_v18 = vmin.f32 %v7795_v62, 6.0  ;;  %v7793_v4 = vmax.f32 %v7761_v5, 0.0 }
 0x7d9   : > { %v7766_v31 = vadd.f32 3.0, %v7658_v52  ;;  %v7650_v8 = vadd.f32 %v17428_v35, %v7649_v57  ;;  %v11064_v26 = vpop.f32.mrf.mxu0 }
 0x7da   : > { %7995 = vst [vmem:[#allocation3 + $0x48] sm:$0xff] %v7890_v29  ;;  %v7888_v33 = vmul.f32 0.16666667, %v7856_v10  ;;  %v7859_v59 = vmul.f32 %v7827_v18, %v7645_v22  ;;  %v7825_v25 = vmin.f32 %v7793_v4, 6.0  ;;  %v17471_v61 = vmul.f32 %v17458_v53, %v7890_v29 }
 0x7db   : > { %v7798_v11 = vmax.f32 %v7766_v31, 0.0  ;;  %v7764_v44 = vadd.f32 3.0, %v7650_v8  ;;  %v7661_v62 = vadd.f32 %v11064_v26, %v17428_v35  ;;  %v17475_v5 = vmul.f32 %v17463_v55, %v7890_v29  ;;  %v7652_v58 = vpop.f32.mrf.mxu0  ;;  %v17487_v26 = vld [vmem:[%s18598_s16 + $0x3] ss:$0 sm:$0xff] }
 0x7dc   : > { %7993 = vst [vmem:[#allocation3 + $0x28] sm:$0xff] %v7888_v33  ;;  %v17478_v41 = vmul.f32 %v17440_v56, %v7888_v33  ;;  %v7891_v39 = vmul.f32 0.16666667, %v7859_v59  ;;  %v7857_v16 = vmul.f32 %v7825_v25, %v7637_v45  ;;  %v17481_v22 = vmul.f32 %v17463_v55, %v7888_v33 }
 0x7dd   : > { %v7830_v20 = vmin.f32 %v7798_v11, 6.0  ;;  %v7796_v10 = vmax.f32 %v7764_v44, 0.0  ;;  %v7767_v18 = vadd.f32 3.0, %v7661_v62  ;;  %v7653_v4 = vadd.f32 %v17428_v35, %v7652_v58  ;;  %v11067_v31 = vpop.f32.mrf.mxu0 }
 0x7de   : > { %7996 = vst [vmem:[#allocation3 + $0x50] sm:$0xff] %v7891_v39  ;;  %v7889_v57 = vmul.f32 0.16666667, %v7857_v16  ;;  %v17490_v59 = vmul.f32 %v17458_v53, %v7891_v39  ;;  %v17493_v45 = vmul.f32 %v17463_v55, %v7891_v39  ;;  %v17496_v33 = vmul.f32 %v17440_v56, %v7890_v29  ;;  %v17501_v16 = vld [vmem:[%s18598_s16 + $0x6] ss:$0 sm:$0xff] }
 0x7df   : > { %v7862_v25 = vmul.f32 %v7830_v20, %v7658_v52  ;;  %v7828_v11 = vmin.f32 %v7796_v10, 6.0  ;;  %v7799_v44 = vmax.f32 %v7767_v18, 0.0  ;;  %v7765_v58 = vadd.f32 3.0, %v7653_v4  ;;  %v7665_v21 = vpop.f32.mrf.mxu0 }
 0x7e0   : > { %7994 = vst [vmem:[#allocation3 + $0x30] sm:$0xff] %v7889_v57  ;;  %v17504_v12 = vmul.f32 %v17440_v56, %v7889_v57  ;;  %v7674_v32 = vadd.f32 %v11067_v31, %v17428_v35  ;;  %v17508_v46 = vmul.f32 %v17463_v55, %v7889_v57  ;;  %v17511_v52 = vmul.f32 %v17440_v56, %v7891_v39 }
 0x7e1   : > { %v17513_v29 = vmul.f32 0.16666667, %v7862_v25  ;;  %v7860_v20 = vmul.f32 %v7828_v11, %v7650_v8  ;;  %v7831_v10 = vmin.f32 %v7799_v44, 6.0  ;;  %v7797_v18 = vmax.f32 %v7765_v58, 0.0  ;;  %v17515_v7 = vld [vmem:[#allocation3 + $0x47] sm:$0xff]  ;;  %v11068_v17 = vpop.f32.mrf.mxu0 }
 0x7e2   : > { %v7770_v15 = vadd.f32 3.0, %v7674_v32  ;;  %v7666_v1 = vadd.f32 %v17428_v35, %v7665_v21  ;;  %v17520_v31 = vmul.f32 %v17501_v16, %v17515_v7  ;;  %v17524_v57 = vmul.f32 %v17487_v26, %v17515_v7 }
 0x7e3   : > { %v8027_v39 = vld [vmem:[#allocation3 + $0x27] sm:$0xff]  ;;  %7999 = vst [vmem:[#allocation3 + $0x88] sm:$0xff] %v17513_v29  ;;  %v17527_v8 = vmul.f32 0.16666667, %v7860_v20  ;;  %v7863_v25 = vmul.f32 %v7831_v10, %v7661_v62  ;;  %v7829_v11 = vmin.f32 %v7797_v18, 6.0  ;;  %v7677_v44 = vadd.f32 %v11068_v17, %v17428_v35  ;;  %v7668_v2 = vpop.f32.mrf.mxu0 }
 0x7e4   : > { %v17531_v21 = vmul.f32 %v17434_v48, %v8027_v39  ;;  %v7802_v58 = vmax.f32 %v7770_v15, 0.0  ;;  %v7768_v49 = vadd.f32 3.0, %v7666_v1  ;;  %v8376_v24 = vmul.f32 %v17487_v26, %v8027_v39 }
 0x7e5   : > { %7997 = vst [vmem:[#allocation3 + $0x68] sm:$0xff] %v17527_v8  ;;  %v17540_v20 = vmul.f32 0.16666667, %v7863_v25  ;;  %v7861_v62 = vmul.f32 %v7829_v11, %v7653_v4  ;;  %v7771_v10 = vadd.f32 3.0, %v7677_v44  ;;  %v7669_v17 = vadd.f32 %v17428_v35, %v7668_v2  ;;  %v17543_v18 = vld [vmem:[#allocation3 + $0x4f] sm:$0xff]  ;;  %v11071_v39 = vpop.f32.mrf.mxu0 }
 0x7e6   : > { %v17545_v15 = vld [vmem:[#allocation3 + $0x49] sm:$0xff]  ;;  %v7834_v14 = vmin.f32 %v7802_v58, 6.0  ;;  %v7800_v38 = vmax.f32 %v7768_v49, 0.0  ;;  %v8408_v47 = vadd.f32 %v8376_v24, %v17466_v28  ;;  %v17550_v30 = vmul.f32 %v17501_v16, %v17543_v18 }
 0x7e7   : > { %v8028_v34 = vld [vmem:[#allocation3 + $0x2f] sm:$0xff]  ;;  %8000 = vst [vmem:[#allocation3 + $0x90] sm:$0xff] %v17540_v20  ;;  %v17553_v4 = vmul.f32 0.16666667, %v7861_v62  ;;  %v7803_v25 = vmax.f32 %v7771_v10, 0.0  ;;  %v7690_v2 = vadd.f32 %v11071_v39, %v17428_v35  ;;  %v17558_v11 = vmul.f32 %v17537_v23, %v17545_v15  ;;  %v7681_v3 = vpop.f32.mrf.mxu0 }
 0x7e8   : > { %v17561_v49 = vmul.f32 %v17434_v48, %v8028_v34  ;;  %v7866_v24 = vmul.f32 %v7834_v14, %v7674_v32  ;;  %v7832_v28 = vmin.f32 %v7800_v38, 6.0  ;;  %v7769_v58 = vadd.f32 3.0, %v7669_v17  ;;  %v17563_v27 = vld [vmem:[#allocation3 + $0x29] sm:$0xff]  ;;  %v17569_v14 = vld [vmem:[#allocation3 + $0x31] sm:$0xff] }
 0x7e9   : > { %7998 = vst [vmem:[#allocation3 + $0x70] sm:$0xff] %v17553_v4  ;;  %v7835_v62 = vmin.f32 %v7803_v25, 6.0  ;;  %v7774_v36 = vadd.f32 3.0, %v7690_v2  ;;  %v7682_v10 = vadd.f32 %v17428_v35, %v7681_v3  ;;  %v8377_v39 = vmul.f32 %v17487_v26, %v8028_v34  ;;  %v11072_v42 = vpop.f32.mrf.mxu0  ;;  %v17575_v25 = vld [vmem:[%s18598_s16 + $0x5] ss:$0 sm:$0xff] }
 0x7ea   : > { %v7898_v54 = vmul.f32 0.16666667, %v7866_v24  ;;  %v7864_v43 = vmul.f32 %v7832_v28, %v7666_v1  ;;  %v7801_v9 = vmax.f32 %v7769_v58, 0.0  ;;  %v8512_v51 = vadd.f32 %v17481_v22, %v8408_v47 }
 0x7eb   : > { %v7867_v38 = vmul.f32 %v7835_v62, %v7677_v44  ;;  %v7806_v32 = vmax.f32 %v7774_v36, 0.0  ;;  %v7772_v19 = vadd.f32 3.0, %v7682_v10  ;;  %v7693_v6 = vadd.f32 %v11072_v42, %v17428_v35  ;;  %v7684_v1 = vpop.f32.mrf.mxu0 }
 0x7ec   : > { %8003 = vst [vmem:[#allocation3 + $0xc8] sm:$0xff] %v7898_v54  ;;  %v17577_v3 = vmul.f32 0.16666667, %v7864_v43  ;;  %v7833_v34 = vmin.f32 %v7801_v9, 6.0  ;;  %v8409_v24 = vadd.f32 %v8377_v39, %v17468_v50  ;;  %v8584_v47 = vmul.f32 %v17575_v25, %v17563_v27 }
 0x7ed   : > { %v17582_v22 = vmul.f32 0.16666667, %v7867_v38  ;;  %v7838_v36 = vmin.f32 %v7806_v32, 6.0  ;;  %v7804_v44 = vmax.f32 %v7772_v19, 0.0  ;;  %v7775_v42 = vadd.f32 3.0, %v7693_v6  ;;  %v11075_v54 = vpop.f32.mrf.mxu0 }
 0x7ee   : > { %8001 = vst [vmem:[#allocation3 + $0xa8] sm:$0xff] %v17577_v3  ;;  %v7865_v28 = vmul.f32 %v7833_v34, %v7669_v17  ;;  %v7685_v58 = vadd.f32 %v17428_v35, %v7684_v1  ;;  %v8513_v43 = vadd.f32 %v17508_v46, %v8409_v24  ;;  %v8585_v9 = vmul.f32 %v17575_v25, %v17569_v14 }
 0x7ef   : > { %8004 = vst [vmem:[#allocation3 + $0xd0] sm:$0xff] %v17582_v22  ;;  %v7870_v50 = vmul.f32 %v7838_v36, %v7690_v2  ;;  %v7836_v62 = vmin.f32 %v7804_v44, 6.0  ;;  %v7807_v39 = vmax.f32 %v7775_v42, 0.0  ;;  %v7706_v38 = vadd.f32 %v11075_v54, %v17428_v35  ;;  %v7697_v37 = vpop.f32.mrf.mxu0 }
 0x7f0   : > { %v17591_v19 = vmul.f32 0.16666667, %v7865_v28  ;;  %v7773_v32 = vadd.f32 3.0, %v7685_v58  ;;  %v8616_v17 = vadd.f32 %v8584_v47, %v8512_v51  ;;  %v8617_v34 = vadd.f32 %v8585_v9, %v8513_v43  ;;  %v17598_v47 = vld [vmem:[#allocation3 + $0x51] sm:$0xff] }
 0x7f1   : > { %v7902_v1 = vmul.f32 0.16666667, %v7870_v50  ;;  %v7868_v0 = vmul.f32 %v7836_v62, %v7682_v10  ;;  %v7839_v63 = vmin.f32 %v7807_v39, 6.0  ;;  %v7778_v46 = vadd.f32 3.0, %v7706_v38  ;;  %v11076_v2 = vpop.f32.mrf.mxu0 }
 0x7f2   : > { %8002 = vst [vmem:[#allocation3 + $0xb0] sm:$0xff] %v17591_v19  ;;  %v7805_v24 = vmax.f32 %v7773_v32, 0.0  ;;  %v7698_v60 = vadd.f32 %v17428_v35, %v7697_v37  ;;  %v8721_v36 = vadd.f32 %v17520_v31, %v8616_v17  ;;  %v8722_v44 = vadd.f32 %v17550_v30, %v8617_v34 }
 0x7f3   : > { %8007 = vst [vmem:[#allocation3 + $0x108] sm:$0xff] %v7902_v1  ;;  %v7900_v42 = vmul.f32 0.16666667, %v7868_v0  ;;  %v7871_v28 = vmul.f32 %v7839_v63, %v7693_v6  ;;  %v7810_v54 = vmax.f32 %v7778_v46, 0.0  ;;  %v7709_v51 = vadd.f32 %v11076_v2, %v17428_v35  ;;  %v7700_v9 = vpop.f32.mrf.mxu0  ;;  %v17606_v63 = vld [vmem:[%s18599_s17] ss:$0 sm:$0xff] }
 0x7f4   : > { %v7837_v10 = vmin.f32 %v7805_v24, 6.0  ;;  %v7776_v43 = vadd.f32 3.0, %v7698_v60  ;;  %v8825_v50 = vadd.f32 %v17471_v61, %v8721_v36  ;;  %v8826_v37 = vadd.f32 %v17490_v59, %v8722_v44 }
 0x7f5   : > { %8005 = vst [vmem:[#allocation3 + $0xe8] sm:$0xff] %v7900_v42  ;;  %v7903_v62 = vmul.f32 0.16666667, %v7871_v28  ;;  %v7842_v31 = vmin.f32 %v7810_v54, 6.0  ;;  %v7779_v39 = vadd.f32 3.0, %v7709_v51  ;;  %v7701_v30 = vadd.f32 %v17428_v35, %v7700_v9  ;;  %v11079_v32 = vpop.f32.mrf.mxu0 }
 0x7f6   : > { %v7869_v0 = vmul.f32 %v7837_v10, %v7685_v58  ;;  %v7808_v6 = vmax.f32 %v7776_v43, 0.0  ;;  %v8898_v17 = vmul.f32 %v17537_v23, %v17598_v47  ;;  %v8929_v61 = vadd.f32 %v17558_v11, %v8825_v50 }
 0x7f7   : > { %8008 = vst [vmem:[#allocation3 + $0x110] sm:$0xff] %v7903_v62  ;;  %v7874_v59 = vmul.f32 %v7842_v31, %v7706_v38  ;;  %v7811_v34 = vmax.f32 %v7779_v39, 0.0  ;;  %v7777_v1 = vadd.f32 3.0, %v7701_v30  ;;  %v7722_v46 = vadd.f32 %v11079_v32, %v17428_v35  ;;  %v7713_v36 = vpop.f32.mrf.mxu0 }
 0x7f8   : > { %v7901_v24 = vmul.f32 0.16666667, %v7869_v0  ;;  %v7840_v2 = vmin.f32 %v7808_v6, 6.0  ;;  %v8930_v44 = vadd.f32 %v8898_v17, %v8826_v37  ;;  %v8968_v42 = vadd.f32 %v17606_v63, %v8929_v61 }
 0x7f9   : > { %v7906_v58 = vmul.f32 0.16666667, %v7874_v59  ;;  %v7843_v28 = vmin.f32 %v7811_v34, 6.0  ;;  %v7809_v54 = vmax.f32 %v7777_v1, 0.0  ;;  %v7782_v10 = vadd.f32 3.0, %v7722_v46  ;;  %v11080_v9 = vpop.f32.mrf.mxu0 }
 0x7fa   : > { %8006 = vst [vmem:[#allocation3 + $0xf0] sm:$0xff] %v7901_v24  ;;  %v7872_v43 = vmul.f32 %v7840_v2, %v7698_v60  ;;  %v7714_v11 = vadd.f32 %v17428_v35, %v7713_v36  ;;  %v8969_v38 = vadd.f32 %v17606_v63, %v8930_v44  ;;  %v9000_v50 = vadd.f32 3.0, %v8968_v42 }
 0x7fb   : > { %8011 = vst [vmem:[#allocation3 + $0x148] sm:$0xff] %v7906_v58  ;;  %v7875_v62 = vmul.f32 %v7843_v28, %v7709_v51  ;;  %v7841_v31 = vmin.f32 %v7809_v54, 6.0  ;;  %v7814_v39 = vmax.f32 %v7782_v10, 0.0  ;;  %v7725_v37 = vadd.f32 %v11080_v9, %v17428_v35  ;;  %v7716_v32 = vpop.f32.mrf.mxu0 }
 0x7fc   : > { %v7904_v0 = vmul.f32 0.16666667, %v7872_v43  ;;  %v7780_v6 = vadd.f32 3.0, %v7714_v11  ;;  %v9001_v17 = vadd.f32 3.0, %v8969_v38  ;;  %v9032_v61 = vmax.f32 %v9000_v50, 0.0 }
 0x7fd   : > { %v7907_v59 = vmul.f32 0.16666667, %v7875_v62  ;;  %v7873_v34 = vmul.f32 %v7841_v31, %v7701_v30  ;;  %v7846_v60 = vmin.f32 %v7814_v39, 6.0  ;;  %v7783_v1 = vadd.f32 3.0, %v7725_v37  ;;  %v11083_v36 = vpop.f32.mrf.mxu0 }
 0x7fe   : > { %8009 = vst [vmem:[#allocation3 + $0x128] sm:$0xff] %v7904_v0  ;;  %v7812_v24 = vmax.f32 %v7780_v6, 0.0  ;;  %v7717_v2 = vadd.f32 %v17428_v35, %v7716_v32  ;;  %v9033_v44 = vmax.f32 %v9001_v17, 0.0  ;;  %v9064_v51 = vmin.f32 %v9032_v61, 6.0 }
 0x7ff   : > { %8012 = vst [vmem:[#allocation3 + $0x150] sm:$0xff] %v7907_v59  ;;  %v7905_v58 = vmul.f32 0.16666667, %v7873_v34  ;;  %v7878_v28 = vmul.f32 %v7846_v60, %v7722_v46  ;;  %v7815_v54 = vmax.f32 %v7783_v1, 0.0  ;;  %v7738_v10 = vadd.f32 %v11083_v36, %v17428_v35  ;;  %v7729_v50 = vpop.f32.mrf.mxu0 }
 0x800   : > { %v7844_v43 = vmin.f32 %v7812_v24, 6.0  ;;  %v7781_v9 = vadd.f32 3.0, %v7717_v2  ;;  %v9065_v62 = vmin.f32 %v9033_v44, 6.0  ;;  %v9096_v30 = vmul.f32 %v9064_v51, %v8968_v42 }
 0x801   : > { %8010 = vst [vmem:[#allocation3 + $0x130] sm:$0xff] %v7905_v58  ;;  %v7910_v31 = vmul.f32 0.16666667, %v7878_v28  ;;  %v7847_v39 = vmin.f32 %v7815_v54, 6.0  ;;  %v7786_v0 = vadd.f32 3.0, %v7738_v10  ;;  %v7730_v6 = vadd.f32 %v17428_v35, %v7729_v50  ;;  %v11084_v61 = vpop.f32.mrf.mxu0 }
 0x802   : > { %v7876_v32 = vmul.f32 %v7844_v43, %v7714_v11  ;;  %v7813_v17 = vmax.f32 %v7781_v9, 0.0  ;;  %v9097_v59 = vmul.f32 %v9065_v62, %v8969_v38  ;;  %v9128_v34 = vmul.f32 0.16666667, %v9096_v30 }
 0x803   : > { %8015 = vst [vmem:[#allocation3 + $0x188] sm:$0xff] %v7910_v31  ;;  %v7879_v46 = vmul.f32 %v7847_v39, %v7725_v37  ;;  %v7818_v60 = vmax.f32 %v7786_v0, 0.0  ;;  %v7784_v1 = vadd.f32 3.0, %v7730_v6  ;;  %v7741_v24 = vadd.f32 %v11084_v61, %v17428_v35  ;;  %v7732_v42 = vpop.f32.mrf.mxu0 }
 0x804   : > { %v7908_v36 = vmul.f32 0.16666667, %v7876_v32  ;;  %v7845_v44 = vmin.f32 %v7813_v17, 6.0  ;;  %v9129_v51 = vmul.f32 0.16666667, %v9097_v59  ;;  %v8202_v58 = vadd.f32 %v17478_v41, %v17531_v21 }
 0x805   : > { %v7911_v28 = vmul.f32 0.16666667, %v7879_v46  ;;  %v7850_v54 = vmin.f32 %v7818_v60, 6.0  ;;  %v7816_v11 = vmax.f32 %v7784_v1, 0.0  ;;  %v7787_v43 = vadd.f32 3.0, %v7741_v24  ;;  %v11087_v50 = vpop.f32.mrf.mxu0 }
 0x806   : > { %8013 = vst [vmem:[#allocation3 + $0x168] sm:$0xff] %v7908_v36  ;;  %v7877_v38 = vmul.f32 %v7845_v44, %v7717_v2  ;;  %v7733_v9 = vadd.f32 %v17428_v35, %v7732_v42  ;;  %v9160_v37 = vpack.c.bf16 %v9129_v51, %v9128_v34  ;;  %v8203_v62 = vadd.f32 %v17504_v12, %v17561_v49  ;;  %v17633_v42 = vld [vmem:[#allocation3 + $0x67] sm:$0xff] }
 0x807   : > { %8016 = vst [vmem:[#allocation3 + $0x190] sm:$0xff] %v7911_v28  ;;  %v7882_v30 = vmul.f32 %v7850_v54, %v7738_v10  ;;  %v7848_v31 = vmin.f32 %v7816_v11, 6.0  ;;  %v7819_v39 = vmax.f32 %v7787_v43, 0.0  ;;  %v7754_v0 = vadd.f32 %v11087_v50, %v17428_v35  ;;  %v7745_v32 = vpop.f32.mrf.mxu0  ;;  %v17638_v11 = vld [vmem:[#allocation3 + $0x6f] sm:$0xff] }
 0x808   : > { %v7909_v41 = vmul.f32 0.16666667, %v7877_v38  ;;  %v7785_v21 = vadd.f32 3.0, %v7733_v9  ;;  %11105 = vmatprep.mubr.bf16.mxu1 %v9160_v37  ;;  %v8274_v2 = vmul.f32 %v17449_v13, %v17563_v27  ;;  %v8275_v17 = vmul.f32 %v17449_v13, %v17569_v14 }
 0x809   : > { %v7914_v61 = vmul.f32 0.16666667, %v7882_v30  ;;  %v7880_v59 = vmul.f32 %v7848_v31, %v7730_v6  ;;  %v7851_v34 = vmin.f32 %v7819_v39, 6.0  ;;  %v7790_v12 = vadd.f32 3.0, %v7754_v0  ;;  %v11088_v14 = vpop.f32.mrf.mxu0  ;;  %v17647_v31 = vld [vmem:[#allocation3 + $0x71] sm:$0xff] }
 0x80a   : > { %8014 = vst [vmem:[#allocation3 + $0x170] sm:$0xff] %v7909_v41  ;;  %v7817_v49 = vmax.f32 %v7785_v21, 0.0  ;;  %v7746_v10 = vadd.f32 %v17428_v35, %v7745_v32  ;;  %v8306_v46 = vadd.f32 %v8274_v2, %v8202_v58  ;;  %v8307_v60 = vadd.f32 %v8275_v17, %v8203_v62 }
 0x80b   : > { %8019 = vst [vmem:[#allocation3 + $0x1c8] sm:$0xff] %v7914_v61  ;;  %v7912_v1 = vmul.f32 0.16666667, %v7880_v59  ;;  %v7883_v36 = vmul.f32 %v7851_v34, %v7741_v24  ;;  %v7822_v44 = vmax.f32 %v7790_v12, 0.0  ;;  %v8379_v27 = vmul.f32 %v17487_v26, %v17543_v18  ;;  %v7748_v32 = vpop.f32.mrf.mxu0 }
 0x80c   : > { %v7849_v51 = vmin.f32 %v7817_v49, 6.0  ;;  %v7788_v6 = vadd.f32 3.0, %v7746_v10  ;;  %v8410_v28 = vadd.f32 %v17524_v57, %v8306_v46  ;;  %v8586_v54 = vmul.f32 %v17575_v25, %v17545_v15  ;;  %v17645_v57 = vld [vmem:[#allocation3 + $0x69] sm:$0xff] }
 0x80d   : > { %8017 = vst [vmem:[#allocation3 + $0x1a8] sm:$0xff] %v7912_v1  ;;  %v7915_v58 = vmul.f32 0.16666667, %v7883_v36  ;;  %v7854_v43 = vmin.f32 %v7822_v44, 6.0  ;;  %v8411_v24 = vadd.f32 %v8379_v27, %v8307_v60  ;;  %v8587_v38 = vmul.f32 %v17575_v25, %v17598_v47 }
 0x80e   : > { %v7881_v37 = vmul.f32 %v7849_v51, %v7733_v9  ;;  %v7820_v50 = vmax.f32 %v7788_v6, 0.0  ;;  %v8514_v62 = vadd.f32 %v17475_v5, %v8410_v28  ;;  %v8691_v30 = vmul.f32 %v17501_v16, %v17633_v42 }
 0x80f   : > { %8020 = vst [vmem:[#allocation3 + $0x1d0] sm:$0xff] %v7915_v58  ;;  %v7886_v39 = vmul.f32 %v7854_v43, %v7754_v0  ;;  %v8515_v41 = vadd.f32 %v17493_v45, %v8411_v24  ;;  %v8692_v21 = vmul.f32 %v17501_v16, %v17638_v11  ;;  %v8795_v9 = vmul.f32 %v17458_v53, %v17527_v8 }
 0x810   : > { %v7913_v2 = vmul.f32 0.16666667, %v7881_v37  ;;  %v7852_v5 = vmin.f32 %v7820_v50, 6.0  ;;  %v8618_v17 = vadd.f32 %v8586_v54, %v8514_v62  ;;  %v8796_v61 = vmul.f32 %v17458_v53, %v17553_v4 }
 0x811   : > { %v7918_v59 = vmul.f32 0.16666667, %v7886_v39  ;;  %v8619_v34 = vadd.f32 %v8587_v38, %v8515_v41  ;;  %v8899_v0 = vmul.f32 %v17537_v23, %v17645_v57  ;;  %v8900_v45 = vmul.f32 %v17537_v23, %v17647_v31 }
 0x812   : > { %8018 = vst [vmem:[#allocation3 + $0x1b0] sm:$0xff] %v7913_v2  ;;  %v7884_v12 = vmul.f32 %v7852_v5, %v7746_v10  ;;  %v8723_v49 = vadd.f32 %v8691_v30, %v8618_v17  ;;  %v7757_v46 = vadd.f32 %v11088_v14, %v17428_v35  ;;  %v7749_v60 = vadd.f32 %v17428_v35, %v7748_v32 }
 0x813   : > { %8023 = vst [vmem:[#allocation3 + $0x208] sm:$0xff] %v7918_v59  ;;  %v8724_v1 = vadd.f32 %v8692_v21, %v8619_v34  ;;  %v8068_v36 = vmul.f32 %v17434_v48, %v17515_v7  ;;  %v8069_v44 = vmul.f32 %v17434_v48, %v17543_v18  ;;  %v8276_v27 = vmul.f32 %v17449_v13, %v17545_v15 }
 0x814   : > { %v7916_v51 = vmul.f32 0.16666667, %v7884_v12  ;;  %v8827_v6 = vadd.f32 %v8795_v9, %v8723_v49  ;;  %v7791_v28 = vadd.f32 3.0, %v7757_v46  ;;  %v7789_v10 = vadd.f32 3.0, %v7749_v60  ;;  %v17682_v9 = vld [vmem:[#allocation3 + $0x87] sm:$0xff] }
 0x815   : > { %v8828_v54 = vadd.f32 %v8796_v61, %v8724_v1  ;;  %v8204_v14 = vadd.f32 %v17496_v33, %v8068_v36  ;;  %v8205_v35 = vadd.f32 %v17511_v52, %v8069_v44  ;;  %v8277_v58 = vmul.f32 %v17449_v13, %v17598_v47  ;;  %v17686_v61 = vld [vmem:[#allocation3 + $0x8f] sm:$0xff] }
 0x816   : > { %8021 = vst [vmem:[#allocation3 + $0x1e8] sm:$0xff] %v7916_v51  ;;  %v8931_v7 = vadd.f32 %v8899_v0, %v8827_v6  ;;  %v7823_v43 = vmax.f32 %v7791_v28, 0.0  ;;  %v7821_v24 = vmax.f32 %v7789_v10, 0.0  ;;  %v8380_v18 = vmul.f32 %v17487_v26, %v17633_v42  ;;  %v17690_v12 = vld [vmem:[#allocation3 + $0x89] sm:$0xff] }
 0x817   : > { %v8932_v15 = vadd.f32 %v8900_v45, %v8828_v54  ;;  %v8308_v38 = vadd.f32 %v8276_v27, %v8204_v14  ;;  %v8309_v37 = vadd.f32 %v8277_v58, %v8205_v35  ;;  %v8381_v50 = vmul.f32 %v17487_v26, %v17638_v11 }
 0x818   : > { %v8970_v33 = vadd.f32 %v17606_v63, %v8931_v7  ;;  %v7855_v62 = vmin.f32 %v7823_v43, 6.0  ;;  %v7853_v52 = vmin.f32 %v7821_v24, 6.0  ;;  %v8484_v47 = vmul.f32 %v17463_v55, %v17527_v8 }
 0x819   : > { %v8971_v30 = vadd.f32 %v17606_v63, %v8932_v15  ;;  %v8412_v39 = vadd.f32 %v8380_v18, %v8308_v38  ;;  %v8413_v41 = vadd.f32 %v8381_v50, %v8309_v37  ;;  %v8485_v21 = vmul.f32 %v17463_v55, %v17553_v4 }
 0x81a   : > { %v9002_v32 = vadd.f32 3.0, %v8970_v33  ;;  %v7887_v2 = vmul.f32 %v7855_v62, %v7757_v46  ;;  %v7885_v5 = vmul.f32 %v7853_v52, %v7749_v60  ;;  %v8588_v17 = vmul.f32 %v17575_v25, %v17645_v57  ;;  %v17694_v60 = vld [vmem:[#allocation3 + $0x91] sm:$0xff] }
 0x81b   : > { %v9003_v59 = vadd.f32 3.0, %v8971_v30  ;;  %v8516_v34 = vadd.f32 %v8484_v47, %v8412_v39  ;;  %v8517_v0 = vadd.f32 %v8485_v21, %v8413_v41  ;;  %v8589_v45 = vmul.f32 %v17575_v25, %v17647_v31 }
 0x81c   : > { %v9034_v49 = vmax.f32 %v9002_v32, 0.0  ;;  %v7919_v1 = vmul.f32 0.16666667, %v7887_v2  ;;  %v7917_v36 = vmul.f32 0.16666667, %v7885_v5  ;;  %v8693_v46 = vmul.f32 %v17501_v16, %v17682_v9  ;;  %v17724_v5 = vld [vmem:[#allocation3 + $0xa7] sm:$0xff] }
 0x81d   : > { %v9035_v44 = vmax.f32 %v9003_v59, 0.0  ;;  %v8620_v27 = vadd.f32 %v8588_v17, %v8516_v34  ;;  %v8621_v51 = vadd.f32 %v8589_v45, %v8517_v0  ;;  %v8694_v6 = vmul.f32 %v17501_v16, %v17686_v61  ;;  %v17728_v34 = vld [vmem:[#allocation3 + $0xaf] sm:$0xff] }
 0x81e   : > { %v9066_v28 = vmin.f32 %v9034_v49, 6.0  ;;  %8024 = vst [vmem:[#allocation3 + $0x210] sm:$0xff] %v7919_v1  ;;  %8022 = vst [vmem:[#allocation3 + $0x1f0] sm:$0xff] %v7917_v36  ;;  %v8797_v10 = vmul.f32 %v17458_v53, %v17513_v29  ;;  %v8798_v54 = vmul.f32 %v17458_v53, %v17540_v20  ;;  %v8901_v14 = vmul.f32 %v17537_v23, %v17690_v12  ;;  %v17736_v1 = vld [vmem:[#allocation3 + $0xa9] sm:$0xff] }
 0x81f   : > { %v9067_v35 = vmin.f32 %v9035_v44, 6.0  ;;  %v8725_v58 = vadd.f32 %v8693_v46, %v8620_v27  ;;  %v8726_v7 = vadd.f32 %v8694_v6, %v8621_v51  ;;  %v8902_v43 = vmul.f32 %v17537_v23, %v17694_v60  ;;  %v17740_v51 = vld [vmem:[#allocation3 + $0xb1] sm:$0xff] }
 0x820   : > { %v9098_v24 = vmul.f32 %v9066_v28, %v8970_v33  ;;  %v8070_v18 = vmul.f32 %v17434_v48, %v17633_v42  ;;  %v8071_v15 = vmul.f32 %v17434_v48, %v17638_v11  ;;  %v8174_v38 = vmul.f32 %v17440_v56, %v17527_v8 }
 0x821   : > { %v9099_v37 = vmul.f32 %v9067_v35, %v8971_v30  ;;  %v8829_v50 = vadd.f32 %v8797_v10, %v8725_v58  ;;  %v8830_v62 = vadd.f32 %v8798_v54, %v8726_v7  ;;  %v8175_v52 = vmul.f32 %v17440_v56, %v17553_v4 }
 0x822   : > { %v9130_v47 = vmul.f32 0.16666667, %v9098_v24  ;;  %v8206_v39 = vadd.f32 %v8174_v38, %v8070_v18  ;;  %v8278_v33 = vmul.f32 %v17449_v13, %v17645_v57  ;;  %v8279_v42 = vmul.f32 %v17449_v13, %v17647_v31 }
 0x823   : > { %v9131_v41 = vmul.f32 0.16666667, %v9099_v37  ;;  %v8933_v21 = vadd.f32 %v8901_v14, %v8829_v50  ;;  %v8934_v11 = vadd.f32 %v8902_v43, %v8830_v62  ;;  %v8207_v32 = vadd.f32 %v8175_v52, %v8071_v15  ;;  %v8136_v14 = vld [vmem:[#allocation3 + $0x88] sm:$0xff] }
 0x824   : > { %v8310_v2 = vadd.f32 %v8278_v33, %v8206_v39  ;;  %v8382_v8 = vmul.f32 %v17487_v26, %v17682_v9  ;;  %v8383_v30 = vmul.f32 %v17487_v26, %v17686_v61  ;;  %v8486_v4 = vmul.f32 %v17463_v55, %v17513_v29 }
 0x825   : > { %v9161_v57 = vpack.c.bf16 %v9131_v41, %v9130_v47  ;;  %v8972_v17 = vadd.f32 %v17606_v63, %v8933_v21  ;;  %v8973_v31 = vadd.f32 %v17606_v63, %v8934_v11  ;;  %v8311_v59 = vadd.f32 %v8279_v42, %v8207_v32 }
 0x826   : > { %v8414_v0 = vadd.f32 %v8382_v8, %v8310_v2  ;;  %v8487_v45 = vmul.f32 %v17463_v55, %v17540_v20  ;;  %v8590_v49 = vmul.f32 %v17575_v25, %v17690_v12  ;;  %v8591_v29 = vmul.f32 %v17575_v25, %v17694_v60 }
 0x827   : > { %11106 = vmatmul.mubr.bf16.vlgmr.msra.gmra.mxu1 %v9161_v57  ;;  %v9004_v36 = vadd.f32 3.0, %v8972_v17  ;;  %v9005_v46 = vadd.f32 3.0, %v8973_v31  ;;  %v8415_v44 = vadd.f32 %v8383_v30, %v8311_v59  ;;  %v8695_v27 = vmul.f32 %v17501_v16, %v17724_v5 }
 0x828   : > { %v8518_v6 = vadd.f32 %v8486_v4, %v8414_v0  ;;  %v8696_v28 = vmul.f32 %v17501_v16, %v17728_v34  ;;  %v8799_v10 = vmul.f32 %v17458_v53, %v17577_v3  ;;  %v8800_v54 = vmul.f32 %v17458_v53, %v17591_v19  ;;  %v17773_v0 = vld [vmem:[#allocation3 + $0xcf] sm:$0xff] }
 0x829   : > { %v9036_v35 = vmax.f32 %v9004_v36, 0.0  ;;  %v9037_v58 = vmax.f32 %v9005_v46, 0.0  ;;  %v8519_v7 = vadd.f32 %v8487_v45, %v8415_v44  ;;  %v8903_v43 = vmul.f32 %v17537_v23, %v17736_v1  ;;  %v17775_v45 = vld [vmem:[#allocation3 + $0xc8] sm:$0xff] }
 0x82a   : > { %v8622_v24 = vadd.f32 %v8590_v49, %v8518_v6  ;;  %v8904_v18 = vmul.f32 %v17537_v23, %v17740_v51  ;;  %v8072_v15 = vmul.f32 %v17434_v48, %v17682_v9  ;;  %v8073_v38 = vmul.f32 %v17434_v48, %v17686_v61  ;;  %v17779_v44 = vld [vmem:[#allocation3 + $0xc9] sm:$0xff] }
 0x82b   : > { %v9068_v37 = vmin.f32 %v9036_v35, 6.0  ;;  %v9069_v50 = vmin.f32 %v9037_v58, 6.0  ;;  %v8623_v62 = vadd.f32 %v8591_v29, %v8519_v7  ;;  %v8176_v52 = vmul.f32 %v17440_v56, %v8136_v14  ;;  %v8138_v58 = vld [vmem:[#allocation3 + $0xa8] sm:$0xff] }
 0x82c   : > { %v8727_v47 = vadd.f32 %v8695_v27, %v8622_v24  ;;  %v8177_v39 = vmul.f32 %v17440_v56, %v17540_v20  ;;  %v8280_v33 = vmul.f32 %v17449_v13, %v17690_v12  ;;  %v8281_v42 = vmul.f32 %v17449_v13, %v17694_v60  ;;  %v17767_v12 = vld [vmem:[#allocation3 + $0xc7] sm:$0xff] }
 0x82d   : > { %v9100_v41 = vmul.f32 %v9068_v37, %v8972_v17  ;;  %v9101_v9 = vmul.f32 %v9069_v50, %v8973_v31  ;;  %v8728_v21 = vadd.f32 %v8696_v28, %v8623_v62  ;;  %v8208_v11 = vadd.f32 %v8176_v52, %v8072_v15  ;;  %v17786_v28 = vld [vmem:[#allocation3 + $0xd1] sm:$0xff] }
 0x82e   : > { %v8831_v61 = vadd.f32 %v8799_v10, %v8727_v47  ;;  %v8209_v32 = vadd.f32 %v8177_v39, %v8073_v38  ;;  %v8384_v2 = vmul.f32 %v17487_v26, %v17724_v5  ;;  %v8385_v8 = vmul.f32 %v17487_v26, %v17728_v34  ;;  %v8139_v15 = vld [vmem:[#allocation3 + $0xb0] sm:$0xff] }
 0x82f   : > { %v9132_v30 = vmul.f32 0.16666667, %v9100_v41  ;;  %v9133_v20 = vmul.f32 0.16666667, %v9101_v9  ;;  %v8832_v4 = vadd.f32 %v8800_v54, %v8728_v21  ;;  %v8312_v57 = vadd.f32 %v8280_v33, %v8208_v11 }
 0x830   : > { %v8935_v59 = vadd.f32 %v8903_v43, %v8831_v61  ;;  %v8313_v60 = vadd.f32 %v8281_v42, %v8209_v32  ;;  %v8488_v17 = vmul.f32 %v17463_v55, %v17577_v3  ;;  %v8489_v31 = vmul.f32 %v17463_v55, %v17591_v19 }
 0x831   : > { %v9162_v49 = vpack.c.bf16 %v9133_v20, %v9132_v30  ;;  %v8936_v29 = vadd.f32 %v8904_v18, %v8832_v4  ;;  %v8416_v36 = vadd.f32 %v8384_v2, %v8312_v57  ;;  %v8592_v46 = vmul.f32 %v17575_v25, %v17736_v1 }
 0x832   : > { %v8974_v27 = vadd.f32 %v17606_v63, %v8935_v59  ;;  %v8417_v6 = vadd.f32 %v8385_v8, %v8313_v60  ;;  %v8593_v3 = vmul.f32 %v17575_v25, %v17740_v51  ;;  %v8697_v19 = vmul.f32 %v17501_v16, %v17767_v12 }
 0x833   : > { %11109 = vmatprep.mubr.bf16.mxu1 %v9162_v49  ;;  %v8975_v10 = vadd.f32 %v17606_v63, %v8936_v29  ;;  %v8520_v54 = vadd.f32 %v8488_v17, %v8416_v36  ;;  %v8698_v14 = vmul.f32 %v17501_v16, %v17773_v0  ;;  %v8801_v35 = vmul.f32 %v17458_v53, %v17775_v45  ;;  %v17818_v49 = vld [vmem:[#allocation3 + $0xef] sm:$0xff] }
 0x834   : > { %v9006_v7 = vadd.f32 3.0, %v8974_v27  ;;  %v8521_v43 = vadd.f32 %v8489_v31, %v8417_v6  ;;  %v8802_v24 = vmul.f32 %v17458_v53, %v17582_v22  ;;  %v8905_v18 = vmul.f32 %v17537_v23, %v17779_v44  ;;  %v17825_v6 = vld [vmem:[#allocation3 + $0xf0] sm:$0xff] }
 0x835   : > { %v9007_v38 = vadd.f32 3.0, %v8975_v10  ;;  %v8624_v37 = vadd.f32 %v8592_v46, %v8520_v54  ;;  %v8906_v50 = vmul.f32 %v17537_v23, %v17786_v28  ;;  %v8074_v62 = vmul.f32 %v17434_v48, %v17724_v5  ;;  %v17832_v54 = vld [vmem:[#allocation3 + $0xe9] sm:$0xff] }
 0x836   : > { %v9038_v52 = vmax.f32 %v9006_v7, 0.0  ;;  %v8625_v47 = vadd.f32 %v8593_v3, %v8521_v43  ;;  %v8075_v39 = vmul.f32 %v17434_v48, %v17728_v34  ;;  %v8178_v33 = vmul.f32 %v17440_v56, %v8138_v58  ;;  %v8451_v34 = vld [vmem:[#allocation3 + $0xd0] sm:$0xff] }
 0x837   : > { %v9039_v53 = vmax.f32 %v9007_v38, 0.0  ;;  %v8729_v22 = vadd.f32 %v8697_v19, %v8624_v37  ;;  %v8179_v42 = vmul.f32 %v17440_v56, %v8139_v15  ;;  %v8282_v41 = vmul.f32 %v17449_v13, %v17736_v1  ;;  %v17841_v15 = vld [vmem:[%s18598_s16 + $0x7] ss:$0 sm:$0xff] }
 0x838   : > { %v9070_v9 = vmin.f32 %v9038_v52, 6.0  ;;  %v8730_v21 = vadd.f32 %v8698_v14, %v8625_v47  ;;  %v8210_v11 = vadd.f32 %v8178_v33, %v8074_v62  ;;  %v8283_v5 = vmul.f32 %v17449_v13, %v17740_v51  ;;  %v17815_v13 = vld [vmem:[#allocation3 + $0xe7] sm:$0xff]  ;;  %v17834_v14 = vld [vmem:[#allocation3 + $0xf1] sm:$0xff]  ;;  %v17854_v33 = vld [vmem:[%s18598_s16] ss:$0 sm:$0xff] }
 0x839   : > { %v9071_v61 = vmin.f32 %v9039_v53, 6.0  ;;  %v8833_v32 = vadd.f32 %v8801_v35, %v8729_v22  ;;  %v8211_v2 = vadd.f32 %v8179_v42, %v8075_v39  ;;  %v8386_v48 = vmul.f32 %v17487_v26, %v17767_v12 }
 0x83a   : > { %v9102_v8 = vmul.f32 %v9070_v9, %v8974_v27  ;;  %v8834_v30 = vadd.f32 %v8802_v24, %v8730_v21  ;;  %v8314_v20 = vadd.f32 %v8282_v41, %v8210_v11  ;;  %v8387_v56 = vmul.f32 %v17487_v26, %v17773_v0  ;;  %v17823_v27 = vld [vmem:[#allocation3 + $0xe8] sm:$0xff]  ;;  %v17863_v9 = vld [vmem:[%s18598_s16 + $0x1] ss:$0 sm:$0xff] }
 0x83b   : > { %v9103_v1 = vmul.f32 %v9071_v61, %v8975_v10  ;;  %v8937_v4 = vadd.f32 %v8905_v18, %v8833_v32  ;;  %v8315_v57 = vadd.f32 %v8283_v5, %v8211_v2  ;;  %v8490_v59 = vmul.f32 %v17463_v55, %v17775_v45 }
 0x83c   : > { %v9134_v51 = vmul.f32 0.16666667, %v9102_v8  ;;  %v8938_v60 = vadd.f32 %v8906_v50, %v8834_v30  ;;  %v8418_v17 = vadd.f32 %v8386_v48, %v8314_v20  ;;  %v8491_v31 = vmul.f32 %v17463_v55, %v8451_v34 }
 0x83d   : > { %v9135_v29 = vmul.f32 0.16666667, %v9103_v1  ;;  %v8976_v36 = vadd.f32 %v17606_v63, %v8937_v4  ;;  %v8419_v46 = vadd.f32 %v8387_v56, %v8315_v57  ;;  %v8594_v26 = vmul.f32 %v17575_v25, %v17779_v44 }
 0x83e   : > { %v8977_v3 = vadd.f32 %v17606_v63, %v8938_v60  ;;  %v8522_v19 = vadd.f32 %v8490_v59, %v8418_v17  ;;  %v8595_v10 = vmul.f32 %v17575_v25, %v17786_v28  ;;  %v8699_v55 = vmul.f32 %v17501_v16, %v17815_v13  ;;  %v17886_v59 = vld [vmem:[#allocation3 + $0x107] sm:$0xff]  ;;  %v17892_v17 = vld [vmem:[%s18598_s16 + $0x4] ss:$0 sm:$0xff] }
 0x83f   : > { %v9163_v35 = vpack.c.bf16 %v9135_v29, %v9134_v51  ;;  %v9008_v58 = vadd.f32 3.0, %v8976_v36  ;;  %v8523_v7 = vadd.f32 %v8491_v31, %v8419_v46  ;;  %v8700_v43 = vmul.f32 %v17501_v16, %v17818_v49 }
 0x840   : > { %v9009_v24 = vadd.f32 3.0, %v8977_v3  ;;  %v8626_v18 = vadd.f32 %v8594_v26, %v8522_v19  ;;  %v8803_v38 = vmul.f32 %v17841_v15, %v17823_v27  ;;  %v8804_v37 = vmul.f32 %v17841_v15, %v17825_v6 }
 0x841   : > { %11110 = vmatmul.mubr.bf16.gmra.mxu1 %v9163_v35  ;;  %v9040_v50 = vmax.f32 %v9008_v58, 0.0  ;;  %v8627_v62 = vadd.f32 %v8595_v10, %v8523_v7  ;;  %v8907_v52 = vmul.f32 %v17537_v23, %v17832_v54  ;;  %v8908_v16 = vmul.f32 %v17537_v23, %v17834_v14  ;;  %v17903_v10 = vld [vmem:[#allocation3 + $0x108] sm:$0xff] }
 0x842   : > { %v9041_v47 = vmax.f32 %v9009_v24, 0.0  ;;  %v8731_v39 = vadd.f32 %v8699_v55, %v8626_v18  ;;  %v8076_v53 = vmul.f32 %v17854_v33, %v17767_v12  ;;  %v8077_v22 = vmul.f32 %v17854_v33, %v17773_v0  ;;  %v17871_v12 = vld [vmem:[%s18598_s16 + $0x2] ss:$0 sm:$0xff]  ;;  %v17905_v55 = vld [vmem:[#allocation3 + $0x110] sm:$0xff]  ;;  %v17914_v24 = vld [vmem:[%s18598_s16 + $0x6] ss:$0 sm:$0xff] }
 0x843   : > { %v9072_v42 = vmin.f32 %v9040_v50, 6.0  ;;  %v8732_v41 = vadd.f32 %v8700_v43, %v8627_v62  ;;  %v8180_v21 = vmul.f32 %v17863_v9, %v17775_v45  ;;  %v8181_v11 = vmul.f32 %v17863_v9, %v8451_v34  ;;  %v17880_v34 = vld [vmem:[%s18598_s16 + $0x3] ss:$0 sm:$0xff]  ;;  %v17907_v35 = vld [vmem:[#allocation3 + $0x109] sm:$0xff] }
 0x844   : > { %v9073_v5 = vmin.f32 %v9041_v47, 6.0  ;;  %v8835_v61 = vadd.f32 %v8803_v38, %v8731_v39  ;;  %v8284_v0 = vmul.f32 %v17871_v12, %v17779_v44  ;;  %v8285_v32 = vmul.f32 %v17871_v12, %v17786_v28  ;;  %v17918_v38 = vld [vmem:[#allocation3 + $0x111] sm:$0xff] }
 0x845   : > { %v9104_v2 = vmul.f32 %v9072_v42, %v8976_v36  ;;  %v8836_v48 = vadd.f32 %v8804_v37, %v8732_v41  ;;  %v8212_v8 = vadd.f32 %v8180_v21, %v8076_v53  ;;  %v8213_v30 = vadd.f32 %v8181_v11, %v8077_v22  ;;  %v17898_v36 = vld [vmem:[#allocation3 + $0x10f] sm:$0xff]  ;;  %v17931_v21 = vld [vmem:[%s18598_s16 + $0x8] ss:$0 sm:$0xff] }
 0x846   : > { %v9105_v45 = vmul.f32 %v9073_v5, %v8977_v3  ;;  %v8939_v20 = vadd.f32 %v8907_v52, %v8835_v61  ;;  %v8388_v56 = vmul.f32 %v17880_v34, %v17815_v13  ;;  %v8389_v44 = vmul.f32 %v17880_v34, %v17818_v49 }
 0x847   : > { %v9136_v1 = vmul.f32 0.16666667, %v9104_v2  ;;  %v8940_v4 = vadd.f32 %v8908_v16, %v8836_v48  ;;  %v8316_v28 = vadd.f32 %v8284_v0, %v8212_v8  ;;  %v8317_v57 = vadd.f32 %v8285_v32, %v8213_v30 }
 0x848   : > { %v9137_v51 = vmul.f32 0.16666667, %v9105_v45  ;;  %v8978_v60 = vadd.f32 %v17606_v63, %v8939_v20  ;;  %v8492_v31 = vmul.f32 %v17892_v17, %v17823_v27  ;;  %v8493_v29 = vmul.f32 %v17892_v17, %v17825_v6 }
 0x849   : > { %v8979_v46 = vadd.f32 %v17606_v63, %v8940_v4  ;;  %v8420_v26 = vadd.f32 %v8388_v56, %v8316_v28  ;;  %v8421_v3 = vadd.f32 %v8389_v44, %v8317_v57  ;;  %v8596_v19 = vmul.f32 %v17575_v25, %v17832_v54 }
 0x84a   : > { %v9164_v58 = vpack.c.bf16 %v9137_v51, %v9136_v1  ;;  %v9010_v7 = vadd.f32 3.0, %v8978_v60  ;;  %v8597_v43 = vmul.f32 %v17575_v25, %v17834_v14  ;;  %v8701_v18 = vmul.f32 %v17914_v24, %v17886_v59 }
 0x84b   : > { %v9011_v37 = vadd.f32 3.0, %v8979_v46  ;;  %v8524_v50 = vadd.f32 %v8492_v31, %v8420_v26  ;;  %v8525_v62 = vadd.f32 %v8493_v29, %v8421_v3  ;;  %v8702_v52 = vmul.f32 %v17914_v24, %v17898_v36  ;;  %v17953_v29 = vld [vmem:[#allocation3 + $0x12f] sm:$0xff] }
 0x84c   : > { %11113 = vmatprep.mubr.bf16.mxu1 %v9164_v58  ;;  %v9042_v16 = vmax.f32 %v9010_v7, 0.0  ;;  %v8805_v47 = vmul.f32 %v17841_v15, %v17903_v10  ;;  %v8806_v39 = vmul.f32 %v17841_v15, %v17905_v55  ;;  %v8909_v53 = vmul.f32 %v17537_v23, %v17907_v35 }
 0x84d   : > { %v9043_v22 = vmax.f32 %v9011_v37, 0.0  ;;  %v8628_v42 = vadd.f32 %v8596_v19, %v8524_v50  ;;  %v8629_v41 = vadd.f32 %v8597_v43, %v8525_v62  ;;  %v8910_v11 = vmul.f32 %v17931_v21, %v17918_v38  ;;  %v17961_v19 = vld [vmem:[#allocation3 + $0x128] sm:$0xff]  ;;  %v17965_v37 = vld [vmem:[#allocation3 + $0x130] sm:$0xff] }
 0x84e   : > { %v9074_v5 = vmin.f32 %v9042_v16, 6.0  ;;  %v8078_v61 = vmul.f32 %v17854_v33, %v17815_v13  ;;  %v8079_v0 = vmul.f32 %v17854_v33, %v17818_v49  ;;  %v8182_v23 = vmul.f32 %v17863_v9, %v17823_v27  ;;  %v17967_v50 = vld [vmem:[#allocation3 + $0x129] sm:$0xff]  ;;  %v17969_v62 = vld [vmem:[#allocation3 + $0x131] sm:$0xff]  ;;  %v17974_v16 = vld [vmem:[%s18598_s16 + $0x5] ss:$0 sm:$0xff] }
 0x84f   : > { %v9075_v32 = vmin.f32 %v9043_v22, 6.0  ;;  %v8733_v2 = vadd.f32 %v8701_v18, %v8628_v42  ;;  %v8734_v48 = vadd.f32 %v8702_v52, %v8629_v41  ;;  %v8183_v8 = vmul.f32 %v17863_v9, %v17825_v6 }
 0x850   : > { %v9106_v30 = vmul.f32 %v9074_v5, %v8978_v60  ;;  %v8214_v45 = vadd.f32 %v8182_v23, %v8078_v61  ;;  %v8286_v20 = vmul.f32 %v17871_v12, %v17832_v54  ;;  %v8287_v13 = vmul.f32 %v17871_v12, %v17834_v14  ;;  %v17951_v54 = vld [vmem:[#allocation3 + $0x127] sm:$0xff] }
 0x851   : > { %v9107_v56 = vmul.f32 %v9075_v32, %v8979_v46  ;;  %v8837_v44 = vadd.f32 %v8805_v47, %v8733_v2  ;;  %v8838_v49 = vadd.f32 %v8806_v39, %v8734_v48  ;;  %v8215_v1 = vadd.f32 %v8183_v8, %v8079_v0 }
 0x852   : > { %v9138_v4 = vmul.f32 0.16666667, %v9106_v30  ;;  %v8318_v27 = vadd.f32 %v8286_v20, %v8214_v45  ;;  %v8390_v28 = vmul.f32 %v17880_v34, %v17886_v59  ;;  %v8391_v6 = vmul.f32 %v17880_v34, %v17898_v36 }
 0x853   : > { %v9139_v57 = vmul.f32 0.16666667, %v9107_v56  ;;  %v8941_v51 = vadd.f32 %v8909_v53, %v8837_v44  ;;  %v8942_v60 = vadd.f32 %v8910_v11, %v8838_v49  ;;  %v8319_v31 = vadd.f32 %v8287_v13, %v8215_v1 }
 0x854   : > { %v8422_v14 = vadd.f32 %v8390_v28, %v8318_v27  ;;  %v8494_v46 = vmul.f32 %v17892_v17, %v17903_v10  ;;  %v8495_v26 = vmul.f32 %v17892_v17, %v17905_v55  ;;  %v8598_v3 = vmul.f32 %v17575_v25, %v17907_v35 }
 0x855   : > { %v9165_v58 = vpack.c.bf16 %v9139_v57, %v9138_v4  ;;  %v8980_v7 = vadd.f32 %v17606_v63, %v8941_v51  ;;  %v8981_v43 = vadd.f32 %v17606_v63, %v8942_v60  ;;  %v8423_v18 = vadd.f32 %v8391_v6, %v8319_v31 }
 0x856   : > { %v8526_v52 = vadd.f32 %v8494_v46, %v8422_v14  ;;  %v8599_v25 = vmul.f32 %v17974_v16, %v17918_v38  ;;  %v8703_v47 = vmul.f32 %v17914_v24, %v17951_v54  ;;  %v8704_v39 = vmul.f32 %v17914_v24, %v17953_v29 }
 0x857   : > { %11114 = vmatmul.mubr.bf16.gmra.mxu1 %v9165_v58  ;;  %v9012_v53 = vadd.f32 3.0, %v8980_v7  ;;  %v9013_v22 = vadd.f32 3.0, %v8981_v43  ;;  %v8527_v42 = vadd.f32 %v8495_v26, %v8423_v18  ;;  %v8807_v41 = vmul.f32 %v17841_v15, %v17961_v19  ;;  %v18008_v26 = vld [vmem:[#allocation3 + $0x147] sm:$0xff] }
 0x858   : > { %v8630_v11 = vadd.f32 %v8598_v3, %v8526_v52  ;;  %v8808_v5 = vmul.f32 %v17841_v15, %v17965_v37  ;;  %v8911_v61 = vmul.f32 %v17931_v21, %v17967_v50  ;;  %v8912_v0 = vmul.f32 %v17931_v21, %v17969_v62  ;;  %v18015_v18 = vld [vmem:[#allocation3 + $0x148] sm:$0xff]  ;;  %v18017_v52 = vld [vmem:[#allocation3 + $0x150] sm:$0xff] }
 0x859   : > { %v9044_v23 = vmax.f32 %v9012_v53, 0.0  ;;  %v9045_v32 = vmax.f32 %v9013_v22, 0.0  ;;  %v8631_v2 = vadd.f32 %v8599_v25, %v8527_v42  ;;  %v8080_v48 = vmul.f32 %v17854_v33, %v17886_v59  ;;  %v18024_v22 = vld [vmem:[#allocation3 + $0x149] sm:$0xff] }
 0x85a   : > { %v8735_v8 = vadd.f32 %v8703_v47, %v8630_v11  ;;  %v8081_v30 = vmul.f32 %v17854_v33, %v17898_v36  ;;  %v8184_v45 = vmul.f32 %v17863_v9, %v17903_v10  ;;  %v8185_v20 = vmul.f32 %v17863_v9, %v17905_v55 }
 0x85b   : > { %v9076_v13 = vmin.f32 %v9044_v23, 6.0  ;;  %v9077_v56 = vmin.f32 %v9045_v32, 6.0  ;;  %v8736_v44 = vadd.f32 %v8704_v39, %v8631_v2  ;;  %v8288_v49 = vmul.f32 %v17871_v12, %v17907_v35 }
 0x85c   : > { %v8839_v1 = vadd.f32 %v8807_v41, %v8735_v8  ;;  %v8216_v4 = vadd.f32 %v8184_v45, %v8080_v48  ;;  %v8217_v27 = vadd.f32 %v8185_v20, %v8081_v30  ;;  %v8289_v59 = vmul.f32 %v17871_v12, %v17918_v38 }
 0x85d   : > { %v9108_v28 = vmul.f32 %v9076_v13, %v8980_v7  ;;  %v9109_v36 = vmul.f32 %v9077_v56, %v8981_v43  ;;  %v8840_v6 = vadd.f32 %v8808_v5, %v8736_v44  ;;  %v8392_v10 = vmul.f32 %v17880_v34, %v17951_v54  ;;  %v18013_v43 = vld [vmem:[#allocation3 + $0x14f] sm:$0xff] }
 0x85e   : > { %v8943_v57 = vadd.f32 %v8911_v61, %v8839_v1  ;;  %v8320_v55 = vadd.f32 %v8288_v49, %v8216_v4  ;;  %v8321_v51 = vadd.f32 %v8289_v59, %v8217_v27  ;;  %v8393_v60 = vmul.f32 %v17880_v34, %v17953_v29  ;;  %v18028_v61 = vld [vmem:[#allocation3 + $0x151] sm:$0xff] }
 0x85f   : > { %v9140_v31 = vmul.f32 0.16666667, %v9108_v28  ;;  %v9141_v35 = vmul.f32 0.16666667, %v9109_v36  ;;  %v8944_v14 = vadd.f32 %v8912_v0, %v8840_v6  ;;  %v8496_v46 = vmul.f32 %v17892_v17, %v17961_v19 }
 0x860   : > { %v8982_v38 = vadd.f32 %v17606_v63, %v8943_v57  ;;  %v8424_v3 = vadd.f32 %v8392_v10, %v8320_v55  ;;  %v8425_v58 = vadd.f32 %v8393_v60, %v8321_v51  ;;  %v8497_v7 = vmul.f32 %v17892_v17, %v17965_v37 }
 0x861   : > { %v9166_v25 = vpack.c.bf16 %v9141_v35, %v9140_v31  ;;  %v8983_v47 = vadd.f32 %v17606_v63, %v8944_v14  ;;  %v8600_v39 = vmul.f32 %v17974_v16, %v17967_v50  ;;  %v8601_v53 = vmul.f32 %v17974_v16, %v17969_v62 }
 0x862   : > { %v9014_v42 = vadd.f32 3.0, %v8982_v38  ;;  %v8528_v41 = vadd.f32 %v8496_v46, %v8424_v3  ;;  %v8529_v11 = vadd.f32 %v8497_v7, %v8425_v58  ;;  %v8705_v5 = vmul.f32 %v17914_v24, %v18008_v26  ;;  %v18062_v3 = vld [vmem:[#allocation3 + $0x16f] sm:$0xff]  ;;  %v18067_v58 = vld [vmem:[%s18599_s17] ss:$0 sm:$0xff] }
 0x863   : > { %11117 = vmatprep.mubr.bf16.mxu1 %v9166_v25  ;;  %v9015_v0 = vadd.f32 3.0, %v8983_v47  ;;  %v8706_v63 = vmul.f32 %v17914_v24, %v18013_v43  ;;  %v8809_v23 = vmul.f32 %v17841_v15, %v18015_v18  ;;  %v8810_v32 = vmul.f32 %v17841_v15, %v18017_v52 }
 0x864   : > { %v9046_v2 = vmax.f32 %v9014_v42, 0.0  ;;  %v8632_v48 = vadd.f32 %v8600_v39, %v8528_v41  ;;  %v8633_v8 = vadd.f32 %v8601_v53, %v8529_v11  ;;  %v8913_v30 = vmul.f32 %v17931_v21, %v18024_v22  ;;  %v18073_v53 = vld [vmem:[#allocation3 + $0x168] sm:$0xff]  ;;  %v18075_v42 = vld [vmem:[#allocation3 + $0x170] sm:$0xff] }
 0x865   : > { %v9047_v45 = vmax.f32 %v9015_v0, 0.0  ;;  %v8914_v20 = vmul.f32 %v17931_v21, %v18028_v61  ;;  %v8082_v13 = vmul.f32 %v17854_v33, %v17951_v54  ;;  %v8083_v56 = vmul.f32 %v17854_v33, %v17953_v29  ;;  %v18077_v41 = vld [vmem:[#allocation3 + $0x169] sm:$0xff] }
 0x866   : > { %v9078_v44 = vmin.f32 %v9046_v2, 6.0  ;;  %v8737_v49 = vadd.f32 %v8705_v5, %v8632_v48  ;;  %v8738_v1 = vadd.f32 %v8706_v63, %v8633_v8  ;;  %v8186_v4 = vmul.f32 %v17863_v9, %v17961_v19 }
 0x867   : > { %v9079_v27 = vmin.f32 %v9047_v45, 6.0  ;;  %v8187_v59 = vmul.f32 %v17863_v9, %v17965_v37  ;;  %v8290_v28 = vmul.f32 %v17871_v12, %v17967_v50  ;;  %v8291_v36 = vmul.f32 %v17871_v12, %v17969_v62  ;;  %v18056_v50 = vld [vmem:[#allocation3 + $0x167] sm:$0xff] }
 0x868   : > { %v9110_v54 = vmul.f32 %v9078_v44, %v8982_v38  ;;  %v8841_v6 = vadd.f32 %v8809_v23, %v8737_v49  ;;  %v8842_v10 = vadd.f32 %v8810_v32, %v8738_v1  ;;  %v8218_v29 = vadd.f32 %v8186_v4, %v8082_v13  ;;  %v18083_v23 = vld [vmem:[#allocation3 + $0x171] sm:$0xff] }
 0x869   : > { %v9111_v57 = vmul.f32 %v9079_v27, %v8983_v47  ;;  %v8219_v55 = vadd.f32 %v8187_v59, %v8083_v56  ;;  %v8394_v51 = vmul.f32 %v17880_v34, %v18008_v26  ;;  %v8395_v19 = vmul.f32 %v17880_v34, %v18013_v43 }
 0x86a   : > { %v9142_v60 = vmul.f32 0.16666667, %v9110_v54  ;;  %v8945_v37 = vadd.f32 %v8913_v30, %v8841_v6  ;;  %v8946_v31 = vadd.f32 %v8914_v20, %v8842_v10  ;;  %v8322_v35 = vadd.f32 %v8290_v28, %v8218_v29 }
 0x86b   : > { %v9143_v14 = vmul.f32 0.16666667, %v9111_v57  ;;  %v8323_v62 = vadd.f32 %v8291_v36, %v8219_v55  ;;  %v8498_v46 = vmul.f32 %v17892_v17, %v18015_v18  ;;  %v8499_v38 = vmul.f32 %v17892_v17, %v18017_v52 }
 0x86c   : > { %v8984_v7 = vadd.f32 %v18067_v58, %v8945_v37  ;;  %v8985_v25 = vadd.f32 %v18067_v58, %v8946_v31  ;;  %v8426_v47 = vadd.f32 %v8394_v51, %v8322_v35  ;;  %v8602_v39 = vmul.f32 %v17974_v16, %v18024_v22 }
 0x86d   : > { %v9167_v11 = vpack.c.bf16 %v9143_v14, %v9142_v60  ;;  %v8427_v5 = vadd.f32 %v8395_v19, %v8323_v62  ;;  %v8603_v0 = vmul.f32 %v17974_v16, %v18028_v61  ;;  %v8707_v63 = vmul.f32 %v17914_v24, %v18056_v50 }
 0x86e   : > { %v9016_v32 = vadd.f32 3.0, %v8984_v7  ;;  %v9017_v2 = vadd.f32 3.0, %v8985_v25  ;;  %v8530_v48 = vadd.f32 %v8498_v46, %v8426_v47  ;;  %v8708_v8 = vmul.f32 %v17914_v24, %v18062_v3  ;;  %v18117_v47 = vld [vmem:[#allocation3 + $0x18f] sm:$0xff] }
 0x86f   : > { %11118 = vmatmul.mubr.bf16.gmra.mxu1 %v9167_v11  ;;  %v8531_v30 = vadd.f32 %v8499_v38, %v8427_v5  ;;  %v8811_v45 = vmul.f32 %v17841_v15, %v18073_v53  ;;  %v8812_v20 = vmul.f32 %v17841_v15, %v18075_v42  ;;  %v8915_v13 = vmul.f32 %v17931_v21, %v18077_v41 }
 0x870   : > { %v9048_v56 = vmax.f32 %v9016_v32, 0.0  ;;  %v9049_v44 = vmax.f32 %v9017_v2, 0.0  ;;  %v8634_v49 = vadd.f32 %v8602_v39, %v8530_v48  ;;  %v8916_v1 = vmul.f32 %v17931_v21, %v18083_v23  ;;  %v18119_v39 = vld [vmem:[#allocation3 + $0x188] sm:$0xff]  ;;  %v18124_v32 = vld [vmem:[#allocation3 + $0x190] sm:$0xff] }
 0x871   : > { %v8635_v4 = vadd.f32 %v8603_v0, %v8531_v30  ;;  %v8084_v27 = vmul.f32 %v17854_v33, %v18008_v26  ;;  %v8085_v59 = vmul.f32 %v17854_v33, %v18013_v43  ;;  %v8188_v28 = vmul.f32 %v17863_v9, %v18015_v18  ;;  %v18126_v2 = vld [vmem:[#allocation3 + $0x189] sm:$0xff] }
 0x872   : > { %v9080_v36 = vmin.f32 %v9048_v56, 6.0  ;;  %v9081_v54 = vmin.f32 %v9049_v44, 6.0  ;;  %v8739_v6 = vadd.f32 %v8707_v63, %v8634_v49  ;;  %v8189_v10 = vmul.f32 %v17863_v9, %v18017_v52 }
 0x873   : > { %v8740_v29 = vadd.f32 %v8708_v8, %v8635_v4  ;;  %v8220_v57 = vadd.f32 %v8188_v28, %v8084_v27  ;;  %v8292_v55 = vmul.f32 %v17871_v12, %v18024_v22  ;;  %v8293_v26 = vmul.f32 %v17871_v12, %v18028_v61  ;;  %v18111_v22 = vld [vmem:[#allocation3 + $0x187] sm:$0xff] }
 0x874   : > { %v9112_v51 = vmul.f32 %v9080_v36, %v8984_v7  ;;  %v9113_v19 = vmul.f32 %v9081_v54, %v8985_v25  ;;  %v8843_v43 = vadd.f32 %v8811_v45, %v8739_v6  ;;  %v8221_v60 = vadd.f32 %v8189_v10, %v8085_v59 }
 0x875   : > { %v8844_v37 = vadd.f32 %v8812_v20, %v8740_v29  ;;  %v8324_v18 = vadd.f32 %v8292_v55, %v8220_v57  ;;  %v8396_v31 = vmul.f32 %v17880_v34, %v18056_v50  ;;  %v8397_v52 = vmul.f32 %v17880_v34, %v18062_v3  ;;  %v18133_v20 = vld [vmem:[#allocation3 + $0x191] sm:$0xff] }
 0x876   : > { %v9144_v35 = vmul.f32 0.16666667, %v9112_v51  ;;  %v9145_v14 = vmul.f32 0.16666667, %v9113_v19  ;;  %v8947_v62 = vadd.f32 %v8915_v13, %v8843_v43  ;;  %v8325_v46 = vadd.f32 %v8293_v26, %v8221_v60 }
 0x877   : > { %v8948_v38 = vadd.f32 %v8916_v1, %v8844_v37  ;;  %v8428_v61 = vadd.f32 %v8396_v31, %v8324_v18  ;;  %v8500_v7 = vmul.f32 %v17892_v17, %v18073_v53  ;;  %v8501_v25 = vmul.f32 %v17892_v17, %v18075_v42 }
 0x878   : > { %v9168_v11 = vpack.c.bf16 %v9145_v14, %v9144_v35  ;;  %v8986_v5 = vadd.f32 %v18067_v58, %v8947_v62  ;;  %v8429_v0 = vadd.f32 %v8397_v52, %v8325_v46  ;;  %v8604_v63 = vmul.f32 %v17974_v16, %v18077_v41 }
 0x879   : > { %v8987_v48 = vadd.f32 %v18067_v58, %v8948_v38  ;;  %v8532_v8 = vadd.f32 %v8500_v7, %v8428_v61  ;;  %v8605_v30 = vmul.f32 %v17974_v16, %v18083_v23  ;;  %v8709_v45 = vmul.f32 %v17914_v24, %v18111_v22  ;;  %v18163_v7 = vld [vmem:[#allocation3 + $0x1a7] sm:$0xff] }
 0x87a   : > { %11121 = vmatprep.mubr.bf16.mxu1 %v9168_v11  ;;  %v9018_v13 = vadd.f32 3.0, %v8986_v5  ;;  %v8533_v56 = vadd.f32 %v8501_v25, %v8429_v0  ;;  %v8710_v44 = vmul.f32 %v17914_v24, %v18117_v47  ;;  %v8813_v49 = vmul.f32 %v17841_v15, %v18119_v39  ;;  %v18168_v0 = vld [vmem:[#allocation3 + $0x1af] sm:$0xff] }
 0x87b   : > { %v9019_v1 = vadd.f32 3.0, %v8987_v48  ;;  %v8636_v4 = vadd.f32 %v8604_v63, %v8532_v8  ;;  %v8814_v27 = vmul.f32 %v17841_v15, %v18124_v32  ;;  %v8917_v59 = vmul.f32 %v17931_v21, %v18126_v2  ;;  %v18170_v63 = vld [vmem:[#allocation3 + $0x1a8] sm:$0xff] }
 0x87c   : > { %v9050_v28 = vmax.f32 %v9018_v13, 0.0  ;;  %v8637_v36 = vadd.f32 %v8605_v30, %v8533_v56  ;;  %v8918_v54 = vmul.f32 %v17931_v21, %v18133_v20  ;;  %v8086_v6 = vmul.f32 %v17854_v33, %v18056_v50  ;;  %v18177_v13 = vld [vmem:[#allocation3 + $0x1b0] sm:$0xff] }
 0x87d   : > { %v9051_v10 = vmax.f32 %v9019_v1, 0.0  ;;  %v8741_v29 = vadd.f32 %v8709_v45, %v8636_v4  ;;  %v8087_v57 = vmul.f32 %v17854_v33, %v18062_v3  ;;  %v8190_v55 = vmul.f32 %v17863_v9, %v18073_v53  ;;  %v18179_v56 = vld [vmem:[#allocation3 + $0x1a9] sm:$0xff] }
 0x87e   : > { %v9082_v26 = vmin.f32 %v9050_v28, 6.0  ;;  %v8742_v51 = vadd.f32 %v8710_v44, %v8637_v36  ;;  %v8191_v19 = vmul.f32 %v17863_v9, %v18075_v42  ;;  %v8294_v43 = vmul.f32 %v17871_v12, %v18077_v41 }
 0x87f   : > { %v9083_v60 = vmin.f32 %v9051_v10, 6.0  ;;  %v8845_v37 = vadd.f32 %v8813_v49, %v8741_v29  ;;  %v8222_v18 = vadd.f32 %v8190_v55, %v8086_v6  ;;  %v8295_v50 = vmul.f32 %v17871_v12, %v18083_v23 }
 0x880   : > { %v9114_v31 = vmul.f32 %v9082_v26, %v8986_v5  ;;  %v8846_v52 = vadd.f32 %v8814_v27, %v8742_v51  ;;  %v8223_v3 = vadd.f32 %v8191_v19, %v8087_v57  ;;  %v8398_v53 = vmul.f32 %v17880_v34, %v18111_v22  ;;  %v18183_v27 = vld [vmem:[#allocation3 + $0x1b1] sm:$0xff] }
 0x881   : > { %v9115_v35 = vmul.f32 %v9083_v60, %v8987_v48  ;;  %v8949_v14 = vadd.f32 %v8917_v59, %v8845_v37  ;;  %v8326_v62 = vadd.f32 %v8294_v43, %v8222_v18  ;;  %v8399_v42 = vmul.f32 %v17880_v34, %v18117_v47 }
 0x882   : > { %v9146_v46 = vmul.f32 0.16666667, %v9114_v31  ;;  %v8950_v41 = vadd.f32 %v8918_v54, %v8846_v52  ;;  %v8327_v38 = vadd.f32 %v8295_v50, %v8223_v3  ;;  %v8502_v61 = vmul.f32 %v17892_v17, %v18119_v39 }
 0x883   : > { %v9147_v23 = vmul.f32 0.16666667, %v9115_v35  ;;  %v8988_v25 = vadd.f32 %v18067_v58, %v8949_v14  ;;  %v8430_v11 = vadd.f32 %v8398_v53, %v8326_v62  ;;  %v8503_v5 = vmul.f32 %v17892_v17, %v18124_v32 }
 0x884   : > { %v8989_v48 = vadd.f32 %v18067_v58, %v8950_v41  ;;  %v8431_v8 = vadd.f32 %v8399_v42, %v8327_v38  ;;  %v8606_v30 = vmul.f32 %v17974_v16, %v18126_v2  ;;  %v8607_v45 = vmul.f32 %v17974_v16, %v18133_v20 }
 0x885   : > { %v9169_v44 = vpack.c.bf16 %v9147_v23, %v9146_v46  ;;  %v9020_v49 = vadd.f32 3.0, %v8988_v25  ;;  %v8534_v1 = vadd.f32 %v8502_v61, %v8430_v11  ;;  %v8711_v4 = vmul.f32 %v17914_v24, %v18163_v7  ;;  %v18213_v11 = vld [vmem:[#allocation3 + $0x1c7] sm:$0xff] }
 0x886   : > { %v9021_v59 = vadd.f32 3.0, %v8989_v48  ;;  %v8535_v28 = vadd.f32 %v8503_v5, %v8431_v8  ;;  %v8712_v36 = vmul.f32 %v17914_v24, %v18168_v0  ;;  %v8815_v54 = vmul.f32 %v17841_v15, %v18170_v63 }
 0x887   : > { %11122 = vmatmul.mubr.bf16.gmra.mxu1 %v9169_v44  ;;  %v9052_v6 = vmax.f32 %v9020_v49, 0.0  ;;  %v8638_v10 = vadd.f32 %v8606_v30, %v8534_v1  ;;  %v8816_v29 = vmul.f32 %v17841_v15, %v18177_v13  ;;  %v8919_v57 = vmul.f32 %v17931_v21, %v18179_v56  ;;  %v18224_v44 = vld [vmem:[#allocation3 + $0x1d0] sm:$0xff] }
 0x888   : > { %v9053_v55 = vmax.f32 %v9021_v59, 0.0  ;;  %v8639_v26 = vadd.f32 %v8607_v45, %v8535_v28  ;;  %v8920_v51 = vmul.f32 %v17931_v21, %v18183_v27  ;;  %v8088_v19 = vmul.f32 %v17854_v33, %v18111_v22  ;;  %v18222_v45 = vld [vmem:[#allocation3 + $0x1c8] sm:$0xff] }
 0x889   : > { %v9084_v43 = vmin.f32 %v9052_v6, 6.0  ;;  %v8743_v60 = vadd.f32 %v8711_v4, %v8638_v10  ;;  %v8089_v37 = vmul.f32 %v17854_v33, %v18117_v47  ;;  %v8192_v18 = vmul.f32 %v17863_v9, %v18119_v39  ;;  %v18229_v28 = vld [vmem:[#allocation3 + $0x1c9] sm:$0xff] }
 0x88a   : > { %v9085_v50 = vmin.f32 %v9053_v55, 6.0  ;;  %v8744_v31 = vadd.f32 %v8712_v36, %v8639_v26  ;;  %v8193_v52 = vmul.f32 %v17863_v9, %v18124_v32  ;;  %v8296_v3 = vmul.f32 %v17871_v12, %v18126_v2  ;;  %v18231_v36 = vld [vmem:[#allocation3 + $0x1d1] sm:$0xff] }
 0x88b   : > { %v9116_v53 = vmul.f32 %v9084_v43, %v8988_v25  ;;  %v8847_v35 = vadd.f32 %v8815_v54, %v8743_v60  ;;  %v8224_v14 = vadd.f32 %v8192_v18, %v8088_v19  ;;  %v8297_v22 = vmul.f32 %v17871_v12, %v18133_v20  ;;  %v18215_v20 = vld [vmem:[#allocation3 + $0x1cf] sm:$0xff] }
 0x88c   : > { %v9117_v62 = vmul.f32 %v9085_v50, %v8989_v48  ;;  %v8848_v42 = vadd.f32 %v8816_v29, %v8744_v31  ;;  %v8225_v47 = vadd.f32 %v8193_v52, %v8089_v37  ;;  %v8400_v39 = vmul.f32 %v17880_v34, %v18163_v7 }
 0x88d   : > { %v9148_v46 = vmul.f32 0.16666667, %v9116_v53  ;;  %v8951_v41 = vadd.f32 %v8919_v57, %v8847_v35  ;;  %v8328_v38 = vadd.f32 %v8296_v3, %v8224_v14  ;;  %v8401_v32 = vmul.f32 %v17880_v34, %v18168_v0 }
 0x88e   : > { %v9149_v61 = vmul.f32 0.16666667, %v9117_v62  ;;  %v8952_v2 = vadd.f32 %v8920_v51, %v8848_v42  ;;  %v8329_v23 = vadd.f32 %v8297_v22, %v8225_v47  ;;  %v8504_v25 = vmul.f32 %v17892_v17, %v18170_v63 }
 0x88f   : > { %v8990_v5 = vadd.f32 %v18067_v58, %v8951_v41  ;;  %v8432_v48 = vadd.f32 %v8400_v39, %v8328_v38  ;;  %v8505_v8 = vmul.f32 %v17892_v17, %v18177_v13  ;;  %v8608_v30 = vmul.f32 %v17974_v16, %v18179_v56 }
 0x890   : > { %v9170_v49 = vpack.c.bf16 %v9149_v61, %v9148_v46  ;;  %v8991_v1 = vadd.f32 %v18067_v58, %v8952_v2  ;;  %v8433_v4 = vadd.f32 %v8401_v32, %v8329_v23  ;;  %v8609_v59 = vmul.f32 %v17974_v16, %v18183_v27 }
 0x891   : > { %v9022_v54 = vadd.f32 3.0, %v8990_v5  ;;  %v8536_v6 = vadd.f32 %v8504_v25, %v8432_v48  ;;  %v8713_v10 = vmul.f32 %v17914_v24, %v18213_v11  ;;  %v8714_v29 = vmul.f32 %v17914_v24, %v18215_v20 }
 0x892   : > { %11125 = vmatprep.mubr.bf16.mxu1 %v9170_v49  ;;  %v9023_v57 = vadd.f32 3.0, %v8991_v1  ;;  %v8537_v55 = vadd.f32 %v8505_v8, %v8433_v4  ;;  %v8817_v26 = vmul.f32 %v17841_v15, %v18222_v45  ;;  %v8818_v51 = vmul.f32 %v17841_v15, %v18224_v44  ;;  %v18267_v8 = vld [vmem:[#allocation3 + $0x1ef] sm:$0xff] }
 0x893   : > { %v9054_v19 = vmax.f32 %v9022_v54, 0.0  ;;  %v8640_v43 = vadd.f32 %v8608_v30, %v8536_v6  ;;  %v8921_v60 = vmul.f32 %v17931_v21, %v18229_v28  ;;  %v8922_v37 = vmul.f32 %v17931_v21, %v18231_v36  ;;  %v18274_v54 = vld [vmem:[#allocation3 + $0x1f0] sm:$0xff] }
 0x894   : > { %v9055_v18 = vmax.f32 %v9023_v57, 0.0  ;;  %v8641_v50 = vadd.f32 %v8609_v59, %v8537_v55  ;;  %v8090_v31 = vmul.f32 %v17854_v33, %v18163_v7  ;;  %v8091_v52 = vmul.f32 %v17854_v33, %v18168_v0  ;;  %v18272_v59 = vld [vmem:[#allocation3 + $0x1e8] sm:$0xff] }
 0x895   : > { %v9086_v3 = vmin.f32 %v9054_v19, 6.0  ;;  %v8745_v53 = vadd.f32 %v8713_v10, %v8640_v43  ;;  %v8194_v35 = vmul.f32 %v17863_v9, %v18170_v63  ;;  %v8195_v14 = vmul.f32 %v17863_v9, %v18177_v13  ;;  %v18276_v6 = vld [vmem:[#allocation3 + $0x1e9] sm:$0xff] }
 0x896   : > { %v9087_v22 = vmin.f32 %v9055_v18, 6.0  ;;  %v8746_v62 = vadd.f32 %v8714_v29, %v8641_v50  ;;  %v8298_v42 = vmul.f32 %v17871_v12, %v18179_v56  ;;  %v8299_v47 = vmul.f32 %v17871_v12, %v18183_v27  ;;  %v18261_v56 = vld [vmem:[#allocation3 + $0x1e7] sm:$0xff] }
 0x897   : > { %v9118_v7 = vmul.f32 %v9086_v3, %v8990_v5  ;;  %v8849_v39 = vadd.f32 %v8817_v26, %v8745_v53  ;;  %v8226_v46 = vadd.f32 %v8194_v35, %v8090_v31  ;;  %v8227_v0 = vadd.f32 %v8195_v14, %v8091_v52  ;;  %v18283_v26 = vld [vmem:[#allocation3 + $0x1f1] sm:$0xff] }
 0x898   : > { %v9119_v41 = vmul.f32 %v9087_v22, %v8991_v1  ;;  %v8850_v38 = vadd.f32 %v8818_v51, %v8746_v62  ;;  %v8402_v63 = vmul.f32 %v17880_v34, %v18213_v11  ;;  %v8403_v13 = vmul.f32 %v17880_v34, %v18215_v20 }
 0x899   : > { %v9150_v32 = vmul.f32 0.16666667, %v9118_v7  ;;  %v8953_v61 = vadd.f32 %v8921_v60, %v8849_v39  ;;  %v8330_v2 = vadd.f32 %v8298_v42, %v8226_v46  ;;  %v8331_v23 = vadd.f32 %v8299_v47, %v8227_v0 }
 0x89a   : > { %v9151_v25 = vmul.f32 0.16666667, %v9119_v41  ;;  %v8954_v27 = vadd.f32 %v8922_v37, %v8850_v38  ;;  %v8506_v5 = vmul.f32 %v17892_v17, %v18222_v45  ;;  %v8507_v48 = vmul.f32 %v17892_v17, %v18224_v44 }
 0x89b   : > { %v8992_v30 = vadd.f32 %v18067_v58, %v8953_v61  ;;  %v8434_v49 = vadd.f32 %v8402_v63, %v8330_v2  ;;  %v8435_v1 = vadd.f32 %v8403_v13, %v8331_v23  ;;  %v8610_v4 = vmul.f32 %v17974_v16, %v18229_v28 }
 0x89c   : > { %v9171_v10 = vpack.c.bf16 %v9151_v25, %v9150_v32  ;;  %v8993_v29 = vadd.f32 %v18067_v58, %v8954_v27  ;;  %v8611_v57 = vmul.f32 %v17974_v16, %v18231_v36  ;;  %v8715_v55 = vmul.f32 %v17914_v24, %v18261_v56 }
 0x89d   : > { %v9024_v51 = vadd.f32 3.0, %v8992_v30  ;;  %v8538_v19 = vadd.f32 %v8506_v5, %v8434_v49  ;;  %v8539_v43 = vadd.f32 %v8507_v48, %v8435_v1  ;;  %v8716_v60 = vmul.f32 %v17914_v24, %v18267_v8  ;;  %v8678_v1 = vld [vmem:[#allocation3 + $0x20f] sm:$0xff] }
 0x89e   : > { %11126 = vmatmul.mubr.bf16.gmra.mxu1 %v9171_v10  ;;  %v9025_v37 = vadd.f32 3.0, %v8993_v29  ;;  %v8819_v18 = vmul.f32 %v17841_v15, %v18272_v59  ;;  %v8820_v50 = vmul.f32 %v17841_v15, %v18274_v54  ;;  %v8923_v31 = vmul.f32 %v17931_v21, %v18276_v6 }
 0x89f   : > { %v9056_v52 = vmax.f32 %v9024_v51, 0.0  ;;  %v8642_v3 = vadd.f32 %v8610_v4, %v8538_v19  ;;  %v8643_v53 = vadd.f32 %v8611_v57, %v8539_v43  ;;  %v8924_v35 = vmul.f32 %v17931_v21, %v18283_v26  ;;  %v8782_v51 = vld [vmem:[#allocation3 + $0x210] sm:$0xff] }
 0x8a0   : > { %v9057_v14 = vmax.f32 %v9025_v37, 0.0  ;;  %v8092_v22 = vmul.f32 %v17854_v33, %v18213_v11  ;;  %v8093_v62 = vmul.f32 %v17854_v33, %v18215_v20  ;;  %v8196_v42 = vmul.f32 %v17863_v9, %v18222_v45  ;;  %v8885_v19 = vld [vmem:[#allocation3 + $0x209] sm:$0xff] }
 0x8a1   : > { %v9088_v47 = vmin.f32 %v9056_v52, 6.0  ;;  %v8747_v7 = vadd.f32 %v8715_v55, %v8642_v3  ;;  %v8748_v39 = vadd.f32 %v8716_v60, %v8643_v53  ;;  %v8197_v46 = vmul.f32 %v17863_v9, %v18224_v44  ;;  %v8781_v55 = vld [vmem:[#allocation3 + $0x208] sm:$0xff] }
 0x8a2   : > { %v9089_v0 = vmin.f32 %v9057_v14, 6.0  ;;  %v8228_v41 = vadd.f32 %v8196_v42, %v8092_v22  ;;  %v8300_v38 = vmul.f32 %v17871_v12, %v18229_v28  ;;  %v8301_v11 = vmul.f32 %v17871_v12, %v18231_v36  ;;  %v8677_v28 = vld [vmem:[#allocation3 + $0x207] sm:$0xff] }
 0x8a3   : > { %v9120_v63 = vmul.f32 %v9088_v47, %v8992_v30  ;;  %v8851_v13 = vadd.f32 %v8819_v18, %v8747_v7  ;;  %v8852_v20 = vadd.f32 %v8820_v50, %v8748_v39  ;;  %v8229_v32 = vadd.f32 %v8197_v46, %v8093_v62  ;;  %v8886_v50 = vld [vmem:[#allocation3 + $0x211] sm:$0xff] }
 0x8a4   : > { %v9121_v61 = vmul.f32 %v9089_v0, %v8993_v29  ;;  %v8332_v45 = vadd.f32 %v8300_v38, %v8228_v41  ;;  %v8404_v2 = vmul.f32 %v17880_v34, %v18261_v56  ;;  %v8405_v44 = vmul.f32 %v17880_v34, %v18267_v8 }
 0x8a5   : > { %v9152_v23 = vmul.f32 0.16666667, %v9120_v63  ;;  %v8955_v25 = vadd.f32 %v8923_v31, %v8851_v13  ;;  %v8956_v27 = vadd.f32 %v8924_v35, %v8852_v20  ;;  %v8333_v5 = vadd.f32 %v8301_v11, %v8229_v32 }
 0x8a6   : > { %v9153_v48 = vmul.f32 0.16666667, %v9121_v61  ;;  %v8436_v49 = vadd.f32 %v8404_v2, %v8332_v45  ;;  %v8508_v36 = vmul.f32 %v17892_v17, %v18272_v59  ;;  %v8509_v30 = vmul.f32 %v17892_v17, %v18274_v54 }
 0x8a7   : > { %v8994_v4 = vadd.f32 %v18067_v58, %v8955_v25  ;;  %v8995_v10 = vadd.f32 %v18067_v58, %v8956_v27  ;;  %v8437_v29 = vadd.f32 %v8405_v44, %v8333_v5  ;;  %v8612_v57 = vmul.f32 %v17974_v16, %v18276_v6 }
 0x8a8   : > { %v9172_v43 = vpack.c.bf16 %v9153_v48, %v9152_v23  ;;  %v8540_v60 = vadd.f32 %v8508_v36, %v8436_v49  ;;  %v8613_v37 = vmul.f32 %v17974_v16, %v18283_v26  ;;  %v8717_v18 = vmul.f32 %v17914_v24, %v8677_v28  ;;  %v8679_v48 = vld [vmem:[#allocation3 + $0x227] sm:$0xff] }
 0x8a9   : > { %v9026_v31 = vadd.f32 3.0, %v8994_v4  ;;  %v9027_v52 = vadd.f32 3.0, %v8995_v10  ;;  %v8541_v3 = vadd.f32 %v8509_v30, %v8437_v29  ;;  %v8718_v53 = vmul.f32 %v17914_v24, %v8678_v1 }
 0x8aa   : > { %11129 = vmatprep.mubr.bf16.mxu1 %v9172_v43  ;;  %v8644_v35 = vadd.f32 %v8612_v57, %v8540_v60  ;;  %v8821_v14 = vmul.f32 %v17841_v15, %v8781_v55  ;;  %v8822_v22 = vmul.f32 %v17841_v15, %v8782_v51  ;;  %v8925_v62 = vmul.f32 %v17931_v21, %v8885_v19 }
 0x8ab   : > { %v9058_v42 = vmax.f32 %v9026_v31, 0.0  ;;  %v9059_v47 = vmax.f32 %v9027_v52, 0.0  ;;  %v8645_v7 = vadd.f32 %v8613_v37, %v8541_v3  ;;  %v8926_v39 = vmul.f32 %v17931_v21, %v8886_v50  ;;  %v8887_v37 = vld [vmem:[#allocation3 + $0x229] sm:$0xff]  ;;  %v11598_v52 = vld [vmem:[#allocation3] sm:$0xff]  ;;  %v8888_v3 = vld [vmem:[#allocation3 + $0x231] sm:$0xff] }
 0x8ac   : > { %v8749_v46 = vadd.f32 %v8717_v18, %v8644_v35  ;;  %v8094_v0 = vmul.f32 %v17854_v33, %v18261_v56  ;;  %v8095_v41 = vmul.f32 %v17854_v33, %v18267_v8  ;;  %v8198_v38 = vmul.f32 %v17863_v9, %v18272_v59 }
 0x8ad   : > { %v9090_v11 = vmin.f32 %v9058_v42, 6.0  ;;  %v9091_v63 = vmin.f32 %v9059_v47, 6.0  ;;  %v8750_v15 = vadd.f32 %v8718_v53, %v8645_v7  ;;  %v8199_v13 = vmul.f32 %v17863_v9, %v18274_v54 }
 0x8ae   : > { %v8853_v20 = vadd.f32 %v8821_v14, %v8749_v46  ;;  %v8230_v32 = vadd.f32 %v8198_v38, %v8094_v0  ;;  %v8302_v61 = vmul.f32 %v17871_v12, %v18276_v6  ;;  %v8303_v56 = vmul.f32 %v17871_v12, %v18283_v26  ;;  %v8680_v26 = vld [vmem:[#allocation3 + $0x22f] sm:$0xff] }
 0x8af   : > { %v9122_v45 = vmul.f32 %v9090_v11, %v8994_v4  ;;  %v9123_v2 = vmul.f32 %v9091_v63, %v8995_v10  ;;  %v8854_v33 = vadd.f32 %v8822_v22, %v8750_v15  ;;  %v8231_v8 = vadd.f32 %v8199_v13, %v8095_v41 }
 0x8b0   : > { %v8957_v44 = vadd.f32 %v8925_v62, %v8853_v20  ;;  %v8334_v59 = vadd.f32 %v8302_v61, %v8230_v32  ;;  %v8406_v23 = vmul.f32 %v17880_v34, %v8677_v28  ;;  %v8407_v25 = vmul.f32 %v17880_v34, %v8678_v1 }
 0x8b1   : > { %v9154_v27 = vmul.f32 0.16666667, %v9122_v45  ;;  %v9155_v9 = vmul.f32 0.16666667, %v9123_v2  ;;  %v8958_v54 = vadd.f32 %v8926_v39, %v8854_v33  ;;  %v8335_v5 = vadd.f32 %v8303_v56, %v8231_v8 }
 0x8b2   : > { %v8996_v6 = vadd.f32 %v18067_v58, %v8957_v44  ;;  %v8438_v49 = vadd.f32 %v8406_v23, %v8334_v59  ;;  %v8510_v12 = vmul.f32 %v17892_v17, %v8781_v55  ;;  %v8511_v10 = vmul.f32 %v17892_v17, %v8782_v51  ;;  %v11599_v17 = vld [vmem:[%s18598_s16 + $0x7] ss:$0 sm:$0xff]  ;;  %v18360_v44 = vld [vmem:[%s18601_s19] ss:$0 sm:$0xff] }
 0x8b3   : > { %v9173_v36 = vpack.c.bf16 %v9155_v9, %v9154_v27  ;;  %v8997_v30 = vadd.f32 %v18067_v58, %v8958_v54  ;;  %v8439_v4 = vadd.f32 %v8407_v25, %v8335_v5  ;;  %v8614_v34 = vmul.f32 %v17974_v16, %v8885_v19  ;;  %v18365_v59 = vld [vmem:[%s18602_s20] ss:$0 sm:$0xff] }
 0x8b4   : > { %v9028_v28 = vadd.f32 3.0, %v8996_v6  ;;  %v8542_v29 = vadd.f32 %v8510_v12, %v8438_v49  ;;  %v8719_v1 = vmul.f32 %v17914_v24, %v8679_v48  ;;  %v8615_v60 = vmul.f32 %v17974_v16, %v8886_v50  ;;  %v20402_v12 = vld [vmem:[#allocation114_spill] sm:$0xff] }
 0x8b5   : > { %11130 = vmatmul.mubr.bf16.gmra.mxu1 %v9173_v36  ;;  %v9029_v57 = vadd.f32 3.0, %v8997_v30  ;;  %v8543_v43 = vadd.f32 %v8511_v10, %v8439_v4  ;;  %v8720_v55 = vmul.f32 %v17914_v24, %v8680_v26  ;;  %v8823_v51 = vmul.f32 %v11599_v17, %v11598_v52 }
 0x8b6   : > { %v9060_v18 = vmax.f32 %v9028_v28, 0.0  ;;  %v8646_v31 = vadd.f32 %v8614_v34, %v8542_v29  ;;  %v8927_v22 = vmul.f32 %v17931_v21, %v8887_v37  ;;  %v8928_v24 = vmul.f32 %v17931_v21, %v8888_v3  ;;  %v20404_v28 = vld [vmem:[#allocation145_spill] sm:$0xff] }
 0x8b7   : > { %v9061_v19 = vmax.f32 %v9029_v57, 0.0  ;;  %v8647_v53 = vadd.f32 %v8615_v60, %v8543_v43  ;;  %v20405_v37 = vld [vmem:[#allocation133_spill] sm:$0xff] }
 0x8b8   : > { %v9092_v35 = vmin.f32 %v9060_v18, 6.0  ;;  %v8751_v14 = vadd.f32 %v8719_v1, %v8646_v31 }
 0x8b9   : > { %v9093_v62 = vmin.f32 %v9061_v19, 6.0  ;;  %v8752_v16 = vadd.f32 %v8720_v55, %v8647_v53 }
 0x8ba   : > { %v9124_v50 = vmul.f32 %v9092_v35, %v8996_v6  ;;  %v8855_v42 = vadd.f32 %v8823_v51, %v8751_v14  ;;  %v20407_v35 = vld [vmem:[#allocation136_spill] sm:$0xff] }
 0x8bb   : > { %v9125_v47 = vmul.f32 %v9093_v62, %v8997_v30  ;;  %v8856_v7 = vadd.f32 %v8823_v51, %v8752_v16  ;;  %v20406_v51 = vld [vmem:[#allocation73_spill] sm:$0xff]  ;;  %v20408_v62 = vld [vmem:[#allocation106_spill] sm:$0xff] }
 0x8bc   : > { %v8959_v39 = vadd.f32 %v8927_v22, %v8855_v42  ;;  %v9156_v46 = vmul.f32 0.16666667, %v9124_v50 }
 0x8bd   : > { %v9157_v0 = vmul.f32 0.16666667, %v9125_v47  ;;  %v8960_v41 = vadd.f32 %v8928_v24, %v8856_v7 }
 0x8be   : > { %v8998_v38 = vadd.f32 %v18067_v58, %v8959_v39 }
 0x8bf   : > { %v9174_v11 = vpack.c.bf16 %v9157_v0, %v9156_v46  ;;  %v8999_v63 = vadd.f32 %v18067_v58, %v8960_v41  ;;  %v20409_v46 = vld [vmem:[#allocation42_spill] sm:$0xff] }
 0x8c0   : > { %v9030_v15 = vadd.f32 3.0, %v8998_v38 }
 0x8c1   : > { %11133 = vmatprep.mubr.bf16.mxu1 %v9174_v11  ;;  %v9031_v13 = vadd.f32 3.0, %v8999_v63 }
 0x8c2   : > { %v9062_v20 = vmax.f32 %v9030_v15, 0.0 }
 0x8c3   : > { %v9063_v21 = vmax.f32 %v9031_v13, 0.0 }
 0x8c4   : > { %v9094_v32 = vmin.f32 %v9062_v20, 6.0 }
 0x8c5   : > { %v9095_v61 = vmin.f32 %v9063_v21, 6.0  ;;  %v20411_v21 = vld [vmem:[#allocation52_spill] sm:$0xff] }
 0x8c6   : > { %v9126_v56 = vmul.f32 %v9094_v32, %v8998_v38 }
 0x8c7   : > { %v9127_v45 = vmul.f32 %v9095_v61, %v8999_v63  ;;  %v20410_v63 = vld [vmem:[#allocation15_spill] sm:$0xff] }
 0x8c8   : > { %v9158_v2 = vmul.f32 0.16666667, %v9126_v56  ;;  %v20412_v56 = vld [vmem:[#allocation146_spill] sm:$0xff] }
 0x8c9   : > { %v9159_v33 = vmul.f32 0.16666667, %v9127_v45 }
 0x8cb   : > { %v9175_v8 = vpack.c.bf16 %v9159_v33, %v9158_v2 }
 0x8cd   : > { %11134 = vmatmul.mubr.bf16.gmra.mxu1 %v9175_v8 }
 0x8e7   : > { %v11107_v58 = vpop.f32.mrf.mxu1 }
 0x8e8   : > { %v9410_v23 = vmul.f32 %v11107_v58, %v18360_v44 }
 0x8e9   : > { %v9274_v25 = vpop.f32.mrf.mxu1 }
 0x8ea   : > { %v9449_v27 = vadd.f32 %v18365_v59, %v9410_v23  ;;  %v9408_v9 = vmul.f32 %v18360_v44, %v9274_v25 }
 0x8eb   : > { %v11108_v54 = vpop.f32.mrf.mxu1 }
 0x8ec   : > { %v9481_v5 = vadd.f32 %v9449_v27, %v17186_v40  ;;  %v9447_v48 = vadd.f32 %v18365_v59, %v9408_v9  ;;  %v9411_v6 = vmul.f32 %v11108_v54, %v18360_v44  ;;  %v20403_v40 = vld [vmem:[#allocation90_spill] sm:$0xff]  ;;  %v20413_v27 = vld [vmem:[#allocation93_spill] sm:$0xff] }
 0x8ed   : > { %v9277_v49 = vpop.f32.mrf.mxu1 }
 0x8ee   : > { %9513 = vst.msk [vmem:[%s18375_s5 + $0x10] sm:$0xff] %vm724_vm0, %v9481_v5  ;;  %v9479_v26 = vadd.f32 %v9447_v48, %v20402_v12  ;;  %v9450_v36 = vadd.f32 %v18365_v59, %v9411_v6  ;;  %v9409_v30 = vmul.f32 %v18360_v44, %v9277_v49  ;;  %v20414_v6 = vld [vmem:[#allocation144_spill] sm:$0xff] }
 0x8f0   : > { %9511 = vst.msk [vmem:[%s18375_s5] sm:$0xff] %vm724_vm0, %v9479_v26  ;;  %v9482_v4 = vadd.f32 %v9450_v36, %v20403_v40  ;;  %v9448_v10 = vadd.f32 %v18365_v59, %v9409_v30  ;;  %v20415_v36 = vld [vmem:[#allocation143_spill] sm:$0xff] }
 0x8f2   : > { %9514 = vst.msk [vmem:[%s18375_s5 + $0x18] sm:$0xff] %vm724_vm0, %v9482_v4  ;;  %v9480_v29 = vadd.f32 %v9448_v10, %v20404_v28  ;;  %v20416_v4 = vld [vmem:[#allocation41_spill] sm:$0xff] }
 0x8f4   : > { %9512 = vst.msk [vmem:[%s18375_s5 + $0x8] sm:$0xff] %vm724_vm0, %v9480_v29 }
 0x901   : > { %v11111_v34 = vpop.f32.mrf.mxu1 }
 0x902   : > { %v9414_v1 = vmul.f32 %v11111_v34, %v18360_v44 }
 0x903   : > { %v9290_v57 = vpop.f32.mrf.mxu1 }
 0x904   : > { %v9453_v43 = vadd.f32 %v18365_v59, %v9414_v1  ;;  %v9412_v60 = vmul.f32 %v18360_v44, %v9290_v57 }
 0x905   : > { %v11112_v55 = vpop.f32.mrf.mxu1 }
 0x906   : > { %v9485_v18 = vadd.f32 %v9453_v43, %v20405_v37  ;;  %v9451_v31 = vadd.f32 %v18365_v59, %v9412_v60  ;;  %v9415_v52 = vmul.f32 %v11112_v55, %v18360_v44  ;;  %v20417_v60 = vld [vmem:[#allocation97_spill] sm:$0xff] }
 0x907   : > { %v9293_v17 = vpop.f32.mrf.mxu1 }
 0x908   : > { %9517 = vst.msk [vmem:[%s18375_s5 + $0x30] sm:$0xff] %vm724_vm0, %v9485_v18  ;;  %v9483_v3 = vadd.f32 %v9451_v31, %v20406_v51  ;;  %v9454_v19 = vadd.f32 %v18365_v59, %v9415_v52  ;;  %v9413_v53 = vmul.f32 %v18360_v44, %v9293_v17  ;;  %v20418_v52 = vld [vmem:[#allocation96_spill] sm:$0xff] }
 0x90a   : > { %9515 = vst.msk [vmem:[%s18375_s5 + $0x20] sm:$0xff] %vm724_vm0, %v9483_v3  ;;  %v9486_v14 = vadd.f32 %v9454_v19, %v20407_v35  ;;  %v9452_v22 = vadd.f32 %v18365_v59, %v9413_v53  ;;  %v20419_v19 = vld [vmem:[#allocation40_spill] sm:$0xff] }
 0x90c   : > { %9518 = vst.msk [vmem:[%s18375_s5 + $0x38] sm:$0xff] %vm724_vm0, %v9486_v14  ;;  %v9484_v16 = vadd.f32 %v9452_v22, %v20408_v62  ;;  %v20420_v14 = vld [vmem:[#allocation57_spill] sm:$0xff] }
 0x90e   : > { %9516 = vst.msk [vmem:[%s18375_s5 + $0x28] sm:$0xff] %vm724_vm0, %v9484_v16 }
 0x917   : > { %v11115_v24 = vpop.f32.mrf.mxu1 }
 0x918   : > { %v9418_v50 = vmul.f32 %v11115_v24, %v18360_v44 }
 0x919   : > { %v9306_v42 = vpop.f32.mrf.mxu1 }
 0x91a   : > { %v9457_v47 = vadd.f32 %v18365_v59, %v9418_v50  ;;  %v9416_v7 = vmul.f32 %v18360_v44, %v9306_v42 }
 0x91b   : > { %v11116_v39 = vpop.f32.mrf.mxu1 }
 0x91c   : > { %v9489_v0 = vadd.f32 %v9457_v47, %v20409_v46  ;;  %v9455_v41 = vadd.f32 %v18365_v59, %v9416_v7  ;;  %v9419_v38 = vmul.f32 %v11116_v39, %v18360_v44  ;;  %v20421_v7 = vld [vmem:[#allocation118_spill] sm:$0xff] }
 0x91d   : > { %v9309_v11 = vpop.f32.mrf.mxu1 }
 0x91e   : > { %9521 = vst.msk [vmem:[%s18375_s5 + $0x50] sm:$0xff] %vm724_vm0, %v9489_v0  ;;  %v9487_v15 = vadd.f32 %v9455_v41, %v20410_v63  ;;  %v9458_v13 = vadd.f32 %v18365_v59, %v9419_v38  ;;  %v9417_v20 = vmul.f32 %v18360_v44, %v9309_v11  ;;  %v20422_v38 = vld [vmem:[#allocation117_spill] sm:$0xff] }
 0x920   : > { %9519 = vst.msk [vmem:[%s18375_s5 + $0x40] sm:$0xff] %vm724_vm0, %v9487_v15  ;;  %v9490_v32 = vadd.f32 %v9458_v13, %v20411_v21  ;;  %v9456_v61 = vadd.f32 %v18365_v59, %v9417_v20  ;;  %v20423_v13 = vld [vmem:[#allocation79_spill] sm:$0xff] }
 0x922   : > { %9522 = vst.msk [vmem:[%s18375_s5 + $0x58] sm:$0xff] %vm724_vm0, %v9490_v32  ;;  %v9488_v45 = vadd.f32 %v9456_v61, %v20412_v56  ;;  %v20424_v32 = vld [vmem:[#allocation61_spill] sm:$0xff] }
 0x924   : > { %9520 = vst.msk [vmem:[%s18375_s5 + $0x48] sm:$0xff] %vm724_vm0, %v9488_v45 }
 0x92f   : > { %v11119_v2 = vpop.f32.mrf.mxu1 }
 0x930   : > { %v9422_v33 = vmul.f32 %v11119_v2, %v18360_v44 }
 0x931   : > { %v9322_v8 = vpop.f32.mrf.mxu1 }
 0x932   : > { %v9461_v58 = vadd.f32 %v18365_v59, %v9422_v33  ;;  %v9420_v23 = vmul.f32 %v18360_v44, %v9322_v8 }
 0x933   : > { %v11120_v25 = vpop.f32.mrf.mxu1 }
 0x934   : > { %v9493_v9 = vadd.f32 %v9461_v58, %v20413_v27  ;;  %v9459_v54 = vadd.f32 %v18365_v59, %v9420_v23  ;;  %v9423_v5 = vmul.f32 %v11120_v25, %v18360_v44  ;;  %v20425_v23 = vld [vmem:[#allocation120_spill] sm:$0xff] }
 0x935   : > { %v9325_v48 = vpop.f32.mrf.mxu1 }
 0x936   : > { %9525 = vst.msk [vmem:[%s18375_s5 + $0x70] sm:$0xff] %vm724_vm0, %v9493_v9  ;;  %v9491_v49 = vadd.f32 %v9459_v54, %v20414_v6  ;;  %v9462_v12 = vadd.f32 %v18365_v59, %v9423_v5  ;;  %v9421_v26 = vmul.f32 %v18360_v44, %v9325_v48  ;;  %v20426_v5 = vld [vmem:[#allocation35_spill] sm:$0xff] }
 0x938   : > { %9523 = vst.msk [vmem:[%s18375_s5 + $0x60] sm:$0xff] %vm724_vm0, %v9491_v49  ;;  %v9494_v30 = vadd.f32 %v9462_v12, %v20415_v36  ;;  %v9460_v40 = vadd.f32 %v18365_v59, %v9421_v26  ;;  %v20427_v12 = vld [vmem:[#allocation70_spill] sm:$0xff] }
 0x93a   : > { %9526 = vst.msk [vmem:[%s18375_s5 + $0x78] sm:$0xff] %vm724_vm0, %v9494_v30  ;;  %v9492_v10 = vadd.f32 %v9460_v40, %v20416_v4  ;;  %v20428_v30 = vld [vmem:[#allocation119_spill] sm:$0xff] }
 0x93c   : > { %9524 = vst.msk [vmem:[%s18375_s5 + $0x68] sm:$0xff] %vm724_vm0, %v9492_v10 }
 0x947   : > { %v11123_v28 = vpop.f32.mrf.mxu1 }
 0x948   : > { %v9426_v29 = vmul.f32 %v11123_v28, %v18360_v44 }
 0x949   : > { %v9338_v34 = vpop.f32.mrf.mxu1 }
 0x94a   : > { %v9465_v1 = vadd.f32 %v18365_v59, %v9426_v29  ;;  %v9424_v57 = vmul.f32 %v18360_v44, %v9338_v34 }
 0x94b   : > { %v11124_v43 = vpop.f32.mrf.mxu1 }
 0x94c   : > { %v9497_v55 = vadd.f32 %v9465_v1, %v20417_v60  ;;  %v9463_v37 = vadd.f32 %v18365_v59, %v9424_v57  ;;  %v9427_v18 = vmul.f32 %v11124_v43, %v18360_v44  ;;  %v20429_v57 = vld [vmem:[#allocation71_spill] sm:$0xff] }
 0x94d   : > { %v9341_v31 = vpop.f32.mrf.mxu1 }
 0x94e   : > { %9529 = vst.msk [vmem:[%s18375_s5 + $0x90] sm:$0xff] %vm724_vm0, %v9497_v55  ;;  %v9495_v17 = vadd.f32 %v9463_v37, %v20418_v52  ;;  %v9466_v51 = vadd.f32 %v18365_v59, %v9427_v18  ;;  %v9425_v3 = vmul.f32 %v18360_v44, %v9341_v31  ;;  %v20430_v18 = vld [vmem:[#allocation121_spill] sm:$0xff] }
 0x950   : > { %9527 = vst.msk [vmem:[%s18375_s5 + $0x80] sm:$0xff] %vm724_vm0, %v9495_v17  ;;  %v9498_v53 = vadd.f32 %v9466_v51, %v20419_v19  ;;  %v9464_v35 = vadd.f32 %v18365_v59, %v9425_v3  ;;  %v20432_v51 = vld [vmem:[#allocation107_spill] sm:$0xff] }
 0x952   : > { %9530 = vst.msk [vmem:[%s18375_s5 + $0x98] sm:$0xff] %vm724_vm0, %v9498_v53  ;;  %v9496_v22 = vadd.f32 %v9464_v35, %v20420_v14 }
 0x954   : > { %9528 = vst.msk [vmem:[%s18375_s5 + $0x88] sm:$0xff] %vm724_vm0, %v9496_v22 }
 0x95e   : > { %v11127_v62 = vpop.f32.mrf.mxu1 }
 0x95f   : > { %v9430_v16 = vmul.f32 %v11127_v62, %v18360_v44 }
 0x960   : > { %v9354_v24 = vpop.f32.mrf.mxu1 }
 0x961   : > { %v9469_v50 = vadd.f32 %v18365_v59, %v9430_v16  ;;  %v9428_v42 = vmul.f32 %v18360_v44, %v9354_v24 }
 0x962   : > { %v11128_v47 = vpop.f32.mrf.mxu1 }
 0x963   : > { %v9501_v39 = vadd.f32 %v9469_v50, %v20421_v7  ;;  %v9467_v46 = vadd.f32 %v18365_v59, %v9428_v42  ;;  %v9431_v0 = vmul.f32 %v11128_v47, %v18360_v44 }
 0x964   : > { %v9357_v41 = vpop.f32.mrf.mxu1 }
 0x965   : > { %9533 = vst.msk [vmem:[%s18375_s5 + $0xb0] sm:$0xff] %vm724_vm0, %v9501_v39  ;;  %v9499_v11 = vadd.f32 %v9467_v46, %v20422_v38  ;;  %v9470_v63 = vadd.f32 %v18365_v59, %v9431_v0  ;;  %v9429_v15 = vmul.f32 %v18360_v44, %v9357_v41 }
 0x967   : > { %9531 = vst.msk [vmem:[%s18375_s5 + $0xa0] sm:$0xff] %vm724_vm0, %v9499_v11  ;;  %v9502_v20 = vadd.f32 %v9470_v63, %v20423_v13  ;;  %v9468_v21 = vadd.f32 %v18365_v59, %v9429_v15 }
 0x969   : > { %9534 = vst.msk [vmem:[%s18375_s5 + $0xb8] sm:$0xff] %vm724_vm0, %v9502_v20  ;;  %v9500_v61 = vadd.f32 %v9468_v21, %v20424_v32 }
 0x96b   : > { %9532 = vst.msk [vmem:[%s18375_s5 + $0xa8] sm:$0xff] %vm724_vm0, %v9500_v61 }
 0x975   : > { %v11131_v56 = vpop.f32.mrf.mxu1 }
 0x976   : > { %v9434_v45 = vmul.f32 %v11131_v56, %v18360_v44 }
 0x977   : > { %v9370_v2 = vpop.f32.mrf.mxu1 }
 0x978   : > { %v9473_v33 = vadd.f32 %v18365_v59, %v9434_v45  ;;  %v9432_v8 = vmul.f32 %v18360_v44, %v9370_v2 }
 0x979   : > { %v11132_v58 = vpop.f32.mrf.mxu1 }
 0x97a   : > { %v9505_v25 = vadd.f32 %v9473_v33, %v20425_v23  ;;  %v9471_v27 = vadd.f32 %v18365_v59, %v9432_v8  ;;  %v9435_v9 = vmul.f32 %v11132_v58, %v18360_v44 }
 0x97b   : > { %v9373_v54 = vpop.f32.mrf.mxu1 }
 0x97c   : > { %9537 = vst.msk [vmem:[%s18375_s5 + $0xd0] sm:$0xff] %vm724_vm0, %v9505_v25  ;;  %v9503_v48 = vadd.f32 %v9471_v27, %v20426_v5  ;;  %v9474_v6 = vadd.f32 %v18365_v59, %v9435_v9  ;;  %v9433_v49 = vmul.f32 %v18360_v44, %v9373_v54 }
 0x97e   : > { %9535 = vst.msk [vmem:[%s18375_s5 + $0xc0] sm:$0xff] %vm724_vm0, %v9503_v48  ;;  %v9506_v26 = vadd.f32 %v9474_v6, %v20427_v12  ;;  %v9472_v36 = vadd.f32 %v18365_v59, %v9433_v49 }
 0x980   : > { %9538 = vst.msk [vmem:[%s18375_s5 + $0xd8] sm:$0xff] %vm724_vm0, %v9506_v26  ;;  %v9504_v40 = vadd.f32 %v9472_v36, %v20428_v30 }
 0x982   : > { %9536 = vst.msk [vmem:[%s18375_s5 + $0xc8] sm:$0xff] %vm724_vm0, %v9504_v40 }
 0x98d   : > { %v11135_v4 = vpop.f32.mrf.mxu1 }
 0x98e   : > { %v9438_v10 = vmul.f32 %v11135_v4, %v18360_v44 }
 0x98f   : > { %v9386_v28 = vpop.f32.mrf.mxu1 }
 0x990   : > { %v9477_v29 = vadd.f32 %v18365_v59, %v9438_v10  ;;  %v9436_v34 = vmul.f32 %v18360_v44, %v9386_v28 }
 0x991   : > { %v11136_v1 = vpop.f32.mrf.mxu1 }
 0x992   : > { %v9509_v43 = vadd.f32 %v9477_v29, %v20429_v57  ;;  %v9475_v60 = vadd.f32 %v18365_v59, %v9436_v34  ;;  %v9439_v55 = vmul.f32 %v11136_v1, %v18360_v44 }
 0x993   : > { %v9389_v37 = vpop.f32.mrf.mxu1 }
 0x994   : > { %9541 = vst.msk [vmem:[%s18375_s5 + $0xf0] sm:$0xff] %vm724_vm0, %v9509_v43  ;;  %v9507_v31 = vadd.f32 %v9475_v60, %v20430_v18  ;;  %v9478_v52 = vadd.f32 %v18365_v59, %v9439_v55  ;;  %v9437_v17 = vmul.f32 %v18360_v44, %v9389_v37  ;;  %v20434_v44 = vld [vmem:[#allocation127_spill] sm:$0xff] }
 0x996   : > { %9539 = vst.msk [vmem:[%s18375_s5 + $0xe0] sm:$0xff] %vm724_vm0, %v9507_v31  ;;  %v9510_v3 = vadd.f32 %v9478_v52, %v20432_v51  ;;  %v9476_v19 = vadd.f32 %v18365_v59, %v9437_v17 }
 0x998   : > { %9542 = vst.msk [vmem:[%s18375_s5 + $0xf8] sm:$0xff] %vm724_vm0, %v9510_v3  ;;  %v9508_v53 = vadd.f32 %v9476_v19, %v20434_v44 }
 0x99a   : > { %9540 = vst.msk [vmem:[%s18375_s5 + $0xe8] sm:$0xff] %vm724_vm0, %v9508_v53 }
 0x99b   : > { %11613 = shalt.err (!%p11610_p3)
}
 0x99c   : > { %s11614_s2 = scalar_lea.hbm %s18531_s1, 4096  ;;  %s11618_s30 = scalar_lea.hbm %s20433_s23, 8192 }
 0x99d   : > { %p11615_p4 = scmp.ne.s32.totalorder %s18531_s1, %s11614_s2  ;;  %p11619_p9 = scmp.lt.s32.totalorder %s18531_s1, %s20433_s23 }
 0x99e   : > { %p11620_p10 = scmp.lt.s32.totalorder %s11618_s30, %s11614_s2 }
 0x99f   : > { %p11616_p7 = pnand %p11615_p4, %p11814_p5 }
 0x9a0   : > { %p11621_p11 = por %p11620_p10, %p11619_p9 }
 0x9a1   : > { %p11617_p8 = pneg %p11616_p7 }
 0x9a3   : > { %p11622_p12 = pnand %p11621_p11, %p11617_p8 }
 0x9a5   : > { %11625 = shalt.err (!%p11622_p12)
}
 0x9a6   : > { %s11664_s4 = smov 128   ;;  %s11665_s28 = smov 8  }
 0x9a7   : > { %11141 = dma.vmem_to_hbm [thread:$0]  (%p11814_p5), %s18533_s27, 4096, %s18531_s1, %s18542_s3, %s11664_s4, %s11664_s4, %s11665_s28  }
 0x9a8 PF: > { %s20435_s0 = sld [smem:[#allocation9_spill]] }
 0x9a9   : > { %s20436_s6 = sld [smem:[#allocation7_spill]] }
 0x9ae   : > { %p11147_p13 = scmp.ge.s32.totalorder %s20435_s0, 2 }
 0x9af   : > { %s9572_s9 = sand.u32 1, %s20436_s6  }
 0x9b0   : > { %p11144_p0 = pnand %p11147_p13, %p11818_p6  ;;  %s9573_s7 = scalar_lea.sflag [#allocation5], %s9572_s9 }
 0x9b2   : > { %p11145_p1 = pneg %p11144_p0 }
 0x9b4   : > { %11643 = dma.done.wait (%p11145_p1), %s9573_s7, 4096  }
 0x9b5   : > { %11645 = vsyncadd (%p11145_p1), %s9573_s7, 4294963200  ;;  %s20438_s27 = sld [smem:[#allocation10_spill]]  ;;  %s20441_s2 = smov %s11652_s25 }
 0x9b6   : > { %s20439_s8 = sld [smem:[#allocation8_spill]] }
 0x9b7   : > { %s20440_s26 = sld [smem:[#allocation11_spill]] }
 0x9bb   : > { %p31_p2 = scmp.ge.s32.totalorder %s20438_s27, 4  }
 0x9bc   : > { %s20442_s25 = smov %s20439_s8 }
 0x9bd   :  { %33 = sbr.rel (!%p31_p2) target bundleno = 15 (0xf), region = 177 }
 0x9c2   :  { %9578 = vsyncpa [#allocation5], 1 }
 0x9c3   :  { %9580 = vsyncpa [#allocation5 + $0x1], 1 }

</bundles_post_ra>
